<compile_context>
chip_gen: v5e
topology: v5e:2x2
jax: 0.10.0
libtpu: 0.0.40
codegen_flags: <defaults>
</compile_context>

<pallas_src>
import jax
import jax.numpy as jnp
from jax.experimental import pallas as pl
from jax.experimental.pallas import tpu as pltpu

INPUT_SIZE = 784
HIDDEN_SIZE = 500
NUM_CLASSES = 10

# Lane-dense padded feature dims (multiples of 128). Input stays at 784.
PAD_HID = 512    # 500 -> 4 * 128
PAD_OUT = 128    # 10  -> 1 * 128


def _round_up(x, m):
    return ((x + m - 1) // m) * m


def _cdiv(a, b):
    return -(-a // b)


def mlp_kernel(x_ref,
               w1_ref, b1_ref,
               w2_ref, b2_ref,
               w3_ref, b3_ref,
               w4_ref, b4_ref,
               w5_ref, b5_ref,
               o_ref):
    """Fused 5-layer MLP on one (TB, 784) batch tile: (linear+tanh)x4 -> linear."""
    h = x_ref[...]

    h = jnp.dot(h, w1_ref[...], preferred_element_type=jnp.float32) + b1_ref[...]
    h = jnp.tanh(h)

    h = jnp.dot(h, w2_ref[...], preferred_element_type=jnp.float32) + b2_ref[...]
    h = jnp.tanh(h)

    h = jnp.dot(h, w3_ref[...], preferred_element_type=jnp.float32) + b3_ref[...]
    h = jnp.tanh(h)

    h = jnp.dot(h, w4_ref[...], preferred_element_type=jnp.float32) + b4_ref[...]
    h = jnp.tanh(h)

    out = jnp.dot(h, w5_ref[...], preferred_element_type=jnp.float32) + b5_ref[...]

    o_ref[...] = out.astype(o_ref.dtype)


def _pad_2d(a, rows, cols):
    return jnp.pad(a, ((0, rows - a.shape[0]), (0, cols - a.shape[1])))


def neural_net_forward(x, params, *, batch_tile=512):
    """params: list of (weight (out,in), bias (out,)) tuples, PyTorch layout.

    batch_tile: target rows per grid step.  512 is a good default on all
    chips (f32 footprint <~20 MiB); sweep up to 1024 on v5e/v6e, keep <=512
    on v7x (64 MiB VMEM per core).
    """
    batch, in_features = x.shape
    assert in_features == INPUT_SIZE

    # --- balanced batch tiling ---------------------------------------------
    # n_steps chosen from the requested tile size; force >=2 steps when the
    # batch is big enough so v7x megacore (parallel batch axis) uses both
    # TensorCores.  Tile = round_up(cdiv(B, n_steps), 8): ragged batches pad
    # by at most 7 rows per step instead of a full garbage tile.
    n_steps = max(1, _cdiv(batch, batch_tile))
    if n_steps < 2 and batch >= 16:
        n_steps = 2
    tb = _round_up(_cdiv(batch, n_steps), 8)
    b_pad = tb * n_steps
    grid = (n_steps,)

    # --- pad x on the batch dim only (no 784->896 column pad / extra HBM pass)
    x = jnp.asarray(x, jnp.float32)
    x_pad = x if b_pad == batch else jnp.pad(x, ((0, b_pad - batch), (0, 0)))

    # --- pad weights/biases to lane-dense shapes; transpose W to (in, out) ---
    in_pads = [INPUT_SIZE, PAD_HID, PAD_HID, PAD_HID, PAD_HID]
    out_pads = [PAD_HID, PAD_HID, PAD_HID, PAD_HID, PAD_OUT]
    flat_args = []
    for (w, b), pin, pout in zip(params, in_pads, out_pads):
        wt = jnp.asarray(w, jnp.float32).T                     # (in, out)
        flat_args.append(_pad_2d(wt, pin, pout))               # zero-padded
        bb = jnp.asarray(b, jnp.float32)[None, :]               # (1, out)
        flat_args.append(_pad_2d(bb, 1, pout))                  # zero-padded bias

    # --- BlockSpecs: x/out tiled over batch (default double-buffered);
    #     weights/biases grid-invariant -----------------------------------
    x_spec = pl.BlockSpec((tb, INPUT_SIZE), lambda i: (i, 0))
    o_spec = pl.BlockSpec((tb, PAD_OUT), lambda i: (i, 0))

    # --- advisory cost estimate ---
    flops = 2 * b_pad * (INPUT_SIZE * PAD_HID
                         + 3 * PAD_HID * PAD_HID
                         + PAD_HID * PAD_OUT)
    transcendentals = 4 * b_pad * PAD_HID
    bytes_accessed = 4 * (x_pad.size + b_pad * PAD_OUT
                          + sum(int(a.size) for a in flat_args))
    cost = pl.CostEstimate(flops=int(flops),
                           transcendentals=int(transcendentals),
                           bytes_accessed=int(bytes_accessed))

    def _run(const_specs):
        return pl.pallas_call(
            mlp_kernel,
            out_shape=jax.ShapeDtypeStruct((b_pad, PAD_OUT), jnp.float32),
            grid=grid,
            in_specs=[x_spec] + const_specs,
            out_specs=o_spec,
            compiler_params=pltpu.CompilerParams(
                dimension_semantics=("parallel",),
                vmem_limit_bytes=48 * 1024 * 1024,
            ),
            cost_estimate=cost,
        )(x_pad, *flat_args)

    try:
        # Preferred: single-buffer the grid-invariant weight/bias operands
        # (constant index_map -> never re-fetched; double buffers are pure
        # VMEM waste, ~5 MiB of padded f32 weights).
        const_specs = [
            pl.BlockSpec(a.shape, lambda i: (0, 0), pipeline_mode=pl.Buffered(1))
            for a in flat_args
        ]
        out_pad = _run(const_specs)
    except Exception:
        # Fallback: default (double-buffered) constant specs.
        const_specs = [pl.BlockSpec(a.shape, lambda i: (0, 0)) for a in flat_args]
        out_pad = _run(const_specs)

    # Slice away batch/output padding outside the kernel (lane-dense store inside).
    return out_pad[:batch, :NUM_CLASSES]


def init_params(key):
    """Deterministic init mimicking weight.data.uniform_(-0.1, 0.1)."""
    sizes = [
        (HIDDEN_SIZE, INPUT_SIZE),
        (HIDDEN_SIZE, HIDDEN_SIZE),
        (HIDDEN_SIZE, HIDDEN_SIZE),
        (HIDDEN_SIZE, HIDDEN_SIZE),
        (NUM_CLASSES, HIDDEN_SIZE),
    ]
    params = []
    for out_f, in_f in sizes:
        key, kw, kb = jax.random.split(key, 3)
        w = jax.random.uniform(kw, (out_f, in_f), jnp.float32, -0.1, 0.1)
        b = jax.random.uniform(kb, (out_f,), jnp.float32, -0.1, 0.1)
        params.append((w, b))
    return params


def reference_forward(x, params):
    """Pure-JAX reference matching the PyTorch forward semantics.

    Matmul precision pinned to HIGHEST so the reference is true f32 (the
    kernel accumulates in f32 via preferred_element_type).
    """
    h = jnp.asarray(x, jnp.float32)
    for i, (w, b) in enumerate(params):
        h = jnp.dot(h, w.T, precision=jax.lax.Precision.HIGHEST) + b[None, :]
        if i < len(params) - 1:
            h = jnp.tanh(h)
    return h


if __name__ == "__main__":
    key = jax.random.PRNGKey(0)
    key, kx1, kx2 = jax.random.split(key, 3)
    params = init_params(key)

    # Small single-tile batch.
    batch = 8
    x = jax.random.normal(kx1, (batch, INPUT_SIZE), jnp.float32)
    out = jax.block_until_ready(neural_net_forward(x, params))
    ref = reference_forward(x, params)
    assert out.shape == (batch, NUM_CLASSES)
    assert jnp.allclose(out, ref, atol=1e-4, rtol=1e-4), "mismatch vs reference (batch=8)"

    # Ragged multi-step batch (exercises balanced tiling + >=2 parallel steps).
    batch2 = 40
    x2 = jax.random.normal(kx2, (batch2, INPUT_SIZE), jnp.float32)
    out2 = jax.block_until_ready(neural_net_forward(x2, params, batch_tile=16))
    ref2 = reference_forward(x2, params)
    assert out2.shape == (batch2, NUM_CLASSES)
    assert jnp.allclose(out2, ref2, atol=1e-4, rtol=1e-4), "mismatch vs reference (batch=40)"

    print("KERNEL_OK")
</pallas_src>

<mosaic_0001>
module attributes {stable_mosaic.version = 11 : i64} {
  func.func @mlp_kernel(%arg0: i32, %arg1: memref<8x784xf32, #tpu.memory_space<vmem>>, %arg2: memref<784x512xf32, #tpu.memory_space<vmem>>, %arg3: memref<1x512xf32, #tpu.memory_space<vmem>>, %arg4: memref<512x512xf32, #tpu.memory_space<vmem>>, %arg5: memref<1x512xf32, #tpu.memory_space<vmem>>, %arg6: memref<512x512xf32, #tpu.memory_space<vmem>>, %arg7: memref<1x512xf32, #tpu.memory_space<vmem>>, %arg8: memref<512x512xf32, #tpu.memory_space<vmem>>, %arg9: memref<1x512xf32, #tpu.memory_space<vmem>>, %arg10: memref<512x128xf32, #tpu.memory_space<vmem>>, %arg11: memref<1x128xf32, #tpu.memory_space<vmem>>, %arg12: memref<8x128xf32, #tpu.memory_space<vmem>>) attributes {dimension_semantics = [#tpu.dimension_semantics<parallel>], iteration_bounds = array<i64: 1>, scalar_prefetch = 0 : i64, scratch_operands = 0 : i64, tpu.core_type = #tpu.core_type<tc>, window_params = [{transform_indices = @transform_0, window_bounds = array<i64: 8, 784>}, {pipeline_mode = #tpu.pipeline_mode<synchronous>, transform_indices = @transform_1, window_bounds = array<i64: 784, 512>}, {pipeline_mode = #tpu.pipeline_mode<synchronous>, transform_indices = @transform_2, window_bounds = array<i64: 1, 512>}, {pipeline_mode = #tpu.pipeline_mode<synchronous>, transform_indices = @transform_3, window_bounds = array<i64: 512, 512>}, {pipeline_mode = #tpu.pipeline_mode<synchronous>, transform_indices = @transform_4, window_bounds = array<i64: 1, 512>}, {pipeline_mode = #tpu.pipeline_mode<synchronous>, transform_indices = @transform_5, window_bounds = array<i64: 512, 512>}, {pipeline_mode = #tpu.pipeline_mode<synchronous>, transform_indices = @transform_6, window_bounds = array<i64: 1, 512>}, {pipeline_mode = #tpu.pipeline_mode<synchronous>, transform_indices = @transform_7, window_bounds = array<i64: 512, 512>}, {pipeline_mode = #tpu.pipeline_mode<synchronous>, transform_indices = @transform_8, window_bounds = array<i64: 1, 512>}, {pipeline_mode = #tpu.pipeline_mode<synchronous>, transform_indices = @transform_9, window_bounds = array<i64: 512, 128>}, {pipeline_mode = #tpu.pipeline_mode<synchronous>, transform_indices = @transform_10, window_bounds = array<i64: 1, 128>}, {transform_indices = @transform_11, window_bounds = array<i64: 8, 128>}]} {
    %c0 = arith.constant 0 : index
    %c0_0 = arith.constant 0 : index
    %0 = vector.load %arg1[%c0, %c0_0] : memref<8x784xf32, #tpu.memory_space<vmem>>, vector<8x784xf32>
    %c0_1 = arith.constant 0 : index
    %c0_2 = arith.constant 0 : index
    %1 = vector.load %arg2[%c0_1, %c0_2] : memref<784x512xf32, #tpu.memory_space<vmem>>, vector<784x512xf32>
    %cst = arith.constant dense<0.000000e+00> : vector<8x512xf32>
    %2 = tpu.matmul %0, %1, %cst {dimension_numbers = #tpu.dot_dimension_numbers<[1], [0], [0], [1], [0, 0, 1, 1], [], []>} : vector<8x784xf32>, vector<784x512xf32>, vector<8x512xf32> -> vector<8x512xf32>
    %c0_3 = arith.constant 0 : index
    %c0_4 = arith.constant 0 : index
    %3 = vector.load %arg3[%c0_3, %c0_4] : memref<1x512xf32, #tpu.memory_space<vmem>>, vector<1x512xf32>
    %4 = vector.broadcast %3 : vector<1x512xf32> to vector<8x512xf32>
    %5 = arith.addf %2, %4 : vector<8x512xf32>
    %6 = math.tanh %5 : vector<8x512xf32>
    %c0_5 = arith.constant 0 : index
    %c0_6 = arith.constant 0 : index
    %7 = vector.load %arg4[%c0_5, %c0_6] : memref<512x512xf32, #tpu.memory_space<vmem>>, vector<512x512xf32>
    %cst_7 = arith.constant dense<0.000000e+00> : vector<8x512xf32>
    %8 = tpu.matmul %6, %7, %cst_7 {dimension_numbers = #tpu.dot_dimension_numbers<[1], [0], [0], [1], [0, 0, 1, 1], [], []>} : vector<8x512xf32>, vector<512x512xf32>, vector<8x512xf32> -> vector<8x512xf32>
    %c0_8 = arith.constant 0 : index
    %c0_9 = arith.constant 0 : index
    %9 = vector.load %arg5[%c0_8, %c0_9] : memref<1x512xf32, #tpu.memory_space<vmem>>, vector<1x512xf32>
    %10 = vector.broadcast %9 : vector<1x512xf32> to vector<8x512xf32>
    %11 = arith.addf %8, %10 : vector<8x512xf32>
    %12 = math.tanh %11 : vector<8x512xf32>
    %c0_10 = arith.constant 0 : index
    %c0_11 = arith.constant 0 : index
    %13 = vector.load %arg6[%c0_10, %c0_11] : memref<512x512xf32, #tpu.memory_space<vmem>>, vector<512x512xf32>
    %cst_12 = arith.constant dense<0.000000e+00> : vector<8x512xf32>
    %14 = tpu.matmul %12, %13, %cst_12 {dimension_numbers = #tpu.dot_dimension_numbers<[1], [0], [0], [1], [0, 0, 1, 1], [], []>} : vector<8x512xf32>, vector<512x512xf32>, vector<8x512xf32> -> vector<8x512xf32>
    %c0_13 = arith.constant 0 : index
    %c0_14 = arith.constant 0 : index
    %15 = vector.load %arg7[%c0_13, %c0_14] : memref<1x512xf32, #tpu.memory_space<vmem>>, vector<1x512xf32>
    %16 = vector.broadcast %15 : vector<1x512xf32> to vector<8x512xf32>
    %17 = arith.addf %14, %16 : vector<8x512xf32>
    %18 = math.tanh %17 : vector<8x512xf32>
    %c0_15 = arith.constant 0 : index
    %c0_16 = arith.constant 0 : index
    %19 = vector.load %arg8[%c0_15, %c0_16] : memref<512x512xf32, #tpu.memory_space<vmem>>, vector<512x512xf32>
    %cst_17 = arith.constant dense<0.000000e+00> : vector<8x512xf32>
    %20 = tpu.matmul %18, %19, %cst_17 {dimension_numbers = #tpu.dot_dimension_numbers<[1], [0], [0], [1], [0, 0, 1, 1], [], []>} : vector<8x512xf32>, vector<512x512xf32>, vector<8x512xf32> -> vector<8x512xf32>
    %c0_18 = arith.constant 0 : index
    %c0_19 = arith.constant 0 : index
    %21 = vector.load %arg9[%c0_18, %c0_19] : memref<1x512xf32, #tpu.memory_space<vmem>>, vector<1x512xf32>
    %22 = vector.broadcast %21 : vector<1x512xf32> to vector<8x512xf32>
    %23 = arith.addf %20, %22 : vector<8x512xf32>
    %24 = math.tanh %23 : vector<8x512xf32>
    %c0_20 = arith.constant 0 : index
    %c0_21 = arith.constant 0 : index
    %25 = vector.load %arg10[%c0_20, %c0_21] : memref<512x128xf32, #tpu.memory_space<vmem>>, vector<512x128xf32>
    %cst_22 = arith.constant dense<0.000000e+00> : vector<8x128xf32>
    %26 = tpu.matmul %24, %25, %cst_22 {dimension_numbers = #tpu.dot_dimension_numbers<[1], [0], [0], [1], [0, 0, 1, 1], [], []>} : vector<8x512xf32>, vector<512x128xf32>, vector<8x128xf32> -> vector<8x128xf32>
    %c0_23 = arith.constant 0 : index
    %c0_24 = arith.constant 0 : index
    %27 = vector.load %arg11[%c0_23, %c0_24] : memref<1x128xf32, #tpu.memory_space<vmem>>, vector<1x128xf32>
    %28 = vector.broadcast %27 : vector<1x128xf32> to vector<8x128xf32>
    %29 = arith.addf %26, %28 : vector<8x128xf32>
    %c0_25 = arith.constant 0 : index
    %c0_26 = arith.constant 0 : index
    %30 = vector.load %arg12[%c0_25, %c0_26] : memref<8x128xf32, #tpu.memory_space<vmem>>, vector<8x128xf32>
    tpu.vector_store %arg12[%c0_25, %c0_26], %29 {strides = array<i32>} : memref<8x128xf32, #tpu.memory_space<vmem>>, vector<8x128xf32>,
    return
  }
  func.func @transform_0(%arg0: i32) -> (i32, i32) {
    %c0_i32 = arith.constant 0 : i32
    %c0_i32_0 = arith.constant 0 : i32
    return %arg0, %c0_i32 : i32, i32
  }
  func.func @transform_1(%arg0: i32) -> (i32, i32) {
    %c0_i32 = arith.constant 0 : i32
    %c0_i32_0 = arith.constant 0 : i32
    %c0_i32_1 = arith.constant 0 : i32
    return %c0_i32, %c0_i32_0 : i32, i32
  }
  func.func @transform_2(%arg0: i32) -> (i32, i32) {
    %c0_i32 = arith.constant 0 : i32
    %c0_i32_0 = arith.constant 0 : i32
    %c0_i32_1 = arith.constant 0 : i32
    return %c0_i32, %c0_i32_0 : i32, i32
  }
  func.func @transform_3(%arg0: i32) -> (i32, i32) {
    %c0_i32 = arith.constant 0 : i32
    %c0_i32_0 = arith.constant 0 : i32
    %c0_i32_1 = arith.constant 0 : i32
    return %c0_i32, %c0_i32_0 : i32, i32
  }
  func.func @transform_4(%arg0: i32) -> (i32, i32) {
    %c0_i32 = arith.constant 0 : i32
    %c0_i32_0 = arith.constant 0 : i32
    %c0_i32_1 = arith.constant 0 : i32
    return %c0_i32, %c0_i32_0 : i32, i32
  }
  func.func @transform_5(%arg0: i32) -> (i32, i32) {
    %c0_i32 = arith.constant 0 : i32
    %c0_i32_0 = arith.constant 0 : i32
    %c0_i32_1 = arith.constant 0 : i32
    return %c0_i32, %c0_i32_0 : i32, i32
  }
  func.func @transform_6(%arg0: i32) -> (i32, i32) {
    %c0_i32 = arith.constant 0 : i32
    %c0_i32_0 = arith.constant 0 : i32
    %c0_i32_1 = arith.constant 0 : i32
    return %c0_i32, %c0_i32_0 : i32, i32
  }
  func.func @transform_7(%arg0: i32) -> (i32, i32) {
    %c0_i32 = arith.constant 0 : i32
    %c0_i32_0 = arith.constant 0 : i32
    %c0_i32_1 = arith.constant 0 : i32
    return %c0_i32, %c0_i32_0 : i32, i32
  }
  func.func @transform_8(%arg0: i32) -> (i32, i32) {
    %c0_i32 = arith.constant 0 : i32
    %c0_i32_0 = arith.constant 0 : i32
    %c0_i32_1 = arith.constant 0 : i32
    return %c0_i32, %c0_i32_0 : i32, i32
  }
  func.func @transform_9(%arg0: i32) -> (i32, i32) {
    %c0_i32 = arith.constant 0 : i32
    %c0_i32_0 = arith.constant 0 : i32
    %c0_i32_1 = arith.constant 0 : i32
    return %c0_i32, %c0_i32_0 : i32, i32
  }
  func.func @transform_10(%arg0: i32) -> (i32, i32) {
    %c0_i32 = arith.constant 0 : i32
    %c0_i32_0 = arith.constant 0 : i32
    %c0_i32_1 = arith.constant 0 : i32
    return %c0_i32, %c0_i32_0 : i32, i32
  }
  func.func @transform_11(%arg0: i32) -> (i32, i32) {
    %c0_i32 = arith.constant 0 : i32
    %c0_i32_0 = arith.constant 0 : i32
    return %arg0, %c0_i32 : i32, i32
  }
}

module attributes {stable_mosaic.version = 11 : i64} {
  func.func @mlp_kernel(%arg0: i32, %arg1: memref<8x784xf32, #tpu.memory_space<vmem>>, %arg2: memref<784x512xf32, #tpu.memory_space<vmem>>, %arg3: memref<1x512xf32, #tpu.memory_space<vmem>>, %arg4: memref<512x512xf32, #tpu.memory_space<vmem>>, %arg5: memref<1x512xf32, #tpu.memory_space<vmem>>, %arg6: memref<512x512xf32, #tpu.memory_space<vmem>>, %arg7: memref<1x512xf32, #tpu.memory_space<vmem>>, %arg8: memref<512x512xf32, #tpu.memory_space<vmem>>, %arg9: memref<1x512xf32, #tpu.memory_space<vmem>>, %arg10: memref<512x128xf32, #tpu.memory_space<vmem>>, %arg11: memref<1x128xf32, #tpu.memory_space<vmem>>, %arg12: memref<8x128xf32, #tpu.memory_space<vmem>>) attributes {dimension_semantics = [#tpu.dimension_semantics<parallel>], iteration_bounds = array<i64: 1>, scalar_prefetch = 0 : i64, scratch_operands = 0 : i64, tpu.core_type = #tpu.core_type<tc>, window_params = [{transform_indices = @transform_0, window_bounds = array<i64: 8, 784>}, {pipeline_mode = #tpu.pipeline_mode<synchronous>, transform_indices = @transform_1, window_bounds = array<i64: 784, 512>}, {pipeline_mode = #tpu.pipeline_mode<synchronous>, transform_indices = @transform_2, window_bounds = array<i64: 1, 512>}, {pipeline_mode = #tpu.pipeline_mode<synchronous>, transform_indices = @transform_3, window_bounds = array<i64: 512, 512>}, {pipeline_mode = #tpu.pipeline_mode<synchronous>, transform_indices = @transform_4, window_bounds = array<i64: 1, 512>}, {pipeline_mode = #tpu.pipeline_mode<synchronous>, transform_indices = @transform_5, window_bounds = array<i64: 512, 512>}, {pipeline_mode = #tpu.pipeline_mode<synchronous>, transform_indices = @transform_6, window_bounds = array<i64: 1, 512>}, {pipeline_mode = #tpu.pipeline_mode<synchronous>, transform_indices = @transform_7, window_bounds = array<i64: 512, 512>}, {pipeline_mode = #tpu.pipeline_mode<synchronous>, transform_indices = @transform_8, window_bounds = array<i64: 1, 512>}, {pipeline_mode = #tpu.pipeline_mode<synchronous>, transform_indices = @transform_9, window_bounds = array<i64: 512, 128>}, {pipeline_mode = #tpu.pipeline_mode<synchronous>, transform_indices = @transform_10, window_bounds = array<i64: 1, 128>}, {transform_indices = @transform_11, window_bounds = array<i64: 8, 128>}]} {
    %c0 = arith.constant 0 : index
    %c0_0 = arith.constant 0 : index
    %0 = vector.load %arg1[%c0, %c0_0] : memref<8x784xf32, #tpu.memory_space<vmem>>, vector<8x784xf32>
    %c0_1 = arith.constant 0 : index
    %c0_2 = arith.constant 0 : index
    %1 = vector.load %arg2[%c0_1, %c0_2] : memref<784x512xf32, #tpu.memory_space<vmem>>, vector<784x512xf32>
    %cst = arith.constant dense<0.000000e+00> : vector<8x512xf32>
    %2 = tpu.matmul %0, %1, %cst {dimension_numbers = #tpu.dot_dimension_numbers<[1], [0], [0], [1], [0, 0, 1, 1], [], []>} : vector<8x784xf32>, vector<784x512xf32>, vector<8x512xf32> -> vector<8x512xf32>
    %c0_3 = arith.constant 0 : index
    %c0_4 = arith.constant 0 : index
    %3 = vector.load %arg3[%c0_3, %c0_4] : memref<1x512xf32, #tpu.memory_space<vmem>>, vector<1x512xf32>
    %4 = vector.broadcast %3 : vector<1x512xf32> to vector<8x512xf32>
    %5 = arith.addf %2, %4 : vector<8x512xf32>
    %6 = math.tanh %5 : vector<8x512xf32>
    %c0_5 = arith.constant 0 : index
    %c0_6 = arith.constant 0 : index
    %7 = vector.load %arg4[%c0_5, %c0_6] : memref<512x512xf32, #tpu.memory_space<vmem>>, vector<512x512xf32>
    %cst_7 = arith.constant dense<0.000000e+00> : vector<8x512xf32>
    %8 = tpu.matmul %6, %7, %cst_7 {dimension_numbers = #tpu.dot_dimension_numbers<[1], [0], [0], [1], [0, 0, 1, 1], [], []>} : vector<8x512xf32>, vector<512x512xf32>, vector<8x512xf32> -> vector<8x512xf32>
    %c0_8 = arith.constant 0 : index
    %c0_9 = arith.constant 0 : index
    %9 = vector.load %arg5[%c0_8, %c0_9] : memref<1x512xf32, #tpu.memory_space<vmem>>, vector<1x512xf32>
    %10 = vector.broadcast %9 : vector<1x512xf32> to vector<8x512xf32>
    %11 = arith.addf %8, %10 : vector<8x512xf32>
    %12 = math.tanh %11 : vector<8x512xf32>
    %c0_10 = arith.constant 0 : index
    %c0_11 = arith.constant 0 : index
    %13 = vector.load %arg6[%c0_10, %c0_11] : memref<512x512xf32, #tpu.memory_space<vmem>>, vector<512x512xf32>
    %cst_12 = arith.constant dense<0.000000e+00> : vector<8x512xf32>
    %14 = tpu.matmul %12, %13, %cst_12 {dimension_numbers = #tpu.dot_dimension_numbers<[1], [0], [0], [1], [0, 0, 1, 1], [], []>} : vector<8x512xf32>, vector<512x512xf32>, vector<8x512xf32> -> vector<8x512xf32>
    %c0_13 = arith.constant 0 : index
    %c0_14 = arith.constant 0 : index
    %15 = vector.load %arg7[%c0_13, %c0_14] : memref<1x512xf32, #tpu.memory_space<vmem>>, vector<1x512xf32>
    %16 = vector.broadcast %15 : vector<1x512xf32> to vector<8x512xf32>
    %17 = arith.addf %14, %16 : vector<8x512xf32>
    %18 = math.tanh %17 : vector<8x512xf32>
    %c0_15 = arith.constant 0 : index
    %c0_16 = arith.constant 0 : index
    %19 = vector.load %arg8[%c0_15, %c0_16] : memref<512x512xf32, #tpu.memory_space<vmem>>, vector<512x512xf32>
    %cst_17 = arith.constant dense<0.000000e+00> : vector<8x512xf32>
    %20 = tpu.matmul %18, %19, %cst_17 {dimension_numbers = #tpu.dot_dimension_numbers<[1], [0], [0], [1], [0, 0, 1, 1], [], []>} : vector<8x512xf32>, vector<512x512xf32>, vector<8x512xf32> -> vector<8x512xf32>
    %c0_18 = arith.constant 0 : index
    %c0_19 = arith.constant 0 : index
    %21 = vector.load %arg9[%c0_18, %c0_19] : memref<1x512xf32, #tpu.memory_space<vmem>>, vector<1x512xf32>
    %22 = vector.broadcast %21 : vector<1x512xf32> to vector<8x512xf32>
    %23 = arith.addf %20, %22 : vector<8x512xf32>
    %24 = math.tanh %23 : vector<8x512xf32>
    %c0_20 = arith.constant 0 : index
    %c0_21 = arith.constant 0 : index
    %25 = vector.load %arg10[%c0_20, %c0_21] : memref<512x128xf32, #tpu.memory_space<vmem>>, vector<512x128xf32>
    %cst_22 = arith.constant dense<0.000000e+00> : vector<8x128xf32>
    %26 = tpu.matmul %24, %25, %cst_22 {dimension_numbers = #tpu.dot_dimension_numbers<[1], [0], [0], [1], [0, 0, 1, 1], [], []>} : vector<8x512xf32>, vector<512x128xf32>, vector<8x128xf32> -> vector<8x128xf32>
    %c0_23 = arith.constant 0 : index
    %c0_24 = arith.constant 0 : index
    %27 = vector.load %arg11[%c0_23, %c0_24] : memref<1x128xf32, #tpu.memory_space<vmem>>, vector<1x128xf32>
    %28 = vector.broadcast %27 : vector<1x128xf32> to vector<8x128xf32>
    %29 = arith.addf %26, %28 : vector<8x128xf32>
    %c0_25 = arith.constant 0 : index
    %c0_26 = arith.constant 0 : index
    %30 = vector.load %arg12[%c0_25, %c0_26] : memref<8x128xf32, #tpu.memory_space<vmem>>, vector<8x128xf32>
    tpu.vector_store %arg12[%c0_25, %c0_26], %29 {strides = array<i32>} : memref<8x128xf32, #tpu.memory_space<vmem>>, vector<8x128xf32>,
    return
  }
  func.func @transform_0(%arg0: i32) -> (i32, i32) {
    %c0_i32 = arith.constant 0 : i32
    %c0_i32_0 = arith.constant 0 : i32
    return %arg0, %c0_i32 : i32, i32
  }
  func.func @transform_1(%arg0: i32) -> (i32, i32) {
    %c0_i32 = arith.constant 0 : i32
    %c0_i32_0 = arith.constant 0 : i32
    %c0_i32_1 = arith.constant 0 : i32
    return %c0_i32, %c0_i32_0 : i32, i32
  }
  func.func @transform_2(%arg0: i32) -> (i32, i32) {
    %c0_i32 = arith.constant 0 : i32
    %c0_i32_0 = arith.constant 0 : i32
    %c0_i32_1 = arith.constant 0 : i32
    return %c0_i32, %c0_i32_0 : i32, i32
  }
  func.func @transform_3(%arg0: i32) -> (i32, i32) {
    %c0_i32 = arith.constant 0 : i32
    %c0_i32_0 = arith.constant 0 : i32
    %c0_i32_1 = arith.constant 0 : i32
    return %c0_i32, %c0_i32_0 : i32, i32
  }
  func.func @transform_4(%arg0: i32) -> (i32, i32) {
    %c0_i32 = arith.constant 0 : i32
    %c0_i32_0 = arith.constant 0 : i32
    %c0_i32_1 = arith.constant 0 : i32
    return %c0_i32, %c0_i32_0 : i32, i32
  }
  func.func @transform_5(%arg0: i32) -> (i32, i32) {
    %c0_i32 = arith.constant 0 : i32
    %c0_i32_0 = arith.constant 0 : i32
    %c0_i32_1 = arith.constant 0 : i32
    return %c0_i32, %c0_i32_0 : i32, i32
  }
  func.func @transform_6(%arg0: i32) -> (i32, i32) {
    %c0_i32 = arith.constant 0 : i32
    %c0_i32_0 = arith.constant 0 : i32
    %c0_i32_1 = arith.constant 0 : i32
    return %c0_i32, %c0_i32_0 : i32, i32
  }
  func.func @transform_7(%arg0: i32) -> (i32, i32) {
    %c0_i32 = arith.constant 0 : i32
    %c0_i32_0 = arith.constant 0 : i32
    %c0_i32_1 = arith.constant 0 : i32
    return %c0_i32, %c0_i32_0 : i32, i32
  }
  func.func @transform_8(%arg0: i32) -> (i32, i32) {
    %c0_i32 = arith.constant 0 : i32
    %c0_i32_0 = arith.constant 0 : i32
    %c0_i32_1 = arith.constant 0 : i32
    return %c0_i32, %c0_i32_0 : i32, i32
  }
  func.func @transform_9(%arg0: i32) -> (i32, i32) {
    %c0_i32 = arith.constant 0 : i32
    %c0_i32_0 = arith.constant 0 : i32
    %c0_i32_1 = arith.constant 0 : i32
    return %c0_i32, %c0_i32_0 : i32, i32
  }
  func.func @transform_10(%arg0: i32) -> (i32, i32) {
    %c0_i32 = arith.constant 0 : i32
    %c0_i32_0 = arith.constant 0 : i32
    %c0_i32_1 = arith.constant 0 : i32
    return %c0_i32, %c0_i32_0 : i32, i32
  }
  func.func @transform_11(%arg0: i32) -> (i32, i32) {
    %c0_i32 = arith.constant 0 : i32
    %c0_i32_0 = arith.constant 0 : i32
    return %arg0, %c0_i32 : i32, i32
  }
}

</mosaic_0001>

<bundles_post_ra>
// kernel: tpu_custom_call.1
= control target key start
LH: loop header
LB: loop body
LE: loop exit
PB: predicated region body
PF: predicated region fallthrough
CT: control target
= control target key end

     0   :  { %16 = vsyncpa [#allocation3], 0  ;;  %s3725_s0 = inlined_call_operand.hbm [shape: f32[8,784], index: 0, kind: input, shape index: {}]   ;;  %s3726_s1 = inlined_call_operand.hbm [shape: f32[784,512], index: 1, kind: input, shape index: {}]   ;;  %s3727_s2 = inlined_call_operand.hbm [shape: f32[1,512], index: 2, kind: input, shape index: {}]   ;;  %s3728_s3 = inlined_call_operand.hbm [shape: f32[512,512], index: 3, kind: input, shape index: {}]   ;;  %s3729_s4 = inlined_call_operand.hbm [shape: f32[1,512], index: 4, kind: input, shape index: {}]   ;;  %s3730_s5 = inlined_call_operand.hbm [shape: f32[512,512], index: 5, kind: input, shape index: {}]   ;;  %s3731_s6 = inlined_call_operand.hbm [shape: f32[1,512], index: 6, kind: input, shape index: {}]   ;;  %s3732_s7 = inlined_call_operand.hbm [shape: f32[512,512], index: 7, kind: input, shape index: {}]   ;;  %s3733_s8 = inlined_call_operand.hbm [shape: f32[1,512], index: 8, kind: input, shape index: {}]   ;;  %s3734_s9 = inlined_call_operand.hbm [shape: f32[512,128], index: 9, kind: input, shape index: {}]   ;;  %s3735_s10 = inlined_call_operand.hbm [shape: f32[1,128], index: 10, kind: input, shape index: {}]   ;;  %s3736_s11 = inlined_call_operand.hbm [shape: f32[8,128], index: 11, kind: output, shape index: {}]  }
   0x1   :  { %17 = vsyncpa [#allocation6], 0 }
   0x2   :  { %18 = vsyncpa [#allocation9], 0 }
   0x3   :  { %19 = vsyncpa [#allocation12], 0 }
   0x4   :  { %20 = vsyncpa [#allocation15], 0 }
   0x5   :  { %21 = vsyncpa [#allocation18], 0  ;;  %s38_s19 = sshll.u32 %s3726_s1, 4  ;;  %s39_s19 = int_to_ptr.hbm [resolvable:$true] %s38_s19 }
   0x6   :  { %22 = vsyncpa [#allocation4], 0  ;;  %s3478_s20 = smov [#allocation5]   ;;  %s62_s24 = sshll.u32 %s3728_s3, 4  ;;  %s63_s24 = int_to_ptr.hbm [resolvable:$true] %s62_s24 }
   0x7   :  { %s40_s21 = sshll.u32 %s3478_s20, 4  ;;  %s3479_s25 = smov 512   ;;  %s41_s21 = int_to_ptr.vmem [resolvable:$true] %s40_s21 }
   0x8   :  { %s3480_s26 = smov 32   ;;  %s3481_s27 = smov [#allocation8]  }
   0x9   :  { %46 = dma.hbm_to_vmem [thread:$0]  %s39_s19, 50176, %s41_s21, [#allocation6], %s3479_s25, %s3479_s25, %s3480_s26  }
   0xa   :  { %s64_s28 = sshll.u32 %s3481_s27, 4  ;;  %s86_s12 = sshll.u32 %s3730_s5, 4  ;;  %s65_s28 = int_to_ptr.vmem [resolvable:$true] %s64_s28  ;;  %s87_s12 = int_to_ptr.hbm [resolvable:$true] %s86_s12 }
   0xb   :  { %70 = dma.hbm_to_vmem [thread:$0]  %s63_s24, 32768, %s65_s28, [#allocation9], %s3479_s25, %s3479_s25, %s3480_s26  }
   0xc   :  { %s110_s14 = sshll.u32 %s3732_s7, 4  ;;  %s3482_s15 = smov [#allocation11]   ;;  %s111_s14 = int_to_ptr.hbm [resolvable:$true] %s110_s14 }
   0xd   :  { %s88_s16 = sshll.u32 %s3482_s15, 4  ;;  %s3483_s3 = smov [#allocation14]   ;;  %s89_s16 = int_to_ptr.vmem [resolvable:$true] %s88_s16 }
   0xe   :  { %94 = dma.hbm_to_vmem [thread:$0]  %s87_s12, 32768, %s89_s16, [#allocation12], %s3479_s25, %s3479_s25, %s3480_s26  }
   0xf   :  { %s112_s17 = sshll.u32 %s3483_s3, 4  ;;  %s134_s20 = sshll.u32 %s3734_s9, 4  ;;  %s113_s17 = int_to_ptr.vmem [resolvable:$true] %s112_s17  ;;  %s135_s20 = int_to_ptr.hbm [resolvable:$true] %s134_s20 }
  0x10   :  { %118 = dma.hbm_to_vmem [thread:$0]  %s111_s14, 32768, %s113_s17, [#allocation15], %s3479_s25, %s3479_s25, %s3480_s26  }
  0x11   :  { %s3484_s5 = smov [#allocation17]   ;;  %s28_s7 = sshll.u32 %s3725_s0, 4  ;;  %s29_s7 = int_to_ptr.hbm [resolvable:$true] %s28_s7 }
  0x12   :  { %s136_s21 = sshll.u32 %s3484_s5, 4  ;;  %s3485_s24 = smov 128   ;;  %s137_s21 = int_to_ptr.vmem [resolvable:$true] %s136_s21 }
  0x13   :  { %s3486_s27 = smov 8   ;;  %s3487_s28 = smov [#allocation2]  }
  0x14   :  { %142 = dma.hbm_to_vmem [thread:$0]  %s135_s20, 8192, %s137_s21, [#allocation18], %s3485_s24, %s3485_s24, %s3486_s27  }
  0x15   :  { %s30_s29 = sshll.u32 %s3487_s28, 4  ;;  %s52_s9 = sshll.u32 %s3727_s2, 4  ;;  %s31_s29 = int_to_ptr.vmem [resolvable:$true] %s30_s29  ;;  %s53_s9 = int_to_ptr.hbm [resolvable:$true] %s52_s9 }
  0x16   :  { %33 = dma.hbm_to_vmem [thread:$0]  %s29_s7, 896, %s31_s29, [#allocation3]  }
  0x17   :  { %s76_s1 = sshll.u32 %s3729_s4, 4  ;;  %s3488_s13 = smov [#allocation7]   ;;  %s77_s1 = int_to_ptr.hbm [resolvable:$true] %s76_s1 }
  0x18   :  { %s54_s14 = sshll.u32 %s3488_s13, 4  ;;  %s3489_s0 = smov [#allocation10]   ;;  %s55_s14 = int_to_ptr.vmem [resolvable:$true] %s54_s14 }
  0x19   :  { %57 = dma.hbm_to_vmem [thread:$0]  %s53_s9, 64, %s55_s14, [#allocation6]  }
  0x1a   :  { %s78_s15 = sshll.u32 %s3489_s0, 4  ;;  %s100_s17 = sshll.u32 %s3731_s6, 4  ;;  %s79_s15 = int_to_ptr.vmem [resolvable:$true] %s78_s15  ;;  %s101_s17 = int_to_ptr.hbm [resolvable:$true] %s100_s17 }
  0x1b   :  { %81 = dma.hbm_to_vmem [thread:$0]  %s77_s1, 64, %s79_s15, [#allocation9]  }
  0x1c   :  { %s124_s19 = sshll.u32 %s3733_s8, 4  ;;  %s3490_s20 = smov [#allocation13]   ;;  %s125_s19 = int_to_ptr.hbm [resolvable:$true] %s124_s19 }
  0x1d   :  { %s102_s4 = sshll.u32 %s3490_s20, 4  ;;  %s3491_s5 = smov [#allocation16]   ;;  %s103_s4 = int_to_ptr.vmem [resolvable:$true] %s102_s4 }
  0x1e   :  { %105 = dma.hbm_to_vmem [thread:$0]  %s101_s17, 64, %s103_s4, [#allocation12]  }
  0x1f   :  { %s126_s21 = sshll.u32 %s3491_s5, 4  ;;  %s148_s7 = sshll.u32 %s3735_s10, 4  ;;  %s127_s21 = int_to_ptr.vmem [resolvable:$true] %s126_s21  ;;  %s149_s7 = int_to_ptr.hbm [resolvable:$true] %s148_s7 }
  0x20   :  { %129 = dma.hbm_to_vmem [thread:$0]  %s125_s19, 64, %s127_s21, [#allocation15]  }
  0x21   :  { %s3492_s6 = smov [#allocation19]  }
  0x22   :  { %s150_s24 = sshll.u32 %s3492_s6, 4  ;;  %s151_s24 = int_to_ptr.vmem [resolvable:$true] %s150_s24 }
  0x23   :  { %153 = dma.hbm_to_vmem [thread:$0]  %s149_s7, 16, %s151_s24, [#allocation18]  }
  0x24   :  { %3464 = dma.done.wait [#allocation3], 896  }
  0x25   :  { %3465 = vsyncadd [#allocation3], 4294966400 }
  0x26   :  { %3466 = dma.done.wait [#allocation6], 50240  }
  0x27   :  { %3467 = vsyncadd [#allocation6], 4294917056 }
  0x28   :  { %3468 = dma.done.wait [#allocation9], 32832  }
  0x29   :  { %3469 = vsyncadd [#allocation9], 4294934464 }
  0x2a   :  { %3470 = dma.done.wait [#allocation12], 32832  }
  0x2b   :  { %3471 = vsyncadd [#allocation12], 4294934464 }
  0x2c   :  { %3472 = dma.done.wait [#allocation15], 32832  }
  0x2d   :  { %3473 = vsyncadd [#allocation15], 4294934464 }
  0x2e   :  { %3474 = dma.done.wait [#allocation18], 8208  }
  0x2f   :  { %3475 = vsyncadd [#allocation18], 4294959088  ;;  %v265_v0 = vld [vmem:[#allocation5 + $0x1e0] sm:$0xff]  ;;  %vm607_vm0 = vcmask 130048   ;;  %s3493_s8 = smov [#allocation20]   ;;  %s3101_s29 = sshll.u32 %s3736_s11, 4  ;;  %s3102_s29 = int_to_ptr.hbm [resolvable:$true] %s3101_s29 }
  0x30   :  { %v329_v1 = vld [vmem:[#allocation5 + $0x3e0] sm:$0xff]  ;;  %611 = vmatpush.msra.mxu0 %v265_v0  ;;  %s3099_s10 = sshll.u32 %s3493_s8, 4  ;;  %s3100_s10 = int_to_ptr.vmem [resolvable:$true] %s3099_s10 }
  0x31   :  { %v457_v2 = vld [vmem:[#allocation5 + $0x7e0] sm:$0xff]  ;;  %631 = vmatpush.msra.mxu1 %v329_v1  ;;  %v266_v1 = vld [vmem:[#allocation5 + $0x1e8] sm:$0xff] }
  0x32   :  { %v261_v3 = vld [vmem:[#allocation5 + $0x1c0] sm:$0xff]  ;;  %671 = vmatpush.msra.mxu3 %v457_v2 }
  0x33   :  { %v325_v4 = vld [vmem:[#allocation5 + $0x3c0] sm:$0xff]  ;;  %612 = vmatpush.msra.mxu0 %v261_v3 }
  0x34   :  { %v393_v5 = vld [vmem:[#allocation5 + $0x5e0] sm:$0xff]  ;;  %632 = vmatpush.msra.mxu1 %v325_v4 }
  0x35   :  { %651 = vmatpush.msra.mxu2 %v393_v5  ;;  %v453_v6 = vld [vmem:[#allocation5 + $0x7c0] sm:$0xff] }
  0x36   :  { %v257_v7 = vld [vmem:[#allocation5 + $0x1a0] sm:$0xff]  ;;  %672 = vmatpush.msra.mxu3 %v453_v6  ;;  %v262_v6 = vld [vmem:[#allocation5 + $0x1c8] sm:$0xff] }
  0x37   :  { %v321_v8 = vld [vmem:[#allocation5 + $0x3a0] sm:$0xff]  ;;  %613 = vmatpush.msra.mxu0 %v257_v7 }
  0x38   :  { %v389_v9 = vld [vmem:[#allocation5 + $0x5c0] sm:$0xff]  ;;  %633 = vmatpush.msra.mxu1 %v321_v8 }
  0x39   :  { %v449_v10 = vld [vmem:[#allocation5 + $0x7a0] sm:$0xff]  ;;  %652 = vmatpush.msra.mxu2 %v389_v9 }
  0x3a   :  { %v253_v11 = vld [vmem:[#allocation5 + $0x180] sm:$0xff]  ;;  %673 = vmatpush.msra.mxu3 %v449_v10  ;;  %v258_v10 = vld [vmem:[#allocation5 + $0x1a8] sm:$0xff] }
  0x3b   :  { %v317_v12 = vld [vmem:[#allocation5 + $0x380] sm:$0xff]  ;;  %614 = vmatpush.msra.mxu0 %v253_v11  ;;  %v3587_v11 = vld [vmem:[#allocation2 + $0x10] sm:$0xff] }
  0x3c   :  { %v385_v13 = vld [vmem:[#allocation5 + $0x5a0] sm:$0xff]  ;;  %634 = vmatpush.msra.mxu1 %v317_v12  ;;  %v330_v12 = vld [vmem:[#allocation5 + $0x3e8] sm:$0xff] }
  0x3d   :  { %v445_v14 = vld [vmem:[#allocation5 + $0x780] sm:$0xff]  ;;  %653 = vmatpush.msra.mxu2 %v385_v13 }
  0x3e   :  { %v381_v15 = vld [vmem:[#allocation5 + $0x580] sm:$0xff]  ;;  %674 = vmatpush.msra.mxu3 %v445_v14 }
  0x3f   :  { %v249_v16 = vld [vmem:[#allocation5 + $0x160] sm:$0xff]  ;;  %654 = vmatpush.msra.mxu2 %v381_v15  ;;  %v254_v15 = vld [vmem:[#allocation5 + $0x188] sm:$0xff] }
  0x40   :  { %v313_v17 = vld [vmem:[#allocation5 + $0x360] sm:$0xff]  ;;  %615 = vmatpush.msra.mxu0 %v249_v16  ;;  %v3590_v16 = vld [vmem:[#allocation2] sm:$0xff] }
  0x41   :  { %v441_v18 = vld [vmem:[#allocation5 + $0x760] sm:$0xff]  ;;  %635 = vmatpush.msra.mxu1 %v313_v17 }
  0x42   :  { %v377_v19 = vld [vmem:[#allocation5 + $0x560] sm:$0xff]  ;;  %675 = vmatpush.msra.mxu3 %v441_v18  ;;  %v326_v18 = vld [vmem:[#allocation5 + $0x3c8] sm:$0xff] }
  0x43   :  { %v245_v20 = vld [vmem:[#allocation5 + $0x140] sm:$0xff]  ;;  %655 = vmatpush.msra.mxu2 %v377_v19 }
  0x44   :  { %v309_v21 = vld [vmem:[#allocation5 + $0x340] sm:$0xff]  ;;  %616 = vmatpush.msra.mxu0 %v245_v20 }
  0x45   :  { %v437_v22 = vld [vmem:[#allocation5 + $0x740] sm:$0xff]  ;;  %636 = vmatpush.msra.mxu1 %v309_v21  ;;  %v250_v21 = vld [vmem:[#allocation5 + $0x168] sm:$0xff] }
  0x46   :  { %v373_v23 = vld [vmem:[#allocation5 + $0x540] sm:$0xff]  ;;  %676 = vmatpush.msra.mxu3 %v437_v22  ;;  %v3596_v22 = vld [vmem:[#allocation2 + $0x8] sm:$0xff] }
  0x47   :  { %v241_v24 = vld [vmem:[#allocation5 + $0x120] sm:$0xff]  ;;  %656 = vmatpush.msra.mxu2 %v373_v23  ;;  %v322_v23 = vld [vmem:[#allocation5 + $0x3a8] sm:$0xff] }
  0x48   :  { %v305_v25 = vld [vmem:[#allocation5 + $0x320] sm:$0xff]  ;;  %617 = vmatpush.msra.mxu0 %v241_v24 }
  0x49   :  { %v433_v26 = vld [vmem:[#allocation5 + $0x720] sm:$0xff]  ;;  %637 = vmatpush.msra.mxu1 %v305_v25 }
  0x4a   :  { %v369_v27 = vld [vmem:[#allocation5 + $0x520] sm:$0xff]  ;;  %677 = vmatpush.msra.mxu3 %v433_v26  ;;  %v246_v26 = vld [vmem:[#allocation5 + $0x148] sm:$0xff] }
  0x4b   :  { %v237_v28 = vld [vmem:[#allocation5 + $0x100] sm:$0xff]  ;;  %657 = vmatpush.msra.mxu2 %v369_v27  ;;  %v318_v27 = vld [vmem:[#allocation5 + $0x388] sm:$0xff] }
  0x4c   :  { %v301_v29 = vld [vmem:[#allocation5 + $0x300] sm:$0xff]  ;;  %618 = vmatpush.msra.mxu0 %v237_v28 }
  0x4d   :  { %v429_v30 = vld [vmem:[#allocation5 + $0x700] sm:$0xff]  ;;  %638 = vmatpush.msra.mxu1 %v301_v29 }
  0x4e   :  { %v365_v31 = vld [vmem:[#allocation5 + $0x500] sm:$0xff]  ;;  %678 = vmatpush.msra.mxu3 %v429_v30  ;;  %v242_v30 = vld [vmem:[#allocation5 + $0x128] sm:$0xff] }
  0x4f   :  { %v233_v32 = vld [vmem:[#allocation5 + $0xe0] sm:$0xff]  ;;  %658 = vmatpush.msra.mxu2 %v365_v31  ;;  %v314_v31 = vld [vmem:[#allocation5 + $0x368] sm:$0xff] }
  0x50   :  { %v297_v33 = vld [vmem:[#allocation5 + $0x2e0] sm:$0xff]  ;;  %619 = vmatpush.msra.mxu0 %v233_v32 }
  0x51   :  { %v425_v34 = vld [vmem:[#allocation5 + $0x6e0] sm:$0xff]  ;;  %639 = vmatpush.msra.mxu1 %v297_v33 }
  0x52   :  { %v361_v35 = vld [vmem:[#allocation5 + $0x4e0] sm:$0xff]  ;;  %679 = vmatpush.msra.mxu3 %v425_v34  ;;  %v238_v34 = vld [vmem:[#allocation5 + $0x108] sm:$0xff] }
  0x53   :  { %v229_v36 = vld [vmem:[#allocation5 + $0xc0] sm:$0xff]  ;;  %659 = vmatpush.msra.mxu2 %v361_v35  ;;  %v310_v35 = vld [vmem:[#allocation5 + $0x348] sm:$0xff] }
  0x54   :  { %v293_v37 = vld [vmem:[#allocation5 + $0x2c0] sm:$0xff]  ;;  %620 = vmatpush.msra.mxu0 %v229_v36 }
  0x55   :  { %v421_v38 = vld [vmem:[#allocation5 + $0x6c0] sm:$0xff]  ;;  %640 = vmatpush.msra.mxu1 %v293_v37 }
  0x56   :  { %v357_v39 = vld [vmem:[#allocation5 + $0x4c0] sm:$0xff]  ;;  %680 = vmatpush.msra.mxu3 %v421_v38  ;;  %v234_v38 = vld [vmem:[#allocation5 + $0xe8] sm:$0xff] }
  0x57   :  { %v225_v40 = vld [vmem:[#allocation5 + $0xa0] sm:$0xff]  ;;  %660 = vmatpush.msra.mxu2 %v357_v39  ;;  %v306_v39 = vld [vmem:[#allocation5 + $0x328] sm:$0xff] }
  0x58   :  { %v289_v41 = vld [vmem:[#allocation5 + $0x2a0] sm:$0xff]  ;;  %621 = vmatpush.msra.mxu0 %v225_v40 }
  0x59   :  { %v417_v42 = vld [vmem:[#allocation5 + $0x6a0] sm:$0xff]  ;;  %641 = vmatpush.msra.mxu1 %v289_v41 }
  0x5a   :  { %v353_v43 = vld [vmem:[#allocation5 + $0x4a0] sm:$0xff]  ;;  %681 = vmatpush.msra.mxu3 %v417_v42  ;;  %v230_v42 = vld [vmem:[#allocation5 + $0xc8] sm:$0xff] }
  0x5b   :  { %v221_v44 = vld [vmem:[#allocation5 + $0x80] sm:$0xff]  ;;  %661 = vmatpush.msra.mxu2 %v353_v43  ;;  %v302_v43 = vld [vmem:[#allocation5 + $0x308] sm:$0xff] }
  0x5c   :  { %v285_v45 = vld [vmem:[#allocation5 + $0x280] sm:$0xff]  ;;  %622 = vmatpush.msra.mxu0 %v221_v44 }
  0x5d   :  { %v413_v46 = vld [vmem:[#allocation5 + $0x680] sm:$0xff]  ;;  %642 = vmatpush.msra.mxu1 %v285_v45 }
  0x5e   :  { %v349_v47 = vld [vmem:[#allocation5 + $0x480] sm:$0xff]  ;;  %682 = vmatpush.msra.mxu3 %v413_v46  ;;  %v226_v46 = vld [vmem:[#allocation5 + $0xa8] sm:$0xff] }
  0x5f   :  { %v217_v48 = vld [vmem:[#allocation5 + $0x60] sm:$0xff]  ;;  %662 = vmatpush.msra.mxu2 %v349_v47  ;;  %v298_v47 = vld [vmem:[#allocation5 + $0x2e8] sm:$0xff] }
  0x60   :  { %v281_v49 = vld [vmem:[#allocation5 + $0x260] sm:$0xff]  ;;  %623 = vmatpush.msra.mxu0 %v217_v48 }
  0x61   :  { %v409_v50 = vld [vmem:[#allocation5 + $0x660] sm:$0xff]  ;;  %643 = vmatpush.msra.mxu1 %v281_v49 }
  0x62   :  { %v345_v51 = vld [vmem:[#allocation5 + $0x460] sm:$0xff]  ;;  %683 = vmatpush.msra.mxu3 %v409_v50  ;;  %v222_v50 = vld [vmem:[#allocation5 + $0x88] sm:$0xff] }
  0x63   :  { %v213_v52 = vld [vmem:[#allocation5 + $0x40] sm:$0xff]  ;;  %663 = vmatpush.msra.mxu2 %v345_v51  ;;  %v294_v51 = vld [vmem:[#allocation5 + $0x2c8] sm:$0xff] }
  0x64   :  { %v277_v53 = vld [vmem:[#allocation5 + $0x240] sm:$0xff]  ;;  %624 = vmatpush.msra.mxu0 %v213_v52 }
  0x65   :  { %v405_v54 = vld [vmem:[#allocation5 + $0x640] sm:$0xff]  ;;  %644 = vmatpush.msra.mxu1 %v277_v53 }
  0x66   :  { %v341_v55 = vld [vmem:[#allocation5 + $0x440] sm:$0xff]  ;;  %684 = vmatpush.msra.mxu3 %v405_v54  ;;  %v218_v54 = vld [vmem:[#allocation5 + $0x68] sm:$0xff] }
  0x67   :  { %v209_v56 = vld [vmem:[#allocation5 + $0x20] sm:$0xff]  ;;  %664 = vmatpush.msra.mxu2 %v341_v55  ;;  %v290_v55 = vld [vmem:[#allocation5 + $0x2a8] sm:$0xff] }
  0x68   :  { %v273_v57 = vld [vmem:[#allocation5 + $0x220] sm:$0xff]  ;;  %625 = vmatpush.msra.mxu0 %v209_v56 }
  0x69   :  { %v401_v58 = vld [vmem:[#allocation5 + $0x620] sm:$0xff]  ;;  %645 = vmatpush.msra.mxu1 %v273_v57 }
  0x6a   :  { %v337_v59 = vld [vmem:[#allocation5 + $0x420] sm:$0xff]  ;;  %685 = vmatpush.msra.mxu3 %v401_v58  ;;  %v214_v58 = vld [vmem:[#allocation5 + $0x48] sm:$0xff] }
  0x6b   :  { %v205_v60 = vld [vmem:[#allocation5] sm:$0xff]  ;;  %665 = vmatpush.msra.mxu2 %v337_v59  ;;  %v286_v59 = vld [vmem:[#allocation5 + $0x288] sm:$0xff] }
  0x6c   :  { %v269_v61 = vld [vmem:[#allocation5 + $0x200] sm:$0xff]  ;;  %626 = vmatpush.msra.mxu0 %v205_v60 }
  0x6d   :  { %v397_v62 = vld [vmem:[#allocation5 + $0x600] sm:$0xff]  ;;  %646 = vmatpush.msra.mxu1 %v269_v61  ;;  %627 = vmatmul.f32.vlgmr.msra.gmra.mxu0 %v3590_v16 }
  0x6e   :  { %v521_v63 = vld [vmem:[#allocation5 + $0x9e0] sm:$0xff]  ;;  %686 = vmatpush.msra.mxu3 %v397_v62  ;;  %647 = vmatmul.f32.vlgmr.msra.gmra.mxu1 %v3596_v22  ;;  %v210_v62 = vld [vmem:[#allocation5 + $0x28] sm:$0xff] }
  0x6f   :  { %v585_v0 = vld [vmem:[#allocation5 + $0xbe0] sm:$0xff]  ;;  %691 = vmatpush.msrb.mxu0 %v521_v63  ;;  %v3599_v63 = vld [vmem:[#allocation2 + $0x30] sm:$0xff] }
  0x70   :  { %v333_v2 = vld [vmem:[#allocation5 + $0x400] sm:$0xff]  ;;  %711 = vmatpush.msrb.mxu1 %v585_v0  ;;  %751 = vmatpush.msrb.mxu3 %v266_v1  ;;  %v282_v0 = vld [vmem:[#allocation5 + $0x268] sm:$0xff] }
  0x71   :  { %v517_v3 = vld [vmem:[#allocation5 + $0x9c0] sm:$0xff]  ;;  %666 = vmatpush.msra.mxu2 %v333_v2 }
  0x72   :  { %v581_v4 = vld [vmem:[#allocation5 + $0xbc0] sm:$0xff]  ;;  %692 = vmatpush.msrb.mxu0 %v517_v3  ;;  %752 = vmatpush.msrb.mxu3 %v262_v6  ;;  %v206_v3 = vld [vmem:[#allocation5 + $0x8] sm:$0xff] }
  0x73   :  { %v593_v5 = vld [vmem:[#allocation5 + $0xc20] sm:$0xff]  ;;  %712 = vmatpush.msrb.mxu1 %v581_v4  ;;  %667 = vmatmul.f32.vlgmr.msra.gmra.mxu2 %v3587_v11  ;;  %v3603_v4 = vld [vmem:[#allocation2 + $0x20] sm:$0xff] }
  0x74   :  { %v513_v7 = vld [vmem:[#allocation5 + $0x9a0] sm:$0xff]  ;;  %745 = vmatpush.msrb.mxu2 %v593_v5  ;;  %753 = vmatpush.msrb.mxu3 %v258_v10  ;;  %v278_v5 = vld [vmem:[#allocation5 + $0x248] sm:$0xff] }
  0x75   :  { %v577_v8 = vld [vmem:[#allocation5 + $0xba0] sm:$0xff]  ;;  %693 = vmatpush.msrb.mxu0 %v513_v7  ;;  %v458_v6 = vld [vmem:[#allocation5 + $0x7e8] sm:$0xff] }
  0x76   :  { %v589_v9 = vld [vmem:[#allocation5 + $0xc00] sm:$0xff]  ;;  %713 = vmatpush.msrb.mxu1 %v577_v8  ;;  %754 = vmatpush.msrb.mxu3 %v254_v15  ;;  %v522_v7 = vld [vmem:[#allocation5 + $0x9e8] sm:$0xff]  ;;  %v3605_v8 = vld [vmem:[#allocation2 + $0x28] sm:$0xff] }
  0x77   :  { %v509_v13 = vld [vmem:[#allocation5 + $0x980] sm:$0xff]  ;;  %746 = vmatpush.msrb.mxu2 %v589_v9  ;;  %v274_v9 = vld [vmem:[#allocation5 + $0x228] sm:$0xff] }
  0x78   :  { %v573_v14 = vld [vmem:[#allocation5 + $0xb80] sm:$0xff]  ;;  %694 = vmatpush.msrb.mxu0 %v509_v13  ;;  %755 = vmatpush.msrb.mxu3 %v250_v21  ;;  %v454_v10 = vld [vmem:[#allocation5 + $0x7c8] sm:$0xff] }
  0x79   :  { %v3592_v17 = vld [vmem:[#allocation2 + $0x18] sm:$0xff]  ;;  %771 = vmatpush.msra.mxu2 %v330_v12  ;;  %714 = vmatpush.msrb.mxu1 %v573_v14  ;;  %v518_v12 = vld [vmem:[#allocation5 + $0x9c8] sm:$0xff] }
  0x7a   :  { %v505_v19 = vld [vmem:[#allocation5 + $0x960] sm:$0xff]  ;;  %687 = vmatmul.f32.vlgmr.msra.gmra.mxu3 %v3592_v17  ;;  %v270_v13 = vld [vmem:[#allocation5 + $0x208] sm:$0xff] }
  0x7b   :  { %v569_v20 = vld [vmem:[#allocation5 + $0xb60] sm:$0xff]  ;;  %772 = vmatpush.msra.mxu2 %v326_v18  ;;  %695 = vmatpush.msrb.mxu0 %v505_v19  ;;  %v394_v14 = vld [vmem:[#allocation5 + $0x5e8] sm:$0xff] }
  0x7c   :  { %v501_v24 = vld [vmem:[#allocation5 + $0x940] sm:$0xff]  ;;  %715 = vmatpush.msrb.mxu1 %v569_v20  ;;  %756 = vmatpush.msrb.mxu3 %v246_v26  ;;  %v450_v15 = vld [vmem:[#allocation5 + $0x7a8] sm:$0xff] }
  0x7d   :  { %v565_v25 = vld [vmem:[#allocation5 + $0xb40] sm:$0xff]  ;;  %773 = vmatpush.msra.mxu2 %v322_v23  ;;  %696 = vmatpush.msrb.mxu0 %v501_v24  ;;  %v514_v18 = vld [vmem:[#allocation5 + $0x9a8] sm:$0xff] }
  0x7e   :  { %v497_v28 = vld [vmem:[#allocation5 + $0x920] sm:$0xff]  ;;  %716 = vmatpush.msrb.mxu1 %v565_v25  ;;  %757 = vmatpush.msrb.mxu3 %v242_v30  ;;  %v586_v19 = vld [vmem:[#allocation5 + $0xbe8] sm:$0xff] }
  0x7f   :  { %v561_v29 = vld [vmem:[#allocation5 + $0xb20] sm:$0xff]  ;;  %774 = vmatpush.msra.mxu2 %v318_v27  ;;  %697 = vmatpush.msrb.mxu0 %v497_v28  ;;  %v390_v20 = vld [vmem:[#allocation5 + $0x5c8] sm:$0xff] }
  0x80   :  { %v493_v32 = vld [vmem:[#allocation5 + $0x900] sm:$0xff]  ;;  %717 = vmatpush.msrb.mxu1 %v561_v29  ;;  %758 = vmatpush.msrb.mxu3 %v238_v34  ;;  %v446_v21 = vld [vmem:[#allocation5 + $0x788] sm:$0xff] }
  0x81   :  { %v557_v33 = vld [vmem:[#allocation5 + $0xb00] sm:$0xff]  ;;  %775 = vmatpush.msra.mxu2 %v314_v31  ;;  %698 = vmatpush.msrb.mxu0 %v493_v32  ;;  %v510_v23 = vld [vmem:[#allocation5 + $0x988] sm:$0xff] }
  0x82   :  { %v489_v36 = vld [vmem:[#allocation5 + $0x8e0] sm:$0xff]  ;;  %718 = vmatpush.msrb.mxu1 %v557_v33  ;;  %759 = vmatpush.msrb.mxu3 %v234_v38  ;;  %v582_v24 = vld [vmem:[#allocation5 + $0xbc8] sm:$0xff] }
  0x83   :  { %v553_v37 = vld [vmem:[#allocation5 + $0xae0] sm:$0xff]  ;;  %776 = vmatpush.msra.mxu2 %v310_v35  ;;  %699 = vmatpush.msrb.mxu0 %v489_v36  ;;  %v386_v25 = vld [vmem:[#allocation5 + $0x5a8] sm:$0xff] }
  0x84   :  { %v485_v40 = vld [vmem:[#allocation5 + $0x8c0] sm:$0xff]  ;;  %719 = vmatpush.msrb.mxu1 %v553_v37  ;;  %760 = vmatpush.msrb.mxu3 %v230_v42  ;;  %v442_v26 = vld [vmem:[#allocation5 + $0x768] sm:$0xff] }
  0x85   :  { %v549_v41 = vld [vmem:[#allocation5 + $0xac0] sm:$0xff]  ;;  %777 = vmatpush.msra.mxu2 %v306_v39  ;;  %700 = vmatpush.msrb.mxu0 %v485_v40  ;;  %v506_v27 = vld [vmem:[#allocation5 + $0x968] sm:$0xff] }
  0x86   :  { %v481_v44 = vld [vmem:[#allocation5 + $0x8a0] sm:$0xff]  ;;  %720 = vmatpush.msrb.mxu1 %v549_v41  ;;  %761 = vmatpush.msrb.mxu3 %v226_v46  ;;  %v578_v28 = vld [vmem:[#allocation5 + $0xba8] sm:$0xff] }
  0x87   :  { %v545_v45 = vld [vmem:[#allocation5 + $0xaa0] sm:$0xff]  ;;  %778 = vmatpush.msra.mxu2 %v302_v43  ;;  %701 = vmatpush.msrb.mxu0 %v481_v44  ;;  %v382_v29 = vld [vmem:[#allocation5 + $0x588] sm:$0xff] }
  0x88   :  { %v477_v48 = vld [vmem:[#allocation5 + $0x880] sm:$0xff]  ;;  %721 = vmatpush.msrb.mxu1 %v545_v45  ;;  %762 = vmatpush.msrb.mxu3 %v222_v50  ;;  %v438_v30 = vld [vmem:[#allocation5 + $0x748] sm:$0xff] }
  0x89   :  { %v541_v49 = vld [vmem:[#allocation5 + $0xa80] sm:$0xff]  ;;  %779 = vmatpush.msra.mxu2 %v298_v47  ;;  %702 = vmatpush.msrb.mxu0 %v477_v48  ;;  %v502_v31 = vld [vmem:[#allocation5 + $0x948] sm:$0xff] }
  0x8a   :  { %v473_v52 = vld [vmem:[#allocation5 + $0x860] sm:$0xff]  ;;  %722 = vmatpush.msrb.mxu1 %v541_v49  ;;  %763 = vmatpush.msrb.mxu3 %v218_v54  ;;  %v574_v32 = vld [vmem:[#allocation5 + $0xb88] sm:$0xff] }
  0x8b   :  { %v537_v53 = vld [vmem:[#allocation5 + $0xa60] sm:$0xff]  ;;  %780 = vmatpush.msra.mxu2 %v294_v51  ;;  %703 = vmatpush.msrb.mxu0 %v473_v52  ;;  %v378_v33 = vld [vmem:[#allocation5 + $0x568] sm:$0xff] }
  0x8c   :  { %v469_v56 = vld [vmem:[#allocation5 + $0x840] sm:$0xff]  ;;  %723 = vmatpush.msrb.mxu1 %v537_v53  ;;  %764 = vmatpush.msrb.mxu3 %v214_v58  ;;  %v434_v34 = vld [vmem:[#allocation5 + $0x728] sm:$0xff] }
  0x8d   :  { %v533_v57 = vld [vmem:[#allocation5 + $0xa40] sm:$0xff]  ;;  %781 = vmatpush.msra.mxu2 %v290_v55  ;;  %704 = vmatpush.msrb.mxu0 %v469_v56  ;;  %v498_v35 = vld [vmem:[#allocation5 + $0x928] sm:$0xff] }
  0x8e   :  { %v465_v60 = vld [vmem:[#allocation5 + $0x820] sm:$0xff]  ;;  %724 = vmatpush.msrb.mxu1 %v533_v57  ;;  %765 = vmatpush.msrb.mxu3 %v210_v62  ;;  %v570_v36 = vld [vmem:[#allocation5 + $0xb68] sm:$0xff] }
  0x8f   :  { %v529_v61 = vld [vmem:[#allocation5 + $0xa20] sm:$0xff]  ;;  %782 = vmatpush.msra.mxu2 %v286_v59  ;;  %705 = vmatpush.msrb.mxu0 %v465_v60  ;;  %v374_v37 = vld [vmem:[#allocation5 + $0x548] sm:$0xff] }
  0x90   :  { %v461_v1 = vld [vmem:[#allocation5 + $0x800] sm:$0xff]  ;;  %725 = vmatpush.msrb.mxu1 %v529_v61  ;;  %3116 = vmatmul.msk.f32.vlgmr.msrb.gmra.mxu2 %vm607_vm0, %v3599_v63  ;;  %v430_v38 = vld [vmem:[#allocation5 + $0x708] sm:$0xff] }
  0x91   :  { %v525_v2 = vld [vmem:[#allocation5 + $0xa00] sm:$0xff]  ;;  %783 = vmatpush.msra.mxu2 %v282_v0  ;;  %706 = vmatpush.msrb.mxu0 %v461_v1  ;;  %v494_v39 = vld [vmem:[#allocation5 + $0x908] sm:$0xff] }
  0x92   :  { %726 = vmatpush.msrb.mxu1 %v525_v2  ;;  %766 = vmatpush.msrb.mxu3 %v206_v3  ;;  %v566_v40 = vld [vmem:[#allocation5 + $0xb48] sm:$0xff] }
  0x93   :  { %707 = vmatmul.f32.vlgmr.msrb.gmra.mxu0 %v3603_v4  ;;  %784 = vmatpush.msra.mxu2 %v278_v5  ;;  %v370_v41 = vld [vmem:[#allocation5 + $0x528] sm:$0xff] }
  0x94   :  { %811 = vmatpush.msra.mxu1 %v458_v6  ;;  %831 = vmatpush.msra.mxu3 %v522_v7  ;;  %v426_v42 = vld [vmem:[#allocation5 + $0x6e8] sm:$0xff] }
  0x95   :  { %727 = vmatmul.f32.vlgmr.msrb.gmra.mxu1 %v3605_v8  ;;  %785 = vmatpush.msra.mxu2 %v274_v9  ;;  %v490_v43 = vld [vmem:[#allocation5 + $0x8e8] sm:$0xff] }
  0x96   :  { %812 = vmatpush.msra.mxu1 %v454_v10  ;;  %832 = vmatpush.msra.mxu3 %v518_v12  ;;  %v562_v44 = vld [vmem:[#allocation5 + $0xb28] sm:$0xff] }
  0x97   :  { %786 = vmatpush.msra.mxu2 %v270_v13  ;;  %791 = vmatpush.msra.mxu0 %v394_v14  ;;  %v366_v45 = vld [vmem:[#allocation5 + $0x508] sm:$0xff]  ;;  %v267_v14 = vld [vmem:[#allocation5 + $0x1f0] sm:$0xff] }
  0x98   :  { %813 = vmatpush.msra.mxu1 %v450_v15  ;;  %833 = vmatpush.msra.mxu3 %v514_v18  ;;  %v422_v46 = vld [vmem:[#allocation5 + $0x6c8] sm:$0xff] }
  0x99   :  { %851 = vmatpush.msrb.mxu2 %v586_v19  ;;  %792 = vmatpush.msra.mxu0 %v390_v20  ;;  %v486_v47 = vld [vmem:[#allocation5 + $0x8c8] sm:$0xff]  ;;  %v263_v20 = vld [vmem:[#allocation5 + $0x1d0] sm:$0xff] }
  0x9a   :  { %814 = vmatpush.msra.mxu1 %v446_v21  ;;  %834 = vmatpush.msra.mxu3 %v510_v23  ;;  %v558_v48 = vld [vmem:[#allocation5 + $0xb08] sm:$0xff]  ;;  %v331_v21 = vld [vmem:[#allocation5 + $0x3f0] sm:$0xff] }
  0x9b   :  { %852 = vmatpush.msrb.mxu2 %v582_v24  ;;  %793 = vmatpush.msra.mxu0 %v386_v25  ;;  %v362_v49 = vld [vmem:[#allocation5 + $0x4e8] sm:$0xff]  ;;  %v259_v25 = vld [vmem:[#allocation5 + $0x1b0] sm:$0xff] }
  0x9c   :  { %815 = vmatpush.msra.mxu1 %v442_v26  ;;  %835 = vmatpush.msra.mxu3 %v506_v27  ;;  %v418_v50 = vld [vmem:[#allocation5 + $0x6a8] sm:$0xff]  ;;  %v327_v26 = vld [vmem:[#allocation5 + $0x3d0] sm:$0xff] }
  0x9d   :  { %853 = vmatpush.msrb.mxu2 %v578_v28  ;;  %794 = vmatpush.msra.mxu0 %v382_v29  ;;  %v482_v51 = vld [vmem:[#allocation5 + $0x8a8] sm:$0xff]  ;;  %v459_v27 = vld [vmem:[#allocation5 + $0x7f0] sm:$0xff] }
  0x9e   :  { %816 = vmatpush.msra.mxu1 %v438_v30  ;;  %836 = vmatpush.msra.mxu3 %v502_v31  ;;  %v554_v52 = vld [vmem:[#allocation5 + $0xae8] sm:$0xff]  ;;  %v255_v28 = vld [vmem:[#allocation5 + $0x190] sm:$0xff] }
  0x9f   :  { %854 = vmatpush.msrb.mxu2 %v574_v32  ;;  %795 = vmatpush.msra.mxu0 %v378_v33  ;;  %v414_v53 = vld [vmem:[#allocation5 + $0x688] sm:$0xff]  ;;  %v323_v29 = vld [vmem:[#allocation5 + $0x3b0] sm:$0xff] }
  0xa0   :  { %817 = vmatpush.msra.mxu1 %v434_v34  ;;  %837 = vmatpush.msra.mxu3 %v498_v35  ;;  %v478_v54 = vld [vmem:[#allocation5 + $0x888] sm:$0xff]  ;;  %v455_v30 = vld [vmem:[#allocation5 + $0x7d0] sm:$0xff] }
  0xa1   :  { %855 = vmatpush.msrb.mxu2 %v570_v36  ;;  %796 = vmatpush.msra.mxu0 %v374_v37  ;;  %v358_v55 = vld [vmem:[#allocation5 + $0x4c8] sm:$0xff]  ;;  %v251_v31 = vld [vmem:[#allocation5 + $0x170] sm:$0xff] }
  0xa2   :  { %818 = vmatpush.msra.mxu1 %v430_v38  ;;  %838 = vmatpush.msra.mxu3 %v494_v39  ;;  %v550_v56 = vld [vmem:[#allocation5 + $0xac8] sm:$0xff]  ;;  %v319_v32 = vld [vmem:[#allocation5 + $0x390] sm:$0xff] }
  0xa3   :  { %856 = vmatpush.msrb.mxu2 %v566_v40  ;;  %797 = vmatpush.msra.mxu0 %v370_v41  ;;  %v410_v57 = vld [vmem:[#allocation5 + $0x668] sm:$0xff]  ;;  %v395_v33 = vld [vmem:[#allocation5 + $0x5f0] sm:$0xff] }
  0xa4   :  { %819 = vmatpush.msra.mxu1 %v426_v42  ;;  %839 = vmatpush.msra.mxu3 %v490_v43  ;;  %v474_v58 = vld [vmem:[#allocation5 + $0x868] sm:$0xff]  ;;  %v451_v34 = vld [vmem:[#allocation5 + $0x7b0] sm:$0xff] }
  0xa5   :  { %857 = vmatpush.msrb.mxu2 %v562_v44  ;;  %798 = vmatpush.msra.mxu0 %v366_v45  ;;  %v354_v59 = vld [vmem:[#allocation5 + $0x4a8] sm:$0xff]  ;;  %v247_v35 = vld [vmem:[#allocation5 + $0x150] sm:$0xff] }
  0xa6   :  { %820 = vmatpush.msra.mxu1 %v422_v46  ;;  %840 = vmatpush.msra.mxu3 %v486_v47  ;;  %v546_v60 = vld [vmem:[#allocation5 + $0xaa8] sm:$0xff]  ;;  %v315_v36 = vld [vmem:[#allocation5 + $0x370] sm:$0xff] }
  0xa7   :  { %858 = vmatpush.msrb.mxu2 %v558_v48  ;;  %799 = vmatpush.msra.mxu0 %v362_v49  ;;  %v406_v61 = vld [vmem:[#allocation5 + $0x648] sm:$0xff]  ;;  %v391_v37 = vld [vmem:[#allocation5 + $0x5d0] sm:$0xff] }
  0xa8   :  { %821 = vmatpush.msra.mxu1 %v418_v50  ;;  %841 = vmatpush.msra.mxu3 %v482_v51  ;;  %v470_v62 = vld [vmem:[#allocation5 + $0x848] sm:$0xff]  ;;  %v447_v38 = vld [vmem:[#allocation5 + $0x790] sm:$0xff] }
  0xa9   :  { %859 = vmatpush.msrb.mxu2 %v554_v52  ;;  %767 = vmatmul.f32.vlgmr.msrb.gmra.mxu3 %v3590_v16  ;;  %v350_v0 = vld [vmem:[#allocation5 + $0x488] sm:$0xff]  ;;  %v243_v39 = vld [vmem:[#allocation5 + $0x130] sm:$0xff] }
  0xaa   :  { %822 = vmatpush.msra.mxu1 %v414_v53  ;;  %842 = vmatpush.msra.mxu3 %v478_v54  ;;  %v542_v1 = vld [vmem:[#allocation5 + $0xa88] sm:$0xff]  ;;  %v311_v40 = vld [vmem:[#allocation5 + $0x350] sm:$0xff] }
  0xab   :  { %800 = vmatpush.msra.mxu0 %v358_v55  ;;  %860 = vmatpush.msrb.mxu2 %v550_v56  ;;  %v402_v2 = vld [vmem:[#allocation5 + $0x628] sm:$0xff]  ;;  %v387_v41 = vld [vmem:[#allocation5 + $0x5b0] sm:$0xff] }
  0xac   :  { %823 = vmatpush.msra.mxu1 %v410_v57  ;;  %843 = vmatpush.msra.mxu3 %v474_v58  ;;  %v466_v3 = vld [vmem:[#allocation5 + $0x828] sm:$0xff]  ;;  %v443_v42 = vld [vmem:[#allocation5 + $0x770] sm:$0xff] }
  0xad   :  { %801 = vmatpush.msra.mxu0 %v354_v59  ;;  %861 = vmatpush.msrb.mxu2 %v546_v60  ;;  %v346_v5 = vld [vmem:[#allocation5 + $0x468] sm:$0xff]  ;;  %v239_v43 = vld [vmem:[#allocation5 + $0x110] sm:$0xff] }
  0xae   :  { %824 = vmatpush.msra.mxu1 %v406_v61  ;;  %844 = vmatpush.msra.mxu3 %v470_v62  ;;  %v538_v6 = vld [vmem:[#allocation5 + $0xa68] sm:$0xff]  ;;  %v307_v44 = vld [vmem:[#allocation5 + $0x330] sm:$0xff] }
  0xaf   :  { %802 = vmatpush.msra.mxu0 %v350_v0  ;;  %862 = vmatpush.msrb.mxu2 %v542_v1  ;;  %v398_v7 = vld [vmem:[#allocation5 + $0x608] sm:$0xff]  ;;  %v383_v45 = vld [vmem:[#allocation5 + $0x590] sm:$0xff] }
  0xb0   :  { %787 = vmatmul.f32.vlgmr.msra.gmra.mxu2 %v3596_v22  ;;  %825 = vmatpush.msra.mxu1 %v402_v2  ;;  %v462_v9 = vld [vmem:[#allocation5 + $0x808] sm:$0xff]  ;;  %v439_v46 = vld [vmem:[#allocation5 + $0x750] sm:$0xff] }
  0xb1   :  { %v342_v10 = vld [vmem:[#allocation5 + $0x448] sm:$0xff]  ;;  %845 = vmatpush.msra.mxu3 %v466_v3  ;;  %803 = vmatpush.msra.mxu0 %v346_v5  ;;  %v235_v47 = vld [vmem:[#allocation5 + $0xf0] sm:$0xff] }
  0xb2   :  { %v534_v12 = vld [vmem:[#allocation5 + $0xa48] sm:$0xff]  ;;  %863 = vmatpush.msrb.mxu2 %v538_v6  ;;  %826 = vmatpush.msra.mxu1 %v398_v7  ;;  %v303_v48 = vld [vmem:[#allocation5 + $0x310] sm:$0xff] }
  0xb3   :  { %v594_v13 = vld [vmem:[#allocation5 + $0xc28] sm:$0xff]  ;;  %846 = vmatpush.msra.mxu3 %v462_v9  ;;  %804 = vmatpush.msra.mxu0 %v342_v10  ;;  %v379_v49 = vld [vmem:[#allocation5 + $0x570] sm:$0xff] }
  0xb4   :  { %v338_v15 = vld [vmem:[#allocation5 + $0x428] sm:$0xff]  ;;  %847 = vmatmul.f32.vlgmr.msra.gmra.mxu3 %v3603_v4  ;;  %864 = vmatpush.msrb.mxu2 %v534_v12  ;;  %v435_v50 = vld [vmem:[#allocation5 + $0x730] sm:$0xff] }
  0xb5   :  { %v530_v18 = vld [vmem:[#allocation5 + $0xa28] sm:$0xff]  ;;  %885 = vmatpush.msrb.mxu3 %v594_v13  ;;  %891 = vmatpush.msrb.mxu1 %v267_v14  ;;  %v231_v51 = vld [vmem:[#allocation5 + $0xd0] sm:$0xff] }
  0xb6   :  { %v590_v19 = vld [vmem:[#allocation5 + $0xc08] sm:$0xff]  ;;  %805 = vmatpush.msra.mxu0 %v338_v15  ;;  %865 = vmatpush.msrb.mxu2 %v530_v18  ;;  %v299_v52 = vld [vmem:[#allocation5 + $0x2f0] sm:$0xff] }
  0xb7   :  { %v334_v23 = vld [vmem:[#allocation5 + $0x408] sm:$0xff]  ;;  %886 = vmatpush.msrb.mxu3 %v590_v19  ;;  %892 = vmatpush.msrb.mxu1 %v263_v20  ;;  %v375_v53 = vld [vmem:[#allocation5 + $0x550] sm:$0xff] }
  0xb8   :  { %v526_v24 = vld [vmem:[#allocation5 + $0xa08] sm:$0xff]  ;;  %806 = vmatpush.msra.mxu0 %v334_v23  ;;  %827 = vmatmul.f32.vlgmr.msra.gmra.mxu1 %v3592_v17  ;;  %v431_v54 = vld [vmem:[#allocation5 + $0x710] sm:$0xff] }
  0xb9   :  { %911 = vmatpush.msra.mxu3 %v331_v21  ;;  %866 = vmatpush.msrb.mxu2 %v526_v24  ;;  %v227_v55 = vld [vmem:[#allocation5 + $0xb0] sm:$0xff] }
  0xba   :  { %893 = vmatpush.msrb.mxu1 %v259_v25  ;;  %807 = vmatmul.f32.vlgmr.msra.gmra.mxu0 %v3587_v11  ;;  %v295_v56 = vld [vmem:[#allocation5 + $0x2d0] sm:$0xff] }
  0xbb   :  { %867 = vmatmul.f32.vlgmr.msrb.gmra.mxu2 %v3605_v8  ;;  %912 = vmatpush.msra.mxu3 %v327_v26  ;;  %v371_v57 = vld [vmem:[#allocation5 + $0x530] sm:$0xff] }
  0xbc   :  { %951 = vmatpush.msra.mxu2 %v459_v27  ;;  %894 = vmatpush.msrb.mxu1 %v255_v28  ;;  %v427_v58 = vld [vmem:[#allocation5 + $0x6f0] sm:$0xff] }
  0xbd   :  { %3117 = vmatmul.msk.f32.vlgmr.msrb.gmra.mxu3 %vm607_vm0, %v3599_v63  ;;  %931 = vmatpush.msrb.mxu0 %v395_v33  ;;  %v223_v59 = vld [vmem:[#allocation5 + $0x90] sm:$0xff] }
  0xbe   :  { %913 = vmatpush.msra.mxu3 %v323_v29  ;;  %952 = vmatpush.msra.mxu2 %v455_v30  ;;  %v291_v60 = vld [vmem:[#allocation5 + $0x2b0] sm:$0xff] }
  0xbf   :  { %895 = vmatpush.msrb.mxu1 %v251_v31  ;;  %932 = vmatpush.msrb.mxu0 %v391_v37  ;;  %v367_v61 = vld [vmem:[#allocation5 + $0x510] sm:$0xff] }
  0xc0   :  { %914 = vmatpush.msra.mxu3 %v319_v32  ;;  %953 = vmatpush.msra.mxu2 %v451_v34  ;;  %v423_v62 = vld [vmem:[#allocation5 + $0x6d0] sm:$0xff]  ;;  %v268_v32 = vld [vmem:[#allocation5 + $0x1f8] sm:$0xff] }
  0xc1   :  { %896 = vmatpush.msrb.mxu1 %v247_v35  ;;  %933 = vmatpush.msrb.mxu0 %v387_v41  ;;  %v219_v0 = vld [vmem:[#allocation5 + $0x70] sm:$0xff] }
  0xc2   :  { %915 = vmatpush.msra.mxu3 %v315_v36  ;;  %954 = vmatpush.msra.mxu2 %v447_v38  ;;  %v287_v1 = vld [vmem:[#allocation5 + $0x290] sm:$0xff]  ;;  %v264_v36 = vld [vmem:[#allocation5 + $0x1d8] sm:$0xff] }
  0xc3   :  { %897 = vmatpush.msrb.mxu1 %v243_v39  ;;  %934 = vmatpush.msrb.mxu0 %v383_v45  ;;  %v363_v2 = vld [vmem:[#allocation5 + $0x4f0] sm:$0xff] }
  0xc4   :  { %916 = vmatpush.msra.mxu3 %v311_v40  ;;  %955 = vmatpush.msra.mxu2 %v443_v42  ;;  %v419_v3 = vld [vmem:[#allocation5 + $0x6b0] sm:$0xff]  ;;  %v260_v40 = vld [vmem:[#allocation5 + $0x1b8] sm:$0xff] }
  0xc5   :  { %898 = vmatpush.msrb.mxu1 %v239_v43  ;;  %935 = vmatpush.msrb.mxu0 %v379_v49  ;;  %v215_v5 = vld [vmem:[#allocation5 + $0x50] sm:$0xff]  ;;  %v256_v43 = vld [vmem:[#allocation5 + $0x198] sm:$0xff] }
  0xc6   :  { %917 = vmatpush.msra.mxu3 %v307_v44  ;;  %956 = vmatpush.msra.mxu2 %v439_v46  ;;  %v283_v6 = vld [vmem:[#allocation5 + $0x270] sm:$0xff] }
  0xc7   :  { %899 = vmatpush.msrb.mxu1 %v235_v47  ;;  %936 = vmatpush.msrb.mxu0 %v375_v53  ;;  %v359_v7 = vld [vmem:[#allocation5 + $0x4d0] sm:$0xff]  ;;  %v252_v47 = vld [vmem:[#allocation5 + $0x178] sm:$0xff] }
  0xc8   :  { %918 = vmatpush.msra.mxu3 %v303_v48  ;;  %957 = vmatpush.msra.mxu2 %v435_v50  ;;  %v415_v9 = vld [vmem:[#allocation5 + $0x690] sm:$0xff]  ;;  %v332_v48 = vld [vmem:[#allocation5 + $0x3f8] sm:$0xff] }
  0xc9   :  { %900 = vmatpush.msrb.mxu1 %v231_v51  ;;  %937 = vmatpush.msrb.mxu0 %v371_v57  ;;  %v211_v10 = vld [vmem:[#allocation5 + $0x30] sm:$0xff]  ;;  %v248_v50 = vld [vmem:[#allocation5 + $0x158] sm:$0xff] }
  0xca   :  { %919 = vmatpush.msra.mxu3 %v299_v52  ;;  %958 = vmatpush.msra.mxu2 %v431_v54  ;;  %v279_v12 = vld [vmem:[#allocation5 + $0x250] sm:$0xff]  ;;  %v244_v53 = vld [vmem:[#allocation5 + $0x138] sm:$0xff] }
  0xcb   :  { %901 = vmatpush.msrb.mxu1 %v227_v55  ;;  %938 = vmatpush.msrb.mxu0 %v367_v61  ;;  %v355_v13 = vld [vmem:[#allocation5 + $0x4b0] sm:$0xff]  ;;  %v324_v54 = vld [vmem:[#allocation5 + $0x3b8] sm:$0xff] }
  0xcc   :  { %920 = vmatpush.msra.mxu3 %v295_v56  ;;  %959 = vmatpush.msra.mxu2 %v427_v58  ;;  %v411_v14 = vld [vmem:[#allocation5 + $0x670] sm:$0xff]  ;;  %v240_v57 = vld [vmem:[#allocation5 + $0x118] sm:$0xff] }
  0xcd   :  { %902 = vmatpush.msrb.mxu1 %v223_v59  ;;  %939 = vmatpush.msrb.mxu0 %v363_v2  ;;  %v207_v15 = vld [vmem:[#allocation5 + $0x10] sm:$0xff]  ;;  %v320_v58 = vld [vmem:[#allocation5 + $0x398] sm:$0xff] }
  0xce   :  { %921 = vmatpush.msra.mxu3 %v291_v60  ;;  %960 = vmatpush.msra.mxu2 %v423_v62  ;;  %v275_v18 = vld [vmem:[#allocation5 + $0x230] sm:$0xff]  ;;  %v236_v60 = vld [vmem:[#allocation5 + $0xf8] sm:$0xff] }
  0xcf   :  { %903 = vmatpush.msrb.mxu1 %v219_v0  ;;  %940 = vmatpush.msrb.mxu0 %v359_v7  ;;  %v523_v19 = vld [vmem:[#allocation5 + $0x9f0] sm:$0xff]  ;;  %v316_v61 = vld [vmem:[#allocation5 + $0x378] sm:$0xff] }
  0xd0   :  { %922 = vmatpush.msra.mxu3 %v287_v1  ;;  %961 = vmatpush.msra.mxu2 %v419_v3  ;;  %v407_v20 = vld [vmem:[#allocation5 + $0x650] sm:$0xff]  ;;  %v232_v1 = vld [vmem:[#allocation5 + $0xd8] sm:$0xff] }
  0xd1   :  { %904 = vmatpush.msrb.mxu1 %v215_v5  ;;  %941 = vmatpush.msrb.mxu0 %v355_v13  ;;  %v351_v21 = vld [vmem:[#allocation5 + $0x490] sm:$0xff]  ;;  %v312_v2 = vld [vmem:[#allocation5 + $0x358] sm:$0xff] }
  0xd2   :  { %923 = vmatpush.msra.mxu3 %v283_v6  ;;  %962 = vmatpush.msra.mxu2 %v415_v9  ;;  %v271_v23 = vld [vmem:[#allocation5 + $0x210] sm:$0xff]  ;;  %v228_v6 = vld [vmem:[#allocation5 + $0xb8] sm:$0xff] }
  0xd3   :  { %905 = vmatpush.msrb.mxu1 %v211_v10  ;;  %v519_v24 = vld [vmem:[#allocation5 + $0x9d0] sm:$0xff]  ;;  %942 = vmatpush.msrb.mxu0 %v351_v21  ;;  %v308_v7 = vld [vmem:[#allocation5 + $0x338] sm:$0xff] }
  0xd4   :  { %924 = vmatpush.msra.mxu3 %v279_v12  ;;  %963 = vmatpush.msra.mxu2 %v411_v14  ;;  %v403_v25 = vld [vmem:[#allocation5 + $0x630] sm:$0xff]  ;;  %v224_v12 = vld [vmem:[#allocation5 + $0x98] sm:$0xff] }
  0xd5   :  { %906 = vmatpush.msrb.mxu1 %v207_v15  ;;  %v347_v26 = vld [vmem:[#allocation5 + $0x470] sm:$0xff]  ;;  %v304_v13 = vld [vmem:[#allocation5 + $0x318] sm:$0xff] }
  0xd6   :  { %925 = vmatpush.msra.mxu3 %v275_v18  ;;  %964 = vmatpush.msra.mxu2 %v407_v20  ;;  %v587_v27 = vld [vmem:[#allocation5 + $0xbf0] sm:$0xff]  ;;  %v220_v18 = vld [vmem:[#allocation5 + $0x78] sm:$0xff] }
  0xd7   :  { %971 = vmatpush.msra.mxu1 %v523_v19  ;;  %v515_v28 = vld [vmem:[#allocation5 + $0x9b0] sm:$0xff]  ;;  %943 = vmatpush.msrb.mxu0 %v347_v26  ;;  %v300_v19 = vld [vmem:[#allocation5 + $0x2f8] sm:$0xff] }
  0xd8   :  { %926 = vmatpush.msra.mxu3 %v271_v23  ;;  %v399_v29 = vld [vmem:[#allocation5 + $0x610] sm:$0xff]  ;;  %965 = vmatpush.msra.mxu2 %v403_v25  ;;  %v216_v23 = vld [vmem:[#allocation5 + $0x58] sm:$0xff] }
  0xd9   :  { %972 = vmatpush.msra.mxu1 %v519_v24  ;;  %v343_v30 = vld [vmem:[#allocation5 + $0x450] sm:$0xff]  ;;  %927 = vmatmul.f32.vlgmr.msra.gmra.mxu3 %v3596_v22  ;;  %v296_v24 = vld [vmem:[#allocation5 + $0x2d8] sm:$0xff] }
  0xda   :  { %v583_v31 = vld [vmem:[#allocation5 + $0xbd0] sm:$0xff]  ;;  %991 = vmatpush.msrb.mxu3 %v587_v27  ;;  %966 = vmatpush.msra.mxu2 %v399_v29  ;;  %v396_v25 = vld [vmem:[#allocation5 + $0x5f8] sm:$0xff] }
  0xdb   :  { %973 = vmatpush.msra.mxu1 %v515_v28  ;;  %v511_v33 = vld [vmem:[#allocation5 + $0x990] sm:$0xff]  ;;  %944 = vmatpush.msrb.mxu0 %v343_v30  ;;  %v212_v27 = vld [vmem:[#allocation5 + $0x38] sm:$0xff] }
  0xdc   :  { %v339_v34 = vld [vmem:[#allocation5 + $0x430] sm:$0xff]  ;;  %992 = vmatpush.msrb.mxu3 %v583_v31  ;;  %1031 = vmatpush.msrb.mxu2 %v268_v32  ;;  %v292_v28 = vld [vmem:[#allocation5 + $0x2b8] sm:$0xff] }
  0xdd   :  { %v579_v35 = vld [vmem:[#allocation5 + $0xbb0] sm:$0xff]  ;;  %974 = vmatpush.msra.mxu1 %v511_v33  ;;  %945 = vmatpush.msrb.mxu0 %v339_v34  ;;  %v392_v29 = vld [vmem:[#allocation5 + $0x5d8] sm:$0xff] }
  0xde   :  { %v507_v37 = vld [vmem:[#allocation5 + $0x970] sm:$0xff]  ;;  %993 = vmatpush.msrb.mxu3 %v579_v35  ;;  %1032 = vmatpush.msrb.mxu2 %v264_v36  ;;  %v460_v30 = vld [vmem:[#allocation5 + $0x7f8] sm:$0xff] }
  0xdf   :  { %v335_v38 = vld [vmem:[#allocation5 + $0x410] sm:$0xff]  ;;  %975 = vmatpush.msra.mxu1 %v507_v37  ;;  %967 = vmatmul.f32.vlgmr.msra.gmra.mxu2 %v3592_v17  ;;  %v328_v17 = vld [vmem:[#allocation5 + $0x3d8] sm:$0xff] }
  0xe0   :  { %v575_v39 = vld [vmem:[#allocation5 + $0xb90] sm:$0xff]  ;;  %907 = vmatmul.f32.vlgmr.msrb.gmra.mxu1 %v3590_v16  ;;  %946 = vmatpush.msrb.mxu0 %v335_v38  ;;  %v208_v31 = vld [vmem:[#allocation5 + $0x18] sm:$0xff] }
  0xe1   :  { %v503_v41 = vld [vmem:[#allocation5 + $0x950] sm:$0xff]  ;;  %994 = vmatpush.msrb.mxu3 %v575_v39  ;;  %1033 = vmatpush.msrb.mxu2 %v260_v40  ;;  %v288_v32 = vld [vmem:[#allocation5 + $0x298] sm:$0xff] }
  0xe2   :  { %v595_v22 = vld [vmem:[#allocation5 + $0xc30] sm:$0xff]  ;;  %976 = vmatpush.msra.mxu1 %v503_v41  ;;  %947 = vmatmul.f32.vlgmr.msrb.gmra.mxu0 %v3587_v11  ;;  %v388_v33 = vld [vmem:[#allocation5 + $0x5b8] sm:$0xff] }
  0xe3   :  { %v571_v42 = vld [vmem:[#allocation5 + $0xb70] sm:$0xff]  ;;  %1025 = vmatpush.msra.mxu0 %v595_v22  ;;  %1034 = vmatpush.msrb.mxu2 %v256_v43  ;;  %v456_v34 = vld [vmem:[#allocation5 + $0x7d8] sm:$0xff] }
  0xe4   :  { %v499_v44 = vld [vmem:[#allocation5 + $0x930] sm:$0xff]  ;;  %995 = vmatpush.msrb.mxu3 %v571_v42  ;;  %v524_v35 = vld [vmem:[#allocation5 + $0x9f8] sm:$0xff] }
  0xe5   :  { %v591_v45 = vld [vmem:[#allocation5 + $0xc10] sm:$0xff]  ;;  %977 = vmatpush.msra.mxu1 %v499_v44  ;;  %1035 = vmatpush.msrb.mxu2 %v252_v47  ;;  %v384_v36 = vld [vmem:[#allocation5 + $0x598] sm:$0xff] }
  0xe6   :  { %v567_v46 = vld [vmem:[#allocation5 + $0xb50] sm:$0xff]  ;;  %1026 = vmatpush.msra.mxu0 %v591_v45  ;;  %v452_v37 = vld [vmem:[#allocation5 + $0x7b8] sm:$0xff] }
  0xe7   :  { %v495_v49 = vld [vmem:[#allocation5 + $0x910] sm:$0xff]  ;;  %996 = vmatpush.msrb.mxu3 %v567_v46  ;;  %1036 = vmatpush.msrb.mxu2 %v248_v50  ;;  %v520_v38 = vld [vmem:[#allocation5 + $0x9d8] sm:$0xff] }
  0xe8   :  { %v563_v16 = vld [vmem:[#allocation5 + $0xb30] sm:$0xff]  ;;  %1051 = vmatpush.msrb.mxu0 %v332_v48  ;;  %978 = vmatpush.msra.mxu1 %v495_v49  ;;  %v280_v39 = vld [vmem:[#allocation5 + $0x258] sm:$0xff] }
  0xe9   :  { %v491_v51 = vld [vmem:[#allocation5 + $0x8f0] sm:$0xff]  ;;  %997 = vmatpush.msrb.mxu3 %v563_v16  ;;  %1037 = vmatpush.msrb.mxu2 %v244_v53  ;;  %v380_v40 = vld [vmem:[#allocation5 + $0x578] sm:$0xff] }
  0xea   :  { %v559_v52 = vld [vmem:[#allocation5 + $0xb10] sm:$0xff]  ;;  %1052 = vmatpush.msrb.mxu0 %v328_v17  ;;  %979 = vmatpush.msra.mxu1 %v491_v51  ;;  %v448_v41 = vld [vmem:[#allocation5 + $0x798] sm:$0xff] }
  0xeb   :  { %v487_v55 = vld [vmem:[#allocation5 + $0x8d0] sm:$0xff]  ;;  %998 = vmatpush.msrb.mxu3 %v559_v52  ;;  %1038 = vmatpush.msrb.mxu2 %v240_v57  ;;  %v516_v22 = vld [vmem:[#allocation5 + $0x9b8] sm:$0xff] }
  0xec   :  { %v555_v56 = vld [vmem:[#allocation5 + $0xaf0] sm:$0xff]  ;;  %1053 = vmatpush.msrb.mxu0 %v324_v54  ;;  %980 = vmatpush.msra.mxu1 %v487_v55  ;;  %v376_v42 = vld [vmem:[#allocation5 + $0x558] sm:$0xff] }
  0xed   :  { %v483_v59 = vld [vmem:[#allocation5 + $0x8b0] sm:$0xff]  ;;  %999 = vmatpush.msrb.mxu3 %v555_v56  ;;  %1039 = vmatpush.msrb.mxu2 %v236_v60  ;;  %v444_v43 = vld [vmem:[#allocation5 + $0x778] sm:$0xff] }
  0xee   :  { %v551_v11 = vld [vmem:[#allocation5 + $0xad0] sm:$0xff]  ;;  %1054 = vmatpush.msrb.mxu0 %v320_v58  ;;  %981 = vmatpush.msra.mxu1 %v483_v59  ;;  %v512_v44 = vld [vmem:[#allocation5 + $0x998] sm:$0xff] }
  0xef   :  { %v479_v62 = vld [vmem:[#allocation5 + $0x890] sm:$0xff]  ;;  %1000 = vmatpush.msrb.mxu3 %v551_v11  ;;  %1040 = vmatpush.msrb.mxu2 %v232_v1  ;;  %v272_v45 = vld [vmem:[#allocation5 + $0x218] sm:$0xff] }
  0xf0   :  { %v547_v0 = vld [vmem:[#allocation5 + $0xab0] sm:$0xff]  ;;  %1055 = vmatpush.msrb.mxu0 %v316_v61  ;;  %982 = vmatpush.msra.mxu1 %v479_v62  ;;  %v372_v46 = vld [vmem:[#allocation5 + $0x538] sm:$0xff] }
  0xf1   :  { %v475_v3 = vld [vmem:[#allocation5 + $0x870] sm:$0xff]  ;;  %1001 = vmatpush.msrb.mxu3 %v547_v0  ;;  %1041 = vmatpush.msrb.mxu2 %v228_v6  ;;  %v440_v47 = vld [vmem:[#allocation5 + $0x758] sm:$0xff] }
  0xf2   :  { %v543_v5 = vld [vmem:[#allocation5 + $0xa90] sm:$0xff]  ;;  %1056 = vmatpush.msrb.mxu0 %v312_v2  ;;  %983 = vmatpush.msra.mxu1 %v475_v3  ;;  %v508_v48 = vld [vmem:[#allocation5 + $0x978] sm:$0xff] }
  0xf3   :  { %v471_v9 = vld [vmem:[#allocation5 + $0x850] sm:$0xff]  ;;  %1002 = vmatpush.msrb.mxu3 %v543_v5  ;;  %1042 = vmatpush.msrb.mxu2 %v224_v12  ;;  %v588_v49 = vld [vmem:[#allocation5 + $0xbf8] sm:$0xff] }
  0xf4   :  { %v539_v10 = vld [vmem:[#allocation5 + $0xa70] sm:$0xff]  ;;  %1057 = vmatpush.msrb.mxu0 %v308_v7  ;;  %984 = vmatpush.msra.mxu1 %v471_v9  ;;  %v368_v16 = vld [vmem:[#allocation5 + $0x518] sm:$0xff] }
  0xf5   :  { %v467_v14 = vld [vmem:[#allocation5 + $0x830] sm:$0xff]  ;;  %1003 = vmatpush.msrb.mxu3 %v539_v10  ;;  %1043 = vmatpush.msrb.mxu2 %v220_v18  ;;  %v436_v50 = vld [vmem:[#allocation5 + $0x738] sm:$0xff] }
  0xf6   :  { %v535_v15 = vld [vmem:[#allocation5 + $0xa50] sm:$0xff]  ;;  %1058 = vmatpush.msrb.mxu0 %v304_v13  ;;  %985 = vmatpush.msra.mxu1 %v467_v14  ;;  %v504_v17 = vld [vmem:[#allocation5 + $0x958] sm:$0xff] }
  0xf7   :  { %v463_v20 = vld [vmem:[#allocation5 + $0x810] sm:$0xff]  ;;  %1004 = vmatpush.msrb.mxu3 %v535_v15  ;;  %1044 = vmatpush.msrb.mxu2 %v216_v23  ;;  %v584_v51 = vld [vmem:[#allocation5 + $0xbd8] sm:$0xff]  ;;  %v3169_v23 = vld [vmem:[#allocation2] sm:$0xff] }
  0xf8   :  { %v531_v21 = vld [vmem:[#allocation5 + $0xa30] sm:$0xff]  ;;  %1059 = vmatpush.msrb.mxu0 %v300_v19  ;;  %986 = vmatpush.msra.mxu1 %v463_v20  ;;  %v364_v52 = vld [vmem:[#allocation5 + $0x4f8] sm:$0xff] }
  0xf9   :  { %v527_v26 = vld [vmem:[#allocation5 + $0xa10] sm:$0xff]  ;;  %987 = vmatmul.f32.vlgmr.msra.gmra.mxu1 %v3603_v4  ;;  %1005 = vmatpush.msrb.mxu3 %v531_v21  ;;  %v284_v4 = vld [vmem:[#allocation5 + $0x278] sm:$0xff]  ;;  %v3625_v21 = vld [vmem:[#allocation7] sm:$0xf] }
  0xfa   :  { %1060 = vmatpush.msrb.mxu0 %v296_v24  ;;  %1071 = vmatpush.msrb.mxu1 %v396_v25  ;;  %v432_v53 = vld [vmem:[#allocation5 + $0x718] sm:$0xff] }
  0xfb   :  { %1006 = vmatpush.msrb.mxu3 %v527_v26  ;;  %1045 = vmatpush.msrb.mxu2 %v212_v27  ;;  %v500_v54 = vld [vmem:[#allocation5 + $0x938] sm:$0xff] }
  0xfc   :  { %1061 = vmatpush.msrb.mxu0 %v292_v28  ;;  %1072 = vmatpush.msrb.mxu1 %v392_v29  ;;  %v580_v55 = vld [vmem:[#allocation5 + $0xbb8] sm:$0xff] }
  0xfd   :  { %1007 = vmatmul.f32.vlgmr.msrb.gmra.mxu3 %v3605_v8  ;;  %1046 = vmatpush.msrb.mxu2 %v208_v31  ;;  %v276_v8 = vld [vmem:[#allocation5 + $0x238] sm:$0xff] }
  0xfe   :  { %1091 = vmatpush.msra.mxu3 %v460_v30  ;;  %1062 = vmatpush.msrb.mxu0 %v288_v32  ;;  %v428_v56 = vld [vmem:[#allocation5 + $0x6f8] sm:$0xff]  ;;  %v599_v30 = vperm.slane %v3625_v21, 0 }
  0xff   :  { %1073 = vmatpush.msrb.mxu1 %v388_v33  ;;  %1111 = vmatpush.msra.mxu2 %v524_v35  ;;  %v496_v57 = vld [vmem:[#allocation5 + $0x918] sm:$0xff]  ;;  %v628_v33 = vpop.f32.mrf.mxu0  ;;  %v1299_v35 = vld [vmem:[#allocation8 + $0x3e0] sm:$0xff] }
 0x100   :  { %1092 = vmatpush.msra.mxu3 %v456_v34  ;;  %1063 = vmatpush.msrb.mxu0 %v284_v4  ;;  %v576_v58 = vld [vmem:[#allocation5 + $0xb98] sm:$0xff]  ;;  %v1235_v34 = vld [vmem:[#allocation8 + $0x1e0] sm:$0xff] }
 0x101   :  { %1074 = vmatpush.msrb.mxu1 %v384_v36  ;;  %1112 = vmatpush.msra.mxu2 %v520_v38  ;;  %v356_v59 = vld [vmem:[#allocation5 + $0x4b8] sm:$0xff] }
 0x102   :  { %1093 = vmatpush.msra.mxu3 %v452_v37  ;;  %1064 = vmatpush.msrb.mxu0 %v280_v39  ;;  %v424_v11 = vld [vmem:[#allocation5 + $0x6d8] sm:$0xff]  ;;  %v629_v37 = vadd.f32 %v628_v33, %v599_v30  ;;  %v3171_v39 = vld [vmem:[#allocation2 + $0x18] sm:$0xff] }
 0x103   :  { %1075 = vmatpush.msrb.mxu1 %v380_v40  ;;  %1113 = vmatpush.msra.mxu2 %v516_v22  ;;  %v492_v60 = vld [vmem:[#allocation5 + $0x8f8] sm:$0xff]  ;;  %v648_v40 = vpop.f32.mrf.mxu1  ;;  %v1295_v22 = vld [vmem:[#allocation8 + $0x3c0] sm:$0xff] }
 0x104   :  { %1094 = vmatpush.msra.mxu3 %v448_v41  ;;  %1065 = vmatpush.msrb.mxu0 %v276_v8  ;;  %v572_v61 = vld [vmem:[#allocation5 + $0xb78] sm:$0xff]  ;;  %v1231_v41 = vld [vmem:[#allocation8 + $0x1c0] sm:$0xff] }
 0x105   :  { %1076 = vmatpush.msrb.mxu1 %v376_v42  ;;  %3118 = vmatmul.msk.f32.vlgmr.msra.gmra.mxu0 %vm607_vm0, %v3599_v63  ;;  %v360_v63 = vld [vmem:[#allocation5 + $0x4d8] sm:$0xff]  ;;  %v3172_v42 = vld [vmem:[#allocation2 + $0x8] sm:$0xff]  ;;  %v1183_v30 = vld [vmem:[#allocation8 + $0x40] sm:$0xff] }
 0x106   :  { %1095 = vmatpush.msra.mxu3 %v444_v43  ;;  %1114 = vmatpush.msra.mxu2 %v512_v44  ;;  %v352_v62 = vld [vmem:[#allocation5 + $0x498] sm:$0xff]  ;;  %v3173_v43 = vld [vmem:[#allocation2 + $0x20] sm:$0xff] }
 0x107   :  { %1066 = vmatpush.msrb.mxu0 %v272_v45  ;;  %1077 = vmatpush.msrb.mxu1 %v372_v46  ;;  %v420_v0 = vld [vmem:[#allocation5 + $0x6b8] sm:$0xff]  ;;  %v1227_v44 = vld [vmem:[#allocation8 + $0x1a0] sm:$0xff]  ;;  %v649_v46 = vadd.f32 %v648_v40, %v629_v37 }
 0x108   :  { %1096 = vmatpush.msra.mxu3 %v440_v47  ;;  %1115 = vmatpush.msra.mxu2 %v508_v48  ;;  %v488_v1 = vld [vmem:[#allocation5 + $0x8d8] sm:$0xff]  ;;  %v1291_v45 = vld [vmem:[#allocation8 + $0x3a0] sm:$0xff]  ;;  %v668_v48 = vpop.f32.mrf.mxu2 }
 0x109   :  { %1131 = vmatpush.msra.mxu0 %v588_v49  ;;  %1078 = vmatpush.msrb.mxu1 %v368_v16  ;;  %v568_v2 = vld [vmem:[#allocation5 + $0xb58] sm:$0xff]  ;;  %v1223_v49 = vld [vmem:[#allocation8 + $0x180] sm:$0xff] }
 0x10a   :  { %1097 = vmatpush.msra.mxu3 %v436_v50  ;;  %1116 = vmatpush.msra.mxu2 %v504_v17  ;;  %v348_v3 = vld [vmem:[#allocation5 + $0x478] sm:$0xff]  ;;  %v1287_v16 = vld [vmem:[#allocation8 + $0x380] sm:$0xff] }
 0x10b   :  { %1132 = vmatpush.msra.mxu0 %v584_v51  ;;  %1079 = vmatpush.msrb.mxu1 %v364_v52  ;;  %v416_v5 = vld [vmem:[#allocation5 + $0x698] sm:$0xff]  ;;  %v1219_v17 = vld [vmem:[#allocation8 + $0x160] sm:$0xff]  ;;  %v669_v52 = vadd.f32 %v668_v48, %v649_v46  ;;  %v1296_v48 = vld [vmem:[#allocation8 + $0x3c8] sm:$0xff] }
 0x10c   :  { %1098 = vmatpush.msra.mxu3 %v432_v53  ;;  %1117 = vmatpush.msra.mxu2 %v500_v54  ;;  %v484_v6 = vld [vmem:[#allocation5 + $0x8b8] sm:$0xff]  ;;  %v1283_v51 = vld [vmem:[#allocation8 + $0x360] sm:$0xff]  ;;  %v688_v53 = vpop.f32.mrf.mxu3 }
 0x10d   :  { %1133 = vmatpush.msra.mxu0 %v580_v55  ;;  %1080 = vmatpush.msrb.mxu1 %v360_v63  ;;  %v564_v7 = vld [vmem:[#allocation5 + $0xb38] sm:$0xff]  ;;  %v1215_v55 = vld [vmem:[#allocation8 + $0x140] sm:$0xff] }
 0x10e   :  { %1099 = vmatpush.msra.mxu3 %v428_v56  ;;  %1118 = vmatpush.msra.mxu2 %v496_v57  ;;  %v344_v9 = vld [vmem:[#allocation5 + $0x458] sm:$0xff]  ;;  %v1279_v56 = vld [vmem:[#allocation8 + $0x340] sm:$0xff] }
 0x10f   :  { %1134 = vmatpush.msra.mxu0 %v576_v58  ;;  %1081 = vmatpush.msrb.mxu1 %v356_v59  ;;  %v412_v10 = vld [vmem:[#allocation5 + $0x678] sm:$0xff]  ;;  %v1211_v58 = vld [vmem:[#allocation8 + $0x120] sm:$0xff]  ;;  %v689_v59 = vadd.f32 %v688_v53, %v669_v52 }
 0x110   :  { %1100 = vmatpush.msra.mxu3 %v424_v11  ;;  %1119 = vmatpush.msra.mxu2 %v492_v60  ;;  %v480_v12 = vld [vmem:[#allocation5 + $0x898] sm:$0xff]  ;;  %v708_v57 = vpop.f32.mrf.mxu0  ;;  %v3175_v11 = vld [vmem:[#allocation2 + $0x28] sm:$0xff]  ;;  %v1275_v60 = vld [vmem:[#allocation8 + $0x320] sm:$0xff] }
 0x111   :  { %1135 = vmatpush.msra.mxu0 %v572_v61  ;;  %1082 = vmatpush.msrb.mxu1 %v352_v62  ;;  %v560_v13 = vld [vmem:[#allocation5 + $0xb18] sm:$0xff]  ;;  %v1207_v61 = vld [vmem:[#allocation8 + $0x100] sm:$0xff]  ;;  %v709_v62 = vadd.f32 %v708_v57, %v689_v59  ;;  %v1284_v57 = vld [vmem:[#allocation8 + $0x368] sm:$0xff] }
 0x112   :  { %1101 = vmatpush.msra.mxu3 %v420_v0  ;;  %1120 = vmatpush.msra.mxu2 %v488_v1  ;;  %v340_v14 = vld [vmem:[#allocation5 + $0x438] sm:$0xff]  ;;  %v1271_v1 = vld [vmem:[#allocation8 + $0x300] sm:$0xff]  ;;  %v1216_v59 = vld [vmem:[#allocation8 + $0x148] sm:$0xff] }
 0x113   :  { %1136 = vmatpush.msra.mxu0 %v568_v2  ;;  %1083 = vmatpush.msrb.mxu1 %v348_v3  ;;  %v408_v15 = vld [vmem:[#allocation5 + $0x658] sm:$0xff]  ;;  %v748_v0 = vpop.f32.mrf.mxu2  ;;  %v728_v2 = vpop.f32.mrf.mxu1  ;;  %v1203_v3 = vld [vmem:[#allocation8 + $0xe0] sm:$0xff] }
 0x114   :  { %1102 = vmatpush.msra.mxu3 %v416_v5  ;;  %1121 = vmatpush.msra.mxu2 %v484_v6  ;;  %v476_v18 = vld [vmem:[#allocation5 + $0x878] sm:$0xff]  ;;  %v600_v5 = vperm.slane %v3625_v21, 1  ;;  %v1267_v6 = vld [vmem:[#allocation8 + $0x2e0] sm:$0xff] }
 0x115   :  { %1137 = vmatpush.msra.mxu0 %v564_v7  ;;  %1084 = vmatpush.msrb.mxu1 %v344_v9  ;;  %v556_v19 = vld [vmem:[#allocation5 + $0xaf8] sm:$0xff]  ;;  %v1199_v9 = vld [vmem:[#allocation8 + $0xc0] sm:$0xff] }
 0x116   :  { %1103 = vmatpush.msra.mxu3 %v412_v10  ;;  %1122 = vmatpush.msra.mxu2 %v480_v12  ;;  %v336_v20 = vld [vmem:[#allocation5 + $0x418] sm:$0xff]  ;;  %v729_v10 = vadd.f32 %v728_v2, %v709_v62  ;;  %v1263_v12 = vld [vmem:[#allocation8 + $0x2c0] sm:$0xff]  ;;  %v1276_v62 = vld [vmem:[#allocation8 + $0x328] sm:$0xff] }
 0x117   :  { %1138 = vmatpush.msra.mxu0 %v560_v13  ;;  %1047 = vmatmul.f32.vlgmr.msrb.gmra.mxu2 %v3169_v23  ;;  %v404_v24 = vld [vmem:[#allocation5 + $0x638] sm:$0xff]  ;;  %v1195_v13 = vld [vmem:[#allocation8 + $0xa0] sm:$0xff]  ;;  %v1208_v2 = vld [vmem:[#allocation8 + $0x108] sm:$0xff] }
 0x118   :  { %1085 = vmatpush.msrb.mxu1 %v340_v14  ;;  %v472_v25 = vld [vmem:[#allocation5 + $0x858] sm:$0xff]  ;;  %1104 = vmatpush.msra.mxu3 %v408_v15  ;;  %v1259_v15 = vld [vmem:[#allocation8 + $0x2a0] sm:$0xff] }
 0x119   :  { %1123 = vmatpush.msra.mxu2 %v476_v18  ;;  %v552_v26 = vld [vmem:[#allocation5 + $0xad8] sm:$0xff]  ;;  %1139 = vmatpush.msra.mxu0 %v556_v19  ;;  %v1363_v18 = vld [vmem:[#allocation8 + $0x5e0] sm:$0xff] }
 0x11a   :  { %v596_v27 = vld [vmem:[#allocation5 + $0xc38] sm:$0xff]  ;;  %1086 = vmatpush.msrb.mxu1 %v336_v20  ;;  %1105 = vmatpush.msra.mxu3 %v404_v24  ;;  %v1191_v19 = vld [vmem:[#allocation8 + $0x80] sm:$0xff]  ;;  %v749_v20 = vadd.f32 %v748_v0, %v729_v10  ;;  %v1200_v10 = vld [vmem:[#allocation8 + $0xc8] sm:$0xff] }
 0x11b   :  { %v400_v28 = vld [vmem:[#allocation5 + $0x618] sm:$0xff]  ;;  %1124 = vmatpush.msra.mxu2 %v472_v25  ;;  %1140 = vmatpush.msra.mxu0 %v552_v26  ;;  %v1255_v23 = vld [vmem:[#allocation8 + $0x280] sm:$0xff] }
 0x11c   :  { %v468_v29 = vld [vmem:[#allocation5 + $0x838] sm:$0xff]  ;;  %1165 = vmatpush.msra.mxu1 %v596_v27  ;;  %1106 = vmatpush.msra.mxu3 %v400_v28  ;;  %v1359_v25 = vld [vmem:[#allocation8 + $0x5c0] sm:$0xff]  ;;  %3137 = vtanh.f32 %v749_v20  ;;  %v1256_v20 = vld [vmem:[#allocation8 + $0x288] sm:$0xff] }
 0x11d   :  { %v548_v31 = vld [vmem:[#allocation5 + $0xab8] sm:$0xff]  ;;  %1125 = vmatpush.msra.mxu2 %v468_v29  ;;  %1107 = vmatmul.f32.vlgmr.msra.gmra.mxu3 %v3171_v39  ;;  %v1187_v26 = vld [vmem:[#allocation8 + $0x60] sm:$0xff] }
 0x11e   :  { %v592_v32 = vld [vmem:[#allocation5 + $0xc18] sm:$0xff]  ;;  %1141 = vmatpush.msra.mxu0 %v548_v31  ;;  %1441 = vmatpush.msrb.mxu3 %v1235_v34  ;;  %v1251_v28 = vld [vmem:[#allocation8 + $0x260] sm:$0xff] }
 0x11f   :  { %1166 = vmatpush.msra.mxu1 %v592_v32  ;;  %v464_v4 = vld [vmem:[#allocation5 + $0x818] sm:$0xff]  ;;  %1067 = vmatmul.f32.vlgmr.msrb.gmra.mxu0 %v3172_v42  ;;  %v1355_v29 = vld [vmem:[#allocation8 + $0x5a0] sm:$0xff]  ;;  %v1300_v42 = vld [vmem:[#allocation8 + $0x3e8] sm:$0xff] }
 0x120   :  { %v544_v36 = vld [vmem:[#allocation5 + $0xa98] sm:$0xff]  ;;  %1126 = vmatpush.msra.mxu2 %v464_v4  ;;  %1442 = vmatpush.msrb.mxu3 %v1231_v41  ;;  %v1247_v31 = vld [vmem:[#allocation8 + $0x240] sm:$0xff] }
 0x121   :  { %v3170_v38 = vld [vmem:[#allocation2 + $0x10] sm:$0xff]  ;;  %1142 = vmatpush.msra.mxu0 %v544_v36  ;;  %1127 = vmatmul.f32.vlgmr.msra.gmra.mxu2 %v3173_v43  ;;  %v1351_v34 = vld [vmem:[#allocation8 + $0x580] sm:$0xff] }
 0x122   :  { %1087 = vmatmul.f32.vlgmr.msrb.gmra.mxu1 %v3170_v38  ;;  %v540_v8 = vld [vmem:[#allocation5 + $0xa78] sm:$0xff]  ;;  %1443 = vmatpush.msrb.mxu3 %v1227_v44  ;;  %v1243_v36 = vld [vmem:[#allocation8 + $0x220] sm:$0xff]  ;;  %v3630_v43 = vpop.eup %3137 }
 0x123   :  { %1461 = vmatpush.msrb.mxu1 %v1299_v35  ;;  %v536_v47 = vld [vmem:[#allocation5 + $0xa58] sm:$0xff]  ;;  %1143 = vmatpush.msra.mxu0 %v540_v8  ;;  %v1179_v35 = vld [vmem:[#allocation8 + $0x20] sm:$0xff]  ;;  %v1236_v8 = vld [vmem:[#allocation8 + $0x1e8] sm:$0xff] }
 0x124   :  { %v532_v50 = vld [vmem:[#allocation5 + $0xa38] sm:$0xff]  ;;  %1444 = vmatpush.msrb.mxu3 %v1223_v49  ;;  %1481 = vmatpush.msrb.mxu2 %v1363_v18  ;;  %v1347_v37 = vld [vmem:[#allocation8 + $0x560] sm:$0xff]  ;;  %v1364_v18 = vld [vmem:[#allocation8 + $0x5e8] sm:$0xff] }
 0x125   :  { %1462 = vmatpush.msrb.mxu1 %v1295_v22  ;;  %1144 = vmatpush.msra.mxu0 %v536_v47  ;;  %v528_v54 = vld [vmem:[#allocation5 + $0xa18] sm:$0xff]  ;;  %v1175_v38 = vld [vmem:[#allocation8] sm:$0xff]  ;;  %v1232_v47 = vld [vmem:[#allocation8 + $0x1c8] sm:$0xff] }
 0x126   :  { %v3174_v63 = vld [vmem:[#allocation2 + $0x30] sm:$0xff]  ;;  %1445 = vmatpush.msrb.mxu3 %v1219_v17  ;;  %1482 = vmatpush.msrb.mxu2 %v1359_v25  ;;  %v1239_v40 = vld [vmem:[#allocation8 + $0x200] sm:$0xff]  ;;  %v1228_v17 = vld [vmem:[#allocation8 + $0x1a8] sm:$0xff] }
 0x127   :  { %1463 = vmatpush.msrb.mxu1 %v1291_v45  ;;  %1145 = vmatpush.msra.mxu0 %v532_v50  ;;  %v1343_v22 = vld [vmem:[#allocation8 + $0x540] sm:$0xff]  ;;  %v1252_v25 = vld [vmem:[#allocation8 + $0x268] sm:$0xff] }
 0x128   :  { %1446 = vmatpush.msrb.mxu3 %v1215_v55  ;;  %1483 = vmatpush.msrb.mxu2 %v1355_v29  ;;  %v1339_v46 = vld [vmem:[#allocation8 + $0x520] sm:$0xff]  ;;  %v1288_v55 = vld [vmem:[#allocation8 + $0x388] sm:$0xff] }
 0x129   :  { %1464 = vmatpush.msrb.mxu1 %v1287_v16  ;;  %1146 = vmatpush.msra.mxu0 %v528_v54  ;;  %v1335_v50 = vld [vmem:[#allocation8 + $0x500] sm:$0xff]  ;;  %v1224_v54 = vld [vmem:[#allocation8 + $0x188] sm:$0xff] }
 0x12a   :  { %3119 = vmatmul.msk.f32.vlgmr.msra.gmra.mxu1 %vm607_vm0, %v3174_v63  ;;  %1147 = vmatmul.f32.vlgmr.msra.gmra.mxu0 %v3175_v11  ;;  %v1331_v53 = vld [vmem:[#allocation8 + $0x4e0] sm:$0xff]  ;;  %v1280_v11 = vld [vmem:[#allocation8 + $0x348] sm:$0xff] }
 0x12b   :  { %1465 = vmatpush.msrb.mxu1 %v1283_v51  ;;  %1447 = vmatpush.msrb.mxu3 %v1211_v58  ;;  %v1292_v51 = vld [vmem:[#allocation8 + $0x3a8] sm:$0xff]  ;;  %v1327_v63 = vld [vmem:[#allocation8 + $0x4c0] sm:$0xff] }
 0x12c   :  { %v768_v7 = vpop.f32.mrf.mxu3  ;;  %1484 = vmatpush.msrb.mxu2 %v1351_v34  ;;  %v1323_v58 = vld [vmem:[#allocation8 + $0x4a0] sm:$0xff]  ;;  %v1248_v29 = vld [vmem:[#allocation8 + $0x248] sm:$0xff] }
 0x12d   :  { %1466 = vmatpush.msrb.mxu1 %v1279_v56  ;;  %1448 = vmatpush.msrb.mxu3 %v1207_v61  ;;  %v769_v14 = vadd.f32 %v768_v7, %v600_v5  ;;  %v1220_v56 = vld [vmem:[#allocation8 + $0x168] sm:$0xff]  ;;  %v1311_v5 = vld [vmem:[#allocation8 + $0x440] sm:$0xff] }
 0x12e   :  { %1485 = vmatpush.msrb.mxu2 %v1347_v37  ;;  %v1212_v61 = vld [vmem:[#allocation8 + $0x128] sm:$0xff]  ;;  %v1419_v34 = vld [vmem:[#allocation8 + $0x7a0] sm:$0xff] }
 0x12f   :  { %1467 = vmatpush.msrb.mxu1 %v1275_v60  ;;  %1449 = vmatpush.msrb.mxu3 %v1203_v3  ;;  %v1319_v60 = vld [vmem:[#allocation8 + $0x480] sm:$0xff]  ;;  %v1272_v3 = vld [vmem:[#allocation8 + $0x308] sm:$0xff] }
 0x130   :  { %1486 = vmatpush.msrb.mxu2 %v1343_v22  ;;  %v1268_v7 = vld [vmem:[#allocation8 + $0x2e8] sm:$0xff]  ;;  %v1415_v37 = vld [vmem:[#allocation8 + $0x780] sm:$0xff]  ;;  %v1233_v22 = vld [vmem:[#allocation8 + $0x1d0] sm:$0xff] }
 0x131   :  { %1468 = vmatpush.msrb.mxu1 %v1271_v1  ;;  %1450 = vmatpush.msrb.mxu3 %v1199_v9  ;;  %v1315_v1 = vld [vmem:[#allocation8 + $0x460] sm:$0xff] }
 0x132   :  { %1487 = vmatpush.msrb.mxu2 %v1339_v46  ;;  %v1307_v9 = vld [vmem:[#allocation8 + $0x420] sm:$0xff]  ;;  %v1293_v46 = vld [vmem:[#allocation8 + $0x3b0] sm:$0xff] }
 0x133   :  { %1469 = vmatpush.msrb.mxu1 %v1267_v6  ;;  %1451 = vmatpush.msrb.mxu3 %v1195_v13  ;;  %v788_v24 = vpop.f32.mrf.mxu2  ;;  %v1204_v6 = vld [vmem:[#allocation8 + $0xe8] sm:$0xff]  ;;  %v1303_v13 = vld [vmem:[#allocation8 + $0x400] sm:$0xff] }
 0x134   :  { %v789_v27 = vadd.f32 %v788_v24, %v769_v14  ;;  %1488 = vmatpush.msrb.mxu2 %v1335_v50  ;;  %v1196_v14 = vld [vmem:[#allocation8 + $0xa8] sm:$0xff] }
 0x135   :  { %1470 = vmatpush.msrb.mxu1 %v1263_v12  ;;  %1452 = vmatpush.msrb.mxu3 %v1191_v19  ;;  %v828_v39 = vpop.f32.mrf.mxu1  ;;  %v1264_v12 = vld [vmem:[#allocation8 + $0x2c8] sm:$0xff] }
 0x136   :  { %1489 = vmatpush.msrb.mxu2 %v1331_v53  ;;  %v1192_v19 = vld [vmem:[#allocation8 + $0x88] sm:$0xff] }
 0x137   :  { %1471 = vmatpush.msrb.mxu1 %v1259_v15  ;;  %1453 = vmatpush.msrb.mxu3 %v1187_v26  ;;  %v808_v32 = vpop.f32.mrf.mxu0  ;;  %v848_v33 = vpop.f32.mrf.mxu3  ;;  %v1260_v15 = vld [vmem:[#allocation8 + $0x2a8] sm:$0xff]  ;;  %v1427_v26 = vld [vmem:[#allocation8 + $0x7e0] sm:$0xff] }
 0x138   :  { %v809_v4 = vadd.f32 %v808_v32, %v789_v27  ;;  %1490 = vmatpush.msrb.mxu2 %v1327_v63  ;;  %v1188_v24 = vld [vmem:[#allocation8 + $0x68] sm:$0xff]  ;;  %1501 = vmatpush.msrb.mxu0 %v1427_v26  ;;  %v1281_v63 = vld [vmem:[#allocation8 + $0x350] sm:$0xff] }
 0x139   :  { %1472 = vmatpush.msrb.mxu1 %v1255_v23  ;;  %1454 = vmatpush.msrb.mxu3 %v1183_v30  ;;  %v1360_v23 = vld [vmem:[#allocation8 + $0x5c8] sm:$0xff]  ;;  %v1423_v30 = vld [vmem:[#allocation8 + $0x7c0] sm:$0xff]  ;;  %v1193_v26 = vld [vmem:[#allocation8 + $0x90] sm:$0xff] }
 0x13a   :  { %v829_v41 = vadd.f32 %v828_v39, %v809_v4  ;;  %1491 = vmatpush.msrb.mxu2 %v1323_v58  ;;  %v1356_v27 = vld [vmem:[#allocation8 + $0x5a8] sm:$0xff]  ;;  %1502 = vmatpush.msrb.mxu0 %v1423_v30  ;;  %v1301_v39 = vld [vmem:[#allocation8 + $0x3f0] sm:$0xff] }
 0x13b   :  { %1473 = vmatpush.msrb.mxu1 %v1251_v28  ;;  %1455 = vmatpush.msrb.mxu3 %v1179_v35  ;;  %v1184_v28 = vld [vmem:[#allocation8 + $0x48] sm:$0xff]  ;;  %v1213_v58 = vld [vmem:[#allocation8 + $0x130] sm:$0xff] }
 0x13c   :  { %v849_v44 = vadd.f32 %v848_v33, %v829_v41  ;;  %1492 = vmatpush.msrb.mxu2 %v1319_v60  ;;  %v1180_v32 = vld [vmem:[#allocation8 + $0x28] sm:$0xff]  ;;  %1503 = vmatpush.msrb.mxu0 %v1419_v34  ;;  %v1411_v41 = vld [vmem:[#allocation8 + $0x760] sm:$0xff]  ;;  %v1185_v34 = vld [vmem:[#allocation8 + $0x50] sm:$0xff] }
 0x13d   :  { %1474 = vmatpush.msrb.mxu1 %v1247_v31  ;;  %1456 = vmatpush.msrb.mxu3 %v1175_v38  ;;  %v1352_v31 = vld [vmem:[#allocation8 + $0x588] sm:$0xff]  ;;  %v1237_v38 = vld [vmem:[#allocation8 + $0x1f0] sm:$0xff]  ;;  %v1387_v60 = vld [vmem:[#allocation8 + $0x6a0] sm:$0xff] }
 0x13e   :  { %v868_v45 = vpop.f32.mrf.mxu2  ;;  %1457 = vmatmul.f32.vlgmr.msrb.gmra.mxu3 %v3630_v43  ;;  %1493 = vmatpush.msrb.mxu2 %v1315_v1  ;;  %v1244_v33 = vld [vmem:[#allocation8 + $0x228] sm:$0xff]  ;;  %v601_v1 = vperm.slane %v3625_v21, 2 }
 0x13f   :  { %1475 = vmatpush.msrb.mxu1 %v1243_v36  ;;  %1521 = vmatpush.msra.mxu3 %v1236_v8  ;;  %v869_v49 = vadd.f32 %v868_v45, %v849_v44  ;;  %v1348_v35 = vld [vmem:[#allocation8 + $0x568] sm:$0xff]  ;;  %v1297_v8 = vld [vmem:[#allocation8 + $0x3d0] sm:$0xff]  ;;  %v1407_v44 = vld [vmem:[#allocation8 + $0x740] sm:$0xff] }
 0x140   :  { %v888_v16 = vpop.f32.mrf.mxu3  ;;  %1494 = vmatpush.msrb.mxu2 %v1311_v5  ;;  %v1176_v4 = vld [vmem:[#allocation8 + $0x8] sm:$0xff]  ;;  %1504 = vmatpush.msrb.mxu0 %v1415_v37  ;;  %v1229_v45 = vld [vmem:[#allocation8 + $0x1b0] sm:$0xff] }
 0x141   :  { %1476 = vmatpush.msrb.mxu1 %v1239_v40  ;;  %1522 = vmatpush.msra.mxu3 %v1232_v47  ;;  %v889_v52 = vadd.f32 %v888_v16, %v869_v49  ;;  %v1240_v36 = vld [vmem:[#allocation8 + $0x208] sm:$0xff]  ;;  %v1225_v49 = vld [vmem:[#allocation8 + $0x190] sm:$0xff] }
 0x142   :  { %1495 = vmatpush.msrb.mxu2 %v1307_v9  ;;  %v1344_v40 = vld [vmem:[#allocation8 + $0x548] sm:$0xff]  ;;  %1505 = vmatpush.msrb.mxu0 %v1411_v41  ;;  %v1289_v16 = vld [vmem:[#allocation8 + $0x390] sm:$0xff] }
 0x143   :  { %1541 = vmatpush.msra.mxu1 %v1300_v42  ;;  %1523 = vmatpush.msra.mxu3 %v1228_v17  ;;  %3139 = vtanh.f32 %v889_v52  ;;  %v1340_v42 = vld [vmem:[#allocation8 + $0x528] sm:$0xff]  ;;  %v1399_v17 = vld [vmem:[#allocation8 + $0x700] sm:$0xff]  ;;  %v1285_v52 = vld [vmem:[#allocation8 + $0x370] sm:$0xff] }
 0x144   :  { %1496 = vmatpush.msrb.mxu2 %v1303_v13  ;;  %v1336_v47 = vld [vmem:[#allocation8 + $0x508] sm:$0xff]  ;;  %1506 = vmatpush.msrb.mxu0 %v1407_v44  ;;  %v1265_v13 = vld [vmem:[#allocation8 + $0x2d0] sm:$0xff]  ;;  %v1238_v44 = vld [vmem:[#allocation8 + $0x1f8] sm:$0xff] }
 0x145   :  { %1542 = vmatpush.msra.mxu1 %v1296_v48  ;;  %1524 = vmatpush.msra.mxu3 %v1224_v54  ;;  %v1403_v48 = vld [vmem:[#allocation8 + $0x720] sm:$0xff]  ;;  %v1332_v50 = vld [vmem:[#allocation8 + $0x4e8] sm:$0xff] }
 0x146   :  { %1561 = vmatpush.msra.mxu2 %v1364_v18  ;;  %1507 = vmatpush.msrb.mxu0 %v1403_v48  ;;  %v1328_v53 = vld [vmem:[#allocation8 + $0x4c8] sm:$0xff]  ;;  %v1395_v54 = vld [vmem:[#allocation8 + $0x6e0] sm:$0xff]  ;;  %v1234_v48 = vld [vmem:[#allocation8 + $0x1d8] sm:$0xff] }
 0x147   :  { %1543 = vmatpush.msra.mxu1 %v1292_v51  ;;  %1525 = vmatpush.msra.mxu3 %v1220_v56  ;;  %v1221_v51 = vld [vmem:[#allocation8 + $0x170] sm:$0xff]  ;;  %v1324_v56 = vld [vmem:[#allocation8 + $0x4a8] sm:$0xff]  ;;  %v1375_v18 = vld [vmem:[#allocation8 + $0x640] sm:$0xff] }
 0x148   :  { %1562 = vmatpush.msra.mxu2 %v1360_v23  ;;  %1508 = vmatpush.msrb.mxu0 %v1399_v17  ;;  %v1312_v9 = vld [vmem:[#allocation8 + $0x448] sm:$0xff]  ;;  %v1261_v23 = vld [vmem:[#allocation8 + $0x2b0] sm:$0xff] }
 0x149   :  { %1544 = vmatpush.msra.mxu1 %v1288_v55  ;;  %v3633_v0 = vpop.eup %3139  ;;  %1526 = vmatpush.msra.mxu3 %v1216_v59  ;;  %v1217_v55 = vld [vmem:[#allocation8 + $0x150] sm:$0xff]  ;;  %v1412_v17 = vld [vmem:[#allocation8 + $0x768] sm:$0xff] }
 0x14a   :  { %1477 = vmatmul.f32.vlgmr.msrb.gmra.mxu1 %v3633_v0  ;;  %1563 = vmatpush.msra.mxu2 %v1356_v27  ;;  %v1277_v59 = vld [vmem:[#allocation8 + $0x330] sm:$0xff] }
 0x14b   :  { %1545 = vmatpush.msra.mxu1 %v1284_v57  ;;  %1527 = vmatpush.msra.mxu3 %v1212_v61  ;;  %v1391_v57 = vld [vmem:[#allocation8 + $0x6c0] sm:$0xff]  ;;  %v1209_v61 = vld [vmem:[#allocation8 + $0x110] sm:$0xff] }
 0x14c   :  { %1564 = vmatpush.msra.mxu2 %v1352_v31  ;;  %1509 = vmatpush.msrb.mxu0 %v1395_v54  ;;  %v1257_v27 = vld [vmem:[#allocation8 + $0x290] sm:$0xff]  ;;  %v1408_v54 = vld [vmem:[#allocation8 + $0x748] sm:$0xff] }
 0x14d   :  { %1546 = vmatpush.msra.mxu1 %v1280_v11  ;;  %1528 = vmatpush.msra.mxu3 %v1208_v2  ;;  %v1320_v11 = vld [vmem:[#allocation8 + $0x488] sm:$0xff]  ;;  %v1189_v31 = vld [vmem:[#allocation8 + $0x70] sm:$0xff] }
 0x14e   :  { %1565 = vmatpush.msra.mxu2 %v1348_v35  ;;  %1510 = vmatpush.msrb.mxu0 %v1391_v57  ;;  %v1316_v2 = vld [vmem:[#allocation8 + $0x468] sm:$0xff]  ;;  %v1249_v35 = vld [vmem:[#allocation8 + $0x250] sm:$0xff] }
 0x14f   :  { %1547 = vmatpush.msra.mxu1 %v1276_v62  ;;  %1529 = vmatpush.msra.mxu3 %v1204_v6  ;;  %v1273_v62 = vld [vmem:[#allocation8 + $0x310] sm:$0xff]  ;;  %v1404_v57 = vld [vmem:[#allocation8 + $0x728] sm:$0xff] }
 0x150   :  { %1566 = vmatpush.msra.mxu2 %v1344_v40  ;;  %v1205_v6 = vld [vmem:[#allocation8 + $0xf0] sm:$0xff]  ;;  %1511 = vmatpush.msrb.mxu0 %v1387_v60  ;;  %v1420_v40 = vld [vmem:[#allocation8 + $0x7a8] sm:$0xff]  ;;  %v1218_v60 = vld [vmem:[#allocation8 + $0x158] sm:$0xff] }
 0x151   :  { %1548 = vmatpush.msra.mxu1 %v1272_v3  ;;  %1530 = vmatpush.msra.mxu3 %v1200_v10  ;;  %v1383_v3 = vld [vmem:[#allocation8 + $0x680] sm:$0xff] }
 0x152   :  { %1567 = vmatpush.msra.mxu2 %v1340_v42  ;;  %v1379_v10 = vld [vmem:[#allocation8 + $0x660] sm:$0xff]  ;;  %1512 = vmatpush.msrb.mxu0 %v1383_v3  ;;  %v1392_v3 = vld [vmem:[#allocation8 + $0x6c8] sm:$0xff] }
 0x153   :  { %1549 = vmatpush.msra.mxu1 %v1268_v7  ;;  %1531 = vmatpush.msra.mxu3 %v1196_v14  ;;  %v1269_v7 = vld [vmem:[#allocation8 + $0x2f0] sm:$0xff] }
 0x154   :  { %1568 = vmatpush.msra.mxu2 %v1336_v47  ;;  %1513 = vmatpush.msrb.mxu0 %v1379_v10  ;;  %v1416_v47 = vld [vmem:[#allocation8 + $0x788] sm:$0xff] }
 0x155   :  { %1550 = vmatpush.msra.mxu1 %v1264_v12  ;;  %1532 = vmatpush.msra.mxu3 %v1192_v19  ;;  %v1201_v12 = vld [vmem:[#allocation8 + $0xd0] sm:$0xff]  ;;  %v1388_v10 = vld [vmem:[#allocation8 + $0x6a8] sm:$0xff] }
 0x156   :  { %1569 = vmatpush.msra.mxu2 %v1332_v50  ;;  %1514 = vmatpush.msrb.mxu0 %v1375_v18  ;;  %v1202_v18 = vld [vmem:[#allocation8 + $0xd8] sm:$0xff] }
 0x157   :  { %1551 = vmatpush.msra.mxu1 %v1260_v15  ;;  %1533 = vmatpush.msra.mxu3 %v1188_v24  ;;  %v1308_v15 = vld [vmem:[#allocation8 + $0x428] sm:$0xff] }
 0x158   :  { %1570 = vmatpush.msra.mxu2 %v1328_v53  ;;  %v1304_v24 = vld [vmem:[#allocation8 + $0x408] sm:$0xff] }
 0x159   :  { %1552 = vmatpush.msra.mxu1 %v1256_v20  ;;  %1534 = vmatpush.msra.mxu3 %v1184_v28  ;;  %v1197_v20 = vld [vmem:[#allocation8 + $0xb0] sm:$0xff] }
 0x15a   :  { %1571 = vmatpush.msra.mxu2 %v1324_v56 }
 0x15b   :  { %1553 = vmatpush.msra.mxu1 %v1252_v25  ;;  %1535 = vmatpush.msra.mxu3 %v1180_v32  ;;  %v1371_v25 = vld [vmem:[#allocation8 + $0x620] sm:$0xff]  ;;  %v1253_v32 = vld [vmem:[#allocation8 + $0x270] sm:$0xff] }
 0x15c   :  { %1572 = vmatpush.msra.mxu2 %v1320_v11  ;;  %v928_v19 = vpop.f32.mrf.mxu3  ;;  %1515 = vmatpush.msrb.mxu0 %v1371_v25  ;;  %v1400_v11 = vld [vmem:[#allocation8 + $0x708] sm:$0xff]  ;;  %v1262_v25 = vld [vmem:[#allocation8 + $0x2b8] sm:$0xff] }
 0x15d   :  { %1554 = vmatpush.msra.mxu1 %v1248_v29  ;;  %1536 = vmatpush.msra.mxu3 %v1176_v4  ;;  %v908_v5 = vpop.f32.mrf.mxu1  ;;  %v1367_v29 = vld [vmem:[#allocation8 + $0x600] sm:$0xff] }
 0x15e   :  { %1537 = vmatmul.f32.vlgmr.msra.gmra.mxu3 %v3630_v43  ;;  %1573 = vmatpush.msra.mxu2 %v1316_v2  ;;  %v909_v14 = vadd.f32 %v908_v5, %v601_v1  ;;  %v1214_v1 = vld [vmem:[#allocation8 + $0x138] sm:$0xff] }
 0x15f   :  { %1555 = vmatpush.msra.mxu1 %v1244_v33  ;;  %1601 = vmatpush.msrb.mxu3 %v1237_v38  ;;  %v948_v30 = vpop.f32.mrf.mxu0  ;;  %v1428_v33 = vld [vmem:[#allocation8 + $0x7e8] sm:$0xff]  ;;  %v1181_v38 = vld [vmem:[#allocation8 + $0x30] sm:$0xff]  ;;  %v1278_v2 = vld [vmem:[#allocation8 + $0x338] sm:$0xff] }
 0x160   :  { %1574 = vmatpush.msra.mxu2 %v1312_v9  ;;  %v929_v28 = vadd.f32 %v928_v19, %v909_v14  ;;  %1516 = vmatpush.msrb.mxu0 %v1367_v29  ;;  %v1365_v9 = vld [vmem:[#allocation8 + $0x5f0] sm:$0xff]  ;;  %v1266_v19 = vld [vmem:[#allocation8 + $0x2d8] sm:$0xff] }
 0x161   :  { %1556 = vmatpush.msra.mxu1 %v1240_v36  ;;  %1602 = vmatpush.msrb.mxu3 %v1233_v22  ;;  %v1424_v36 = vld [vmem:[#allocation8 + $0x7c8] sm:$0xff]  ;;  %v1177_v22 = vld [vmem:[#allocation8 + $0x10] sm:$0xff]  ;;  %v1258_v29 = vld [vmem:[#allocation8 + $0x298] sm:$0xff] }
 0x162   :  { %1557 = vmatmul.f32.vlgmr.msra.gmra.mxu1 %v3633_v0  ;;  %1575 = vmatpush.msra.mxu2 %v1308_v15  ;;  %v949_v4 = vadd.f32 %v948_v30, %v929_v28  ;;  %v968_v37 = vpop.f32.mrf.mxu2  ;;  %v1361_v14 = vld [vmem:[#allocation8 + $0x5d0] sm:$0xff]  ;;  %v1384_v15 = vld [vmem:[#allocation8 + $0x688] sm:$0xff]  ;;  %v1194_v28 = vld [vmem:[#allocation8 + $0x98] sm:$0xff] }
 0x163   :  { %1621 = vmatpush.msrb.mxu1 %v1301_v39  ;;  %1603 = vmatpush.msrb.mxu3 %v1229_v45  ;;  %v1245_v39 = vld [vmem:[#allocation8 + $0x230] sm:$0xff]  ;;  %v1302_v45 = vld [vmem:[#allocation8 + $0x3f8] sm:$0xff]  ;;  %v1372_v30 = vld [vmem:[#allocation8 + $0x628] sm:$0xff] }
 0x164   :  { %1576 = vmatpush.msra.mxu2 %v1304_v24  ;;  %1581 = vmatpush.msra.mxu0 %v1428_v33  ;;  %v969_v42 = vadd.f32 %v968_v37, %v949_v4  ;;  %v1198_v24 = vld [vmem:[#allocation8 + $0xb8] sm:$0xff]  ;;  %v1349_v33 = vld [vmem:[#allocation8 + $0x570] sm:$0xff] }
 0x165   :  { %1622 = vmatpush.msrb.mxu1 %v1297_v8  ;;  %1604 = vmatpush.msrb.mxu3 %v1225_v49  ;;  %v1241_v8 = vld [vmem:[#allocation8 + $0x210] sm:$0xff]  ;;  %v1298_v49 = vld [vmem:[#allocation8 + $0x3d8] sm:$0xff] }
 0x166   :  { %1582 = vmatpush.msra.mxu0 %v1424_v36  ;;  %v1250_v4 = vld [vmem:[#allocation8 + $0x258] sm:$0xff]  ;;  %v602_v36 = vperm.slane %v3625_v21, 3  ;;  %v1345_v37 = vld [vmem:[#allocation8 + $0x550] sm:$0xff] }
 0x167   :  { %1623 = vmatpush.msrb.mxu1 %v1293_v46  ;;  %1605 = vmatpush.msrb.mxu3 %v1221_v51  ;;  %v1230_v51 = vld [vmem:[#allocation8 + $0x1b8] sm:$0xff]  ;;  %v1337_v21 = vld [vmem:[#allocation8 + $0x510] sm:$0xff] }
 0x168   :  { %1583 = vmatpush.msra.mxu0 %v1420_v40  ;;  %v1341_v40 = vld [vmem:[#allocation8 + $0x530] sm:$0xff] }
 0x169   :  { %1624 = vmatpush.msrb.mxu1 %v1289_v16  ;;  %1606 = vmatpush.msrb.mxu3 %v1217_v55  ;;  %v1226_v55 = vld [vmem:[#allocation8 + $0x198] sm:$0xff] }
 0x16a   :  { %1584 = vmatpush.msra.mxu0 %v1416_v47  ;;  %v1333_v47 = vld [vmem:[#allocation8 + $0x4f0] sm:$0xff] }
 0x16b   :  { %1625 = vmatpush.msrb.mxu1 %v1285_v52  ;;  %1607 = vmatpush.msrb.mxu3 %v1213_v58  ;;  %v1294_v52 = vld [vmem:[#allocation8 + $0x3b8] sm:$0xff] }
 0x16c   :  { %1585 = vmatpush.msra.mxu0 %v1412_v17  ;;  %v1222_v58 = vld [vmem:[#allocation8 + $0x178] sm:$0xff]  ;;  %v1325_v17 = vld [vmem:[#allocation8 + $0x4b0] sm:$0xff] }
 0x16d   :  { %1626 = vmatpush.msrb.mxu1 %v1281_v63  ;;  %1608 = vmatpush.msrb.mxu3 %v1209_v61  ;;  %v1290_v63 = vld [vmem:[#allocation8 + $0x398] sm:$0xff] }
 0x16e   :  { %1586 = vmatpush.msra.mxu0 %v1408_v54  ;;  %v1282_v61 = vld [vmem:[#allocation8 + $0x358] sm:$0xff] }
 0x16f   :  { %1627 = vmatpush.msrb.mxu1 %v1277_v59  ;;  %1609 = vmatpush.msrb.mxu3 %v1205_v6  ;;  %v1286_v59 = vld [vmem:[#allocation8 + $0x378] sm:$0xff] }
 0x170   :  { %1587 = vmatpush.msra.mxu0 %v1404_v57  ;;  %v1210_v6 = vld [vmem:[#allocation8 + $0x118] sm:$0xff]  ;;  %v1309_v57 = vld [vmem:[#allocation8 + $0x430] sm:$0xff] }
 0x171   :  { %1628 = vmatpush.msrb.mxu1 %v1273_v62  ;;  %1610 = vmatpush.msrb.mxu3 %v1201_v12  ;;  %v1396_v62 = vld [vmem:[#allocation8 + $0x6e8] sm:$0xff]  ;;  %v1206_v12 = vld [vmem:[#allocation8 + $0xf8] sm:$0xff] }
 0x172   :  { %1588 = vmatpush.msra.mxu0 %v1400_v11  ;;  %v1362_v11 = vld [vmem:[#allocation8 + $0x5d8] sm:$0xff] }
 0x173   :  { %1629 = vmatpush.msrb.mxu1 %v1269_v7  ;;  %1611 = vmatpush.msrb.mxu3 %v1197_v20  ;;  %v1274_v7 = vld [vmem:[#allocation8 + $0x318] sm:$0xff]  ;;  %v1357_v20 = vld [vmem:[#allocation8 + $0x5b0] sm:$0xff] }
 0x174   :  { %1589 = vmatpush.msra.mxu0 %v1396_v62  ;;  %v1358_v62 = vld [vmem:[#allocation8 + $0x5b8] sm:$0xff] }
 0x175   :  { %1630 = vmatpush.msrb.mxu1 %v1265_v13  ;;  %1612 = vmatpush.msrb.mxu3 %v1193_v26  ;;  %v1270_v13 = vld [vmem:[#allocation8 + $0x2f8] sm:$0xff]  ;;  %v1353_v26 = vld [vmem:[#allocation8 + $0x590] sm:$0xff] }
 0x176   :  { %v988_v41 = vpop.f32.mrf.mxu1  ;;  %1590 = vmatpush.msra.mxu0 %v1392_v3  ;;  %v1421_v3 = vld [vmem:[#allocation8 + $0x7b0] sm:$0xff] }
 0x177   :  { %1631 = vmatpush.msrb.mxu1 %v1261_v23  ;;  %1613 = vmatpush.msrb.mxu3 %v1189_v31  ;;  %v989_v46 = vadd.f32 %v988_v41, %v969_v42  ;;  %v1380_v23 = vld [vmem:[#allocation8 + $0x668] sm:$0xff]  ;;  %v1190_v31 = vld [vmem:[#allocation8 + $0x78] sm:$0xff] }
 0x178   :  { %1591 = vmatpush.msra.mxu0 %v1388_v10  ;;  %v1413_v10 = vld [vmem:[#allocation8 + $0x770] sm:$0xff] }
 0x179   :  { %1632 = vmatpush.msrb.mxu1 %v1257_v27  ;;  %1614 = vmatpush.msrb.mxu3 %v1185_v34  ;;  %v1376_v27 = vld [vmem:[#allocation8 + $0x648] sm:$0xff] }
 0x17a   :  { %1592 = vmatpush.msra.mxu0 %v1384_v15  ;;  %v1368_v34 = vld [vmem:[#allocation8 + $0x608] sm:$0xff]  ;;  %v1405_v15 = vld [vmem:[#allocation8 + $0x730] sm:$0xff] }
 0x17b   :  { %1633 = vmatpush.msrb.mxu1 %v1253_v32  ;;  %1615 = vmatpush.msrb.mxu3 %v1181_v38  ;;  %v1254_v32 = vld [vmem:[#allocation8 + $0x278] sm:$0xff] }
 0x17c   :  { %1593 = vmatpush.msra.mxu0 %v1380_v23  ;;  %v1182_v38 = vld [vmem:[#allocation8 + $0x38] sm:$0xff]  ;;  %v1397_v23 = vld [vmem:[#allocation8 + $0x6f0] sm:$0xff] }
 0x17d   :  { %1634 = vmatpush.msrb.mxu1 %v1249_v35  ;;  %1616 = vmatpush.msrb.mxu3 %v1177_v22  ;;  %v1186_v35 = vld [vmem:[#allocation8 + $0x58] sm:$0xff] }
 0x17e   :  { %1617 = vmatmul.f32.vlgmr.msrb.gmra.mxu3 %v3630_v43  ;;  %1594 = vmatpush.msra.mxu0 %v1376_v27  ;;  %v1178_v22 = vld [vmem:[#allocation8 + $0x18] sm:$0xff]  ;;  %v1389_v27 = vld [vmem:[#allocation8 + $0x6b0] sm:$0xff] }
 0x17f   :  { %1635 = vmatpush.msrb.mxu1 %v1245_v39  ;;  %1681 = vmatpush.msra.mxu3 %v1238_v44  ;;  %v1246_v39 = vld [vmem:[#allocation8 + $0x238] sm:$0xff] }
 0x180   :  { %v1008_v16 = vpop.f32.mrf.mxu3  ;;  %1595 = vmatpush.msra.mxu0 %v1372_v30  ;;  %v1314_v30 = vld [vmem:[#allocation8 + $0x458] sm:$0xff] }
 0x181   :  { %1636 = vmatpush.msrb.mxu1 %v1241_v8  ;;  %v1009_v50 = vadd.f32 %v1008_v16, %v989_v46  ;;  %1682 = vmatpush.msra.mxu3 %v1234_v48  ;;  %v1242_v8 = vld [vmem:[#allocation8 + $0x218] sm:$0xff] }
 0x182   :  { %1637 = vmatmul.f32.vlgmr.msrb.gmra.mxu1 %v3633_v0  ;;  %v1028_v53 = vpop.f32.mrf.mxu0  ;;  %1596 = vmatpush.msra.mxu0 %v1368_v34  ;;  %v1306_v34 = vld [vmem:[#allocation8 + $0x418] sm:$0xff] }
 0x183   :  { %1701 = vmatpush.msra.mxu1 %v1302_v45  ;;  %v1029_v56 = vadd.f32 %v1028_v53, %v1009_v50  ;;  %1683 = vmatpush.msra.mxu3 %v1230_v51  ;;  %v1321_v53 = vld [vmem:[#allocation8 + $0x490] sm:$0xff] }
 0x185   :  { %1702 = vmatpush.msra.mxu1 %v1298_v49  ;;  %3141 = vtanh.f32 %v1029_v56  ;;  %1684 = vmatpush.msra.mxu3 %v1226_v55  ;;  %v1329_v49 = vld [vmem:[#allocation8 + $0x4d0] sm:$0xff] }
 0x186   :  { %v1317_v55 = vld [vmem:[#allocation8 + $0x470] sm:$0xff] }
 0x187   :  { %1703 = vmatpush.msra.mxu1 %v1294_v52  ;;  %1685 = vmatpush.msra.mxu3 %v1222_v58  ;;  %v1305_v58 = vld [vmem:[#allocation8 + $0x410] sm:$0xff] }
 0x189   :  { %1704 = vmatpush.msra.mxu1 %v1290_v63  ;;  %1686 = vmatpush.msra.mxu3 %v1218_v60  ;;  %v1429_v60 = vld [vmem:[#allocation8 + $0x7f0] sm:$0xff] }
 0x18b   :  { %1705 = vmatpush.msra.mxu1 %v1286_v59  ;;  %v3641_v5 = vpop.eup %3141  ;;  %1687 = vmatpush.msra.mxu3 %v1214_v1  ;;  %v1366_v59 = vld [vmem:[#allocation8 + $0x5f8] sm:$0xff]  ;;  %v1425_v1 = vld [vmem:[#allocation8 + $0x7d0] sm:$0xff] }
 0x18c   :  { %1497 = vmatmul.f32.vlgmr.msrb.gmra.mxu2 %v3641_v5 }
 0x18d   :  { %1706 = vmatpush.msra.mxu1 %v1282_v61  ;;  %1688 = vmatpush.msra.mxu3 %v1210_v6  ;;  %v1350_v6 = vld [vmem:[#allocation8 + $0x578] sm:$0xff] }
 0x18e   :  { %1641 = vmatpush.msrb.mxu2 %v1365_v9  ;;  %v1346_v9 = vld [vmem:[#allocation8 + $0x558] sm:$0xff] }
 0x18f   :  { %1707 = vmatpush.msra.mxu1 %v1278_v2  ;;  %1689 = vmatpush.msra.mxu3 %v1206_v12  ;;  %v1354_v2 = vld [vmem:[#allocation8 + $0x598] sm:$0xff] }
 0x190   :  { %1642 = vmatpush.msrb.mxu2 %v1361_v14  ;;  %v1342_v12 = vld [vmem:[#allocation8 + $0x538] sm:$0xff] }
 0x191   :  { %1708 = vmatpush.msra.mxu1 %v1274_v7  ;;  %1690 = vmatpush.msra.mxu3 %v1202_v18  ;;  %v1417_v7 = vld [vmem:[#allocation8 + $0x790] sm:$0xff]  ;;  %v1338_v14 = vld [vmem:[#allocation8 + $0x518] sm:$0xff] }
 0x192   :  { %1643 = vmatpush.msrb.mxu2 %v1357_v20  ;;  %v1334_v18 = vld [vmem:[#allocation8 + $0x4f8] sm:$0xff] }
 0x193   :  { %1709 = vmatpush.msra.mxu1 %v1270_v13  ;;  %1691 = vmatpush.msra.mxu3 %v1198_v24  ;;  %v1409_v13 = vld [vmem:[#allocation8 + $0x750] sm:$0xff]  ;;  %v1330_v20 = vld [vmem:[#allocation8 + $0x4d8] sm:$0xff] }
 0x194   :  { %1644 = vmatpush.msrb.mxu2 %v1353_v26  ;;  %v1326_v24 = vld [vmem:[#allocation8 + $0x4b8] sm:$0xff] }
 0x195   :  { %1710 = vmatpush.msra.mxu1 %v1266_v19  ;;  %1692 = vmatpush.msra.mxu3 %v1194_v28  ;;  %v1401_v19 = vld [vmem:[#allocation8 + $0x710] sm:$0xff]  ;;  %v1322_v26 = vld [vmem:[#allocation8 + $0x498] sm:$0xff] }
 0x196   :  { %1577 = vmatmul.f32.vlgmr.msra.gmra.mxu2 %v3641_v5  ;;  %v1318_v28 = vld [vmem:[#allocation8 + $0x478] sm:$0xff] }
 0x197   :  { %1711 = vmatpush.msra.mxu1 %v1262_v25  ;;  %1693 = vmatpush.msra.mxu3 %v1190_v31  ;;  %v1393_v25 = vld [vmem:[#allocation8 + $0x6d0] sm:$0xff] }
 0x198   :  { %1645 = vmatpush.msrb.mxu2 %v1349_v33  ;;  %v1381_v31 = vld [vmem:[#allocation8 + $0x670] sm:$0xff] }
 0x199   :  { %1712 = vmatpush.msra.mxu1 %v1258_v29  ;;  %1694 = vmatpush.msra.mxu3 %v1186_v35  ;;  %v1385_v29 = vld [vmem:[#allocation8 + $0x690] sm:$0xff] }
 0x19a   :  { %v1048_v41 = vpop.f32.mrf.mxu2  ;;  %1646 = vmatpush.msrb.mxu2 %v1345_v37  ;;  %v1377_v33 = vld [vmem:[#allocation8 + $0x650] sm:$0xff]  ;;  %v1426_v37 = vld [vmem:[#allocation8 + $0x7d8] sm:$0xff] }
 0x19b   :  { %1713 = vmatpush.msra.mxu1 %v1254_v32  ;;  %v1049_v42 = vadd.f32 %v1048_v41, %v602_v36  ;;  %1695 = vmatpush.msra.mxu3 %v1182_v38  ;;  %v1310_v32 = vld [vmem:[#allocation8 + $0x438] sm:$0xff]  ;;  %v1373_v35 = vld [vmem:[#allocation8 + $0x630] sm:$0xff] }
 0x19c   :  { %1647 = vmatpush.msrb.mxu2 %v1341_v40  ;;  %v1068_v45 = vpop.f32.mrf.mxu0  ;;  %v1430_v36 = vld [vmem:[#allocation8 + $0x7f8] sm:$0xff] }
 0x19d   :  { %1714 = vmatpush.msra.mxu1 %v1250_v4  ;;  %1696 = vmatpush.msra.mxu3 %v1178_v22  ;;  %v1069_v46 = vadd.f32 %v1068_v45, %v1049_v42  ;;  %v1369_v4 = vld [vmem:[#allocation8 + $0x610] sm:$0xff]  ;;  %v1422_v38 = vld [vmem:[#allocation8 + $0x7b8] sm:$0xff]  ;;  %v1825_v22 = vld [vmem:[#allocation11 + $0x1e0] sm:$0xff] }
 0x19e   :  { %1697 = vmatmul.f32.vlgmr.msra.gmra.mxu3 %v3630_v43  ;;  %1648 = vmatpush.msrb.mxu2 %v1337_v21  ;;  %v1414_v40 = vld [vmem:[#allocation8 + $0x778] sm:$0xff] }
 0x19f   :  { %1715 = vmatpush.msra.mxu1 %v1246_v39  ;;  %v1088_v44 = vpop.f32.mrf.mxu1  ;;  %v1418_v39 = vld [vmem:[#allocation8 + $0x798] sm:$0xff]  ;;  %2031 = vmatpush.msrb.mxu3 %v1825_v22  ;;  %v1874_v22 = vld [vmem:[#allocation11 + $0x368] sm:$0xff] }
 0x1a0   :  { %v1089_v48 = vadd.f32 %v1088_v44, %v1069_v46  ;;  %v1108_v16 = vpop.f32.mrf.mxu3  ;;  %1649 = vmatpush.msrb.mxu2 %v1333_v47  ;;  %v1410_v41 = vld [vmem:[#allocation8 + $0x758] sm:$0xff]  ;;  %v1817_v44 = vld [vmem:[#allocation11 + $0x1a0] sm:$0xff] }
 0x1a1   :  { %1716 = vmatpush.msra.mxu1 %v1242_v8  ;;  %v1821_v8 = vld [vmem:[#allocation11 + $0x1c0] sm:$0xff]  ;;  %v1406_v42 = vld [vmem:[#allocation8 + $0x738] sm:$0xff] }
 0x1a2   :  { %1717 = vmatmul.f32.vlgmr.msra.gmra.mxu1 %v3633_v0  ;;  %v1109_v50 = vadd.f32 %v1108_v16, %v1089_v48  ;;  %1650 = vmatpush.msrb.mxu2 %v1329_v49  ;;  %v1313_v0 = vld [vmem:[#allocation8 + $0x450] sm:$0xff]  ;;  %v1398_v21 = vld [vmem:[#allocation8 + $0x6f8] sm:$0xff]  ;;  %v1813_v46 = vld [vmem:[#allocation11 + $0x180] sm:$0xff] }
 0x1a3   :  { %2032 = vmatpush.msrb.mxu3 %v1821_v8  ;;  %v1394_v45 = vld [vmem:[#allocation8 + $0x6d8] sm:$0xff]  ;;  %v1889_v47 = vld [vmem:[#allocation11 + $0x3e0] sm:$0xff] }
 0x1a4   :  { %v1128_v51 = vpop.f32.mrf.mxu2  ;;  %1651 = vmatpush.msrb.mxu2 %v1325_v17  ;;  %v1809_v48 = vld [vmem:[#allocation11 + $0x160] sm:$0xff]  ;;  %2051 = vmatpush.msrb.mxu1 %v1889_v47  ;;  %v1390_v16 = vld [vmem:[#allocation8 + $0x6b8] sm:$0xff]  ;;  %v1782_v47 = vld [vmem:[#allocation11 + $0x88] sm:$0xff] }
 0x1a5   :  { %v1129_v52 = vadd.f32 %v1128_v51, %v1109_v50  ;;  %2033 = vmatpush.msrb.mxu3 %v1817_v44  ;;  %v1885_v49 = vld [vmem:[#allocation11 + $0x3c0] sm:$0xff]  ;;  %v1386_v51 = vld [vmem:[#allocation8 + $0x698] sm:$0xff]  ;;  %v1786_v44 = vld [vmem:[#allocation11 + $0xa8] sm:$0xff] }
 0x1a6   :  { %1652 = vmatpush.msrb.mxu2 %v1321_v53  ;;  %v1881_v50 = vld [vmem:[#allocation11 + $0x3a0] sm:$0xff]  ;;  %2052 = vmatpush.msrb.mxu1 %v1885_v49 }
 0x1a7   :  { %v1148_v54 = vpop.f32.mrf.mxu0  ;;  %v1168_v63 = vpop.f32.mrf.mxu1  ;;  %2034 = vmatpush.msrb.mxu3 %v1813_v46  ;;  %v1805_v17 = vld [vmem:[#allocation11 + $0x140] sm:$0xff] }
 0x1a8   :  { %v1149_v43 = vadd.f32 %v1148_v54, %v1129_v52  ;;  %1653 = vmatpush.msrb.mxu2 %v1317_v55  ;;  %v1877_v52 = vld [vmem:[#allocation11 + $0x380] sm:$0xff]  ;;  %2053 = vmatpush.msrb.mxu1 %v1881_v50  ;;  %v1382_v54 = vld [vmem:[#allocation8 + $0x678] sm:$0xff]  ;;  %v1858_v50 = vld [vmem:[#allocation11 + $0x2e8] sm:$0xff] }
 0x1a9   :  { %2035 = vmatpush.msrb.mxu3 %v1809_v48  ;;  %v1801_v53 = vld [vmem:[#allocation11 + $0x120] sm:$0xff]  ;;  %v1862_v48 = vld [vmem:[#allocation11 + $0x308] sm:$0xff] }
 0x1aa   :  { %v1169_v56 = vadd.f32 %v1168_v63, %v1149_v43  ;;  %1654 = vmatpush.msrb.mxu2 %v1313_v0  ;;  %v1873_v55 = vld [vmem:[#allocation11 + $0x360] sm:$0xff]  ;;  %2054 = vmatpush.msrb.mxu1 %v1877_v52  ;;  %v1378_v43 = vld [vmem:[#allocation8 + $0x658] sm:$0xff]  ;;  %v1854_v52 = vld [vmem:[#allocation11 + $0x2c8] sm:$0xff] }
 0x1ab   :  { %2036 = vmatpush.msrb.mxu3 %v1805_v17  ;;  %v1797_v63 = vld [vmem:[#allocation11 + $0x100] sm:$0xff] }
 0x1ac   :  { %3143 = vtanh.f32 %v1169_v56  ;;  %1655 = vmatpush.msrb.mxu2 %v1309_v57  ;;  %v1869_v0 = vld [vmem:[#allocation11 + $0x340] sm:$0xff]  ;;  %2055 = vmatpush.msrb.mxu1 %v1873_v55  ;;  %v1374_v57 = vld [vmem:[#allocation8 + $0x638] sm:$0xff]  ;;  %v1850_v55 = vld [vmem:[#allocation11 + $0x2a8] sm:$0xff] }
 0x1ad   :  { %2037 = vmatpush.msrb.mxu3 %v1801_v53  ;;  %v1793_v56 = vld [vmem:[#allocation11 + $0xe0] sm:$0xff] }
 0x1ae   :  { %1656 = vmatpush.msrb.mxu2 %v1305_v58  ;;  %v1865_v58 = vld [vmem:[#allocation11 + $0x320] sm:$0xff]  ;;  %2056 = vmatpush.msrb.mxu1 %v1869_v0  ;;  %v1846_v0 = vld [vmem:[#allocation11 + $0x288] sm:$0xff] }
 0x1af   :  { %1657 = vmatmul.f32.vlgmr.msrb.gmra.mxu2 %v3641_v5  ;;  %2038 = vmatpush.msrb.mxu3 %v1797_v63  ;;  %v1917_v8 = vld [vmem:[#allocation11 + $0x4c0] sm:$0xff] }
 0x1b0   :  { %1721 = vmatpush.msra.mxu2 %v1366_v59  ;;  %v1789_v59 = vld [vmem:[#allocation11 + $0xc0] sm:$0xff]  ;;  %2057 = vmatpush.msrb.mxu1 %v1865_v58  ;;  %v1842_v58 = vld [vmem:[#allocation11 + $0x268] sm:$0xff] }
 0x1b1   :  { %2039 = vmatpush.msrb.mxu3 %v1793_v56  ;;  %v1909_v46 = vld [vmem:[#allocation11 + $0x480] sm:$0xff] }
 0x1b2   :  { %v3649_v61 = vpop.eup %3143  ;;  %1722 = vmatpush.msra.mxu2 %v1362_v11  ;;  %v1370_v11 = vld [vmem:[#allocation8 + $0x618] sm:$0xff]  ;;  %v1905_v49 = vld [vmem:[#allocation11 + $0x460] sm:$0xff] }
 0x1b3   :  { %1517 = vmatmul.f32.vlgmr.msrb.gmra.mxu0 %v3649_v61  ;;  %2040 = vmatpush.msrb.mxu3 %v1789_v59  ;;  %v1901_v17 = vld [vmem:[#allocation11 + $0x440] sm:$0xff] }
 0x1b4   :  { %1661 = vmatpush.msrb.mxu0 %v1429_v60  ;;  %1723 = vmatpush.msra.mxu2 %v1358_v62  ;;  %v1861_v60 = vld [vmem:[#allocation11 + $0x300] sm:$0xff] }
 0x1b5   :  { %v1785_v62 = vld [vmem:[#allocation11 + $0xa0] sm:$0xff]  ;;  %2058 = vmatpush.msrb.mxu1 %v1861_v60  ;;  %v1838_v60 = vld [vmem:[#allocation11 + $0x248] sm:$0xff] }
 0x1b6   :  { %1662 = vmatpush.msrb.mxu0 %v1425_v1  ;;  %1724 = vmatpush.msra.mxu2 %v1354_v2  ;;  %v1857_v1 = vld [vmem:[#allocation11 + $0x2e0] sm:$0xff] }
 0x1b7   :  { %v1781_v2 = vld [vmem:[#allocation11 + $0x80] sm:$0xff]  ;;  %2041 = vmatpush.msrb.mxu3 %v1785_v62  ;;  %2059 = vmatpush.msrb.mxu1 %v1857_v1  ;;  %v1946_v1 = vld [vmem:[#allocation11 + $0x5a8] sm:$0xff] }
 0x1b8   :  { %1663 = vmatpush.msrb.mxu0 %v1421_v3  ;;  %1725 = vmatpush.msra.mxu2 %v1350_v6  ;;  %v1853_v3 = vld [vmem:[#allocation11 + $0x2c0] sm:$0xff] }
 0x1b9   :  { %v1777_v6 = vld [vmem:[#allocation11 + $0x60] sm:$0xff]  ;;  %2042 = vmatpush.msrb.mxu3 %v1781_v2  ;;  %2060 = vmatpush.msrb.mxu1 %v1853_v3  ;;  %v1834_v2 = vld [vmem:[#allocation11 + $0x228] sm:$0xff] }
 0x1ba   :  { %1664 = vmatpush.msrb.mxu0 %v1417_v7  ;;  %1726 = vmatpush.msra.mxu2 %v1346_v9  ;;  %v1849_v7 = vld [vmem:[#allocation11 + $0x2a0] sm:$0xff] }
 0x1bb   :  { %1597 = vmatmul.f32.vlgmr.msra.gmra.mxu0 %v3649_v61  ;;  %v1773_v9 = vld [vmem:[#allocation11 + $0x40] sm:$0xff]  ;;  %2043 = vmatpush.msrb.mxu3 %v1777_v6  ;;  %v1942_v6 = vld [vmem:[#allocation11 + $0x588] sm:$0xff] }
 0x1bc   :  { %1665 = vmatpush.msrb.mxu0 %v1413_v10  ;;  %1727 = vmatpush.msra.mxu2 %v1342_v12  ;;  %v1769_v10 = vld [vmem:[#allocation11 + $0x20] sm:$0xff] }
 0x1bd   :  { %2061 = vmatpush.msrb.mxu1 %v1849_v7  ;;  %2044 = vmatpush.msrb.mxu3 %v1773_v9  ;;  %v1765_v12 = vld [vmem:[#allocation11] sm:$0xff]  ;;  %v1830_v7 = vld [vmem:[#allocation11 + $0x208] sm:$0xff] }
 0x1be   :  { %1666 = vmatpush.msrb.mxu0 %v1409_v13  ;;  %1728 = vmatpush.msra.mxu2 %v1338_v14  ;;  %v1845_v13 = vld [vmem:[#allocation11 + $0x280] sm:$0xff] }
 0x1bf   :  { %2045 = vmatpush.msrb.mxu3 %v1769_v10  ;;  %v1953_v14 = vld [vmem:[#allocation11 + $0x5e0] sm:$0xff]  ;;  %2062 = vmatpush.msrb.mxu1 %v1845_v13  ;;  %v1938_v10 = vld [vmem:[#allocation11 + $0x568] sm:$0xff] }
 0x1c0   :  { %1667 = vmatpush.msrb.mxu0 %v1405_v15  ;;  %1729 = vmatpush.msra.mxu2 %v1334_v18  ;;  %v1826_v15 = vld [vmem:[#allocation11 + $0x1e8] sm:$0xff]  ;;  %v1949_v18 = vld [vmem:[#allocation11 + $0x5c0] sm:$0xff] }
 0x1c1   :  { %2046 = vmatpush.msrb.mxu3 %v1765_v12  ;;  %v1897_v53 = vld [vmem:[#allocation11 + $0x420] sm:$0xff]  ;;  %v3656_v12 = vld [vmem:[#allocation10] sm:$0xf] }
 0x1c2   :  { %1668 = vmatpush.msrb.mxu0 %v1401_v19  ;;  %1730 = vmatpush.msra.mxu2 %v1330_v20  ;;  %v1822_v19 = vld [vmem:[#allocation11 + $0x1c8] sm:$0xff]  ;;  %v1837_v20 = vld [vmem:[#allocation11 + $0x240] sm:$0xff] }
 0x1c3   :  { %2111 = vmatpush.msra.mxu3 %v1826_v15  ;;  %v1893_v63 = vld [vmem:[#allocation11 + $0x400] sm:$0xff]  ;;  %v1458_v15 = vpop.f32.mrf.mxu3 }
 0x1c4   :  { %1669 = vmatpush.msrb.mxu0 %v1397_v23  ;;  %1731 = vmatpush.msra.mxu2 %v1326_v24  ;;  %v1945_v23 = vld [vmem:[#allocation11 + $0x5a0] sm:$0xff]  ;;  %v1818_v24 = vld [vmem:[#allocation11 + $0x1a8] sm:$0xff] }
 0x1c5   :  { %2112 = vmatpush.msra.mxu3 %v1822_v19  ;;  %v2017_v56 = vld [vmem:[#allocation11 + $0x7e0] sm:$0xff]  ;;  %v1930_v19 = vld [vmem:[#allocation11 + $0x528] sm:$0xff] }
 0x1c6   :  { %1670 = vmatpush.msrb.mxu0 %v1393_v25  ;;  %1732 = vmatpush.msra.mxu2 %v1322_v26  ;;  %v1833_v25 = vld [vmem:[#allocation11 + $0x220] sm:$0xff] }
 0x1c7   :  { %2113 = vmatpush.msra.mxu3 %v1818_v24  ;;  %v1941_v26 = vld [vmem:[#allocation11 + $0x580] sm:$0xff]  ;;  %v1478_v24 = vpop.f32.mrf.mxu1 }
 0x1c8   :  { %1671 = vmatpush.msrb.mxu0 %v1389_v27  ;;  %1733 = vmatpush.msra.mxu2 %v1318_v28  ;;  %v1814_v27 = vld [vmem:[#allocation11 + $0x188] sm:$0xff]  ;;  %v1829_v28 = vld [vmem:[#allocation11 + $0x200] sm:$0xff] }
 0x1c9   :  { %2114 = vmatpush.msra.mxu3 %v1814_v27  ;;  %v2013_v59 = vld [vmem:[#allocation11 + $0x7c0] sm:$0xff] }
 0x1ca   :  { %1672 = vmatpush.msrb.mxu0 %v1385_v29  ;;  %1734 = vmatpush.msra.mxu2 %v1314_v30  ;;  %v1937_v29 = vld [vmem:[#allocation11 + $0x560] sm:$0xff]  ;;  %v1810_v30 = vld [vmem:[#allocation11 + $0x168] sm:$0xff] }
 0x1cb   :  { %2115 = vmatpush.msra.mxu3 %v1810_v30  ;;  %v2009_v62 = vld [vmem:[#allocation11 + $0x7a0] sm:$0xff] }
 0x1cc   :  { %1673 = vmatpush.msrb.mxu0 %v1381_v31  ;;  %1735 = vmatpush.msra.mxu2 %v1310_v32  ;;  %v1890_v31 = vld [vmem:[#allocation11 + $0x3e8] sm:$0xff]  ;;  %v1933_v32 = vld [vmem:[#allocation11 + $0x540] sm:$0xff] }
 0x1cd   :  { %v2005_v3 = vld [vmem:[#allocation11 + $0x780] sm:$0xff] }
 0x1ce   :  { %1674 = vmatpush.msrb.mxu0 %v1377_v33  ;;  %1736 = vmatpush.msra.mxu2 %v1306_v34  ;;  %v1806_v33 = vld [vmem:[#allocation11 + $0x148] sm:$0xff]  ;;  %v2001_v9 = vld [vmem:[#allocation11 + $0x760] sm:$0xff] }
 0x1cf   :  { %1737 = vmatmul.f32.vlgmr.msra.gmra.mxu2 %v3641_v5  ;;  %v1402_v5 = vld [vmem:[#allocation8 + $0x718] sm:$0xff]  ;;  %v1886_v34 = vld [vmem:[#allocation11 + $0x3c8] sm:$0xff]  ;;  %2116 = vmatpush.msra.mxu3 %v1806_v33  ;;  %v1997_v13 = vld [vmem:[#allocation11 + $0x740] sm:$0xff] }
 0x1d0   :  { %1675 = vmatpush.msrb.mxu0 %v1373_v35  ;;  %2071 = vmatpush.msrb.mxu2 %v1953_v14  ;;  %v1929_v35 = vld [vmem:[#allocation11 + $0x520] sm:$0xff]  ;;  %v1934_v14 = vld [vmem:[#allocation11 + $0x548] sm:$0xff] }
 0x1d2   :  { %1676 = vmatpush.msrb.mxu0 %v1369_v4  ;;  %2072 = vmatpush.msrb.mxu2 %v1949_v18  ;;  %v1802_v4 = vld [vmem:[#allocation11 + $0x128] sm:$0xff]  ;;  %v1433_v18 = vperm.slane %v3656_v12, 0 }
 0x1d3   :  { %1677 = vmatmul.f32.vlgmr.msrb.gmra.mxu0 %v3649_v61  ;;  %2117 = vmatpush.msra.mxu3 %v1802_v4  ;;  %v1914_v4 = vld [vmem:[#allocation11 + $0x4a8] sm:$0xff] }
 0x1d4   :  { %1741 = vmatpush.msra.mxu0 %v1430_v36  ;;  %2073 = vmatpush.msrb.mxu2 %v1945_v23  ;;  %v1882_v36 = vld [vmem:[#allocation11 + $0x3a8] sm:$0xff]  ;;  %v1459_v27 = vadd.f32 %v1458_v15, %v1433_v18  ;;  %v1791_v18 = vld [vmem:[#allocation11 + $0xd0] sm:$0xff] }
 0x1d5   :  { %v1926_v23 = vld [vmem:[#allocation11 + $0x508] sm:$0xff] }
 0x1d6   :  { %1742 = vmatpush.msra.mxu0 %v1426_v37  ;;  %2074 = vmatpush.msrb.mxu2 %v1941_v26  ;;  %v1925_v37 = vld [vmem:[#allocation11 + $0x500] sm:$0xff]  ;;  %v1479_v30 = vadd.f32 %v1478_v24, %v1459_v27 }
 0x1d7   :  { %v1985_v26 = vld [vmem:[#allocation11 + $0x6e0] sm:$0xff] }
 0x1d8   :  { %1743 = vmatpush.msra.mxu0 %v1422_v38  ;;  %2075 = vmatpush.msrb.mxu2 %v1937_v29  ;;  %v1798_v38 = vld [vmem:[#allocation11 + $0x108] sm:$0xff]  ;;  %v1981_v29 = vld [vmem:[#allocation11 + $0x6c0] sm:$0xff] }
 0x1d9   :  { %2118 = vmatpush.msra.mxu3 %v1798_v38 }
 0x1da   :  { %1744 = vmatpush.msra.mxu0 %v1418_v39  ;;  %2076 = vmatpush.msrb.mxu2 %v1933_v32  ;;  %v1878_v39 = vld [vmem:[#allocation11 + $0x388] sm:$0xff] }
 0x1db   :  { %v1918_v32 = vld [vmem:[#allocation11 + $0x4c8] sm:$0xff] }
 0x1dc   :  { %1745 = vmatpush.msra.mxu0 %v1414_v40  ;;  %2077 = vmatpush.msrb.mxu2 %v1929_v35  ;;  %v1921_v40 = vld [vmem:[#allocation11 + $0x4e0] sm:$0xff] }
 0x1de   :  { %1746 = vmatpush.msra.mxu0 %v1410_v41  ;;  %v1794_v41 = vld [vmem:[#allocation11 + $0xe8] sm:$0xff]  ;;  %2078 = vmatpush.msrb.mxu2 %v1925_v37 }
 0x1df   :  { %2119 = vmatpush.msra.mxu3 %v1794_v41  ;;  %v1558_v41 = vpop.f32.mrf.mxu1 }
 0x1e0   :  { %1747 = vmatpush.msra.mxu0 %v1406_v42  ;;  %v1790_v42 = vld [vmem:[#allocation11 + $0xc8] sm:$0xff]  ;;  %2079 = vmatpush.msrb.mxu2 %v1921_v40 }
 0x1e1   :  { %2120 = vmatpush.msra.mxu3 %v1790_v42  ;;  %v1538_v33 = vpop.f32.mrf.mxu3  ;;  %v1910_v40 = vld [vmem:[#allocation11 + $0x488] sm:$0xff] }
 0x1e2   :  { %1748 = vmatpush.msra.mxu0 %v1402_v5  ;;  %v1870_v5 = vld [vmem:[#allocation11 + $0x348] sm:$0xff]  ;;  %2080 = vmatpush.msrb.mxu2 %v1917_v8  ;;  %v1969_v8 = vld [vmem:[#allocation11 + $0x660] sm:$0xff] }
 0x1e3   :  { %2121 = vmatpush.msra.mxu3 %v1786_v44  ;;  %v1906_v42 = vld [vmem:[#allocation11 + $0x468] sm:$0xff] }
 0x1e4   :  { %1749 = vmatpush.msra.mxu0 %v1398_v21  ;;  %v1913_v21 = vld [vmem:[#allocation11 + $0x4a0] sm:$0xff]  ;;  %v1902_v44 = vld [vmem:[#allocation11 + $0x448] sm:$0xff] }
 0x1e5   :  { %2081 = vmatpush.msrb.mxu2 %v1913_v21  ;;  %2122 = vmatpush.msra.mxu3 %v1782_v47  ;;  %v1965_v21 = vld [vmem:[#allocation11 + $0x640] sm:$0xff]  ;;  %v1898_v47 = vld [vmem:[#allocation11 + $0x428] sm:$0xff] }
 0x1e6   :  { %1750 = vmatpush.msra.mxu0 %v1394_v45  ;;  %v1866_v45 = vld [vmem:[#allocation11 + $0x328] sm:$0xff] }
 0x1e7   :  { %2082 = vmatpush.msrb.mxu2 %v1909_v46 }
 0x1e8   :  { %1751 = vmatpush.msra.mxu0 %v1390_v16  ;;  %v1778_v16 = vld [vmem:[#allocation11 + $0x68] sm:$0xff] }
 0x1e9   :  { %2083 = vmatpush.msrb.mxu2 %v1905_v49  ;;  %2123 = vmatpush.msra.mxu3 %v1778_v16  ;;  %v1827_v49 = vld [vmem:[#allocation11 + $0x1f0] sm:$0xff]  ;;  %v1957_v16 = vld [vmem:[#allocation11 + $0x600] sm:$0xff] }
 0x1ea   :  { %1752 = vmatpush.msra.mxu0 %v1386_v51  ;;  %v1774_v51 = vld [vmem:[#allocation11 + $0x48] sm:$0xff] }
 0x1eb   :  { %2084 = vmatpush.msrb.mxu2 %v1901_v17  ;;  %2124 = vmatpush.msra.mxu3 %v1774_v51  ;;  %v1894_v51 = vld [vmem:[#allocation11 + $0x408] sm:$0xff] }
 0x1ec   :  { %1753 = vmatpush.msra.mxu0 %v1382_v54  ;;  %v1770_v54 = vld [vmem:[#allocation11 + $0x28] sm:$0xff] }
 0x1ed   :  { %2085 = vmatpush.msrb.mxu2 %v1897_v53  ;;  %2125 = vmatpush.msra.mxu3 %v1770_v54  ;;  %v2018_v53 = vld [vmem:[#allocation11 + $0x7e8] sm:$0xff]  ;;  %v1819_v54 = vld [vmem:[#allocation11 + $0x1b0] sm:$0xff] }
 0x1ee   :  { %1754 = vmatpush.msra.mxu0 %v1378_v43  ;;  %v1766_v43 = vld [vmem:[#allocation11 + $0x8] sm:$0xff] }
 0x1ef   :  { %2086 = vmatpush.msrb.mxu2 %v1893_v63  ;;  %2126 = vmatpush.msra.mxu3 %v1766_v43  ;;  %v1815_v63 = vld [vmem:[#allocation11 + $0x190] sm:$0xff]  ;;  %v2010_v43 = vld [vmem:[#allocation11 + $0x7a8] sm:$0xff] }
 0x1f0   :  { %1755 = vmatpush.msra.mxu0 %v1374_v57  ;;  %v1954_v57 = vld [vmem:[#allocation11 + $0x5e8] sm:$0xff] }
 0x1f1   :  { %2151 = vmatpush.msra.mxu2 %v1954_v57 }
 0x1f2   :  { %1756 = vmatpush.msra.mxu0 %v1370_v11  ;;  %v1950_v11 = vld [vmem:[#allocation11 + $0x5c8] sm:$0xff] }
 0x1f3   :  { %1757 = vmatmul.f32.vlgmr.msra.gmra.mxu0 %v3649_v61  ;;  %v1841_v61 = vld [vmem:[#allocation11 + $0x260] sm:$0xff]  ;;  %2152 = vmatpush.msra.mxu2 %v1950_v11  ;;  %v1887_v11 = vld [vmem:[#allocation11 + $0x3d0] sm:$0xff] }
 0x1f4   :  { %2063 = vmatpush.msrb.mxu1 %v1841_v61  ;;  %2091 = vmatpush.msrb.mxu0 %v2017_v56  ;;  %v1993_v61 = vld [vmem:[#allocation11 + $0x720] sm:$0xff]  ;;  %v1891_v56 = vld [vmem:[#allocation11 + $0x3f0] sm:$0xff] }
 0x1f5   :  { %2153 = vmatpush.msra.mxu2 %v1946_v1  ;;  %v1883_v1 = vld [vmem:[#allocation11 + $0x3b0] sm:$0xff] }
 0x1f6   :  { %2064 = vmatpush.msrb.mxu1 %v1837_v20  ;;  %2092 = vmatpush.msrb.mxu0 %v2013_v59  ;;  %v1989_v20 = vld [vmem:[#allocation11 + $0x700] sm:$0xff]  ;;  %v1807_v59 = vld [vmem:[#allocation11 + $0x150] sm:$0xff] }
 0x1f7   :  { %2154 = vmatpush.msra.mxu2 %v1942_v6 }
 0x1f8   :  { %2065 = vmatpush.msrb.mxu1 %v1833_v25  ;;  %2093 = vmatpush.msrb.mxu0 %v2009_v62  ;;  %v1803_v62 = vld [vmem:[#allocation11 + $0x130] sm:$0xff] }
 0x1f9   :  { %2155 = vmatpush.msra.mxu2 %v1938_v10  ;;  %v1994_v10 = vld [vmem:[#allocation11 + $0x728] sm:$0xff] }
 0x1fa   :  { %2066 = vmatpush.msrb.mxu1 %v1829_v28  ;;  %2094 = vmatpush.msrb.mxu0 %v2005_v3  ;;  %v1922_v28 = vld [vmem:[#allocation11 + $0x4e8] sm:$0xff] }
 0x1fb   :  { %2156 = vmatpush.msra.mxu2 %v1934_v14  ;;  %v1998_v3 = vld [vmem:[#allocation11 + $0x748] sm:$0xff]  ;;  %v1875_v14 = vld [vmem:[#allocation11 + $0x370] sm:$0xff] }
 0x1fc   :  { %2131 = vmatpush.msra.mxu1 %v1890_v31  ;;  %2095 = vmatpush.msrb.mxu0 %v2001_v9  ;;  %v1434_v31 = vperm.slane %v3656_v12, 1  ;;  %v1879_v9 = vld [vmem:[#allocation11 + $0x390] sm:$0xff] }
 0x1fd   :  { %2157 = vmatpush.msra.mxu2 %v1930_v19  ;;  %v1871_v19 = vld [vmem:[#allocation11 + $0x350] sm:$0xff] }
 0x1fe   :  { %2132 = vmatpush.msra.mxu1 %v1886_v34  ;;  %2096 = vmatpush.msrb.mxu0 %v1997_v13  ;;  %v1977_v34 = vld [vmem:[#allocation11 + $0x6a0] sm:$0xff]  ;;  %v1539_v37 = vadd.f32 %v1538_v33, %v1434_v31  ;;  %v1795_v13 = vld [vmem:[#allocation11 + $0xf0] sm:$0xff] }
 0x1ff   :  { %2158 = vmatpush.msra.mxu2 %v1926_v23  ;;  %v1638_v23 = vpop.f32.mrf.mxu1 }
 0x200   :  { %2133 = vmatpush.msra.mxu1 %v1882_v36  ;;  %2097 = vmatpush.msrb.mxu0 %v1993_v61  ;;  %v1990_v61 = vld [vmem:[#allocation11 + $0x708] sm:$0xff] }
 0x201   :  { %2159 = vmatpush.msra.mxu2 %v1922_v28  ;;  %v1618_v6 = vpop.f32.mrf.mxu3  ;;  %v1982_v28 = vld [vmem:[#allocation11 + $0x6c8] sm:$0xff] }
 0x202   :  { %2134 = vmatpush.msra.mxu1 %v1878_v39  ;;  %2098 = vmatpush.msrb.mxu0 %v1989_v20  ;;  %v1973_v39 = vld [vmem:[#allocation11 + $0x680] sm:$0xff]  ;;  %v1986_v20 = vld [vmem:[#allocation11 + $0x6e8] sm:$0xff] }
 0x203   :  { %2160 = vmatpush.msra.mxu2 %v1918_v32  ;;  %v1978_v32 = vld [vmem:[#allocation11 + $0x6a8] sm:$0xff] }
 0x204   :  { %2135 = vmatpush.msra.mxu1 %v1874_v22  ;;  %2099 = vmatpush.msrb.mxu0 %v1985_v26  ;;  %v1867_v26 = vld [vmem:[#allocation11 + $0x330] sm:$0xff] }
 0x205   :  { %2161 = vmatpush.msra.mxu2 %v1914_v4 }
 0x206   :  { %2136 = vmatpush.msra.mxu1 %v1870_v5  ;;  %2100 = vmatpush.msrb.mxu0 %v1981_v29  ;;  %v1559_v5 = vadd.f32 %v1558_v41, %v1539_v37  ;;  %v1783_v29 = vld [vmem:[#allocation11 + $0x90] sm:$0xff] }
 0x207   :  { %2162 = vmatpush.msra.mxu2 %v1910_v40  ;;  %v1775_v37 = vld [vmem:[#allocation11 + $0x50] sm:$0xff] }
 0x208   :  { %2137 = vmatpush.msra.mxu1 %v1866_v45  ;;  %2101 = vmatpush.msrb.mxu0 %v1977_v34  ;;  %v1961_v45 = vld [vmem:[#allocation11 + $0x620] sm:$0xff]  ;;  %v1779_v34 = vld [vmem:[#allocation11 + $0x70] sm:$0xff] }
 0x209   :  { %2163 = vmatpush.msra.mxu2 %v1906_v42  ;;  %v1771_v40 = vld [vmem:[#allocation11 + $0x30] sm:$0xff] }
 0x20a   :  { %2138 = vmatpush.msra.mxu1 %v1862_v48  ;;  %2102 = vmatpush.msrb.mxu0 %v1973_v39  ;;  %v1970_v39 = vld [vmem:[#allocation11 + $0x668] sm:$0xff]  ;;  %v1851_v41 = vld [vmem:[#allocation11 + $0x2b0] sm:$0xff] }
 0x20b   :  { %2164 = vmatpush.msra.mxu2 %v1902_v44  ;;  %v1847_v42 = vld [vmem:[#allocation11 + $0x290] sm:$0xff] }
 0x20c   :  { %2139 = vmatpush.msra.mxu1 %v1858_v50  ;;  %2103 = vmatpush.msrb.mxu0 %v1969_v8  ;;  %v1767_v8 = vld [vmem:[#allocation11 + $0x10] sm:$0xff] }
 0x20d   :  { %2165 = vmatpush.msra.mxu2 %v1898_v47  ;;  %v1951_v47 = vld [vmem:[#allocation11 + $0x5d0] sm:$0xff] }
 0x20e   :  { %2140 = vmatpush.msra.mxu1 %v1854_v52  ;;  %2104 = vmatpush.msrb.mxu0 %v1965_v21  ;;  %v1823_v52 = vld [vmem:[#allocation11 + $0x1d0] sm:$0xff]  ;;  %v1828_v21 = vld [vmem:[#allocation11 + $0x1f8] sm:$0xff] }
 0x20f   :  { %v1498_v25 = vpop.f32.mrf.mxu2  ;;  %2166 = vmatpush.msra.mxu2 %v1894_v51  ;;  %v1820_v51 = vld [vmem:[#allocation11 + $0x1b8] sm:$0xff] }
 0x210   :  { %2141 = vmatpush.msra.mxu1 %v1850_v55  ;;  %v1499_v35 = vadd.f32 %v1498_v25, %v1479_v30  ;;  %2105 = vmatpush.msrb.mxu0 %v1961_v45  ;;  %v2014_v55 = vld [vmem:[#allocation11 + $0x7c8] sm:$0xff]  ;;  %v1787_v25 = vld [vmem:[#allocation11 + $0xb0] sm:$0xff] }
 0x211   :  { %v1863_v30 = vld [vmem:[#allocation11 + $0x310] sm:$0xff] }
 0x212   :  { %2142 = vmatpush.msra.mxu1 %v1846_v0  ;;  %2106 = vmatpush.msrb.mxu0 %v1957_v16  ;;  %v1811_v0 = vld [vmem:[#allocation11 + $0x170] sm:$0xff]  ;;  %v1958_v16 = vld [vmem:[#allocation11 + $0x608] sm:$0xff] }
 0x213   :  { %v1843_v45 = vld [vmem:[#allocation11 + $0x270] sm:$0xff] }
 0x214   :  { %2143 = vmatpush.msra.mxu1 %v1842_v58  ;;  %2171 = vmatpush.msra.mxu0 %v2018_v53  ;;  %v2006_v58 = vld [vmem:[#allocation11 + $0x788] sm:$0xff]  ;;  %v1943_v53 = vld [vmem:[#allocation11 + $0x590] sm:$0xff] }
 0x216   :  { %2144 = vmatpush.msra.mxu1 %v1838_v60  ;;  %2172 = vmatpush.msra.mxu0 %v2014_v55  ;;  %v2002_v60 = vld [vmem:[#allocation11 + $0x768] sm:$0xff]  ;;  %v1831_v55 = vld [vmem:[#allocation11 + $0x210] sm:$0xff] }
 0x218   :  { %2145 = vmatpush.msra.mxu1 %v1834_v2  ;;  %2173 = vmatpush.msra.mxu0 %v2010_v43  ;;  %v1435_v2 = vperm.slane %v3656_v12, 2  ;;  %v1812_v43 = vld [vmem:[#allocation11 + $0x178] sm:$0xff] }
 0x219   :  { %v1578_v22 = vpop.f32.mrf.mxu2 }
 0x21a   :  { %2146 = vmatpush.msra.mxu1 %v1830_v7  ;;  %v1579_v46 = vadd.f32 %v1578_v22, %v1559_v5  ;;  %2174 = vmatpush.msra.mxu0 %v2006_v58  ;;  %v1799_v7 = vld [vmem:[#allocation11 + $0x110] sm:$0xff]  ;;  %v1619_v15 = vadd.f32 %v1618_v6, %v1435_v2  ;;  %v1966_v22 = vld [vmem:[#allocation11 + $0x648] sm:$0xff]  ;;  %v1808_v58 = vld [vmem:[#allocation11 + $0x158] sm:$0xff] }
 0x21b   :  { %v1955_v5 = vld [vmem:[#allocation11 + $0x5f0] sm:$0xff]  ;;  %v1800_v6 = vld [vmem:[#allocation11 + $0x118] sm:$0xff] }
 0x21c   :  { %2175 = vmatpush.msra.mxu0 %v2002_v60  ;;  %v1639_v27 = vadd.f32 %v1638_v23, %v1619_v15  ;;  %v1436_v60 = vperm.slane %v3656_v12, 3  ;;  %v1919_v12 = vld [vmem:[#allocation11 + $0x4d0] sm:$0xff]  ;;  %v1792_v15 = vld [vmem:[#allocation11 + $0xd8] sm:$0xff] }
 0x21e   :  { %2176 = vmatpush.msra.mxu0 %v1998_v3  ;;  %v1927_v3 = vld [vmem:[#allocation11 + $0x510] sm:$0xff] }
 0x220   :  { %2177 = vmatpush.msra.mxu0 %v1994_v10 }
 0x221   :  { %v1698_v2 = vpop.f32.mrf.mxu3 }
 0x222   :  { %2178 = vmatpush.msra.mxu0 %v1990_v61  ;;  %v1699_v10 = vadd.f32 %v1698_v2, %v1436_v60  ;;  %v1872_v61 = vld [vmem:[#allocation11 + $0x358] sm:$0xff] }
 0x223   :  { %v1920_v60 = vld [vmem:[#allocation11 + $0x4d8] sm:$0xff] }
 0x224   :  { %2179 = vmatpush.msra.mxu0 %v1986_v20  ;;  %v1915_v20 = vld [vmem:[#allocation11 + $0x4b0] sm:$0xff]  ;;  %v1912_v2 = vld [vmem:[#allocation11 + $0x498] sm:$0xff] }
 0x226   :  { %2180 = vmatpush.msra.mxu0 %v1982_v28  ;;  %v1784_v28 = vld [vmem:[#allocation11 + $0x98] sm:$0xff] }
 0x228   :  { %2181 = vmatpush.msra.mxu0 %v1978_v32 }
 0x230   :  { %v1518_v36 = vpop.f32.mrf.mxu0 }
 0x231   :  { %v1519_v38 = vadd.f32 %v1518_v36, %v1499_v35  ;;  %v1859_v35 = vld [vmem:[#allocation11 + $0x2f0] sm:$0xff]  ;;  %v1974_v36 = vld [vmem:[#allocation11 + $0x688] sm:$0xff] }
 0x232   :  { %v1658_v24 = vpop.f32.mrf.mxu2  ;;  %2182 = vmatpush.msra.mxu0 %v1974_v36  ;;  %v1856_v36 = vld [vmem:[#allocation11 + $0x2d8] sm:$0xff] }
 0x233   :  { %3145 = vtanh.f32 %v1519_v38  ;;  %v1659_v31 = vadd.f32 %v1658_v24, %v1639_v27  ;;  %v1855_v38 = vld [vmem:[#allocation11 + $0x2d0] sm:$0xff]  ;;  %v1788_v24 = vld [vmem:[#allocation11 + $0xb8] sm:$0xff] }
 0x234   :  { %2183 = vmatpush.msra.mxu0 %v1970_v39  ;;  %v1852_v39 = vld [vmem:[#allocation11 + $0x2b8] sm:$0xff] }
 0x236   :  { %2184 = vmatpush.msra.mxu0 %v1966_v22  ;;  %v1848_v22 = vld [vmem:[#allocation11 + $0x298] sm:$0xff] }
 0x238   :  { %v1598_v48 = vpop.f32.mrf.mxu0 }
 0x239   :  { %v3660_v50 = vpop.eup %3145  ;;  %v1599_v17 = vadd.f32 %v1598_v48, %v1579_v46  ;;  %v1962_v46 = vld [vmem:[#allocation11 + $0x628] sm:$0xff]  ;;  %v1824_v48 = vld [vmem:[#allocation11 + $0x1d8] sm:$0xff] }
 0x23a   :  { %2047 = vmatmul.f32.vlgmr.msrb.gmra.mxu3 %v3660_v50  ;;  %2185 = vmatpush.msra.mxu0 %v1962_v46  ;;  %v1952_v46 = vld [vmem:[#allocation11 + $0x5d8] sm:$0xff] }
 0x23b   :  { %3147 = vtanh.f32 %v1599_v17  ;;  %2191 = vmatpush.msrb.mxu3 %v1827_v49  ;;  %v1839_v49 = vld [vmem:[#allocation11 + $0x250] sm:$0xff] }
 0x23c   :  { %v1947_v17 = vld [vmem:[#allocation11 + $0x5b0] sm:$0xff]  ;;  %2186 = vmatpush.msra.mxu0 %v1958_v16  ;;  %v1836_v16 = vld [vmem:[#allocation11 + $0x238] sm:$0xff] }
 0x23d   :  { %2192 = vmatpush.msrb.mxu3 %v1823_v52  ;;  %v1835_v52 = vld [vmem:[#allocation11 + $0x230] sm:$0xff] }
 0x23f   :  { %2193 = vmatpush.msrb.mxu3 %v1819_v54  ;;  %v1816_v54 = vld [vmem:[#allocation11 + $0x198] sm:$0xff] }
 0x241   :  { %v3663_v57 = vpop.eup %3147  ;;  %2194 = vmatpush.msrb.mxu3 %v1815_v63  ;;  %v1939_v63 = vld [vmem:[#allocation11 + $0x570] sm:$0xff] }
 0x242   :  { %2067 = vmatmul.f32.vlgmr.msrb.gmra.mxu1 %v3663_v57  ;;  %2127 = vmatmul.f32.vlgmr.msra.gmra.mxu3 %v3660_v50 }
 0x243   :  { %2195 = vmatpush.msrb.mxu3 %v1811_v0  ;;  %2211 = vmatpush.msrb.mxu1 %v1891_v56  ;;  %v1892_v0 = vld [vmem:[#allocation11 + $0x3f8] sm:$0xff]  ;;  %v1935_v56 = vld [vmem:[#allocation11 + $0x550] sm:$0xff] }
 0x245   :  { %2196 = vmatpush.msrb.mxu3 %v1807_v59  ;;  %2212 = vmatpush.msrb.mxu1 %v1887_v11  ;;  %v1888_v59 = vld [vmem:[#allocation11 + $0x3d8] sm:$0xff]  ;;  %v1931_v11 = vld [vmem:[#allocation11 + $0x530] sm:$0xff] }
 0x247   :  { %2197 = vmatpush.msrb.mxu3 %v1803_v62  ;;  %2213 = vmatpush.msrb.mxu1 %v1883_v1  ;;  %v1804_v62 = vld [vmem:[#allocation11 + $0x138] sm:$0xff] }
 0x248   :  { %v1884_v1 = vld [vmem:[#allocation11 + $0x3b8] sm:$0xff] }
 0x249   :  { %2198 = vmatpush.msrb.mxu3 %v1799_v7  ;;  %2214 = vmatpush.msrb.mxu1 %v1879_v9  ;;  %v1880_v7 = vld [vmem:[#allocation11 + $0x398] sm:$0xff]  ;;  %v1923_v9 = vld [vmem:[#allocation11 + $0x4f0] sm:$0xff] }
 0x24a   :  { %2147 = vmatmul.f32.vlgmr.msra.gmra.mxu1 %v3663_v57 }
 0x24b   :  { %2199 = vmatpush.msrb.mxu3 %v1795_v13  ;;  %2215 = vmatpush.msrb.mxu1 %v1875_v14  ;;  %v1796_v13 = vld [vmem:[#allocation11 + $0xf8] sm:$0xff] }
 0x24c   :  { %v1876_v14 = vld [vmem:[#allocation11 + $0x378] sm:$0xff] }
 0x24d   :  { %2200 = vmatpush.msrb.mxu3 %v1791_v18  ;;  %2216 = vmatpush.msrb.mxu1 %v1871_v19  ;;  %v1718_v18 = vpop.f32.mrf.mxu1 }
 0x24e   :  { %v1719_v23 = vadd.f32 %v1718_v18, %v1699_v10  ;;  %v1963_v10 = vld [vmem:[#allocation11 + $0x630] sm:$0xff]  ;;  %v2012_v18 = vld [vmem:[#allocation11 + $0x7b8] sm:$0xff] }
 0x24f   :  { %2201 = vmatpush.msrb.mxu3 %v1787_v25  ;;  %2217 = vmatpush.msrb.mxu1 %v1867_v26  ;;  %v1868_v25 = vld [vmem:[#allocation11 + $0x338] sm:$0xff]  ;;  %v1911_v26 = vld [vmem:[#allocation11 + $0x490] sm:$0xff] }
 0x250   :  { %v1678_v33 = vpop.f32.mrf.mxu0 }
 0x251   :  { %v1679_v4 = vadd.f32 %v1678_v33, %v1659_v31  ;;  %2202 = vmatpush.msrb.mxu3 %v1783_v29  ;;  %2218 = vmatpush.msrb.mxu1 %v1863_v30  ;;  %v1864_v29 = vld [vmem:[#allocation11 + $0x318] sm:$0xff]  ;;  %v1907_v31 = vld [vmem:[#allocation11 + $0x470] sm:$0xff] }
 0x252   :  { %v1738_v19 = vpop.f32.mrf.mxu2  ;;  %v1780_v33 = vld [vmem:[#allocation11 + $0x78] sm:$0xff] }
 0x253   :  { %3149 = vtanh.f32 %v1679_v4  ;;  %2203 = vmatpush.msrb.mxu3 %v1779_v34  ;;  %2219 = vmatpush.msrb.mxu1 %v1859_v35  ;;  %v1739_v27 = vadd.f32 %v1738_v19, %v1719_v23  ;;  %v1860_v34 = vld [vmem:[#allocation11 + $0x2f8] sm:$0xff]  ;;  %v1903_v35 = vld [vmem:[#allocation11 + $0x450] sm:$0xff]  ;;  %v2411_v23 = vld [vmem:[#allocation14 + $0x1c0] sm:$0xff] }
 0x254   :  { %v1776_v4 = vld [vmem:[#allocation11 + $0x58] sm:$0xff] }
 0x255   :  { %2204 = vmatpush.msrb.mxu3 %v1775_v37  ;;  %2220 = vmatpush.msrb.mxu1 %v1855_v38  ;;  %v1899_v37 = vld [vmem:[#allocation11 + $0x430] sm:$0xff]  ;;  %v1772_v38 = vld [vmem:[#allocation11 + $0x38] sm:$0xff] }
 0x256   :  { %v2008_v19 = vld [vmem:[#allocation11 + $0x798] sm:$0xff] }
 0x257   :  { %2205 = vmatpush.msrb.mxu3 %v1771_v40  ;;  %2221 = vmatpush.msrb.mxu1 %v1851_v41  ;;  %v1895_v40 = vld [vmem:[#allocation11 + $0x410] sm:$0xff]  ;;  %v1768_v41 = vld [vmem:[#allocation11 + $0x18] sm:$0xff] }
 0x259   :  { %v3669_v44 = vpop.eup %3149  ;;  %2206 = vmatpush.msrb.mxu3 %v1767_v8  ;;  %2222 = vmatpush.msrb.mxu1 %v1847_v42  ;;  %v2019_v42 = vld [vmem:[#allocation11 + $0x7f0] sm:$0xff] }
 0x25a   :  { %2087 = vmatmul.f32.vlgmr.msrb.gmra.mxu2 %v3669_v44  ;;  %2207 = vmatmul.f32.vlgmr.msrb.gmra.mxu3 %v3660_v50 }
 0x25b   :  { %2231 = vmatpush.msrb.mxu2 %v1955_v5  ;;  %2271 = vmatpush.msra.mxu3 %v1828_v21  ;;  %v1956_v5 = vld [vmem:[#allocation11 + $0x5f8] sm:$0xff] }
 0x25c   :  { %2223 = vmatpush.msrb.mxu1 %v1843_v45  ;;  %v1844_v21 = vld [vmem:[#allocation11 + $0x278] sm:$0xff]  ;;  %v2015_v45 = vld [vmem:[#allocation11 + $0x7d0] sm:$0xff] }
 0x25d   :  { %2232 = vmatpush.msrb.mxu2 %v1951_v47  ;;  %2272 = vmatpush.msra.mxu3 %v1824_v48  ;;  %v1840_v47 = vld [vmem:[#allocation11 + $0x258] sm:$0xff]  ;;  %v2011_v48 = vld [vmem:[#allocation11 + $0x7b0] sm:$0xff] }
 0x25e   :  { %2224 = vmatpush.msrb.mxu1 %v1839_v49  ;;  %v1948_v49 = vld [vmem:[#allocation11 + $0x5b8] sm:$0xff] }
 0x25f   :  { %2233 = vmatpush.msrb.mxu2 %v1947_v17  ;;  %2273 = vmatpush.msra.mxu3 %v1820_v51  ;;  %v2007_v17 = vld [vmem:[#allocation11 + $0x790] sm:$0xff]  ;;  %v1944_v51 = vld [vmem:[#allocation11 + $0x598] sm:$0xff] }
 0x260   :  { %2225 = vmatpush.msrb.mxu1 %v1835_v52  ;;  %v1832_v52 = vld [vmem:[#allocation11 + $0x218] sm:$0xff] }
 0x261   :  { %2234 = vmatpush.msrb.mxu2 %v1943_v53  ;;  %2274 = vmatpush.msra.mxu3 %v1816_v54  ;;  %v2003_v53 = vld [vmem:[#allocation11 + $0x770] sm:$0xff]  ;;  %v1940_v54 = vld [vmem:[#allocation11 + $0x578] sm:$0xff] }
 0x262   :  { %2226 = vmatpush.msrb.mxu1 %v1831_v55  ;;  %2167 = vmatmul.f32.vlgmr.msra.gmra.mxu2 %v3669_v44  ;;  %v1936_v55 = vld [vmem:[#allocation11 + $0x558] sm:$0xff] }
 0x263   :  { %2227 = vmatmul.f32.vlgmr.msrb.gmra.mxu1 %v3663_v57  ;;  %2235 = vmatpush.msrb.mxu2 %v1939_v63  ;;  %v1995_v63 = vld [vmem:[#allocation11 + $0x730] sm:$0xff] }
 0x264   :  { %2275 = vmatpush.msra.mxu3 %v1812_v43  ;;  %2291 = vmatpush.msra.mxu1 %v1892_v0  ;;  %v1932_v43 = vld [vmem:[#allocation11 + $0x538] sm:$0xff]  ;;  %v1991_v0 = vld [vmem:[#allocation11 + $0x710] sm:$0xff] }
 0x265   :  { %2236 = vmatpush.msrb.mxu2 %v1935_v56  ;;  %v1928_v56 = vld [vmem:[#allocation11 + $0x518] sm:$0xff] }
 0x266   :  { %2276 = vmatpush.msra.mxu3 %v1808_v58  ;;  %2292 = vmatpush.msra.mxu1 %v1888_v59  ;;  %v1987_v58 = vld [vmem:[#allocation11 + $0x6f0] sm:$0xff]  ;;  %v1924_v59 = vld [vmem:[#allocation11 + $0x4f8] sm:$0xff] }
 0x267   :  { %2237 = vmatpush.msrb.mxu2 %v1931_v11  ;;  %v1983_v11 = vld [vmem:[#allocation11 + $0x6d0] sm:$0xff] }
 0x268   :  { %2277 = vmatpush.msra.mxu3 %v1804_v62  ;;  %2293 = vmatpush.msra.mxu1 %v1884_v1  ;;  %v1916_v62 = vld [vmem:[#allocation11 + $0x4b8] sm:$0xff]  ;;  %v1975_v1 = vld [vmem:[#allocation11 + $0x690] sm:$0xff] }
 0x269   :  { %2238 = vmatpush.msrb.mxu2 %v1927_v3  ;;  %v1971_v3 = vld [vmem:[#allocation11 + $0x670] sm:$0xff] }
 0x26a   :  { %2278 = vmatpush.msra.mxu3 %v1800_v6  ;;  %2294 = vmatpush.msra.mxu1 %v1880_v7  ;;  %v1908_v6 = vld [vmem:[#allocation11 + $0x478] sm:$0xff]  ;;  %v1967_v7 = vld [vmem:[#allocation11 + $0x650] sm:$0xff] }
 0x26b   :  { %2239 = vmatpush.msrb.mxu2 %v1923_v9  ;;  %v1904_v9 = vld [vmem:[#allocation11 + $0x458] sm:$0xff] }
 0x26c   :  { %2279 = vmatpush.msra.mxu3 %v1796_v13  ;;  %2295 = vmatpush.msra.mxu1 %v1876_v14  ;;  %v1900_v13 = vld [vmem:[#allocation11 + $0x438] sm:$0xff]  ;;  %v1959_v14 = vld [vmem:[#allocation11 + $0x610] sm:$0xff] }
 0x26d   :  { %2240 = vmatpush.msrb.mxu2 %v1919_v12  ;;  %v1896_v12 = vld [vmem:[#allocation11 + $0x418] sm:$0xff] }
 0x26e   :  { %2280 = vmatpush.msra.mxu3 %v1792_v15  ;;  %2296 = vmatpush.msra.mxu1 %v1872_v61  ;;  %v2020_v15 = vld [vmem:[#allocation11 + $0x7f8] sm:$0xff] }
 0x26f   :  { %2241 = vmatpush.msrb.mxu2 %v1915_v20  ;;  %v2016_v61 = vld [vmem:[#allocation11 + $0x7d8] sm:$0xff]  ;;  %v2415_v20 = vld [vmem:[#allocation14 + $0x1e0] sm:$0xff] }
 0x270   :  { %2281 = vmatpush.msra.mxu3 %v1788_v24  ;;  %2297 = vmatpush.msra.mxu1 %v1868_v25  ;;  %v1758_v30 = vpop.f32.mrf.mxu0  ;;  %v2004_v24 = vld [vmem:[#allocation11 + $0x778] sm:$0xff] }
 0x271   :  { %v1759_v32 = vadd.f32 %v1758_v30, %v1739_v27  ;;  %2242 = vmatpush.msrb.mxu2 %v1911_v26  ;;  %v2000_v25 = vld [vmem:[#allocation11 + $0x758] sm:$0xff]  ;;  %v2407_v27 = vld [vmem:[#allocation14 + $0x1a0] sm:$0xff] }
 0x272   :  { %2282 = vmatpush.msra.mxu3 %v1784_v28  ;;  %2298 = vmatpush.msra.mxu1 %v1864_v29  ;;  %v1996_v26 = vld [vmem:[#allocation11 + $0x738] sm:$0xff]  ;;  %v2399_v29 = vld [vmem:[#allocation14 + $0x160] sm:$0xff] }
 0x273   :  { %3151 = vtanh.f32 %v1759_v32  ;;  %2243 = vmatpush.msrb.mxu2 %v1907_v31  ;;  %v1992_v28 = vld [vmem:[#allocation11 + $0x718] sm:$0xff]  ;;  %v2479_v30 = vld [vmem:[#allocation14 + $0x3e0] sm:$0xff] }
 0x274   :  { %2283 = vmatpush.msra.mxu3 %v1780_v33  ;;  %2299 = vmatpush.msra.mxu1 %v1860_v34  ;;  %v2475_v31 = vld [vmem:[#allocation14 + $0x3c0] sm:$0xff]  ;;  %v1988_v32 = vld [vmem:[#allocation11 + $0x6f8] sm:$0xff] }
 0x275   :  { %2244 = vmatpush.msrb.mxu2 %v1903_v35  ;;  %v2395_v33 = vld [vmem:[#allocation14 + $0x140] sm:$0xff]  ;;  %v1984_v35 = vld [vmem:[#allocation11 + $0x6d8] sm:$0xff] }
 0x276   :  { %2284 = vmatpush.msra.mxu3 %v1776_v4  ;;  %2300 = vmatpush.msra.mxu1 %v1856_v36  ;;  %v2471_v34 = vld [vmem:[#allocation14 + $0x3a0] sm:$0xff] }
 0x277   :  { %2245 = vmatpush.msrb.mxu2 %v1899_v37  ;;  %v2391_v4 = vld [vmem:[#allocation14 + $0x120] sm:$0xff]  ;;  %v1980_v37 = vld [vmem:[#allocation11 + $0x6b8] sm:$0xff] }
 0x278   :  { %2285 = vmatpush.msra.mxu3 %v1772_v38  ;;  %2301 = vmatpush.msra.mxu1 %v1852_v39  ;;  %v2467_v36 = vld [vmem:[#allocation14 + $0x380] sm:$0xff] }
 0x279   :  { %v3676_v8 = vpop.eup %3151  ;;  %2246 = vmatpush.msrb.mxu2 %v1895_v40  ;;  %v2387_v38 = vld [vmem:[#allocation14 + $0x100] sm:$0xff]  ;;  %v1976_v40 = vld [vmem:[#allocation11 + $0x698] sm:$0xff] }
 0x27a   :  { %2286 = vmatpush.msra.mxu3 %v1768_v41  ;;  %2302 = vmatpush.msra.mxu1 %v1848_v22  ;;  %v2463_v39 = vld [vmem:[#allocation14 + $0x360] sm:$0xff] }
 0x27b   :  { %2107 = vmatmul.f32.vlgmr.msrb.gmra.mxu0 %v3676_v8  ;;  %2247 = vmatmul.f32.vlgmr.msrb.gmra.mxu2 %v3669_v44  ;;  %v2383_v41 = vld [vmem:[#allocation14 + $0xe0] sm:$0xff] }
 0x27c   :  { %2251 = vmatpush.msrb.mxu0 %v2019_v42  ;;  %2287 = vmatmul.f32.vlgmr.msra.gmra.mxu3 %v3660_v50  ;;  %v1999_v50 = vld [vmem:[#allocation11 + $0x750] sm:$0xff]  ;;  %v2459_v22 = vld [vmem:[#allocation14 + $0x340] sm:$0xff]  ;;  %v1972_v42 = vld [vmem:[#allocation11 + $0x678] sm:$0xff] }
 0x27d   :  { %2311 = vmatpush.msra.mxu2 %v1956_v5  ;;  %2303 = vmatpush.msra.mxu1 %v1844_v21  ;;  %v2379_v5 = vld [vmem:[#allocation14 + $0xc0] sm:$0xff] }
 0x27e   :  { %2252 = vmatpush.msrb.mxu0 %v2015_v45  ;;  %2621 = vmatpush.msrb.mxu3 %v2415_v20  ;;  %v2455_v21 = vld [vmem:[#allocation14 + $0x320] sm:$0xff]  ;;  %v1968_v45 = vld [vmem:[#allocation11 + $0x658] sm:$0xff] }
 0x27f   :  { %2312 = vmatpush.msra.mxu2 %v1952_v46  ;;  %2304 = vmatpush.msra.mxu1 %v1840_v47  ;;  %v2375_v46 = vld [vmem:[#allocation14 + $0xa0] sm:$0xff] }
 0x280   :  { %2253 = vmatpush.msrb.mxu0 %v2011_v48  ;;  %2622 = vmatpush.msrb.mxu3 %v2411_v23  ;;  %v2451_v47 = vld [vmem:[#allocation14 + $0x300] sm:$0xff]  ;;  %v1964_v48 = vld [vmem:[#allocation11 + $0x638] sm:$0xff]  ;;  %v2384_v23 = vld [vmem:[#allocation14 + $0xe8] sm:$0xff] }
 0x281   :  { %2313 = vmatpush.msra.mxu2 %v1948_v49  ;;  %2305 = vmatpush.msra.mxu1 %v1836_v16  ;;  %v2371_v49 = vld [vmem:[#allocation14 + $0x80] sm:$0xff] }
 0x282   :  { %2254 = vmatpush.msrb.mxu0 %v2007_v17  ;;  %2623 = vmatpush.msrb.mxu3 %v2407_v27  ;;  %v2447_v16 = vld [vmem:[#allocation14 + $0x2e0] sm:$0xff]  ;;  %v1960_v17 = vld [vmem:[#allocation11 + $0x618] sm:$0xff]  ;;  %v2460_v27 = vld [vmem:[#allocation14 + $0x348] sm:$0xff] }
 0x283   :  { %2314 = vmatpush.msra.mxu2 %v1944_v51  ;;  %2306 = vmatpush.msra.mxu1 %v1832_v52  ;;  %v2367_v51 = vld [vmem:[#allocation14 + $0x60] sm:$0xff] }
 0x284   :  { %2187 = vmatmul.f32.vlgmr.msra.gmra.mxu0 %v3676_v8  ;;  %2307 = vmatmul.f32.vlgmr.msra.gmra.mxu1 %v3663_v57  ;;  %v1979_v57 = vld [vmem:[#allocation11 + $0x6b0] sm:$0xff]  ;;  %v2443_v52 = vld [vmem:[#allocation14 + $0x2c0] sm:$0xff] }
 0x285   :  { %2255 = vmatpush.msrb.mxu0 %v2003_v53  ;;  %2315 = vmatpush.msra.mxu2 %v1940_v54  ;;  %v2363_v53 = vld [vmem:[#allocation14 + $0x40] sm:$0xff] }
 0x286   :  { %2641 = vmatpush.msrb.mxu1 %v2479_v30  ;;  %v2359_v54 = vld [vmem:[#allocation14 + $0x20] sm:$0xff] }
 0x287   :  { %2256 = vmatpush.msrb.mxu0 %v1999_v50  ;;  %2316 = vmatpush.msra.mxu2 %v1936_v55  ;;  %v2439_v50 = vld [vmem:[#allocation14 + $0x2a0] sm:$0xff] }
 0x288   :  { %2642 = vmatpush.msrb.mxu1 %v2475_v31  ;;  %v2355_v55 = vld [vmem:[#allocation14] sm:$0xff]  ;;  %v2372_v31 = vld [vmem:[#allocation14 + $0x88] sm:$0xff] }
 0x289   :  { %2257 = vmatpush.msrb.mxu0 %v1995_v63  ;;  %2317 = vmatpush.msra.mxu2 %v1932_v43  ;;  %v2435_v63 = vld [vmem:[#allocation14 + $0x280] sm:$0xff] }
 0x28a   :  { %2643 = vmatpush.msrb.mxu1 %v2471_v34  ;;  %v2543_v43 = vld [vmem:[#allocation14 + $0x5e0] sm:$0xff]  ;;  %v2368_v34 = vld [vmem:[#allocation14 + $0x68] sm:$0xff] }
 0x28b   :  { %2258 = vmatpush.msrb.mxu0 %v1991_v0  ;;  %2318 = vmatpush.msra.mxu2 %v1928_v56  ;;  %v2416_v0 = vld [vmem:[#allocation14 + $0x1e8] sm:$0xff]  ;;  %v2431_v56 = vld [vmem:[#allocation14 + $0x260] sm:$0xff] }
 0x28c   :  { %2644 = vmatpush.msrb.mxu1 %v2467_v36  ;;  %v2511_v20 = vld [vmem:[#allocation14 + $0x4e0] sm:$0xff]  ;;  %v2364_v36 = vld [vmem:[#allocation14 + $0x48] sm:$0xff] }
 0x28d   :  { %2259 = vmatpush.msrb.mxu0 %v1987_v58  ;;  %2319 = vmatpush.msra.mxu2 %v1924_v59  ;;  %v2539_v58 = vld [vmem:[#allocation14 + $0x5c0] sm:$0xff]  ;;  %v2412_v59 = vld [vmem:[#allocation14 + $0x1c8] sm:$0xff] }
 0x28e   :  { %2645 = vmatpush.msrb.mxu1 %v2463_v39  ;;  %v2499_v30 = vld [vmem:[#allocation14 + $0x480] sm:$0xff]  ;;  %v2360_v39 = vld [vmem:[#allocation14 + $0x28] sm:$0xff] }
 0x28f   :  { %2260 = vmatpush.msrb.mxu0 %v1983_v11  ;;  %2320 = vmatpush.msra.mxu2 %v1920_v60  ;;  %v2427_v11 = vld [vmem:[#allocation14 + $0x240] sm:$0xff]  ;;  %v2408_v60 = vld [vmem:[#allocation14 + $0x1a8] sm:$0xff] }
 0x290   :  { %2646 = vmatpush.msrb.mxu1 %v2459_v22  ;;  %v2356_v22 = vld [vmem:[#allocation14 + $0x8] sm:$0xff] }
 0x291   :  { %2261 = vmatpush.msrb.mxu0 %v1979_v57  ;;  %2321 = vmatpush.msra.mxu2 %v1916_v62  ;;  %v2423_v57 = vld [vmem:[#allocation14 + $0x220] sm:$0xff] }
 0x292   :  { %2647 = vmatpush.msrb.mxu1 %v2455_v21  ;;  %v2531_v62 = vld [vmem:[#allocation14 + $0x580] sm:$0xff]  ;;  %v2544_v21 = vld [vmem:[#allocation14 + $0x5e8] sm:$0xff] }
 0x293   :  { %2262 = vmatpush.msrb.mxu0 %v1975_v1  ;;  %2322 = vmatpush.msra.mxu2 %v1912_v2  ;;  %v2404_v1 = vld [vmem:[#allocation14 + $0x188] sm:$0xff]  ;;  %v2419_v2 = vld [vmem:[#allocation14 + $0x200] sm:$0xff] }
 0x294   :  { %2648 = vmatpush.msrb.mxu1 %v2451_v47  ;;  %v2540_v47 = vld [vmem:[#allocation14 + $0x5c8] sm:$0xff] }
 0x295   :  { %2263 = vmatpush.msrb.mxu0 %v1971_v3  ;;  %2323 = vmatpush.msra.mxu2 %v1908_v6  ;;  %v2527_v3 = vld [vmem:[#allocation14 + $0x560] sm:$0xff]  ;;  %v2400_v6 = vld [vmem:[#allocation14 + $0x168] sm:$0xff] }
 0x296   :  { %2649 = vmatpush.msrb.mxu1 %v2447_v16  ;;  %v2536_v16 = vld [vmem:[#allocation14 + $0x5a8] sm:$0xff] }
 0x297   :  { %2264 = vmatpush.msrb.mxu0 %v1967_v7  ;;  %2324 = vmatpush.msra.mxu2 %v1904_v9  ;;  %v2480_v7 = vld [vmem:[#allocation14 + $0x3e8] sm:$0xff]  ;;  %v2523_v9 = vld [vmem:[#allocation14 + $0x540] sm:$0xff] }
 0x298   :  { %2650 = vmatpush.msrb.mxu1 %v2443_v52  ;;  %v2532_v52 = vld [vmem:[#allocation14 + $0x588] sm:$0xff] }
 0x299   :  { %2265 = vmatpush.msrb.mxu0 %v1963_v10  ;;  %2325 = vmatpush.msra.mxu2 %v1900_v13  ;;  %v2396_v10 = vld [vmem:[#allocation14 + $0x148] sm:$0xff] }
 0x29a   :  { %2651 = vmatpush.msrb.mxu1 %v2439_v50  ;;  %v2476_v13 = vld [vmem:[#allocation14 + $0x3c8] sm:$0xff]  ;;  %v2591_v50 = vld [vmem:[#allocation14 + $0x760] sm:$0xff] }
 0x29b   :  { %2266 = vmatpush.msrb.mxu0 %v1959_v14  ;;  %2326 = vmatpush.msra.mxu2 %v1896_v12  ;;  %v2519_v14 = vld [vmem:[#allocation14 + $0x520] sm:$0xff]  ;;  %v2392_v12 = vld [vmem:[#allocation14 + $0x128] sm:$0xff] }
 0x29c   :  { %2267 = vmatmul.f32.vlgmr.msrb.gmra.mxu0 %v3676_v8  ;;  %2327 = vmatmul.f32.vlgmr.msra.gmra.mxu2 %v3669_v44  ;;  %v2403_v44 = vld [vmem:[#allocation14 + $0x180] sm:$0xff] }
 0x29d   :  { %2331 = vmatpush.msra.mxu0 %v2020_v15  ;;  %2624 = vmatpush.msrb.mxu3 %v2403_v44  ;;  %v2472_v15 = vld [vmem:[#allocation14 + $0x3a8] sm:$0xff] }
 0x29e   :  { %2652 = vmatpush.msrb.mxu1 %v2435_v63  ;;  %2661 = vmatpush.msrb.mxu2 %v2543_v43  ;;  %v2376_v44 = vld [vmem:[#allocation14 + $0xa8] sm:$0xff]  ;;  %v2587_v63 = vld [vmem:[#allocation14 + $0x740] sm:$0xff] }
 0x29f   :  { %2332 = vmatpush.msra.mxu0 %v2016_v61  ;;  %2625 = vmatpush.msrb.mxu3 %v2399_v29  ;;  %v2515_v61 = vld [vmem:[#allocation14 + $0x500] sm:$0xff]  ;;  %v2456_v29 = vld [vmem:[#allocation14 + $0x328] sm:$0xff] }
 0x2a0   :  { %2653 = vmatpush.msrb.mxu1 %v2431_v56  ;;  %2662 = vmatpush.msrb.mxu2 %v2539_v58  ;;  %v2524_v56 = vld [vmem:[#allocation14 + $0x548] sm:$0xff]  ;;  %v2583_v58 = vld [vmem:[#allocation14 + $0x720] sm:$0xff] }
 0x2a1   :  { %2333 = vmatpush.msra.mxu0 %v2012_v18  ;;  %2626 = vmatpush.msrb.mxu3 %v2395_v33  ;;  %v2388_v18 = vld [vmem:[#allocation14 + $0x108] sm:$0xff]  ;;  %v2495_v33 = vld [vmem:[#allocation14 + $0x460] sm:$0xff] }
 0x2a2   :  { %2654 = vmatpush.msrb.mxu1 %v2427_v11  ;;  %v2579_v11 = vld [vmem:[#allocation14 + $0x700] sm:$0xff] }
 0x2a3   :  { %2334 = vmatpush.msra.mxu0 %v2008_v19  ;;  %2627 = vmatpush.msrb.mxu3 %v2391_v4  ;;  %v2468_v19 = vld [vmem:[#allocation14 + $0x388] sm:$0xff]  ;;  %v2491_v4 = vld [vmem:[#allocation14 + $0x440] sm:$0xff] }
 0x2a4   :  { %2655 = vmatpush.msrb.mxu1 %v2423_v57  ;;  %v2516_v57 = vld [vmem:[#allocation14 + $0x508] sm:$0xff] }
 0x2a5   :  { %2335 = vmatpush.msra.mxu0 %v2004_v24  ;;  %2628 = vmatpush.msrb.mxu3 %v2387_v38  ;;  %v2464_v24 = vld [vmem:[#allocation14 + $0x368] sm:$0xff]  ;;  %v2487_v38 = vld [vmem:[#allocation14 + $0x420] sm:$0xff] }
 0x2a6   :  { %2656 = vmatpush.msrb.mxu1 %v2419_v2  ;;  %v2512_v2 = vld [vmem:[#allocation14 + $0x4e8] sm:$0xff] }
 0x2a7   :  { %2336 = vmatpush.msra.mxu0 %v2000_v25  ;;  %2629 = vmatpush.msrb.mxu3 %v2383_v41  ;;  %v2507_v25 = vld [vmem:[#allocation14 + $0x4c0] sm:$0xff] }
 0x2a8   :  { %2721 = vmatpush.msra.mxu1 %v2480_v7  ;;  %v2483_v41 = vld [vmem:[#allocation14 + $0x400] sm:$0xff]  ;;  %v2508_v7 = vld [vmem:[#allocation14 + $0x4c8] sm:$0xff] }
 0x2a9   :  { %2337 = vmatpush.msra.mxu0 %v1996_v26  ;;  %2630 = vmatpush.msrb.mxu3 %v2379_v5  ;;  %v2380_v26 = vld [vmem:[#allocation14 + $0xc8] sm:$0xff]  ;;  %v2607_v5 = vld [vmem:[#allocation14 + $0x7e0] sm:$0xff] }
 0x2aa   :  { %2722 = vmatpush.msra.mxu1 %v2476_v13 }
 0x2ab   :  { %2338 = vmatpush.msra.mxu0 %v1992_v28  ;;  %2631 = vmatpush.msrb.mxu3 %v2375_v46  ;;  %v2503_v28 = vld [vmem:[#allocation14 + $0x4a0] sm:$0xff] }
 0x2ac   :  { %2723 = vmatpush.msra.mxu1 %v2472_v15  ;;  %v2603_v46 = vld [vmem:[#allocation14 + $0x7c0] sm:$0xff] }
 0x2ad   :  { %2339 = vmatpush.msra.mxu0 %v1988_v32  ;;  %2632 = vmatpush.msrb.mxu3 %v2371_v49  ;;  %v2452_v32 = vld [vmem:[#allocation14 + $0x308] sm:$0xff]  ;;  %v2599_v49 = vld [vmem:[#allocation14 + $0x7a0] sm:$0xff] }
 0x2ae   :  { %2724 = vmatpush.msra.mxu1 %v2468_v19  ;;  %v2563_v19 = vld [vmem:[#allocation14 + $0x680] sm:$0xff] }
 0x2af   :  { %2340 = vmatpush.msra.mxu0 %v1984_v35  ;;  %2633 = vmatpush.msrb.mxu3 %v2367_v51  ;;  %v2448_v35 = vld [vmem:[#allocation14 + $0x2e8] sm:$0xff]  ;;  %v2595_v51 = vld [vmem:[#allocation14 + $0x780] sm:$0xff] }
 0x2b0   :  { %2725 = vmatpush.msra.mxu1 %v2464_v24  ;;  %v2559_v24 = vld [vmem:[#allocation14 + $0x660] sm:$0xff] }
 0x2b1   :  { %2341 = vmatpush.msra.mxu0 %v1980_v37  ;;  %2634 = vmatpush.msrb.mxu3 %v2363_v53  ;;  %v2444_v37 = vld [vmem:[#allocation14 + $0x2c8] sm:$0xff]  ;;  %v3686_v53 = vld [vmem:[#allocation13] sm:$0xf] }
 0x2b2   :  { %2726 = vmatpush.msra.mxu1 %v2460_v27  ;;  %v2023_v43 = vperm.slane %v3686_v53, 0  ;;  %v2555_v27 = vld [vmem:[#allocation14 + $0x640] sm:$0xff] }
 0x2b3   :  { %2342 = vmatpush.msra.mxu0 %v1976_v40  ;;  %2635 = vmatpush.msrb.mxu3 %v2359_v54  ;;  %v2440_v40 = vld [vmem:[#allocation14 + $0x2a8] sm:$0xff] }
 0x2b4   :  { %2727 = vmatpush.msra.mxu1 %v2456_v29  ;;  %v2420_v54 = vld [vmem:[#allocation14 + $0x208] sm:$0xff] }
 0x2b5   :  { %2343 = vmatpush.msra.mxu0 %v1972_v42  ;;  %2636 = vmatpush.msrb.mxu3 %v2355_v55  ;;  %v2436_v42 = vld [vmem:[#allocation14 + $0x288] sm:$0xff] }
 0x2b6   :  { %2728 = vmatpush.msra.mxu1 %v2452_v32  ;;  %v2528_v55 = vld [vmem:[#allocation14 + $0x568] sm:$0xff] }
 0x2b7   :  { %2344 = vmatpush.msra.mxu0 %v1968_v45  ;;  %2701 = vmatpush.msra.mxu3 %v2416_v0  ;;  %v2432_v45 = vld [vmem:[#allocation14 + $0x268] sm:$0xff] }
 0x2b8   :  { %2729 = vmatpush.msra.mxu1 %v2448_v35  ;;  %v2488_v32 = vld [vmem:[#allocation14 + $0x428] sm:$0xff]  ;;  %v2547_v35 = vld [vmem:[#allocation14 + $0x600] sm:$0xff] }
 0x2b9   :  { %2345 = vmatpush.msra.mxu0 %v1964_v48  ;;  %2702 = vmatpush.msra.mxu3 %v2412_v59  ;;  %v2428_v48 = vld [vmem:[#allocation14 + $0x248] sm:$0xff] }
 0x2ba   :  { %2730 = vmatpush.msra.mxu1 %v2444_v37  ;;  %v2520_v59 = vld [vmem:[#allocation14 + $0x528] sm:$0xff]  ;;  %v2413_v37 = vld [vmem:[#allocation14 + $0x1d0] sm:$0xff] }
 0x2bb   :  { %2346 = vmatpush.msra.mxu0 %v1960_v17  ;;  %2703 = vmatpush.msra.mxu3 %v2408_v60  ;;  %v2424_v17 = vld [vmem:[#allocation14 + $0x228] sm:$0xff] }
 0x2bc   :  { %2347 = vmatmul.f32.vlgmr.msra.gmra.mxu0 %v3676_v8  ;;  %v2535_v8 = vld [vmem:[#allocation14 + $0x5a0] sm:$0xff]  ;;  %2731 = vmatpush.msra.mxu1 %v2440_v40  ;;  %v2604_v40 = vld [vmem:[#allocation14 + $0x7c8] sm:$0xff] }
 0x2bd   :  { %2663 = vmatpush.msrb.mxu2 %v2535_v8  ;;  %2704 = vmatpush.msra.mxu3 %v2404_v1  ;;  %v2048_v0 = vpop.f32.mrf.mxu3 }
 0x2be   :  { %2732 = vmatpush.msra.mxu1 %v2436_v42  ;;  %2681 = vmatpush.msrb.mxu0 %v2607_v5  ;;  %v2049_v8 = vadd.f32 %v2048_v0, %v2023_v43  ;;  %v2401_v42 = vld [vmem:[#allocation14 + $0x170] sm:$0xff]  ;;  %v2596_v5 = vld [vmem:[#allocation14 + $0x788] sm:$0xff] }
 0x2bf   :  { %2664 = vmatpush.msrb.mxu2 %v2531_v62  ;;  %2705 = vmatpush.msra.mxu3 %v2400_v6  ;;  %v2068_v60 = vpop.f32.mrf.mxu1  ;;  %v2575_v62 = vld [vmem:[#allocation14 + $0x6e0] sm:$0xff]  ;;  %v2465_v43 = vld [vmem:[#allocation14 + $0x370] sm:$0xff]  ;;  %v2580_v0 = vld [vmem:[#allocation14 + $0x708] sm:$0xff] }
 0x2c0   :  { %2733 = vmatpush.msra.mxu1 %v2432_v45  ;;  %2682 = vmatpush.msrb.mxu0 %v2603_v46  ;;  %v2069_v6 = vadd.f32 %v2068_v60, %v2049_v8  ;;  %v2397_v46 = vld [vmem:[#allocation14 + $0x150] sm:$0xff]  ;;  %v2576_v8 = vld [vmem:[#allocation14 + $0x6e8] sm:$0xff] }
 0x2c1   :  { %2665 = vmatpush.msrb.mxu2 %v2527_v3  ;;  %2706 = vmatpush.msra.mxu3 %v2396_v10  ;;  %v2571_v3 = vld [vmem:[#allocation14 + $0x6c0] sm:$0xff]  ;;  %v2377_v60 = vld [vmem:[#allocation14 + $0xb0] sm:$0xff] }
 0x2c2   :  { %2734 = vmatpush.msra.mxu1 %v2428_v48  ;;  %2683 = vmatpush.msrb.mxu0 %v2599_v49  ;;  %v2567_v10 = vld [vmem:[#allocation14 + $0x6a0] sm:$0xff]  ;;  %v2592_v48 = vld [vmem:[#allocation14 + $0x768] sm:$0xff]  ;;  %v2393_v49 = vld [vmem:[#allocation14 + $0x130] sm:$0xff] }
 0x2c3   :  { %2666 = vmatpush.msrb.mxu2 %v2523_v9  ;;  %2707 = vmatpush.msra.mxu3 %v2392_v12  ;;  %v2024_v9 = vperm.slane %v3686_v53, 1  ;;  %v2504_v12 = vld [vmem:[#allocation14 + $0x4a8] sm:$0xff] }
 0x2c4   :  { %2735 = vmatpush.msra.mxu1 %v2424_v17  ;;  %2684 = vmatpush.msrb.mxu0 %v2595_v51  ;;  %v2588_v17 = vld [vmem:[#allocation14 + $0x748] sm:$0xff]  ;;  %v2025_v51 = vperm.slane %v3686_v53, 2 }
 0x2c5   :  { %2667 = vmatpush.msrb.mxu2 %v2519_v14  ;;  %2708 = vmatpush.msra.mxu3 %v2388_v18  ;;  %v2128_v13 = vpop.f32.mrf.mxu3 }
 0x2c6   :  { %2736 = vmatpush.msra.mxu1 %v2420_v54  ;;  %2685 = vmatpush.msrb.mxu0 %v2591_v50  ;;  %v2129_v18 = vadd.f32 %v2128_v13, %v2024_v9  ;;  %v2469_v50 = vld [vmem:[#allocation14 + $0x390] sm:$0xff] }
 0x2c7   :  { %2668 = vmatpush.msrb.mxu2 %v2515_v61  ;;  %2709 = vmatpush.msra.mxu3 %v2384_v23  ;;  %v2148_v23 = vpop.f32.mrf.mxu1 }
 0x2c8   :  { %2686 = vmatpush.msrb.mxu0 %v2587_v63  ;;  %v2385_v63 = vld [vmem:[#allocation14 + $0xf0] sm:$0xff] }
 0x2c9   :  { %2669 = vmatpush.msrb.mxu2 %v2511_v20  ;;  %2710 = vmatpush.msra.mxu3 %v2380_v26  ;;  %v2500_v20 = vld [vmem:[#allocation14 + $0x488] sm:$0xff] }
 0x2ca   :  { %2687 = vmatpush.msrb.mxu0 %v2583_v58  ;;  %v2381_v58 = vld [vmem:[#allocation14 + $0xd0] sm:$0xff] }
 0x2cb   :  { %2670 = vmatpush.msrb.mxu2 %v2507_v25  ;;  %2711 = vmatpush.msra.mxu3 %v2376_v44  ;;  %v2496_v25 = vld [vmem:[#allocation14 + $0x468] sm:$0xff]  ;;  %v2149_v44 = vadd.f32 %v2148_v23, %v2129_v18  ;;  %v2445_v18 = vld [vmem:[#allocation14 + $0x2d0] sm:$0xff] }
 0x2cc   :  { %2688 = vmatpush.msrb.mxu0 %v2579_v11  ;;  %v2461_v11 = vld [vmem:[#allocation14 + $0x350] sm:$0xff] }
 0x2cd   :  { %2671 = vmatpush.msrb.mxu2 %v2503_v28  ;;  %2712 = vmatpush.msra.mxu3 %v2372_v31  ;;  %v2492_v28 = vld [vmem:[#allocation14 + $0x448] sm:$0xff]  ;;  %v2551_v31 = vld [vmem:[#allocation14 + $0x620] sm:$0xff]  ;;  %v2441_v23 = vld [vmem:[#allocation14 + $0x2b0] sm:$0xff] }
 0x2ce   :  { %2689 = vmatpush.msrb.mxu0 %v2575_v62  ;;  %v2457_v62 = vld [vmem:[#allocation14 + $0x330] sm:$0xff] }
 0x2cf   :  { %2672 = vmatpush.msrb.mxu2 %v2499_v30  ;;  %2713 = vmatpush.msra.mxu3 %v2368_v34  ;;  %v2417_v30 = vld [vmem:[#allocation14 + $0x1f0] sm:$0xff] }
 0x2d0   :  { %2690 = vmatpush.msrb.mxu0 %v2571_v3  ;;  %v2373_v3 = vld [vmem:[#allocation14 + $0x90] sm:$0xff] }
 0x2d1   :  { %2673 = vmatpush.msrb.mxu2 %v2495_v33  ;;  %2714 = vmatpush.msra.mxu3 %v2364_v36 }
 0x2d2   :  { %2691 = vmatpush.msrb.mxu0 %v2567_v10  ;;  %v2369_v10 = vld [vmem:[#allocation14 + $0x70] sm:$0xff] }
 0x2d3   :  { %2674 = vmatpush.msrb.mxu2 %v2491_v4  ;;  %2715 = vmatpush.msra.mxu3 %v2360_v39  ;;  %v2484_v4 = vld [vmem:[#allocation14 + $0x408] sm:$0xff]  ;;  %v2409_v39 = vld [vmem:[#allocation14 + $0x1b0] sm:$0xff] }
 0x2d4   :  { %2692 = vmatpush.msrb.mxu0 %v2563_v19  ;;  %v2361_v19 = vld [vmem:[#allocation14 + $0x30] sm:$0xff] }
 0x2d5   :  { %2675 = vmatpush.msrb.mxu2 %v2487_v38  ;;  %2716 = vmatpush.msra.mxu3 %v2356_v22  ;;  %v2608_v38 = vld [vmem:[#allocation14 + $0x7e8] sm:$0xff] }
 0x2d6   :  { %2693 = vmatpush.msrb.mxu0 %v2559_v24  ;;  %v2600_v22 = vld [vmem:[#allocation14 + $0x7a8] sm:$0xff] }
 0x2d7   :  { %2676 = vmatpush.msrb.mxu2 %v2483_v41  ;;  %v2405_v41 = vld [vmem:[#allocation14 + $0x190] sm:$0xff]  ;;  %v2556_v24 = vld [vmem:[#allocation14 + $0x648] sm:$0xff] }
 0x2d8   :  { %2694 = vmatpush.msrb.mxu0 %v2555_v27  ;;  %v2552_v27 = vld [vmem:[#allocation14 + $0x628] sm:$0xff] }
 0x2d9   :  { %2741 = vmatpush.msra.mxu2 %v2544_v21  ;;  %v2481_v21 = vld [vmem:[#allocation14 + $0x3f0] sm:$0xff] }
 0x2da   :  { %2695 = vmatpush.msrb.mxu0 %v2551_v31  ;;  %v2414_v31 = vld [vmem:[#allocation14 + $0x1d8] sm:$0xff] }
 0x2db   :  { %2742 = vmatpush.msra.mxu2 %v2540_v47  ;;  %v2477_v47 = vld [vmem:[#allocation14 + $0x3d0] sm:$0xff] }
 0x2dc   :  { %2696 = vmatpush.msrb.mxu0 %v2547_v35  ;;  %v2429_v35 = vld [vmem:[#allocation14 + $0x250] sm:$0xff] }
 0x2dd   :  { %2743 = vmatpush.msra.mxu2 %v2536_v16  ;;  %v2088_v1 = vpop.f32.mrf.mxu2  ;;  %v2473_v16 = vld [vmem:[#allocation14 + $0x3b0] sm:$0xff]  ;;  %v2208_v54 = vpop.f32.mrf.mxu3 }
 0x2de   :  { %v2089_v14 = vadd.f32 %v2088_v1, %v2069_v6  ;;  %2761 = vmatpush.msra.mxu0 %v2608_v38  ;;  %v2572_v1 = vld [vmem:[#allocation14 + $0x6c8] sm:$0xff]  ;;  %v2453_v6 = vld [vmem:[#allocation14 + $0x310] sm:$0xff]  ;;  %v2406_v38 = vld [vmem:[#allocation14 + $0x198] sm:$0xff] }
 0x2df   :  { %2744 = vmatpush.msra.mxu2 %v2532_v52  ;;  %v2389_v52 = vld [vmem:[#allocation14 + $0x110] sm:$0xff] }
 0x2e0   :  { %2762 = vmatpush.msra.mxu0 %v2604_v40  ;;  %v2421_v40 = vld [vmem:[#allocation14 + $0x210] sm:$0xff] }
 0x2e1   :  { %2745 = vmatpush.msra.mxu2 %v2528_v55  ;;  %v2584_v55 = vld [vmem:[#allocation14 + $0x728] sm:$0xff] }
 0x2e2   :  { %2763 = vmatpush.msra.mxu0 %v2600_v22  ;;  %v2402_v22 = vld [vmem:[#allocation14 + $0x178] sm:$0xff] }
 0x2e3   :  { %2746 = vmatpush.msra.mxu2 %v2524_v56  ;;  %v2209_v56 = vadd.f32 %v2208_v54, %v2025_v51  ;;  %v2517_v51 = vld [vmem:[#allocation14 + $0x510] sm:$0xff]  ;;  %v2470_v54 = vld [vmem:[#allocation14 + $0x398] sm:$0xff] }
 0x2e4   :  { %2764 = vmatpush.msra.mxu0 %v2596_v5  ;;  %v2525_v5 = vld [vmem:[#allocation14 + $0x550] sm:$0xff] }
 0x2e5   :  { %2747 = vmatpush.msra.mxu2 %v2520_v59  ;;  %v2168_v26 = vpop.f32.mrf.mxu2  ;;  %v2228_v59 = vpop.f32.mrf.mxu1 }
 0x2e6   :  { %v2169_v29 = vadd.f32 %v2168_v26, %v2149_v44  ;;  %2765 = vmatpush.msra.mxu0 %v2592_v48  ;;  %v2437_v26 = vld [vmem:[#allocation14 + $0x290] sm:$0xff]  ;;  %v2394_v48 = vld [vmem:[#allocation14 + $0x138] sm:$0xff] }
 0x2e7   :  { %2748 = vmatpush.msra.mxu2 %v2516_v57  ;;  %v2545_v44 = vld [vmem:[#allocation14 + $0x5f0] sm:$0xff] }
 0x2e8   :  { %2766 = vmatpush.msra.mxu0 %v2588_v17 }
 0x2e9   :  { %2749 = vmatpush.msra.mxu2 %v2512_v2  ;;  %v2229_v2 = vadd.f32 %v2228_v59, %v2209_v56  ;;  %v2382_v56 = vld [vmem:[#allocation14 + $0xd8] sm:$0xff] }
 0x2ea   :  { %2767 = vmatpush.msra.mxu0 %v2584_v55  ;;  %v2386_v55 = vld [vmem:[#allocation14 + $0xf8] sm:$0xff] }
 0x2eb   :  { %2750 = vmatpush.msra.mxu2 %v2508_v7  ;;  %v2568_v7 = vld [vmem:[#allocation14 + $0x6a8] sm:$0xff] }
 0x2ec   :  { %2768 = vmatpush.msra.mxu0 %v2580_v0 }
 0x2ed   :  { %2751 = vmatpush.msra.mxu2 %v2504_v12 }
 0x2ee   :  { %2769 = vmatpush.msra.mxu0 %v2576_v8  ;;  %v2378_v8 = vld [vmem:[#allocation14 + $0xb8] sm:$0xff] }
 0x2ef   :  { %2752 = vmatpush.msra.mxu2 %v2500_v20  ;;  %v2560_v20 = vld [vmem:[#allocation14 + $0x668] sm:$0xff] }
 0x2f0   :  { %2770 = vmatpush.msra.mxu0 %v2572_v1  ;;  %v2374_v1 = vld [vmem:[#allocation14 + $0x98] sm:$0xff] }
 0x2f1   :  { %2753 = vmatpush.msra.mxu2 %v2496_v25  ;;  %v2357_v25 = vld [vmem:[#allocation14 + $0x10] sm:$0xff] }
 0x2f2   :  { %2771 = vmatpush.msra.mxu0 %v2568_v7  ;;  %v2497_v7 = vld [vmem:[#allocation14 + $0x470] sm:$0xff] }
 0x2f3   :  { %2754 = vmatpush.msra.mxu2 %v2492_v28  ;;  %v2418_v28 = vld [vmem:[#allocation14 + $0x1f8] sm:$0xff] }
 0x2f5   :  { %2755 = vmatpush.msra.mxu2 %v2488_v32  ;;  %v2548_v32 = vld [vmem:[#allocation14 + $0x608] sm:$0xff] }
 0x2f7   :  { %2756 = vmatpush.msra.mxu2 %v2484_v4  ;;  %v2410_v4 = vld [vmem:[#allocation14 + $0x1b8] sm:$0xff] }
 0x2f8   :  { %v2108_v15 = vpop.f32.mrf.mxu0 }
 0x2f9   :  { %v2109_v61 = vadd.f32 %v2108_v15, %v2089_v14  ;;  %v2449_v14 = vld [vmem:[#allocation14 + $0x2f0] sm:$0xff] }
 0x2fa   :  { %v2365_v15 = vld [vmem:[#allocation14 + $0x50] sm:$0xff] }
 0x2fb   :  { %3153 = vtanh.f32 %v2109_v61  ;;  %v2564_v61 = vld [vmem:[#allocation14 + $0x688] sm:$0xff] }
 0x2fc   :  { %2772 = vmatpush.msra.mxu0 %v2564_v61  ;;  %v2489_v61 = vld [vmem:[#allocation14 + $0x430] sm:$0xff] }
 0x2fe   :  { %v2248_v57 = vpop.f32.mrf.mxu2  ;;  %2773 = vmatpush.msra.mxu0 %v2560_v20  ;;  %v2485_v20 = vld [vmem:[#allocation14 + $0x410] sm:$0xff] }
 0x2ff   :  { %v2249_v9 = vadd.f32 %v2248_v57, %v2229_v2  ;;  %v2288_v17 = vpop.f32.mrf.mxu3  ;;  %v2458_v57 = vld [vmem:[#allocation14 + $0x338] sm:$0xff] }
 0x300   :  { %2774 = vmatpush.msra.mxu0 %v2556_v24  ;;  %v2438_v24 = vld [vmem:[#allocation14 + $0x298] sm:$0xff] }
 0x301   :  { %v3690_v33 = vpop.eup %3153  ;;  %v2188_v34 = vpop.f32.mrf.mxu0 }
 0x302   :  { %v2189_v36 = vadd.f32 %v2188_v34, %v2169_v29  ;;  %2637 = vmatmul.f32.vlgmr.msrb.gmra.mxu3 %v3690_v33  ;;  %v2433_v29 = vld [vmem:[#allocation14 + $0x270] sm:$0xff]  ;;  %2775 = vmatpush.msra.mxu0 %v2552_v27  ;;  %v2308_v0 = vpop.f32.mrf.mxu1  ;;  %v2546_v27 = vld [vmem:[#allocation14 + $0x5f8] sm:$0xff] }
 0x303   :  { %2781 = vmatpush.msrb.mxu3 %v2417_v30  ;;  %v2541_v34 = vld [vmem:[#allocation14 + $0x5d0] sm:$0xff] }
 0x304   :  { %3155 = vtanh.f32 %v2189_v36  ;;  %v2537_v36 = vld [vmem:[#allocation14 + $0x5b0] sm:$0xff]  ;;  %2776 = vmatpush.msra.mxu0 %v2548_v32 }
 0x305   :  { %2782 = vmatpush.msrb.mxu3 %v2413_v37  ;;  %v2425_v37 = vld [vmem:[#allocation14 + $0x230] sm:$0xff] }
 0x306   :  { %v2601_v32 = vld [vmem:[#allocation14 + $0x7b0] sm:$0xff] }
 0x307   :  { %2783 = vmatpush.msrb.mxu3 %v2409_v39  ;;  %v2533_v39 = vld [vmem:[#allocation14 + $0x590] sm:$0xff] }
 0x309   :  { %2784 = vmatpush.msrb.mxu3 %v2405_v41  ;;  %v2529_v41 = vld [vmem:[#allocation14 + $0x570] sm:$0xff] }
 0x30a   :  { %v3693_v45 = vpop.eup %3155  ;;  %2717 = vmatmul.f32.vlgmr.msra.gmra.mxu3 %v3690_v33 }
 0x30b   :  { %2657 = vmatmul.f32.vlgmr.msrb.gmra.mxu1 %v3693_v45  ;;  %2785 = vmatpush.msrb.mxu3 %v2401_v42  ;;  %v2482_v42 = vld [vmem:[#allocation14 + $0x3f8] sm:$0xff] }
 0x30c   :  { %2801 = vmatpush.msrb.mxu1 %v2481_v21  ;;  %v2398_v21 = vld [vmem:[#allocation14 + $0x158] sm:$0xff] }
 0x30d   :  { %2786 = vmatpush.msrb.mxu3 %v2397_v46  ;;  %v2478_v46 = vld [vmem:[#allocation14 + $0x3d8] sm:$0xff] }
 0x30e   :  { %2802 = vmatpush.msrb.mxu1 %v2477_v47  ;;  %v2521_v47 = vld [vmem:[#allocation14 + $0x530] sm:$0xff] }
 0x30f   :  { %2787 = vmatpush.msrb.mxu3 %v2393_v49  ;;  %v2026_v49 = vperm.slane %v3686_v53, 3  ;;  %v2509_v53 = vld [vmem:[#allocation14 + $0x4d0] sm:$0xff] }
 0x310   :  { %2803 = vmatpush.msrb.mxu1 %v2473_v16  ;;  %v2474_v16 = vld [vmem:[#allocation14 + $0x3b8] sm:$0xff] }
 0x311   :  { %2788 = vmatpush.msrb.mxu3 %v2389_v52  ;;  %v2390_v52 = vld [vmem:[#allocation14 + $0x118] sm:$0xff] }
 0x312   :  { %2804 = vmatpush.msrb.mxu1 %v2469_v50  ;;  %v2513_v50 = vld [vmem:[#allocation14 + $0x4f0] sm:$0xff] }
 0x313   :  { %2737 = vmatmul.f32.vlgmr.msra.gmra.mxu1 %v3693_v45  ;;  %2789 = vmatpush.msrb.mxu3 %v2385_v63  ;;  %v2289_v63 = vadd.f32 %v2288_v17, %v2026_v49  ;;  %v2569_v49 = vld [vmem:[#allocation14 + $0x6b0] sm:$0xff]  ;;  %v2502_v17 = vld [vmem:[#allocation14 + $0x498] sm:$0xff] }
 0x314   :  { %2805 = vmatpush.msrb.mxu1 %v2465_v43  ;;  %v2466_v43 = vld [vmem:[#allocation14 + $0x378] sm:$0xff] }
 0x315   :  { %2790 = vmatpush.msrb.mxu3 %v2381_v58  ;;  %v2462_v58 = vld [vmem:[#allocation14 + $0x358] sm:$0xff] }
 0x316   :  { %2806 = vmatpush.msrb.mxu1 %v2461_v11  ;;  %v2505_v11 = vld [vmem:[#allocation14 + $0x4b0] sm:$0xff] }
 0x317   :  { %2791 = vmatpush.msrb.mxu3 %v2377_v60  ;;  %v2309_v60 = vadd.f32 %v2308_v0, %v2289_v63  ;;  %v2490_v63 = vld [vmem:[#allocation14 + $0x438] sm:$0xff] }
 0x318   :  { %2807 = vmatpush.msrb.mxu1 %v2457_v62  ;;  %v2501_v62 = vld [vmem:[#allocation14 + $0x490] sm:$0xff]  ;;  %v2486_v0 = vld [vmem:[#allocation14 + $0x418] sm:$0xff] }
 0x319   :  { %v2268_v13 = vpop.f32.mrf.mxu0  ;;  %2792 = vmatpush.msrb.mxu3 %v2373_v3  ;;  %v2454_v3 = vld [vmem:[#allocation14 + $0x318] sm:$0xff] }
 0x31a   :  { %v2269_v12 = vadd.f32 %v2268_v13, %v2249_v9  ;;  %2808 = vmatpush.msrb.mxu1 %v2453_v6  ;;  %v2370_v9 = vld [vmem:[#allocation14 + $0x78] sm:$0xff] }
 0x31b   :  { %2793 = vmatpush.msrb.mxu3 %v2369_v10  ;;  %v2450_v13 = vld [vmem:[#allocation14 + $0x2f8] sm:$0xff] }
 0x31c   :  { %3157 = vtanh.f32 %v2269_v12  ;;  %2809 = vmatpush.msrb.mxu1 %v2449_v14  ;;  %v2493_v14 = vld [vmem:[#allocation14 + $0x450] sm:$0xff]  ;;  %v2366_v12 = vld [vmem:[#allocation14 + $0x58] sm:$0xff] }
 0x31d   :  { %2794 = vmatpush.msrb.mxu3 %v2365_v15  ;;  %v2446_v15 = vld [vmem:[#allocation14 + $0x2d8] sm:$0xff] }
 0x31e   :  { %2810 = vmatpush.msrb.mxu1 %v2445_v18  ;;  %v2362_v18 = vld [vmem:[#allocation14 + $0x38] sm:$0xff] }
 0x31f   :  { %2795 = vmatpush.msrb.mxu3 %v2361_v19  ;;  %v2328_v59 = vpop.f32.mrf.mxu2  ;;  %v2442_v19 = vld [vmem:[#allocation14 + $0x2b8] sm:$0xff] }
 0x320   :  { %2811 = vmatpush.msrb.mxu1 %v2441_v23  ;;  %v2329_v2 = vadd.f32 %v2328_v59, %v2309_v60  ;;  %v2358_v23 = vld [vmem:[#allocation14 + $0x18] sm:$0xff] }
 0x321   :  { %2796 = vmatpush.msrb.mxu3 %v2357_v25  ;;  %v2609_v25 = vld [vmem:[#allocation14 + $0x7f0] sm:$0xff]  ;;  %v2598_v59 = vld [vmem:[#allocation14 + $0x798] sm:$0xff] }
 0x322   :  { %v3699_v30 = vpop.eup %3157  ;;  %2812 = vmatpush.msrb.mxu1 %v2437_v26  ;;  %2797 = vmatmul.f32.vlgmr.msrb.gmra.mxu3 %v3690_v33  ;;  %v2586_v60 = vld [vmem:[#allocation14 + $0x738] sm:$0xff] }
 0x323   :  { %2677 = vmatmul.f32.vlgmr.msrb.gmra.mxu2 %v3699_v30  ;;  %2861 = vmatpush.msra.mxu3 %v2418_v28  ;;  %v2434_v28 = vld [vmem:[#allocation14 + $0x278] sm:$0xff] }
 0x324   :  { %2821 = vmatpush.msrb.mxu2 %v2545_v44  ;;  %2813 = vmatpush.msrb.mxu1 %v2433_v29  ;;  %v2605_v44 = vld [vmem:[#allocation14 + $0x7d0] sm:$0xff]  ;;  %v2542_v29 = vld [vmem:[#allocation14 + $0x5d8] sm:$0xff] }
 0x325   :  { %2862 = vmatpush.msra.mxu3 %v2414_v31  ;;  %v2430_v31 = vld [vmem:[#allocation14 + $0x258] sm:$0xff] }
 0x326   :  { %2822 = vmatpush.msrb.mxu2 %v2541_v34  ;;  %2814 = vmatpush.msrb.mxu1 %v2429_v35  ;;  %v2538_v34 = vld [vmem:[#allocation14 + $0x5b8] sm:$0xff] }
 0x327   :  { %2863 = vmatpush.msra.mxu3 %v2410_v4  ;;  %v2426_v35 = vld [vmem:[#allocation14 + $0x238] sm:$0xff]  ;;  %v2597_v4 = vld [vmem:[#allocation14 + $0x790] sm:$0xff] }
 0x328   :  { %2823 = vmatpush.msrb.mxu2 %v2537_v36  ;;  %2815 = vmatpush.msrb.mxu1 %v2425_v37  ;;  %v2534_v36 = vld [vmem:[#allocation14 + $0x598] sm:$0xff] }
 0x329   :  { %2864 = vmatpush.msra.mxu3 %v2406_v38  ;;  %v2422_v37 = vld [vmem:[#allocation14 + $0x218] sm:$0xff]  ;;  %v2593_v38 = vld [vmem:[#allocation14 + $0x770] sm:$0xff] }
 0x32a   :  { %2824 = vmatpush.msrb.mxu2 %v2533_v39  ;;  %2816 = vmatpush.msrb.mxu1 %v2421_v40  ;;  %v2530_v39 = vld [vmem:[#allocation14 + $0x578] sm:$0xff] }
 0x32b   :  { %2757 = vmatmul.f32.vlgmr.msra.gmra.mxu2 %v3699_v30  ;;  %2817 = vmatmul.f32.vlgmr.msrb.gmra.mxu1 %v3693_v45  ;;  %v2526_v40 = vld [vmem:[#allocation14 + $0x558] sm:$0xff] }
 0x32c   :  { %2825 = vmatpush.msrb.mxu2 %v2529_v41  ;;  %2865 = vmatpush.msra.mxu3 %v2402_v22  ;;  %v2585_v41 = vld [vmem:[#allocation14 + $0x730] sm:$0xff]  ;;  %v2522_v22 = vld [vmem:[#allocation14 + $0x538] sm:$0xff] }
 0x32d   :  { %2881 = vmatpush.msra.mxu1 %v2482_v42  ;;  %v2581_v42 = vld [vmem:[#allocation14 + $0x710] sm:$0xff] }
 0x32e   :  { %2826 = vmatpush.msrb.mxu2 %v2525_v5  ;;  %2866 = vmatpush.msra.mxu3 %v2398_v21  ;;  %v2518_v5 = vld [vmem:[#allocation14 + $0x518] sm:$0xff]  ;;  %v2577_v21 = vld [vmem:[#allocation14 + $0x6f0] sm:$0xff] }
 0x32f   :  { %2882 = vmatpush.msra.mxu1 %v2478_v46  ;;  %v2514_v46 = vld [vmem:[#allocation14 + $0x4f8] sm:$0xff] }
 0x330   :  { %2827 = vmatpush.msrb.mxu2 %v2521_v47  ;;  %2867 = vmatpush.msra.mxu3 %v2394_v48  ;;  %v2573_v47 = vld [vmem:[#allocation14 + $0x6d0] sm:$0xff]  ;;  %v2510_v48 = vld [vmem:[#allocation14 + $0x4d8] sm:$0xff] }
 0x331   :  { %2883 = vmatpush.msra.mxu1 %v2474_v16  ;;  %v2565_v16 = vld [vmem:[#allocation14 + $0x690] sm:$0xff] }
 0x332   :  { %2828 = vmatpush.msrb.mxu2 %v2517_v51  ;;  %2868 = vmatpush.msra.mxu3 %v2390_v52  ;;  %v2561_v51 = vld [vmem:[#allocation14 + $0x670] sm:$0xff]  ;;  %v2498_v52 = vld [vmem:[#allocation14 + $0x478] sm:$0xff] }
 0x333   :  { %2884 = vmatpush.msra.mxu1 %v2470_v54  ;;  %v2557_v54 = vld [vmem:[#allocation14 + $0x650] sm:$0xff] }
 0x334   :  { %2829 = vmatpush.msrb.mxu2 %v2513_v50  ;;  %2869 = vmatpush.msra.mxu3 %v2386_v55  ;;  %v2494_v50 = vld [vmem:[#allocation14 + $0x458] sm:$0xff]  ;;  %v2553_v55 = vld [vmem:[#allocation14 + $0x630] sm:$0xff] }
 0x335   :  { %2885 = vmatpush.msra.mxu1 %v2466_v43  ;;  %v2549_v43 = vld [vmem:[#allocation14 + $0x610] sm:$0xff] }
 0x336   :  { %2830 = vmatpush.msrb.mxu2 %v2509_v53  ;;  %2870 = vmatpush.msra.mxu3 %v2382_v56  ;;  %v2610_v53 = vld [vmem:[#allocation14 + $0x7f8] sm:$0xff] }
 0x337   :  { %2886 = vmatpush.msra.mxu1 %v2462_v58  ;;  %v2606_v56 = vld [vmem:[#allocation14 + $0x7d8] sm:$0xff] }
 0x338   :  { %2831 = vmatpush.msrb.mxu2 %v2505_v11  ;;  %2871 = vmatpush.msra.mxu3 %v2378_v8  ;;  %v2602_v58 = vld [vmem:[#allocation14 + $0x7b8] sm:$0xff] }
 0x339   :  { %2887 = vmatpush.msra.mxu1 %v2458_v57  ;;  %v2348_v6 = vpop.f32.mrf.mxu0  ;;  %v2594_v11 = vld [vmem:[#allocation14 + $0x778] sm:$0xff] }
 0x33a   :  { %v2349_v10 = vadd.f32 %v2348_v6, %v2329_v2  ;;  %2832 = vmatpush.msrb.mxu2 %v2501_v62  ;;  %2872 = vmatpush.msra.mxu3 %v2374_v1  ;;  %v2590_v8 = vld [vmem:[#allocation14 + $0x758] sm:$0xff] }
 0x33b   :  { %2888 = vmatpush.msra.mxu1 %v2454_v3  ;;  %v2582_v57 = vld [vmem:[#allocation14 + $0x718] sm:$0xff] }
 0x33c   :  { %3159 = vtanh.f32 %v2349_v10  ;;  %2833 = vmatpush.msrb.mxu2 %v2497_v7  ;;  %2873 = vmatpush.msra.mxu3 %v2370_v9  ;;  %v2578_v62 = vld [vmem:[#allocation14 + $0x6f8] sm:$0xff] }
 0x33d   :  { %2889 = vmatpush.msra.mxu1 %v2450_v13  ;;  %v2574_v1 = vld [vmem:[#allocation14 + $0x6d8] sm:$0xff] }
 0x33e   :  { %2834 = vmatpush.msrb.mxu2 %v2493_v14  ;;  %2874 = vmatpush.msra.mxu3 %v2366_v12  ;;  %v2570_v2 = vld [vmem:[#allocation14 + $0x6b8] sm:$0xff]  ;;  %v2958_v14 = vld [vmem:[#allocation17 + $0x68] sm:$0xff]  ;;  %v2957_v12 = vld [vmem:[#allocation17 + $0x60] sm:$0xff] }
 0x33f   :  { %2890 = vmatpush.msra.mxu1 %v2446_v15  ;;  %v2562_v3 = vld [vmem:[#allocation14 + $0x678] sm:$0xff] }
 0x340   :  { %2835 = vmatpush.msrb.mxu2 %v2489_v61  ;;  %2875 = vmatpush.msra.mxu3 %v2362_v18  ;;  %v2558_v6 = vld [vmem:[#allocation14 + $0x658] sm:$0xff] }
 0x341   :  { %2891 = vmatpush.msra.mxu1 %v2442_v19  ;;  %v2554_v7 = vld [vmem:[#allocation14 + $0x638] sm:$0xff]  ;;  %v2974_v19 = vld [vmem:[#allocation17 + $0xe8] sm:$0xff] }
 0x342   :  { %v3706_v26 = vpop.eup %3159  ;;  %2836 = vmatpush.msrb.mxu2 %v2485_v20  ;;  %2876 = vmatpush.msra.mxu3 %v2358_v23  ;;  %v2550_v9 = vld [vmem:[#allocation14 + $0x618] sm:$0xff]  ;;  %v2973_v23 = vld [vmem:[#allocation17 + $0xe0] sm:$0xff] }
 0x343   :  { %2892 = vmatpush.msra.mxu1 %v2438_v24  ;;  %2697 = vmatmul.f32.vlgmr.msrb.gmra.mxu0 %v3706_v26  ;;  %v2960_v10 = vld [vmem:[#allocation17 + $0x78] sm:$0xff]  ;;  %v2959_v13 = vld [vmem:[#allocation17 + $0x70] sm:$0xff]  ;;  %v2954_v24 = vld [vmem:[#allocation17 + $0x48] sm:$0xff] }
 0x344   :  { %2837 = vmatmul.f32.vlgmr.msrb.gmra.mxu2 %v3699_v30  ;;  %2841 = vmatpush.msrb.mxu0 %v2609_v25  ;;  %v2976_v15 = vld [vmem:[#allocation17 + $0xf8] sm:$0xff]  ;;  %v2975_v61 = vld [vmem:[#allocation17 + $0xf0] sm:$0xff] }
 0x345   :  { %2877 = vmatmul.f32.vlgmr.msra.gmra.mxu3 %v3690_v33  ;;  %2901 = vmatpush.msra.mxu2 %v2546_v27  ;;  %v2589_v33 = vld [vmem:[#allocation14 + $0x750] sm:$0xff]  ;;  %v2956_v18 = vld [vmem:[#allocation17 + $0x58] sm:$0xff] }
 0x346   :  { %2893 = vmatpush.msra.mxu1 %v2434_v28  ;;  %2842 = vmatpush.msrb.mxu0 %v2605_v44  ;;  %v2955_v20 = vld [vmem:[#allocation17 + $0x50] sm:$0xff]  ;;  %v2972_v25 = vld [vmem:[#allocation17 + $0xd8] sm:$0xff]  ;;  %v2970_v44 = vld [vmem:[#allocation17 + $0xc8] sm:$0xff] }
 0x347   :  { %2902 = vmatpush.msra.mxu2 %v2542_v29  ;;  %3013 = vmatpush.msrb.mxu3 %v2960_v10  ;;  %v2971_v27 = vld [vmem:[#allocation17 + $0xd0] sm:$0xff]  ;;  %v2952_v28 = vld [vmem:[#allocation17 + $0x38] sm:$0xff] }
 0x348   :  { %2894 = vmatpush.msra.mxu1 %v2430_v31  ;;  %2843 = vmatpush.msrb.mxu0 %v2601_v32  ;;  %v2951_v29 = vld [vmem:[#allocation17 + $0x30] sm:$0xff]  ;;  %v2950_v31 = vld [vmem:[#allocation17 + $0x28] sm:$0xff]  ;;  %v2949_v32 = vld [vmem:[#allocation17 + $0x20] sm:$0xff] }
 0x349   :  { %2903 = vmatpush.msra.mxu2 %v2538_v34  ;;  %3014 = vmatpush.msrb.mxu3 %v2959_v13  ;;  %v2969_v34 = vld [vmem:[#allocation17 + $0xc0] sm:$0xff] }
 0x34a   :  { %2895 = vmatpush.msra.mxu1 %v2426_v35  ;;  %2844 = vmatpush.msrb.mxu0 %v2597_v4  ;;  %v2948_v35 = vld [vmem:[#allocation17 + $0x18] sm:$0xff]  ;;  %v2977_v13 = vld [vmem:[#allocation17 + $0x100] sm:$0xff] }
 0x34b   :  { %2904 = vmatpush.msra.mxu2 %v2534_v36  ;;  %2777 = vmatmul.f32.vlgmr.msra.gmra.mxu0 %v3706_v26  ;;  %v2968_v4 = vld [vmem:[#allocation17 + $0xb8] sm:$0xff]  ;;  %v2947_v36 = vld [vmem:[#allocation17 + $0x10] sm:$0xff] }
 0x34c   :  { %2896 = vmatpush.msra.mxu1 %v2422_v37  ;;  %2845 = vmatpush.msrb.mxu0 %v2593_v38  ;;  %v2967_v37 = vld [vmem:[#allocation17 + $0xb0] sm:$0xff]  ;;  %v2946_v38 = vld [vmem:[#allocation17 + $0x8] sm:$0xff] }
 0x34d   :  { %2897 = vmatmul.f32.vlgmr.msra.gmra.mxu1 %v3693_v45  ;;  %2905 = vmatpush.msra.mxu2 %v2530_v39  ;;  %v2506_v45 = vld [vmem:[#allocation14 + $0x4b8] sm:$0xff]  ;;  %v2966_v39 = vld [vmem:[#allocation17 + $0xa8] sm:$0xff] }
 0x34e   :  { %2846 = vmatpush.msrb.mxu0 %v2589_v33  ;;  %3015 = vmatpush.msrb.mxu3 %v2958_v14  ;;  %v2945_v33 = vld [vmem:[#allocation17] sm:$0xff] }
 0x34f   :  { %2906 = vmatpush.msra.mxu2 %v2526_v40  ;;  %3033 = vmatpush.msrb.mxu1 %v2976_v15  ;;  %v2965_v40 = vld [vmem:[#allocation17 + $0xa0] sm:$0xff]  ;;  %v3008_v15 = vld [vmem:[#allocation17 + $0x1f8] sm:$0xff] }
 0x350   :  { %2847 = vmatpush.msrb.mxu0 %v2585_v41  ;;  %3016 = vmatpush.msrb.mxu3 %v2957_v12  ;;  %v2992_v41 = vld [vmem:[#allocation17 + $0x178] sm:$0xff] }
 0x351   :  { %2907 = vmatpush.msra.mxu2 %v2522_v22  ;;  %3034 = vmatpush.msrb.mxu1 %v2975_v61  ;;  %v2964_v22 = vld [vmem:[#allocation17 + $0x98] sm:$0xff]  ;;  %v3007_v61 = vld [vmem:[#allocation17 + $0x1f0] sm:$0xff] }
 0x352   :  { %2848 = vmatpush.msrb.mxu0 %v2581_v42  ;;  %3017 = vmatpush.msrb.mxu3 %v2956_v18  ;;  %v2991_v42 = vld [vmem:[#allocation17 + $0x170] sm:$0xff]  ;;  %v3006_v18 = vld [vmem:[#allocation17 + $0x1e8] sm:$0xff] }
 0x353   :  { %2908 = vmatpush.msra.mxu2 %v2518_v5  ;;  %3035 = vmatpush.msrb.mxu1 %v2974_v19  ;;  %v2963_v5 = vld [vmem:[#allocation17 + $0x90] sm:$0xff]  ;;  %v3005_v19 = vld [vmem:[#allocation17 + $0x1e0] sm:$0xff] }
 0x354   :  { %2849 = vmatpush.msrb.mxu0 %v2577_v21  ;;  %3018 = vmatpush.msrb.mxu3 %v2955_v20  ;;  %v2990_v21 = vld [vmem:[#allocation17 + $0x168] sm:$0xff]  ;;  %v3004_v20 = vld [vmem:[#allocation17 + $0x1d8] sm:$0xff] }
 0x355   :  { %2909 = vmatpush.msra.mxu2 %v2514_v46  ;;  %3036 = vmatpush.msrb.mxu1 %v2973_v23  ;;  %v2962_v46 = vld [vmem:[#allocation17 + $0x88] sm:$0xff] }
 0x356   :  { %2850 = vmatpush.msrb.mxu0 %v2573_v47  ;;  %3019 = vmatpush.msrb.mxu3 %v2954_v24  ;;  %v2989_v47 = vld [vmem:[#allocation17 + $0x160] sm:$0xff]  ;;  %v3003_v24 = vld [vmem:[#allocation17 + $0x1d0] sm:$0xff] }
 0x357   :  { %2910 = vmatpush.msra.mxu2 %v2510_v48  ;;  %3037 = vmatpush.msrb.mxu1 %v2972_v25  ;;  %v2961_v48 = vld [vmem:[#allocation17 + $0x80] sm:$0xff]  ;;  %v3002_v25 = vld [vmem:[#allocation17 + $0x1c8] sm:$0xff] }
 0x358   :  { %2851 = vmatpush.msrb.mxu0 %v2569_v49  ;;  %v3716_v49 = vld [vmem:[#allocation16] sm:$0xf] }
 0x359   :  { %2911 = vmatpush.msra.mxu2 %v2506_v45  ;;  %3038 = vmatpush.msrb.mxu1 %v2971_v27  ;;  %v2988_v45 = vld [vmem:[#allocation17 + $0x158] sm:$0xff] }
 0x35a   :  { %2852 = vmatpush.msrb.mxu0 %v2565_v16  ;;  %v2987_v16 = vld [vmem:[#allocation17 + $0x150] sm:$0xff] }
 0x35b   :  { %2912 = vmatpush.msra.mxu2 %v2502_v17  ;;  %3039 = vmatpush.msrb.mxu1 %v2970_v44  ;;  %v3000_v44 = vld [vmem:[#allocation17 + $0x1b8] sm:$0xff] }
 0x35c   :  { %2853 = vmatpush.msrb.mxu0 %v2561_v51  ;;  %v2613_v51 = vperm.slane %v3716_v49, 0 }
 0x35d   :  { %2913 = vmatpush.msra.mxu2 %v2498_v52  ;;  %3040 = vmatpush.msrb.mxu1 %v2969_v34  ;;  %v2986_v52 = vld [vmem:[#allocation17 + $0x148] sm:$0xff] }
 0x35e   :  { %2854 = vmatpush.msrb.mxu0 %v2557_v54  ;;  %v2985_v54 = vld [vmem:[#allocation17 + $0x140] sm:$0xff] }
 0x35f   :  { %2914 = vmatpush.msra.mxu2 %v2494_v50  ;;  %3041 = vmatpush.msrb.mxu1 %v2968_v4 }
 0x360   :  { %2855 = vmatpush.msrb.mxu0 %v2553_v55 }
 0x361   :  { %2915 = vmatpush.msra.mxu2 %v2490_v63  ;;  %3042 = vmatpush.msrb.mxu1 %v2967_v37  ;;  %v2984_v63 = vld [vmem:[#allocation17 + $0x138] sm:$0xff] }
 0x362   :  { %2856 = vmatpush.msrb.mxu0 %v2549_v43 }
 0x363   :  { %2916 = vmatpush.msra.mxu2 %v2486_v0  ;;  %2857 = vmatmul.f32.vlgmr.msrb.gmra.mxu0 %v3706_v26  ;;  %v2983_v0 = vld [vmem:[#allocation17 + $0x130] sm:$0xff] }
 0x364   :  { %2917 = vmatmul.f32.vlgmr.msra.gmra.mxu2 %v3699_v30  ;;  %2921 = vmatpush.msra.mxu0 %v2610_v53  ;;  %v2566_v30 = vld [vmem:[#allocation14 + $0x698] sm:$0xff] }
 0x365   :  { %3043 = vmatpush.msrb.mxu1 %v2966_v39  ;;  %3053 = vmatpush.msrb.mxu2 %v2992_v41  ;;  %v2994_v41 = vld [vmem:[#allocation17 + $0x188] sm:$0xff] }
 0x366   :  { %2922 = vmatpush.msra.mxu0 %v2606_v56  ;;  %v2614_v56 = vperm.slane %v3716_v49, 1 }
 0x367   :  { %3044 = vmatpush.msrb.mxu1 %v2965_v40  ;;  %3054 = vmatpush.msrb.mxu2 %v2991_v42  ;;  %v2995_v40 = vld [vmem:[#allocation17 + $0x190] sm:$0xff] }
 0x368   :  { %2923 = vmatpush.msra.mxu0 %v2602_v58  ;;  %v2982_v58 = vld [vmem:[#allocation17 + $0x128] sm:$0xff] }
 0x369   :  { %3045 = vmatpush.msrb.mxu1 %v2964_v22  ;;  %3055 = vmatpush.msrb.mxu2 %v2990_v21  ;;  %v2993_v22 = vld [vmem:[#allocation17 + $0x180] sm:$0xff] }
 0x36a   :  { %2924 = vmatpush.msra.mxu0 %v2598_v59 }
 0x36b   :  { %3046 = vmatpush.msrb.mxu1 %v2963_v5  ;;  %3056 = vmatpush.msrb.mxu2 %v2989_v47  ;;  %v2616_v5 = vperm.slane %v3716_v49, 3 }
 0x36c   :  { %2925 = vmatpush.msra.mxu0 %v2594_v11 }
 0x36d   :  { %3047 = vmatpush.msrb.mxu1 %v2962_v46  ;;  %3057 = vmatpush.msrb.mxu2 %v2988_v45 }
 0x36e   :  { %2926 = vmatpush.msra.mxu0 %v2590_v8 }
 0x36f   :  { %3048 = vmatpush.msrb.mxu1 %v2961_v48  ;;  %3058 = vmatpush.msrb.mxu2 %v2987_v16 }
 0x370   :  { %2927 = vmatpush.msra.mxu0 %v2586_v60 }
 0x371   :  { %3059 = vmatpush.msrb.mxu2 %v2986_v52 }
 0x372   :  { %2928 = vmatpush.msra.mxu0 %v2582_v57 }
 0x373   :  { %3060 = vmatpush.msrb.mxu2 %v2985_v54  ;;  %v3136_v54 = vld [vmem:[#allocation19] ss:$0 sm:$0xff] }
 0x374   :  { %2929 = vmatpush.msra.mxu0 %v2578_v62  ;;  %v2981_v62 = vld [vmem:[#allocation17 + $0x120] sm:$0xff] }
 0x375   :  { %3061 = vmatpush.msrb.mxu2 %v2984_v63 }
 0x376   :  { %2930 = vmatpush.msra.mxu0 %v2574_v1 }
 0x377   :  { %3062 = vmatpush.msrb.mxu2 %v2983_v0 }
 0x378   :  { %2931 = vmatpush.msra.mxu0 %v2570_v2  ;;  %v2980_v2 = vld [vmem:[#allocation17 + $0x118] sm:$0xff] }
 0x379   :  { %3063 = vmatpush.msrb.mxu2 %v2982_v58 }
 0x37a   :  { %2932 = vmatpush.msra.mxu0 %v2566_v30  ;;  %v2979_v30 = vld [vmem:[#allocation17 + $0x110] sm:$0xff] }
 0x37b   :  { %3064 = vmatpush.msrb.mxu2 %v2981_v62 }
 0x37c   :  { %2933 = vmatpush.msra.mxu0 %v2562_v3 }
 0x37d   :  { %3065 = vmatpush.msrb.mxu2 %v2980_v2 }
 0x37e   :  { %2934 = vmatpush.msra.mxu0 %v2558_v6 }
 0x37f   :  { %3066 = vmatpush.msrb.mxu2 %v2979_v30 }
 0x380   :  { %2935 = vmatpush.msra.mxu0 %v2554_v7 }
 0x382   :  { %2936 = vmatpush.msra.mxu0 %v2550_v9  ;;  %v2978_v9 = vld [vmem:[#allocation17 + $0x108] sm:$0xff] }
 0x383   :  { %2937 = vmatmul.f32.vlgmr.msra.gmra.mxu0 %v3706_v26  ;;  %v2953_v26 = vld [vmem:[#allocation17 + $0x40] sm:$0xff]  ;;  %3067 = vmatpush.msrb.mxu2 %v2978_v9 }
 0x384   :  { %3020 = vmatpush.msrb.mxu3 %v2953_v26  ;;  %3073 = vmatpush.msrb.mxu0 %v3008_v15  ;;  %v2615_v26 = vperm.slane %v3716_v49, 2 }
 0x385   :  { %v2638_v17 = vpop.f32.mrf.mxu3  ;;  %3068 = vmatpush.msrb.mxu2 %v2977_v13 }
 0x386   :  { %3021 = vmatpush.msrb.mxu3 %v2952_v28  ;;  %v2639_v55 = vadd.f32 %v2638_v17, %v2613_v51  ;;  %3074 = vmatpush.msrb.mxu0 %v3007_v61  ;;  %v3001_v28 = vld [vmem:[#allocation17 + $0x1c0] sm:$0xff] }
 0x388   :  { %3022 = vmatpush.msrb.mxu3 %v2951_v29  ;;  %v2658_v50 = vpop.f32.mrf.mxu1  ;;  %3075 = vmatpush.msrb.mxu0 %v3006_v18 }
 0x389   :  { %v2659_v53 = vadd.f32 %v2658_v50, %v2639_v55 }
 0x38a   :  { %3023 = vmatpush.msrb.mxu3 %v2950_v31  ;;  %3076 = vmatpush.msrb.mxu0 %v3005_v19 }
 0x38c   :  { %3024 = vmatpush.msrb.mxu3 %v2949_v32  ;;  %3077 = vmatpush.msrb.mxu0 %v3004_v20  ;;  %v2999_v32 = vld [vmem:[#allocation17 + $0x1b0] sm:$0xff] }
 0x38d   :  { %v2718_v59 = vpop.f32.mrf.mxu3 }
 0x38e   :  { %3025 = vmatpush.msrb.mxu3 %v2948_v35  ;;  %v2719_v60 = vadd.f32 %v2718_v59, %v2614_v56  ;;  %3078 = vmatpush.msrb.mxu0 %v3003_v24  ;;  %v2998_v35 = vld [vmem:[#allocation17 + $0x1a8] sm:$0xff] }
 0x390   :  { %3026 = vmatpush.msrb.mxu3 %v2947_v36  ;;  %v2738_v1 = vpop.f32.mrf.mxu1  ;;  %3079 = vmatpush.msrb.mxu0 %v3002_v25 }
 0x391   :  { %v2739_v6 = vadd.f32 %v2738_v1, %v2719_v60 }
 0x392   :  { %3027 = vmatpush.msrb.mxu3 %v2946_v38  ;;  %3080 = vmatpush.msrb.mxu0 %v3001_v28  ;;  %v2997_v38 = vld [vmem:[#allocation17 + $0x1a0] sm:$0xff] }
 0x394   :  { %3028 = vmatpush.msrb.mxu3 %v2945_v33  ;;  %3081 = vmatpush.msrb.mxu0 %v3000_v44  ;;  %v2996_v33 = vld [vmem:[#allocation17 + $0x198] sm:$0xff] }
 0x396   :  { %3082 = vmatpush.msrb.mxu0 %v2999_v32 }
 0x398   :  { %3083 = vmatpush.msrb.mxu0 %v2998_v35 }
 0x39a   :  { %3084 = vmatpush.msrb.mxu0 %v2997_v38 }
 0x39c   :  { %3085 = vmatpush.msrb.mxu0 %v2996_v33 }
 0x39e   :  { %3086 = vmatpush.msrb.mxu0 %v2995_v40 }
 0x3a0   :  { %3087 = vmatpush.msrb.mxu0 %v2994_v41 }
 0x3a2   :  { %3088 = vmatpush.msrb.mxu0 %v2993_v22 }
 0x3a5   :  { %v2798_v27 = vpop.f32.mrf.mxu3 }
 0x3a6   :  { %v2678_v43 = vpop.f32.mrf.mxu2  ;;  %v2799_v29 = vadd.f32 %v2798_v27, %v2615_v26 }
 0x3a7   :  { %v2679_v11 = vadd.f32 %v2678_v43, %v2659_v53 }
 0x3a8   :  { %v2818_v31 = vpop.f32.mrf.mxu1 }
 0x3a9   :  { %v2819_v4 = vadd.f32 %v2818_v31, %v2799_v29 }
 0x3ae   :  { %v2758_v3 = vpop.f32.mrf.mxu2 }
 0x3af   :  { %v2759_v7 = vadd.f32 %v2758_v3, %v2739_v6 }
 0x3c0   :  { %v2698_v8 = vpop.f32.mrf.mxu0 }
 0x3c1   :  { %v2699_v57 = vadd.f32 %v2698_v8, %v2679_v11 }
 0x3c3   :  { %3161 = vtanh.f32 %v2699_v57 }
 0x3c7   :  { %v2838_v34 = vpop.f32.mrf.mxu2 }
 0x3c8   :  { %v2778_v10 = vpop.f32.mrf.mxu0  ;;  %v2839_v36 = vadd.f32 %v2838_v34, %v2819_v4  ;;  %v2878_v21 = vpop.f32.mrf.mxu3 }
 0x3c9   :  { %v3162_v14 = vpop.eup %3161  ;;  %v2779_v12 = vadd.f32 %v2778_v10, %v2759_v7  ;;  %v2879_v46 = vadd.f32 %v2878_v21, %v2616_v5 }
 0x3ca   :  { %3029 = vmatmul.f32.vlgmr.msrb.gmra.mxu3 %v3162_v14  ;;  %v2898_v47 = vpop.f32.mrf.mxu1 }
 0x3cb   :  { %3163 = vtanh.f32 %v2779_v12  ;;  %v2899_v45 = vadd.f32 %v2898_v47, %v2879_v46 }
 0x3d1   :  { %v3164_v23 = vpop.eup %3163 }
 0x3d2   :  { %3049 = vmatmul.f32.vlgmr.msrb.gmra.mxu1 %v3164_v23 }
 0x3e0   :  { %v2858_v37 = vpop.f32.mrf.mxu0 }
 0x3e1   :  { %v2859_v39 = vadd.f32 %v2858_v37, %v2839_v36 }
 0x3e3   :  { %3165 = vtanh.f32 %v2859_v39 }
 0x3e7   :  { %v2918_v48 = vpop.f32.mrf.mxu2 }
 0x3e8   :  { %v2919_v16 = vadd.f32 %v2918_v48, %v2899_v45 }
 0x3e9   :  { %v3166_v42 = vpop.eup %3165 }
 0x3ea   :  { %3069 = vmatmul.f32.vlgmr.msrb.gmra.mxu2 %v3166_v42 }
 0x400   :  { %v2938_v17 = vpop.f32.mrf.mxu0 }
 0x401   :  { %v2939_v51 = vadd.f32 %v2938_v17, %v2919_v16 }
 0x403   :  { %3167 = vtanh.f32 %v2939_v51 }
 0x409   :  { %v3168_v52 = vpop.eup %3167 }
 0x40a   :  { %3089 = vmatmul.f32.vlgmr.msrb.gmra.mxu0 %v3168_v52 }
 0x44d   :  { %v3030_v50 = vpop.f32.mrf.mxu3 }
 0x44e   :  { %v3031_v55 = vadd.f32 %v3136_v54, %v3030_v50 }
 0x44f   :  { %v3050_v63 = vpop.f32.mrf.mxu1 }
 0x450   :  { %v3051_v0 = vadd.f32 %v3050_v63, %v3031_v55 }
 0x46d   :  { %v3070_v43 = vpop.f32.mrf.mxu2 }
 0x46e   :  { %v3071_v49 = vadd.f32 %v3070_v43, %v3051_v0 }
 0x487   :  { %v3090_v53 = vpop.f32.mrf.mxu0 }
 0x488   :  { %v3091_v56 = vadd.f32 %v3090_v53, %v3071_v49 }
 0x48a   :  { %3093 = vst [vmem:[#allocation20] sm:$0xff] %v3091_v56 }
 0x48b   :  { %3104 = dma.vmem_to_hbm [thread:$0]  %s3100_s10, 128, %s3102_s29, [#allocation4]  }
 0x48c   :  { %3476 = dma.done.wait [#allocation4], 128  }
 0x48d   :  { %3477 = vsyncadd [#allocation4], 4294967168 }
 0x48e   :  { %3109 = vsyncpa [#allocation3], 1 }
 0x48f   :  { %3110 = vsyncpa [#allocation6], 1 }
 0x490   :  { %3111 = vsyncpa [#allocation9], 1 }
 0x491   :  { %3112 = vsyncpa [#allocation12], 1 }
 0x492   :  { %3113 = vsyncpa [#allocation15], 1 }
 0x493   :  { %3114 = vsyncpa [#allocation18], 1 }
 0x494   :  { %3115 = vsyncpa [#allocation4], 1 }

// kernel: tpu_custom_call.1
= control target key start
LH: loop header
LB: loop body
LE: loop exit
PB: predicated region body
PF: predicated region fallthrough
CT: control target
= control target key end

     0   :  { %16 = vsyncpa [#allocation3], 0  ;;  %s3725_s0 = inlined_call_operand.hbm [shape: f32[8,784], index: 0, kind: input, shape index: {}]   ;;  %s3726_s1 = inlined_call_operand.hbm [shape: f32[784,512], index: 1, kind: input, shape index: {}]   ;;  %s3727_s2 = inlined_call_operand.hbm [shape: f32[1,512], index: 2, kind: input, shape index: {}]   ;;  %s3728_s3 = inlined_call_operand.hbm [shape: f32[512,512], index: 3, kind: input, shape index: {}]   ;;  %s3729_s4 = inlined_call_operand.hbm [shape: f32[1,512], index: 4, kind: input, shape index: {}]   ;;  %s3730_s5 = inlined_call_operand.hbm [shape: f32[512,512], index: 5, kind: input, shape index: {}]   ;;  %s3731_s6 = inlined_call_operand.hbm [shape: f32[1,512], index: 6, kind: input, shape index: {}]   ;;  %s3732_s7 = inlined_call_operand.hbm [shape: f32[512,512], index: 7, kind: input, shape index: {}]   ;;  %s3733_s8 = inlined_call_operand.hbm [shape: f32[1,512], index: 8, kind: input, shape index: {}]   ;;  %s3734_s9 = inlined_call_operand.hbm [shape: f32[512,128], index: 9, kind: input, shape index: {}]   ;;  %s3735_s10 = inlined_call_operand.hbm [shape: f32[1,128], index: 10, kind: input, shape index: {}]   ;;  %s3736_s11 = inlined_call_operand.hbm [shape: f32[8,128], index: 11, kind: output, shape index: {}]  }
   0x1   :  { %17 = vsyncpa [#allocation6], 0 }
   0x2   :  { %18 = vsyncpa [#allocation9], 0 }
   0x3   :  { %19 = vsyncpa [#allocation12], 0 }
   0x4   :  { %20 = vsyncpa [#allocation15], 0 }
   0x5   :  { %21 = vsyncpa [#allocation18], 0  ;;  %s38_s19 = sshll.u32 %s3726_s1, 4  ;;  %s39_s19 = int_to_ptr.hbm [resolvable:$true] %s38_s19 }
   0x6   :  { %22 = vsyncpa [#allocation4], 0  ;;  %s3478_s20 = smov [#allocation5]   ;;  %s62_s24 = sshll.u32 %s3728_s3, 4  ;;  %s63_s24 = int_to_ptr.hbm [resolvable:$true] %s62_s24 }
   0x7   :  { %s40_s21 = sshll.u32 %s3478_s20, 4  ;;  %s3479_s25 = smov 512   ;;  %s41_s21 = int_to_ptr.vmem [resolvable:$true] %s40_s21 }
   0x8   :  { %s3480_s26 = smov 32   ;;  %s3481_s27 = smov [#allocation8]  }
   0x9   :  { %46 = dma.hbm_to_vmem [thread:$0]  %s39_s19, 50176, %s41_s21, [#allocation6], %s3479_s25, %s3479_s25, %s3480_s26  }
   0xa   :  { %s64_s28 = sshll.u32 %s3481_s27, 4  ;;  %s86_s12 = sshll.u32 %s3730_s5, 4  ;;  %s65_s28 = int_to_ptr.vmem [resolvable:$true] %s64_s28  ;;  %s87_s12 = int_to_ptr.hbm [resolvable:$true] %s86_s12 }
   0xb   :  { %70 = dma.hbm_to_vmem [thread:$0]  %s63_s24, 32768, %s65_s28, [#allocation9], %s3479_s25, %s3479_s25, %s3480_s26  }
   0xc   :  { %s110_s14 = sshll.u32 %s3732_s7, 4  ;;  %s3482_s15 = smov [#allocation11]   ;;  %s111_s14 = int_to_ptr.hbm [resolvable:$true] %s110_s14 }
   0xd   :  { %s88_s16 = sshll.u32 %s3482_s15, 4  ;;  %s3483_s3 = smov [#allocation14]   ;;  %s89_s16 = int_to_ptr.vmem [resolvable:$true] %s88_s16 }
   0xe   :  { %94 = dma.hbm_to_vmem [thread:$0]  %s87_s12, 32768, %s89_s16, [#allocation12], %s3479_s25, %s3479_s25, %s3480_s26  }
   0xf   :  { %s112_s17 = sshll.u32 %s3483_s3, 4  ;;  %s134_s20 = sshll.u32 %s3734_s9, 4  ;;  %s113_s17 = int_to_ptr.vmem [resolvable:$true] %s112_s17  ;;  %s135_s20 = int_to_ptr.hbm [resolvable:$true] %s134_s20 }
  0x10   :  { %118 = dma.hbm_to_vmem [thread:$0]  %s111_s14, 32768, %s113_s17, [#allocation15], %s3479_s25, %s3479_s25, %s3480_s26  }
  0x11   :  { %s3484_s5 = smov [#allocation17]   ;;  %s28_s7 = sshll.u32 %s3725_s0, 4  ;;  %s29_s7 = int_to_ptr.hbm [resolvable:$true] %s28_s7 }
  0x12   :  { %s136_s21 = sshll.u32 %s3484_s5, 4  ;;  %s3485_s24 = smov 128   ;;  %s137_s21 = int_to_ptr.vmem [resolvable:$true] %s136_s21 }
  0x13   :  { %s3486_s27 = smov 8   ;;  %s3487_s28 = smov [#allocation2]  }
  0x14   :  { %142 = dma.hbm_to_vmem [thread:$0]  %s135_s20, 8192, %s137_s21, [#allocation18], %s3485_s24, %s3485_s24, %s3486_s27  }
  0x15   :  { %s30_s29 = sshll.u32 %s3487_s28, 4  ;;  %s52_s9 = sshll.u32 %s3727_s2, 4  ;;  %s31_s29 = int_to_ptr.vmem [resolvable:$true] %s30_s29  ;;  %s53_s9 = int_to_ptr.hbm [resolvable:$true] %s52_s9 }
  0x16   :  { %33 = dma.hbm_to_vmem [thread:$0]  %s29_s7, 896, %s31_s29, [#allocation3]  }
  0x17   :  { %s76_s1 = sshll.u32 %s3729_s4, 4  ;;  %s3488_s13 = smov [#allocation7]   ;;  %s77_s1 = int_to_ptr.hbm [resolvable:$true] %s76_s1 }
  0x18   :  { %s54_s14 = sshll.u32 %s3488_s13, 4  ;;  %s3489_s0 = smov [#allocation10]   ;;  %s55_s14 = int_to_ptr.vmem [resolvable:$true] %s54_s14 }
  0x19   :  { %57 = dma.hbm_to_vmem [thread:$0]  %s53_s9, 64, %s55_s14, [#allocation6]  }
  0x1a   :  { %s78_s15 = sshll.u32 %s3489_s0, 4  ;;  %s100_s17 = sshll.u32 %s3731_s6, 4  ;;  %s79_s15 = int_to_ptr.vmem [resolvable:$true] %s78_s15  ;;  %s101_s17 = int_to_ptr.hbm [resolvable:$true] %s100_s17 }
  0x1b   :  { %81 = dma.hbm_to_vmem [thread:$0]  %s77_s1, 64, %s79_s15, [#allocation9]  }
  0x1c   :  { %s124_s19 = sshll.u32 %s3733_s8, 4  ;;  %s3490_s20 = smov [#allocation13]   ;;  %s125_s19 = int_to_ptr.hbm [resolvable:$true] %s124_s19 }
  0x1d   :  { %s102_s4 = sshll.u32 %s3490_s20, 4  ;;  %s3491_s5 = smov [#allocation16]   ;;  %s103_s4 = int_to_ptr.vmem [resolvable:$true] %s102_s4 }
  0x1e   :  { %105 = dma.hbm_to_vmem [thread:$0]  %s101_s17, 64, %s103_s4, [#allocation12]  }
  0x1f   :  { %s126_s21 = sshll.u32 %s3491_s5, 4  ;;  %s148_s7 = sshll.u32 %s3735_s10, 4  ;;  %s127_s21 = int_to_ptr.vmem [resolvable:$true] %s126_s21  ;;  %s149_s7 = int_to_ptr.hbm [resolvable:$true] %s148_s7 }
  0x20   :  { %129 = dma.hbm_to_vmem [thread:$0]  %s125_s19, 64, %s127_s21, [#allocation15]  }
  0x21   :  { %s3492_s6 = smov [#allocation19]  }
  0x22   :  { %s150_s24 = sshll.u32 %s3492_s6, 4  ;;  %s151_s24 = int_to_ptr.vmem [resolvable:$true] %s150_s24 }
  0x23   :  { %153 = dma.hbm_to_vmem [thread:$0]  %s149_s7, 16, %s151_s24, [#allocation18]  }
  0x24   :  { %3464 = dma.done.wait [#allocation3], 896  }
  0x25   :  { %3465 = vsyncadd [#allocation3], 4294966400 }
  0x26   :  { %3466 = dma.done.wait [#allocation6], 50240  }
  0x27   :  { %3467 = vsyncadd [#allocation6], 4294917056 }
  0x28   :  { %3468 = dma.done.wait [#allocation9], 32832  }
  0x29   :  { %3469 = vsyncadd [#allocation9], 4294934464 }
  0x2a   :  { %3470 = dma.done.wait [#allocation12], 32832  }
  0x2b   :  { %3471 = vsyncadd [#allocation12], 4294934464 }
  0x2c   :  { %3472 = dma.done.wait [#allocation15], 32832  }
  0x2d   :  { %3473 = vsyncadd [#allocation15], 4294934464 }
  0x2e   :  { %3474 = dma.done.wait [#allocation18], 8208  }
  0x2f   :  { %3475 = vsyncadd [#allocation18], 4294959088  ;;  %v265_v0 = vld [vmem:[#allocation5 + $0x1e0] sm:$0xff]  ;;  %vm607_vm0 = vcmask 130048   ;;  %s3493_s8 = smov [#allocation20]   ;;  %s3101_s29 = sshll.u32 %s3736_s11, 4  ;;  %s3102_s29 = int_to_ptr.hbm [resolvable:$true] %s3101_s29 }
  0x30   :  { %v329_v1 = vld [vmem:[#allocation5 + $0x3e0] sm:$0xff]  ;;  %611 = vmatpush.msra.mxu0 %v265_v0  ;;  %s3099_s10 = sshll.u32 %s3493_s8, 4  ;;  %s3100_s10 = int_to_ptr.vmem [resolvable:$true] %s3099_s10 }
  0x31   :  { %v457_v2 = vld [vmem:[#allocation5 + $0x7e0] sm:$0xff]  ;;  %631 = vmatpush.msra.mxu1 %v329_v1  ;;  %v266_v1 = vld [vmem:[#allocation5 + $0x1e8] sm:$0xff] }
  0x32   :  { %v261_v3 = vld [vmem:[#allocation5 + $0x1c0] sm:$0xff]  ;;  %671 = vmatpush.msra.mxu3 %v457_v2 }
  0x33   :  { %v325_v4 = vld [vmem:[#allocation5 + $0x3c0] sm:$0xff]  ;;  %612 = vmatpush.msra.mxu0 %v261_v3 }
  0x34   :  { %v393_v5 = vld [vmem:[#allocation5 + $0x5e0] sm:$0xff]  ;;  %632 = vmatpush.msra.mxu1 %v325_v4 }
  0x35   :  { %651 = vmatpush.msra.mxu2 %v393_v5  ;;  %v453_v6 = vld [vmem:[#allocation5 + $0x7c0] sm:$0xff] }
  0x36   :  { %v257_v7 = vld [vmem:[#allocation5 + $0x1a0] sm:$0xff]  ;;  %672 = vmatpush.msra.mxu3 %v453_v6  ;;  %v262_v6 = vld [vmem:[#allocation5 + $0x1c8] sm:$0xff] }
  0x37   :  { %v321_v8 = vld [vmem:[#allocation5 + $0x3a0] sm:$0xff]  ;;  %613 = vmatpush.msra.mxu0 %v257_v7 }
  0x38   :  { %v389_v9 = vld [vmem:[#allocation5 + $0x5c0] sm:$0xff]  ;;  %633 = vmatpush.msra.mxu1 %v321_v8 }
  0x39   :  { %v449_v10 = vld [vmem:[#allocation5 + $0x7a0] sm:$0xff]  ;;  %652 = vmatpush.msra.mxu2 %v389_v9 }
  0x3a   :  { %v253_v11 = vld [vmem:[#allocation5 + $0x180] sm:$0xff]  ;;  %673 = vmatpush.msra.mxu3 %v449_v10  ;;  %v258_v10 = vld [vmem:[#allocation5 + $0x1a8] sm:$0xff] }
  0x3b   :  { %v317_v12 = vld [vmem:[#allocation5 + $0x380] sm:$0xff]  ;;  %614 = vmatpush.msra.mxu0 %v253_v11  ;;  %v3587_v11 = vld [vmem:[#allocation2 + $0x10] sm:$0xff] }
  0x3c   :  { %v385_v13 = vld [vmem:[#allocation5 + $0x5a0] sm:$0xff]  ;;  %634 = vmatpush.msra.mxu1 %v317_v12  ;;  %v330_v12 = vld [vmem:[#allocation5 + $0x3e8] sm:$0xff] }
  0x3d   :  { %v445_v14 = vld [vmem:[#allocation5 + $0x780] sm:$0xff]  ;;  %653 = vmatpush.msra.mxu2 %v385_v13 }
  0x3e   :  { %v381_v15 = vld [vmem:[#allocation5 + $0x580] sm:$0xff]  ;;  %674 = vmatpush.msra.mxu3 %v445_v14 }
  0x3f   :  { %v249_v16 = vld [vmem:[#allocation5 + $0x160] sm:$0xff]  ;;  %654 = vmatpush.msra.mxu2 %v381_v15  ;;  %v254_v15 = vld [vmem:[#allocation5 + $0x188] sm:$0xff] }
  0x40   :  { %v313_v17 = vld [vmem:[#allocation5 + $0x360] sm:$0xff]  ;;  %615 = vmatpush.msra.mxu0 %v249_v16  ;;  %v3590_v16 = vld [vmem:[#allocation2] sm:$0xff] }
  0x41   :  { %v441_v18 = vld [vmem:[#allocation5 + $0x760] sm:$0xff]  ;;  %635 = vmatpush.msra.mxu1 %v313_v17 }
  0x42   :  { %v377_v19 = vld [vmem:[#allocation5 + $0x560] sm:$0xff]  ;;  %675 = vmatpush.msra.mxu3 %v441_v18  ;;  %v326_v18 = vld [vmem:[#allocation5 + $0x3c8] sm:$0xff] }
  0x43   :  { %v245_v20 = vld [vmem:[#allocation5 + $0x140] sm:$0xff]  ;;  %655 = vmatpush.msra.mxu2 %v377_v19 }
  0x44   :  { %v309_v21 = vld [vmem:[#allocation5 + $0x340] sm:$0xff]  ;;  %616 = vmatpush.msra.mxu0 %v245_v20 }
  0x45   :  { %v437_v22 = vld [vmem:[#allocation5 + $0x740] sm:$0xff]  ;;  %636 = vmatpush.msra.mxu1 %v309_v21  ;;  %v250_v21 = vld [vmem:[#allocation5 + $0x168] sm:$0xff] }
  0x46   :  { %v373_v23 = vld [vmem:[#allocation5 + $0x540] sm:$0xff]  ;;  %676 = vmatpush.msra.mxu3 %v437_v22  ;;  %v3596_v22 = vld [vmem:[#allocation2 + $0x8] sm:$0xff] }
  0x47   :  { %v241_v24 = vld [vmem:[#allocation5 + $0x120] sm:$0xff]  ;;  %656 = vmatpush.msra.mxu2 %v373_v23  ;;  %v322_v23 = vld [vmem:[#allocation5 + $0x3a8] sm:$0xff] }
  0x48   :  { %v305_v25 = vld [vmem:[#allocation5 + $0x320] sm:$0xff]  ;;  %617 = vmatpush.msra.mxu0 %v241_v24 }
  0x49   :  { %v433_v26 = vld [vmem:[#allocation5 + $0x720] sm:$0xff]  ;;  %637 = vmatpush.msra.mxu1 %v305_v25 }
  0x4a   :  { %v369_v27 = vld [vmem:[#allocation5 + $0x520] sm:$0xff]  ;;  %677 = vmatpush.msra.mxu3 %v433_v26  ;;  %v246_v26 = vld [vmem:[#allocation5 + $0x148] sm:$0xff] }
  0x4b   :  { %v237_v28 = vld [vmem:[#allocation5 + $0x100] sm:$0xff]  ;;  %657 = vmatpush.msra.mxu2 %v369_v27  ;;  %v318_v27 = vld [vmem:[#allocation5 + $0x388] sm:$0xff] }
  0x4c   :  { %v301_v29 = vld [vmem:[#allocation5 + $0x300] sm:$0xff]  ;;  %618 = vmatpush.msra.mxu0 %v237_v28 }
  0x4d   :  { %v429_v30 = vld [vmem:[#allocation5 + $0x700] sm:$0xff]  ;;  %638 = vmatpush.msra.mxu1 %v301_v29 }
  0x4e   :  { %v365_v31 = vld [vmem:[#allocation5 + $0x500] sm:$0xff]  ;;  %678 = vmatpush.msra.mxu3 %v429_v30  ;;  %v242_v30 = vld [vmem:[#allocation5 + $0x128] sm:$0xff] }
  0x4f   :  { %v233_v32 = vld [vmem:[#allocation5 + $0xe0] sm:$0xff]  ;;  %658 = vmatpush.msra.mxu2 %v365_v31  ;;  %v314_v31 = vld [vmem:[#allocation5 + $0x368] sm:$0xff] }
  0x50   :  { %v297_v33 = vld [vmem:[#allocation5 + $0x2e0] sm:$0xff]  ;;  %619 = vmatpush.msra.mxu0 %v233_v32 }
  0x51   :  { %v425_v34 = vld [vmem:[#allocation5 + $0x6e0] sm:$0xff]  ;;  %639 = vmatpush.msra.mxu1 %v297_v33 }
  0x52   :  { %v361_v35 = vld [vmem:[#allocation5 + $0x4e0] sm:$0xff]  ;;  %679 = vmatpush.msra.mxu3 %v425_v34  ;;  %v238_v34 = vld [vmem:[#allocation5 + $0x108] sm:$0xff] }
  0x53   :  { %v229_v36 = vld [vmem:[#allocation5 + $0xc0] sm:$0xff]  ;;  %659 = vmatpush.msra.mxu2 %v361_v35  ;;  %v310_v35 = vld [vmem:[#allocation5 + $0x348] sm:$0xff] }
  0x54   :  { %v293_v37 = vld [vmem:[#allocation5 + $0x2c0] sm:$0xff]  ;;  %620 = vmatpush.msra.mxu0 %v229_v36 }
  0x55   :  { %v421_v38 = vld [vmem:[#allocation5 + $0x6c0] sm:$0xff]  ;;  %640 = vmatpush.msra.mxu1 %v293_v37 }
  0x56   :  { %v357_v39 = vld [vmem:[#allocation5 + $0x4c0] sm:$0xff]  ;;  %680 = vmatpush.msra.mxu3 %v421_v38  ;;  %v234_v38 = vld [vmem:[#allocation5 + $0xe8] sm:$0xff] }
  0x57   :  { %v225_v40 = vld [vmem:[#allocation5 + $0xa0] sm:$0xff]  ;;  %660 = vmatpush.msra.mxu2 %v357_v39  ;;  %v306_v39 = vld [vmem:[#allocation5 + $0x328] sm:$0xff] }
  0x58   :  { %v289_v41 = vld [vmem:[#allocation5 + $0x2a0] sm:$0xff]  ;;  %621 = vmatpush.msra.mxu0 %v225_v40 }
  0x59   :  { %v417_v42 = vld [vmem:[#allocation5 + $0x6a0] sm:$0xff]  ;;  %641 = vmatpush.msra.mxu1 %v289_v41 }
  0x5a   :  { %v353_v43 = vld [vmem:[#allocation5 + $0x4a0] sm:$0xff]  ;;  %681 = vmatpush.msra.mxu3 %v417_v42  ;;  %v230_v42 = vld [vmem:[#allocation5 + $0xc8] sm:$0xff] }
  0x5b   :  { %v221_v44 = vld [vmem:[#allocation5 + $0x80] sm:$0xff]  ;;  %661 = vmatpush.msra.mxu2 %v353_v43  ;;  %v302_v43 = vld [vmem:[#allocation5 + $0x308] sm:$0xff] }
  0x5c   :  { %v285_v45 = vld [vmem:[#allocation5 + $0x280] sm:$0xff]  ;;  %622 = vmatpush.msra.mxu0 %v221_v44 }
  0x5d   :  { %v413_v46 = vld [vmem:[#allocation5 + $0x680] sm:$0xff]  ;;  %642 = vmatpush.msra.mxu1 %v285_v45 }
  0x5e   :  { %v349_v47 = vld [vmem:[#allocation5 + $0x480] sm:$0xff]  ;;  %682 = vmatpush.msra.mxu3 %v413_v46  ;;  %v226_v46 = vld [vmem:[#allocation5 + $0xa8] sm:$0xff] }
  0x5f   :  { %v217_v48 = vld [vmem:[#allocation5 + $0x60] sm:$0xff]  ;;  %662 = vmatpush.msra.mxu2 %v349_v47  ;;  %v298_v47 = vld [vmem:[#allocation5 + $0x2e8] sm:$0xff] }
  0x60   :  { %v281_v49 = vld [vmem:[#allocation5 + $0x260] sm:$0xff]  ;;  %623 = vmatpush.msra.mxu0 %v217_v48 }
  0x61   :  { %v409_v50 = vld [vmem:[#allocation5 + $0x660] sm:$0xff]  ;;  %643 = vmatpush.msra.mxu1 %v281_v49 }
  0x62   :  { %v345_v51 = vld [vmem:[#allocation5 + $0x460] sm:$0xff]  ;;  %683 = vmatpush.msra.mxu3 %v409_v50  ;;  %v222_v50 = vld [vmem:[#allocation5 + $0x88] sm:$0xff] }
  0x63   :  { %v213_v52 = vld [vmem:[#allocation5 + $0x40] sm:$0xff]  ;;  %663 = vmatpush.msra.mxu2 %v345_v51  ;;  %v294_v51 = vld [vmem:[#allocation5 + $0x2c8] sm:$0xff] }
  0x64   :  { %v277_v53 = vld [vmem:[#allocation5 + $0x240] sm:$0xff]  ;;  %624 = vmatpush.msra.mxu0 %v213_v52 }
  0x65   :  { %v405_v54 = vld [vmem:[#allocation5 + $0x640] sm:$0xff]  ;;  %644 = vmatpush.msra.mxu1 %v277_v53 }
  0x66   :  { %v341_v55 = vld [vmem:[#allocation5 + $0x440] sm:$0xff]  ;;  %684 = vmatpush.msra.mxu3 %v405_v54  ;;  %v218_v54 = vld [vmem:[#allocation5 + $0x68] sm:$0xff] }
  0x67   :  { %v209_v56 = vld [vmem:[#allocation5 + $0x20] sm:$0xff]  ;;  %664 = vmatpush.msra.mxu2 %v341_v55  ;;  %v290_v55 = vld [vmem:[#allocation5 + $0x2a8] sm:$0xff] }
  0x68   :  { %v273_v57 = vld [vmem:[#allocation5 + $0x220] sm:$0xff]  ;;  %625 = vmatpush.msra.mxu0 %v209_v56 }
  0x69   :  { %v401_v58 = vld [vmem:[#allocation5 + $0x620] sm:$0xff]  ;;  %645 = vmatpush.msra.mxu1 %v273_v57 }
  0x6a   :  { %v337_v59 = vld [vmem:[#allocation5 + $0x420] sm:$0xff]  ;;  %685 = vmatpush.msra.mxu3 %v401_v58  ;;  %v214_v58 = vld [vmem:[#allocation5 + $0x48] sm:$0xff] }
  0x6b   :  { %v205_v60 = vld [vmem:[#allocation5] sm:$0xff]  ;;  %665 = vmatpush.msra.mxu2 %v337_v59  ;;  %v286_v59 = vld [vmem:[#allocation5 + $0x288] sm:$0xff] }
  0x6c   :  { %v269_v61 = vld [vmem:[#allocation5 + $0x200] sm:$0xff]  ;;  %626 = vmatpush.msra.mxu0 %v205_v60 }
  0x6d   :  { %v397_v62 = vld [vmem:[#allocation5 + $0x600] sm:$0xff]  ;;  %646 = vmatpush.msra.mxu1 %v269_v61  ;;  %627 = vmatmul.f32.vlgmr.msra.gmra.mxu0 %v3590_v16 }
  0x6e   :  { %v521_v63 = vld [vmem:[#allocation5 + $0x9e0] sm:$0xff]  ;;  %686 = vmatpush.msra.mxu3 %v397_v62  ;;  %647 = vmatmul.f32.vlgmr.msra.gmra.mxu1 %v3596_v22  ;;  %v210_v62 = vld [vmem:[#allocation5 + $0x28] sm:$0xff] }
  0x6f   :  { %v585_v0 = vld [vmem:[#allocation5 + $0xbe0] sm:$0xff]  ;;  %691 = vmatpush.msrb.mxu0 %v521_v63  ;;  %v3599_v63 = vld [vmem:[#allocation2 + $0x30] sm:$0xff] }
  0x70   :  { %v333_v2 = vld [vmem:[#allocation5 + $0x400] sm:$0xff]  ;;  %711 = vmatpush.msrb.mxu1 %v585_v0  ;;  %751 = vmatpush.msrb.mxu3 %v266_v1  ;;  %v282_v0 = vld [vmem:[#allocation5 + $0x268] sm:$0xff] }
  0x71   :  { %v517_v3 = vld [vmem:[#allocation5 + $0x9c0] sm:$0xff]  ;;  %666 = vmatpush.msra.mxu2 %v333_v2 }
  0x72   :  { %v581_v4 = vld [vmem:[#allocation5 + $0xbc0] sm:$0xff]  ;;  %692 = vmatpush.msrb.mxu0 %v517_v3  ;;  %752 = vmatpush.msrb.mxu3 %v262_v6  ;;  %v206_v3 = vld [vmem:[#allocation5 + $0x8] sm:$0xff] }
  0x73   :  { %v593_v5 = vld [vmem:[#allocation5 + $0xc20] sm:$0xff]  ;;  %712 = vmatpush.msrb.mxu1 %v581_v4  ;;  %667 = vmatmul.f32.vlgmr.msra.gmra.mxu2 %v3587_v11  ;;  %v3603_v4 = vld [vmem:[#allocation2 + $0x20] sm:$0xff] }
  0x74   :  { %v513_v7 = vld [vmem:[#allocation5 + $0x9a0] sm:$0xff]  ;;  %745 = vmatpush.msrb.mxu2 %v593_v5  ;;  %753 = vmatpush.msrb.mxu3 %v258_v10  ;;  %v278_v5 = vld [vmem:[#allocation5 + $0x248] sm:$0xff] }
  0x75   :  { %v577_v8 = vld [vmem:[#allocation5 + $0xba0] sm:$0xff]  ;;  %693 = vmatpush.msrb.mxu0 %v513_v7  ;;  %v458_v6 = vld [vmem:[#allocation5 + $0x7e8] sm:$0xff] }
  0x76   :  { %v589_v9 = vld [vmem:[#allocation5 + $0xc00] sm:$0xff]  ;;  %713 = vmatpush.msrb.mxu1 %v577_v8  ;;  %754 = vmatpush.msrb.mxu3 %v254_v15  ;;  %v522_v7 = vld [vmem:[#allocation5 + $0x9e8] sm:$0xff]  ;;  %v3605_v8 = vld [vmem:[#allocation2 + $0x28] sm:$0xff] }
  0x77   :  { %v509_v13 = vld [vmem:[#allocation5 + $0x980] sm:$0xff]  ;;  %746 = vmatpush.msrb.mxu2 %v589_v9  ;;  %v274_v9 = vld [vmem:[#allocation5 + $0x228] sm:$0xff] }
  0x78   :  { %v573_v14 = vld [vmem:[#allocation5 + $0xb80] sm:$0xff]  ;;  %694 = vmatpush.msrb.mxu0 %v509_v13  ;;  %755 = vmatpush.msrb.mxu3 %v250_v21  ;;  %v454_v10 = vld [vmem:[#allocation5 + $0x7c8] sm:$0xff] }
  0x79   :  { %v3592_v17 = vld [vmem:[#allocation2 + $0x18] sm:$0xff]  ;;  %771 = vmatpush.msra.mxu2 %v330_v12  ;;  %714 = vmatpush.msrb.mxu1 %v573_v14  ;;  %v518_v12 = vld [vmem:[#allocation5 + $0x9c8] sm:$0xff] }
  0x7a   :  { %v505_v19 = vld [vmem:[#allocation5 + $0x960] sm:$0xff]  ;;  %687 = vmatmul.f32.vlgmr.msra.gmra.mxu3 %v3592_v17  ;;  %v270_v13 = vld [vmem:[#allocation5 + $0x208] sm:$0xff] }
  0x7b   :  { %v569_v20 = vld [vmem:[#allocation5 + $0xb60] sm:$0xff]  ;;  %772 = vmatpush.msra.mxu2 %v326_v18  ;;  %695 = vmatpush.msrb.mxu0 %v505_v19  ;;  %v394_v14 = vld [vmem:[#allocation5 + $0x5e8] sm:$0xff] }
  0x7c   :  { %v501_v24 = vld [vmem:[#allocation5 + $0x940] sm:$0xff]  ;;  %715 = vmatpush.msrb.mxu1 %v569_v20  ;;  %756 = vmatpush.msrb.mxu3 %v246_v26  ;;  %v450_v15 = vld [vmem:[#allocation5 + $0x7a8] sm:$0xff] }
  0x7d   :  { %v565_v25 = vld [vmem:[#allocation5 + $0xb40] sm:$0xff]  ;;  %773 = vmatpush.msra.mxu2 %v322_v23  ;;  %696 = vmatpush.msrb.mxu0 %v501_v24  ;;  %v514_v18 = vld [vmem:[#allocation5 + $0x9a8] sm:$0xff] }
  0x7e   :  { %v497_v28 = vld [vmem:[#allocation5 + $0x920] sm:$0xff]  ;;  %716 = vmatpush.msrb.mxu1 %v565_v25  ;;  %757 = vmatpush.msrb.mxu3 %v242_v30  ;;  %v586_v19 = vld [vmem:[#allocation5 + $0xbe8] sm:$0xff] }
  0x7f   :  { %v561_v29 = vld [vmem:[#allocation5 + $0xb20] sm:$0xff]  ;;  %774 = vmatpush.msra.mxu2 %v318_v27  ;;  %697 = vmatpush.msrb.mxu0 %v497_v28  ;;  %v390_v20 = vld [vmem:[#allocation5 + $0x5c8] sm:$0xff] }
  0x80   :  { %v493_v32 = vld [vmem:[#allocation5 + $0x900] sm:$0xff]  ;;  %717 = vmatpush.msrb.mxu1 %v561_v29  ;;  %758 = vmatpush.msrb.mxu3 %v238_v34  ;;  %v446_v21 = vld [vmem:[#allocation5 + $0x788] sm:$0xff] }
  0x81   :  { %v557_v33 = vld [vmem:[#allocation5 + $0xb00] sm:$0xff]  ;;  %775 = vmatpush.msra.mxu2 %v314_v31  ;;  %698 = vmatpush.msrb.mxu0 %v493_v32  ;;  %v510_v23 = vld [vmem:[#allocation5 + $0x988] sm:$0xff] }
  0x82   :  { %v489_v36 = vld [vmem:[#allocation5 + $0x8e0] sm:$0xff]  ;;  %718 = vmatpush.msrb.mxu1 %v557_v33  ;;  %759 = vmatpush.msrb.mxu3 %v234_v38  ;;  %v582_v24 = vld [vmem:[#allocation5 + $0xbc8] sm:$0xff] }
  0x83   :  { %v553_v37 = vld [vmem:[#allocation5 + $0xae0] sm:$0xff]  ;;  %776 = vmatpush.msra.mxu2 %v310_v35  ;;  %699 = vmatpush.msrb.mxu0 %v489_v36  ;;  %v386_v25 = vld [vmem:[#allocation5 + $0x5a8] sm:$0xff] }
  0x84   :  { %v485_v40 = vld [vmem:[#allocation5 + $0x8c0] sm:$0xff]  ;;  %719 = vmatpush.msrb.mxu1 %v553_v37  ;;  %760 = vmatpush.msrb.mxu3 %v230_v42  ;;  %v442_v26 = vld [vmem:[#allocation5 + $0x768] sm:$0xff] }
  0x85   :  { %v549_v41 = vld [vmem:[#allocation5 + $0xac0] sm:$0xff]  ;;  %777 = vmatpush.msra.mxu2 %v306_v39  ;;  %700 = vmatpush.msrb.mxu0 %v485_v40  ;;  %v506_v27 = vld [vmem:[#allocation5 + $0x968] sm:$0xff] }
  0x86   :  { %v481_v44 = vld [vmem:[#allocation5 + $0x8a0] sm:$0xff]  ;;  %720 = vmatpush.msrb.mxu1 %v549_v41  ;;  %761 = vmatpush.msrb.mxu3 %v226_v46  ;;  %v578_v28 = vld [vmem:[#allocation5 + $0xba8] sm:$0xff] }
  0x87   :  { %v545_v45 = vld [vmem:[#allocation5 + $0xaa0] sm:$0xff]  ;;  %778 = vmatpush.msra.mxu2 %v302_v43  ;;  %701 = vmatpush.msrb.mxu0 %v481_v44  ;;  %v382_v29 = vld [vmem:[#allocation5 + $0x588] sm:$0xff] }
  0x88   :  { %v477_v48 = vld [vmem:[#allocation5 + $0x880] sm:$0xff]  ;;  %721 = vmatpush.msrb.mxu1 %v545_v45  ;;  %762 = vmatpush.msrb.mxu3 %v222_v50  ;;  %v438_v30 = vld [vmem:[#allocation5 + $0x748] sm:$0xff] }
  0x89   :  { %v541_v49 = vld [vmem:[#allocation5 + $0xa80] sm:$0xff]  ;;  %779 = vmatpush.msra.mxu2 %v298_v47  ;;  %702 = vmatpush.msrb.mxu0 %v477_v48  ;;  %v502_v31 = vld [vmem:[#allocation5 + $0x948] sm:$0xff] }
  0x8a   :  { %v473_v52 = vld [vmem:[#allocation5 + $0x860] sm:$0xff]  ;;  %722 = vmatpush.msrb.mxu1 %v541_v49  ;;  %763 = vmatpush.msrb.mxu3 %v218_v54  ;;  %v574_v32 = vld [vmem:[#allocation5 + $0xb88] sm:$0xff] }
  0x8b   :  { %v537_v53 = vld [vmem:[#allocation5 + $0xa60] sm:$0xff]  ;;  %780 = vmatpush.msra.mxu2 %v294_v51  ;;  %703 = vmatpush.msrb.mxu0 %v473_v52  ;;  %v378_v33 = vld [vmem:[#allocation5 + $0x568] sm:$0xff] }
  0x8c   :  { %v469_v56 = vld [vmem:[#allocation5 + $0x840] sm:$0xff]  ;;  %723 = vmatpush.msrb.mxu1 %v537_v53  ;;  %764 = vmatpush.msrb.mxu3 %v214_v58  ;;  %v434_v34 = vld [vmem:[#allocation5 + $0x728] sm:$0xff] }
  0x8d   :  { %v533_v57 = vld [vmem:[#allocation5 + $0xa40] sm:$0xff]  ;;  %781 = vmatpush.msra.mxu2 %v290_v55  ;;  %704 = vmatpush.msrb.mxu0 %v469_v56  ;;  %v498_v35 = vld [vmem:[#allocation5 + $0x928] sm:$0xff] }
  0x8e   :  { %v465_v60 = vld [vmem:[#allocation5 + $0x820] sm:$0xff]  ;;  %724 = vmatpush.msrb.mxu1 %v533_v57  ;;  %765 = vmatpush.msrb.mxu3 %v210_v62  ;;  %v570_v36 = vld [vmem:[#allocation5 + $0xb68] sm:$0xff] }
  0x8f   :  { %v529_v61 = vld [vmem:[#allocation5 + $0xa20] sm:$0xff]  ;;  %782 = vmatpush.msra.mxu2 %v286_v59  ;;  %705 = vmatpush.msrb.mxu0 %v465_v60  ;;  %v374_v37 = vld [vmem:[#allocation5 + $0x548] sm:$0xff] }
  0x90   :  { %v461_v1 = vld [vmem:[#allocation5 + $0x800] sm:$0xff]  ;;  %725 = vmatpush.msrb.mxu1 %v529_v61  ;;  %3116 = vmatmul.msk.f32.vlgmr.msrb.gmra.mxu2 %vm607_vm0, %v3599_v63  ;;  %v430_v38 = vld [vmem:[#allocation5 + $0x708] sm:$0xff] }
  0x91   :  { %v525_v2 = vld [vmem:[#allocation5 + $0xa00] sm:$0xff]  ;;  %783 = vmatpush.msra.mxu2 %v282_v0  ;;  %706 = vmatpush.msrb.mxu0 %v461_v1  ;;  %v494_v39 = vld [vmem:[#allocation5 + $0x908] sm:$0xff] }
  0x92   :  { %726 = vmatpush.msrb.mxu1 %v525_v2  ;;  %766 = vmatpush.msrb.mxu3 %v206_v3  ;;  %v566_v40 = vld [vmem:[#allocation5 + $0xb48] sm:$0xff] }
  0x93   :  { %707 = vmatmul.f32.vlgmr.msrb.gmra.mxu0 %v3603_v4  ;;  %784 = vmatpush.msra.mxu2 %v278_v5  ;;  %v370_v41 = vld [vmem:[#allocation5 + $0x528] sm:$0xff] }
  0x94   :  { %811 = vmatpush.msra.mxu1 %v458_v6  ;;  %831 = vmatpush.msra.mxu3 %v522_v7  ;;  %v426_v42 = vld [vmem:[#allocation5 + $0x6e8] sm:$0xff] }
  0x95   :  { %727 = vmatmul.f32.vlgmr.msrb.gmra.mxu1 %v3605_v8  ;;  %785 = vmatpush.msra.mxu2 %v274_v9  ;;  %v490_v43 = vld [vmem:[#allocation5 + $0x8e8] sm:$0xff] }
  0x96   :  { %812 = vmatpush.msra.mxu1 %v454_v10  ;;  %832 = vmatpush.msra.mxu3 %v518_v12  ;;  %v562_v44 = vld [vmem:[#allocation5 + $0xb28] sm:$0xff] }
  0x97   :  { %786 = vmatpush.msra.mxu2 %v270_v13  ;;  %791 = vmatpush.msra.mxu0 %v394_v14  ;;  %v366_v45 = vld [vmem:[#allocation5 + $0x508] sm:$0xff]  ;;  %v267_v14 = vld [vmem:[#allocation5 + $0x1f0] sm:$0xff] }
  0x98   :  { %813 = vmatpush.msra.mxu1 %v450_v15  ;;  %833 = vmatpush.msra.mxu3 %v514_v18  ;;  %v422_v46 = vld [vmem:[#allocation5 + $0x6c8] sm:$0xff] }
  0x99   :  { %851 = vmatpush.msrb.mxu2 %v586_v19  ;;  %792 = vmatpush.msra.mxu0 %v390_v20  ;;  %v486_v47 = vld [vmem:[#allocation5 + $0x8c8] sm:$0xff]  ;;  %v263_v20 = vld [vmem:[#allocation5 + $0x1d0] sm:$0xff] }
  0x9a   :  { %814 = vmatpush.msra.mxu1 %v446_v21  ;;  %834 = vmatpush.msra.mxu3 %v510_v23  ;;  %v558_v48 = vld [vmem:[#allocation5 + $0xb08] sm:$0xff]  ;;  %v331_v21 = vld [vmem:[#allocation5 + $0x3f0] sm:$0xff] }
  0x9b   :  { %852 = vmatpush.msrb.mxu2 %v582_v24  ;;  %793 = vmatpush.msra.mxu0 %v386_v25  ;;  %v362_v49 = vld [vmem:[#allocation5 + $0x4e8] sm:$0xff]  ;;  %v259_v25 = vld [vmem:[#allocation5 + $0x1b0] sm:$0xff] }
  0x9c   :  { %815 = vmatpush.msra.mxu1 %v442_v26  ;;  %835 = vmatpush.msra.mxu3 %v506_v27  ;;  %v418_v50 = vld [vmem:[#allocation5 + $0x6a8] sm:$0xff]  ;;  %v327_v26 = vld [vmem:[#allocation5 + $0x3d0] sm:$0xff] }
  0x9d   :  { %853 = vmatpush.msrb.mxu2 %v578_v28  ;;  %794 = vmatpush.msra.mxu0 %v382_v29  ;;  %v482_v51 = vld [vmem:[#allocation5 + $0x8a8] sm:$0xff]  ;;  %v459_v27 = vld [vmem:[#allocation5 + $0x7f0] sm:$0xff] }
  0x9e   :  { %816 = vmatpush.msra.mxu1 %v438_v30  ;;  %836 = vmatpush.msra.mxu3 %v502_v31  ;;  %v554_v52 = vld [vmem:[#allocation5 + $0xae8] sm:$0xff]  ;;  %v255_v28 = vld [vmem:[#allocation5 + $0x190] sm:$0xff] }
  0x9f   :  { %854 = vmatpush.msrb.mxu2 %v574_v32  ;;  %795 = vmatpush.msra.mxu0 %v378_v33  ;;  %v414_v53 = vld [vmem:[#allocation5 + $0x688] sm:$0xff]  ;;  %v323_v29 = vld [vmem:[#allocation5 + $0x3b0] sm:$0xff] }
  0xa0   :  { %817 = vmatpush.msra.mxu1 %v434_v34  ;;  %837 = vmatpush.msra.mxu3 %v498_v35  ;;  %v478_v54 = vld [vmem:[#allocation5 + $0x888] sm:$0xff]  ;;  %v455_v30 = vld [vmem:[#allocation5 + $0x7d0] sm:$0xff] }
  0xa1   :  { %855 = vmatpush.msrb.mxu2 %v570_v36  ;;  %796 = vmatpush.msra.mxu0 %v374_v37  ;;  %v358_v55 = vld [vmem:[#allocation5 + $0x4c8] sm:$0xff]  ;;  %v251_v31 = vld [vmem:[#allocation5 + $0x170] sm:$0xff] }
  0xa2   :  { %818 = vmatpush.msra.mxu1 %v430_v38  ;;  %838 = vmatpush.msra.mxu3 %v494_v39  ;;  %v550_v56 = vld [vmem:[#allocation5 + $0xac8] sm:$0xff]  ;;  %v319_v32 = vld [vmem:[#allocation5 + $0x390] sm:$0xff] }
  0xa3   :  { %856 = vmatpush.msrb.mxu2 %v566_v40  ;;  %797 = vmatpush.msra.mxu0 %v370_v41  ;;  %v410_v57 = vld [vmem:[#allocation5 + $0x668] sm:$0xff]  ;;  %v395_v33 = vld [vmem:[#allocation5 + $0x5f0] sm:$0xff] }
  0xa4   :  { %819 = vmatpush.msra.mxu1 %v426_v42  ;;  %839 = vmatpush.msra.mxu3 %v490_v43  ;;  %v474_v58 = vld [vmem:[#allocation5 + $0x868] sm:$0xff]  ;;  %v451_v34 = vld [vmem:[#allocation5 + $0x7b0] sm:$0xff] }
  0xa5   :  { %857 = vmatpush.msrb.mxu2 %v562_v44  ;;  %798 = vmatpush.msra.mxu0 %v366_v45  ;;  %v354_v59 = vld [vmem:[#allocation5 + $0x4a8] sm:$0xff]  ;;  %v247_v35 = vld [vmem:[#allocation5 + $0x150] sm:$0xff] }
  0xa6   :  { %820 = vmatpush.msra.mxu1 %v422_v46  ;;  %840 = vmatpush.msra.mxu3 %v486_v47  ;;  %v546_v60 = vld [vmem:[#allocation5 + $0xaa8] sm:$0xff]  ;;  %v315_v36 = vld [vmem:[#allocation5 + $0x370] sm:$0xff] }
  0xa7   :  { %858 = vmatpush.msrb.mxu2 %v558_v48  ;;  %799 = vmatpush.msra.mxu0 %v362_v49  ;;  %v406_v61 = vld [vmem:[#allocation5 + $0x648] sm:$0xff]  ;;  %v391_v37 = vld [vmem:[#allocation5 + $0x5d0] sm:$0xff] }
  0xa8   :  { %821 = vmatpush.msra.mxu1 %v418_v50  ;;  %841 = vmatpush.msra.mxu3 %v482_v51  ;;  %v470_v62 = vld [vmem:[#allocation5 + $0x848] sm:$0xff]  ;;  %v447_v38 = vld [vmem:[#allocation5 + $0x790] sm:$0xff] }
  0xa9   :  { %859 = vmatpush.msrb.mxu2 %v554_v52  ;;  %767 = vmatmul.f32.vlgmr.msrb.gmra.mxu3 %v3590_v16  ;;  %v350_v0 = vld [vmem:[#allocation5 + $0x488] sm:$0xff]  ;;  %v243_v39 = vld [vmem:[#allocation5 + $0x130] sm:$0xff] }
  0xaa   :  { %822 = vmatpush.msra.mxu1 %v414_v53  ;;  %842 = vmatpush.msra.mxu3 %v478_v54  ;;  %v542_v1 = vld [vmem:[#allocation5 + $0xa88] sm:$0xff]  ;;  %v311_v40 = vld [vmem:[#allocation5 + $0x350] sm:$0xff] }
  0xab   :  { %800 = vmatpush.msra.mxu0 %v358_v55  ;;  %860 = vmatpush.msrb.mxu2 %v550_v56  ;;  %v402_v2 = vld [vmem:[#allocation5 + $0x628] sm:$0xff]  ;;  %v387_v41 = vld [vmem:[#allocation5 + $0x5b0] sm:$0xff] }
  0xac   :  { %823 = vmatpush.msra.mxu1 %v410_v57  ;;  %843 = vmatpush.msra.mxu3 %v474_v58  ;;  %v466_v3 = vld [vmem:[#allocation5 + $0x828] sm:$0xff]  ;;  %v443_v42 = vld [vmem:[#allocation5 + $0x770] sm:$0xff] }
  0xad   :  { %801 = vmatpush.msra.mxu0 %v354_v59  ;;  %861 = vmatpush.msrb.mxu2 %v546_v60  ;;  %v346_v5 = vld [vmem:[#allocation5 + $0x468] sm:$0xff]  ;;  %v239_v43 = vld [vmem:[#allocation5 + $0x110] sm:$0xff] }
  0xae   :  { %824 = vmatpush.msra.mxu1 %v406_v61  ;;  %844 = vmatpush.msra.mxu3 %v470_v62  ;;  %v538_v6 = vld [vmem:[#allocation5 + $0xa68] sm:$0xff]  ;;  %v307_v44 = vld [vmem:[#allocation5 + $0x330] sm:$0xff] }
  0xaf   :  { %802 = vmatpush.msra.mxu0 %v350_v0  ;;  %862 = vmatpush.msrb.mxu2 %v542_v1  ;;  %v398_v7 = vld [vmem:[#allocation5 + $0x608] sm:$0xff]  ;;  %v383_v45 = vld [vmem:[#allocation5 + $0x590] sm:$0xff] }
  0xb0   :  { %787 = vmatmul.f32.vlgmr.msra.gmra.mxu2 %v3596_v22  ;;  %825 = vmatpush.msra.mxu1 %v402_v2  ;;  %v462_v9 = vld [vmem:[#allocation5 + $0x808] sm:$0xff]  ;;  %v439_v46 = vld [vmem:[#allocation5 + $0x750] sm:$0xff] }
  0xb1   :  { %v342_v10 = vld [vmem:[#allocation5 + $0x448] sm:$0xff]  ;;  %845 = vmatpush.msra.mxu3 %v466_v3  ;;  %803 = vmatpush.msra.mxu0 %v346_v5  ;;  %v235_v47 = vld [vmem:[#allocation5 + $0xf0] sm:$0xff] }
  0xb2   :  { %v534_v12 = vld [vmem:[#allocation5 + $0xa48] sm:$0xff]  ;;  %863 = vmatpush.msrb.mxu2 %v538_v6  ;;  %826 = vmatpush.msra.mxu1 %v398_v7  ;;  %v303_v48 = vld [vmem:[#allocation5 + $0x310] sm:$0xff] }
  0xb3   :  { %v594_v13 = vld [vmem:[#allocation5 + $0xc28] sm:$0xff]  ;;  %846 = vmatpush.msra.mxu3 %v462_v9  ;;  %804 = vmatpush.msra.mxu0 %v342_v10  ;;  %v379_v49 = vld [vmem:[#allocation5 + $0x570] sm:$0xff] }
  0xb4   :  { %v338_v15 = vld [vmem:[#allocation5 + $0x428] sm:$0xff]  ;;  %847 = vmatmul.f32.vlgmr.msra.gmra.mxu3 %v3603_v4  ;;  %864 = vmatpush.msrb.mxu2 %v534_v12  ;;  %v435_v50 = vld [vmem:[#allocation5 + $0x730] sm:$0xff] }
  0xb5   :  { %v530_v18 = vld [vmem:[#allocation5 + $0xa28] sm:$0xff]  ;;  %885 = vmatpush.msrb.mxu3 %v594_v13  ;;  %891 = vmatpush.msrb.mxu1 %v267_v14  ;;  %v231_v51 = vld [vmem:[#allocation5 + $0xd0] sm:$0xff] }
  0xb6   :  { %v590_v19 = vld [vmem:[#allocation5 + $0xc08] sm:$0xff]  ;;  %805 = vmatpush.msra.mxu0 %v338_v15  ;;  %865 = vmatpush.msrb.mxu2 %v530_v18  ;;  %v299_v52 = vld [vmem:[#allocation5 + $0x2f0] sm:$0xff] }
  0xb7   :  { %v334_v23 = vld [vmem:[#allocation5 + $0x408] sm:$0xff]  ;;  %886 = vmatpush.msrb.mxu3 %v590_v19  ;;  %892 = vmatpush.msrb.mxu1 %v263_v20  ;;  %v375_v53 = vld [vmem:[#allocation5 + $0x550] sm:$0xff] }
  0xb8   :  { %v526_v24 = vld [vmem:[#allocation5 + $0xa08] sm:$0xff]  ;;  %806 = vmatpush.msra.mxu0 %v334_v23  ;;  %827 = vmatmul.f32.vlgmr.msra.gmra.mxu1 %v3592_v17  ;;  %v431_v54 = vld [vmem:[#allocation5 + $0x710] sm:$0xff] }
  0xb9   :  { %911 = vmatpush.msra.mxu3 %v331_v21  ;;  %866 = vmatpush.msrb.mxu2 %v526_v24  ;;  %v227_v55 = vld [vmem:[#allocation5 + $0xb0] sm:$0xff] }
  0xba   :  { %893 = vmatpush.msrb.mxu1 %v259_v25  ;;  %807 = vmatmul.f32.vlgmr.msra.gmra.mxu0 %v3587_v11  ;;  %v295_v56 = vld [vmem:[#allocation5 + $0x2d0] sm:$0xff] }
  0xbb   :  { %867 = vmatmul.f32.vlgmr.msrb.gmra.mxu2 %v3605_v8  ;;  %912 = vmatpush.msra.mxu3 %v327_v26  ;;  %v371_v57 = vld [vmem:[#allocation5 + $0x530] sm:$0xff] }
  0xbc   :  { %951 = vmatpush.msra.mxu2 %v459_v27  ;;  %894 = vmatpush.msrb.mxu1 %v255_v28  ;;  %v427_v58 = vld [vmem:[#allocation5 + $0x6f0] sm:$0xff] }
  0xbd   :  { %3117 = vmatmul.msk.f32.vlgmr.msrb.gmra.mxu3 %vm607_vm0, %v3599_v63  ;;  %931 = vmatpush.msrb.mxu0 %v395_v33  ;;  %v223_v59 = vld [vmem:[#allocation5 + $0x90] sm:$0xff] }
  0xbe   :  { %913 = vmatpush.msra.mxu3 %v323_v29  ;;  %952 = vmatpush.msra.mxu2 %v455_v30  ;;  %v291_v60 = vld [vmem:[#allocation5 + $0x2b0] sm:$0xff] }
  0xbf   :  { %895 = vmatpush.msrb.mxu1 %v251_v31  ;;  %932 = vmatpush.msrb.mxu0 %v391_v37  ;;  %v367_v61 = vld [vmem:[#allocation5 + $0x510] sm:$0xff] }
  0xc0   :  { %914 = vmatpush.msra.mxu3 %v319_v32  ;;  %953 = vmatpush.msra.mxu2 %v451_v34  ;;  %v423_v62 = vld [vmem:[#allocation5 + $0x6d0] sm:$0xff]  ;;  %v268_v32 = vld [vmem:[#allocation5 + $0x1f8] sm:$0xff] }
  0xc1   :  { %896 = vmatpush.msrb.mxu1 %v247_v35  ;;  %933 = vmatpush.msrb.mxu0 %v387_v41  ;;  %v219_v0 = vld [vmem:[#allocation5 + $0x70] sm:$0xff] }
  0xc2   :  { %915 = vmatpush.msra.mxu3 %v315_v36  ;;  %954 = vmatpush.msra.mxu2 %v447_v38  ;;  %v287_v1 = vld [vmem:[#allocation5 + $0x290] sm:$0xff]  ;;  %v264_v36 = vld [vmem:[#allocation5 + $0x1d8] sm:$0xff] }
  0xc3   :  { %897 = vmatpush.msrb.mxu1 %v243_v39  ;;  %934 = vmatpush.msrb.mxu0 %v383_v45  ;;  %v363_v2 = vld [vmem:[#allocation5 + $0x4f0] sm:$0xff] }
  0xc4   :  { %916 = vmatpush.msra.mxu3 %v311_v40  ;;  %955 = vmatpush.msra.mxu2 %v443_v42  ;;  %v419_v3 = vld [vmem:[#allocation5 + $0x6b0] sm:$0xff]  ;;  %v260_v40 = vld [vmem:[#allocation5 + $0x1b8] sm:$0xff] }
  0xc5   :  { %898 = vmatpush.msrb.mxu1 %v239_v43  ;;  %935 = vmatpush.msrb.mxu0 %v379_v49  ;;  %v215_v5 = vld [vmem:[#allocation5 + $0x50] sm:$0xff]  ;;  %v256_v43 = vld [vmem:[#allocation5 + $0x198] sm:$0xff] }
  0xc6   :  { %917 = vmatpush.msra.mxu3 %v307_v44  ;;  %956 = vmatpush.msra.mxu2 %v439_v46  ;;  %v283_v6 = vld [vmem:[#allocation5 + $0x270] sm:$0xff] }
  0xc7   :  { %899 = vmatpush.msrb.mxu1 %v235_v47  ;;  %936 = vmatpush.msrb.mxu0 %v375_v53  ;;  %v359_v7 = vld [vmem:[#allocation5 + $0x4d0] sm:$0xff]  ;;  %v252_v47 = vld [vmem:[#allocation5 + $0x178] sm:$0xff] }
  0xc8   :  { %918 = vmatpush.msra.mxu3 %v303_v48  ;;  %957 = vmatpush.msra.mxu2 %v435_v50  ;;  %v415_v9 = vld [vmem:[#allocation5 + $0x690] sm:$0xff]  ;;  %v332_v48 = vld [vmem:[#allocation5 + $0x3f8] sm:$0xff] }
  0xc9   :  { %900 = vmatpush.msrb.mxu1 %v231_v51  ;;  %937 = vmatpush.msrb.mxu0 %v371_v57  ;;  %v211_v10 = vld [vmem:[#allocation5 + $0x30] sm:$0xff]  ;;  %v248_v50 = vld [vmem:[#allocation5 + $0x158] sm:$0xff] }
  0xca   :  { %919 = vmatpush.msra.mxu3 %v299_v52  ;;  %958 = vmatpush.msra.mxu2 %v431_v54  ;;  %v279_v12 = vld [vmem:[#allocation5 + $0x250] sm:$0xff]  ;;  %v244_v53 = vld [vmem:[#allocation5 + $0x138] sm:$0xff] }
  0xcb   :  { %901 = vmatpush.msrb.mxu1 %v227_v55  ;;  %938 = vmatpush.msrb.mxu0 %v367_v61  ;;  %v355_v13 = vld [vmem:[#allocation5 + $0x4b0] sm:$0xff]  ;;  %v324_v54 = vld [vmem:[#allocation5 + $0x3b8] sm:$0xff] }
  0xcc   :  { %920 = vmatpush.msra.mxu3 %v295_v56  ;;  %959 = vmatpush.msra.mxu2 %v427_v58  ;;  %v411_v14 = vld [vmem:[#allocation5 + $0x670] sm:$0xff]  ;;  %v240_v57 = vld [vmem:[#allocation5 + $0x118] sm:$0xff] }
  0xcd   :  { %902 = vmatpush.msrb.mxu1 %v223_v59  ;;  %939 = vmatpush.msrb.mxu0 %v363_v2  ;;  %v207_v15 = vld [vmem:[#allocation5 + $0x10] sm:$0xff]  ;;  %v320_v58 = vld [vmem:[#allocation5 + $0x398] sm:$0xff] }
  0xce   :  { %921 = vmatpush.msra.mxu3 %v291_v60  ;;  %960 = vmatpush.msra.mxu2 %v423_v62  ;;  %v275_v18 = vld [vmem:[#allocation5 + $0x230] sm:$0xff]  ;;  %v236_v60 = vld [vmem:[#allocation5 + $0xf8] sm:$0xff] }
  0xcf   :  { %903 = vmatpush.msrb.mxu1 %v219_v0  ;;  %940 = vmatpush.msrb.mxu0 %v359_v7  ;;  %v523_v19 = vld [vmem:[#allocation5 + $0x9f0] sm:$0xff]  ;;  %v316_v61 = vld [vmem:[#allocation5 + $0x378] sm:$0xff] }
  0xd0   :  { %922 = vmatpush.msra.mxu3 %v287_v1  ;;  %961 = vmatpush.msra.mxu2 %v419_v3  ;;  %v407_v20 = vld [vmem:[#allocation5 + $0x650] sm:$0xff]  ;;  %v232_v1 = vld [vmem:[#allocation5 + $0xd8] sm:$0xff] }
  0xd1   :  { %904 = vmatpush.msrb.mxu1 %v215_v5  ;;  %941 = vmatpush.msrb.mxu0 %v355_v13  ;;  %v351_v21 = vld [vmem:[#allocation5 + $0x490] sm:$0xff]  ;;  %v312_v2 = vld [vmem:[#allocation5 + $0x358] sm:$0xff] }
  0xd2   :  { %923 = vmatpush.msra.mxu3 %v283_v6  ;;  %962 = vmatpush.msra.mxu2 %v415_v9  ;;  %v271_v23 = vld [vmem:[#allocation5 + $0x210] sm:$0xff]  ;;  %v228_v6 = vld [vmem:[#allocation5 + $0xb8] sm:$0xff] }
  0xd3   :  { %905 = vmatpush.msrb.mxu1 %v211_v10  ;;  %v519_v24 = vld [vmem:[#allocation5 + $0x9d0] sm:$0xff]  ;;  %942 = vmatpush.msrb.mxu0 %v351_v21  ;;  %v308_v7 = vld [vmem:[#allocation5 + $0x338] sm:$0xff] }
  0xd4   :  { %924 = vmatpush.msra.mxu3 %v279_v12  ;;  %963 = vmatpush.msra.mxu2 %v411_v14  ;;  %v403_v25 = vld [vmem:[#allocation5 + $0x630] sm:$0xff]  ;;  %v224_v12 = vld [vmem:[#allocation5 + $0x98] sm:$0xff] }
  0xd5   :  { %906 = vmatpush.msrb.mxu1 %v207_v15  ;;  %v347_v26 = vld [vmem:[#allocation5 + $0x470] sm:$0xff]  ;;  %v304_v13 = vld [vmem:[#allocation5 + $0x318] sm:$0xff] }
  0xd6   :  { %925 = vmatpush.msra.mxu3 %v275_v18  ;;  %964 = vmatpush.msra.mxu2 %v407_v20  ;;  %v587_v27 = vld [vmem:[#allocation5 + $0xbf0] sm:$0xff]  ;;  %v220_v18 = vld [vmem:[#allocation5 + $0x78] sm:$0xff] }
  0xd7   :  { %971 = vmatpush.msra.mxu1 %v523_v19  ;;  %v515_v28 = vld [vmem:[#allocation5 + $0x9b0] sm:$0xff]  ;;  %943 = vmatpush.msrb.mxu0 %v347_v26  ;;  %v300_v19 = vld [vmem:[#allocation5 + $0x2f8] sm:$0xff] }
  0xd8   :  { %926 = vmatpush.msra.mxu3 %v271_v23  ;;  %v399_v29 = vld [vmem:[#allocation5 + $0x610] sm:$0xff]  ;;  %965 = vmatpush.msra.mxu2 %v403_v25  ;;  %v216_v23 = vld [vmem:[#allocation5 + $0x58] sm:$0xff] }
  0xd9   :  { %972 = vmatpush.msra.mxu1 %v519_v24  ;;  %v343_v30 = vld [vmem:[#allocation5 + $0x450] sm:$0xff]  ;;  %927 = vmatmul.f32.vlgmr.msra.gmra.mxu3 %v3596_v22  ;;  %v296_v24 = vld [vmem:[#allocation5 + $0x2d8] sm:$0xff] }
  0xda   :  { %v583_v31 = vld [vmem:[#allocation5 + $0xbd0] sm:$0xff]  ;;  %991 = vmatpush.msrb.mxu3 %v587_v27  ;;  %966 = vmatpush.msra.mxu2 %v399_v29  ;;  %v396_v25 = vld [vmem:[#allocation5 + $0x5f8] sm:$0xff] }
  0xdb   :  { %973 = vmatpush.msra.mxu1 %v515_v28  ;;  %v511_v33 = vld [vmem:[#allocation5 + $0x990] sm:$0xff]  ;;  %944 = vmatpush.msrb.mxu0 %v343_v30  ;;  %v212_v27 = vld [vmem:[#allocation5 + $0x38] sm:$0xff] }
  0xdc   :  { %v339_v34 = vld [vmem:[#allocation5 + $0x430] sm:$0xff]  ;;  %992 = vmatpush.msrb.mxu3 %v583_v31  ;;  %1031 = vmatpush.msrb.mxu2 %v268_v32  ;;  %v292_v28 = vld [vmem:[#allocation5 + $0x2b8] sm:$0xff] }
  0xdd   :  { %v579_v35 = vld [vmem:[#allocation5 + $0xbb0] sm:$0xff]  ;;  %974 = vmatpush.msra.mxu1 %v511_v33  ;;  %945 = vmatpush.msrb.mxu0 %v339_v34  ;;  %v392_v29 = vld [vmem:[#allocation5 + $0x5d8] sm:$0xff] }
  0xde   :  { %v507_v37 = vld [vmem:[#allocation5 + $0x970] sm:$0xff]  ;;  %993 = vmatpush.msrb.mxu3 %v579_v35  ;;  %1032 = vmatpush.msrb.mxu2 %v264_v36  ;;  %v460_v30 = vld [vmem:[#allocation5 + $0x7f8] sm:$0xff] }
  0xdf   :  { %v335_v38 = vld [vmem:[#allocation5 + $0x410] sm:$0xff]  ;;  %975 = vmatpush.msra.mxu1 %v507_v37  ;;  %967 = vmatmul.f32.vlgmr.msra.gmra.mxu2 %v3592_v17  ;;  %v328_v17 = vld [vmem:[#allocation5 + $0x3d8] sm:$0xff] }
  0xe0   :  { %v575_v39 = vld [vmem:[#allocation5 + $0xb90] sm:$0xff]  ;;  %907 = vmatmul.f32.vlgmr.msrb.gmra.mxu1 %v3590_v16  ;;  %946 = vmatpush.msrb.mxu0 %v335_v38  ;;  %v208_v31 = vld [vmem:[#allocation5 + $0x18] sm:$0xff] }
  0xe1   :  { %v503_v41 = vld [vmem:[#allocation5 + $0x950] sm:$0xff]  ;;  %994 = vmatpush.msrb.mxu3 %v575_v39  ;;  %1033 = vmatpush.msrb.mxu2 %v260_v40  ;;  %v288_v32 = vld [vmem:[#allocation5 + $0x298] sm:$0xff] }
  0xe2   :  { %v595_v22 = vld [vmem:[#allocation5 + $0xc30] sm:$0xff]  ;;  %976 = vmatpush.msra.mxu1 %v503_v41  ;;  %947 = vmatmul.f32.vlgmr.msrb.gmra.mxu0 %v3587_v11  ;;  %v388_v33 = vld [vmem:[#allocation5 + $0x5b8] sm:$0xff] }
  0xe3   :  { %v571_v42 = vld [vmem:[#allocation5 + $0xb70] sm:$0xff]  ;;  %1025 = vmatpush.msra.mxu0 %v595_v22  ;;  %1034 = vmatpush.msrb.mxu2 %v256_v43  ;;  %v456_v34 = vld [vmem:[#allocation5 + $0x7d8] sm:$0xff] }
  0xe4   :  { %v499_v44 = vld [vmem:[#allocation5 + $0x930] sm:$0xff]  ;;  %995 = vmatpush.msrb.mxu3 %v571_v42  ;;  %v524_v35 = vld [vmem:[#allocation5 + $0x9f8] sm:$0xff] }
  0xe5   :  { %v591_v45 = vld [vmem:[#allocation5 + $0xc10] sm:$0xff]  ;;  %977 = vmatpush.msra.mxu1 %v499_v44  ;;  %1035 = vmatpush.msrb.mxu2 %v252_v47  ;;  %v384_v36 = vld [vmem:[#allocation5 + $0x598] sm:$0xff] }
  0xe6   :  { %v567_v46 = vld [vmem:[#allocation5 + $0xb50] sm:$0xff]  ;;  %1026 = vmatpush.msra.mxu0 %v591_v45  ;;  %v452_v37 = vld [vmem:[#allocation5 + $0x7b8] sm:$0xff] }
  0xe7   :  { %v495_v49 = vld [vmem:[#allocation5 + $0x910] sm:$0xff]  ;;  %996 = vmatpush.msrb.mxu3 %v567_v46  ;;  %1036 = vmatpush.msrb.mxu2 %v248_v50  ;;  %v520_v38 = vld [vmem:[#allocation5 + $0x9d8] sm:$0xff] }
  0xe8   :  { %v563_v16 = vld [vmem:[#allocation5 + $0xb30] sm:$0xff]  ;;  %1051 = vmatpush.msrb.mxu0 %v332_v48  ;;  %978 = vmatpush.msra.mxu1 %v495_v49  ;;  %v280_v39 = vld [vmem:[#allocation5 + $0x258] sm:$0xff] }
  0xe9   :  { %v491_v51 = vld [vmem:[#allocation5 + $0x8f0] sm:$0xff]  ;;  %997 = vmatpush.msrb.mxu3 %v563_v16  ;;  %1037 = vmatpush.msrb.mxu2 %v244_v53  ;;  %v380_v40 = vld [vmem:[#allocation5 + $0x578] sm:$0xff] }
  0xea   :  { %v559_v52 = vld [vmem:[#allocation5 + $0xb10] sm:$0xff]  ;;  %1052 = vmatpush.msrb.mxu0 %v328_v17  ;;  %979 = vmatpush.msra.mxu1 %v491_v51  ;;  %v448_v41 = vld [vmem:[#allocation5 + $0x798] sm:$0xff] }
  0xeb   :  { %v487_v55 = vld [vmem:[#allocation5 + $0x8d0] sm:$0xff]  ;;  %998 = vmatpush.msrb.mxu3 %v559_v52  ;;  %1038 = vmatpush.msrb.mxu2 %v240_v57  ;;  %v516_v22 = vld [vmem:[#allocation5 + $0x9b8] sm:$0xff] }
  0xec   :  { %v555_v56 = vld [vmem:[#allocation5 + $0xaf0] sm:$0xff]  ;;  %1053 = vmatpush.msrb.mxu0 %v324_v54  ;;  %980 = vmatpush.msra.mxu1 %v487_v55  ;;  %v376_v42 = vld [vmem:[#allocation5 + $0x558] sm:$0xff] }
  0xed   :  { %v483_v59 = vld [vmem:[#allocation5 + $0x8b0] sm:$0xff]  ;;  %999 = vmatpush.msrb.mxu3 %v555_v56  ;;  %1039 = vmatpush.msrb.mxu2 %v236_v60  ;;  %v444_v43 = vld [vmem:[#allocation5 + $0x778] sm:$0xff] }
  0xee   :  { %v551_v11 = vld [vmem:[#allocation5 + $0xad0] sm:$0xff]  ;;  %1054 = vmatpush.msrb.mxu0 %v320_v58  ;;  %981 = vmatpush.msra.mxu1 %v483_v59  ;;  %v512_v44 = vld [vmem:[#allocation5 + $0x998] sm:$0xff] }
  0xef   :  { %v479_v62 = vld [vmem:[#allocation5 + $0x890] sm:$0xff]  ;;  %1000 = vmatpush.msrb.mxu3 %v551_v11  ;;  %1040 = vmatpush.msrb.mxu2 %v232_v1  ;;  %v272_v45 = vld [vmem:[#allocation5 + $0x218] sm:$0xff] }
  0xf0   :  { %v547_v0 = vld [vmem:[#allocation5 + $0xab0] sm:$0xff]  ;;  %1055 = vmatpush.msrb.mxu0 %v316_v61  ;;  %982 = vmatpush.msra.mxu1 %v479_v62  ;;  %v372_v46 = vld [vmem:[#allocation5 + $0x538] sm:$0xff] }
  0xf1   :  { %v475_v3 = vld [vmem:[#allocation5 + $0x870] sm:$0xff]  ;;  %1001 = vmatpush.msrb.mxu3 %v547_v0  ;;  %1041 = vmatpush.msrb.mxu2 %v228_v6  ;;  %v440_v47 = vld [vmem:[#allocation5 + $0x758] sm:$0xff] }
  0xf2   :  { %v543_v5 = vld [vmem:[#allocation5 + $0xa90] sm:$0xff]  ;;  %1056 = vmatpush.msrb.mxu0 %v312_v2  ;;  %983 = vmatpush.msra.mxu1 %v475_v3  ;;  %v508_v48 = vld [vmem:[#allocation5 + $0x978] sm:$0xff] }
  0xf3   :  { %v471_v9 = vld [vmem:[#allocation5 + $0x850] sm:$0xff]  ;;  %1002 = vmatpush.msrb.mxu3 %v543_v5  ;;  %1042 = vmatpush.msrb.mxu2 %v224_v12  ;;  %v588_v49 = vld [vmem:[#allocation5 + $0xbf8] sm:$0xff] }
  0xf4   :  { %v539_v10 = vld [vmem:[#allocation5 + $0xa70] sm:$0xff]  ;;  %1057 = vmatpush.msrb.mxu0 %v308_v7  ;;  %984 = vmatpush.msra.mxu1 %v471_v9  ;;  %v368_v16 = vld [vmem:[#allocation5 + $0x518] sm:$0xff] }
  0xf5   :  { %v467_v14 = vld [vmem:[#allocation5 + $0x830] sm:$0xff]  ;;  %1003 = vmatpush.msrb.mxu3 %v539_v10  ;;  %1043 = vmatpush.msrb.mxu2 %v220_v18  ;;  %v436_v50 = vld [vmem:[#allocation5 + $0x738] sm:$0xff] }
  0xf6   :  { %v535_v15 = vld [vmem:[#allocation5 + $0xa50] sm:$0xff]  ;;  %1058 = vmatpush.msrb.mxu0 %v304_v13  ;;  %985 = vmatpush.msra.mxu1 %v467_v14  ;;  %v504_v17 = vld [vmem:[#allocation5 + $0x958] sm:$0xff] }
  0xf7   :  { %v463_v20 = vld [vmem:[#allocation5 + $0x810] sm:$0xff]  ;;  %1004 = vmatpush.msrb.mxu3 %v535_v15  ;;  %1044 = vmatpush.msrb.mxu2 %v216_v23  ;;  %v584_v51 = vld [vmem:[#allocation5 + $0xbd8] sm:$0xff]  ;;  %v3169_v23 = vld [vmem:[#allocation2] sm:$0xff] }
  0xf8   :  { %v531_v21 = vld [vmem:[#allocation5 + $0xa30] sm:$0xff]  ;;  %1059 = vmatpush.msrb.mxu0 %v300_v19  ;;  %986 = vmatpush.msra.mxu1 %v463_v20  ;;  %v364_v52 = vld [vmem:[#allocation5 + $0x4f8] sm:$0xff] }
  0xf9   :  { %v527_v26 = vld [vmem:[#allocation5 + $0xa10] sm:$0xff]  ;;  %987 = vmatmul.f32.vlgmr.msra.gmra.mxu1 %v3603_v4  ;;  %1005 = vmatpush.msrb.mxu3 %v531_v21  ;;  %v284_v4 = vld [vmem:[#allocation5 + $0x278] sm:$0xff]  ;;  %v3625_v21 = vld [vmem:[#allocation7] sm:$0xf] }
  0xfa   :  { %1060 = vmatpush.msrb.mxu0 %v296_v24  ;;  %1071 = vmatpush.msrb.mxu1 %v396_v25  ;;  %v432_v53 = vld [vmem:[#allocation5 + $0x718] sm:$0xff] }
  0xfb   :  { %1006 = vmatpush.msrb.mxu3 %v527_v26  ;;  %1045 = vmatpush.msrb.mxu2 %v212_v27  ;;  %v500_v54 = vld [vmem:[#allocation5 + $0x938] sm:$0xff] }
  0xfc   :  { %1061 = vmatpush.msrb.mxu0 %v292_v28  ;;  %1072 = vmatpush.msrb.mxu1 %v392_v29  ;;  %v580_v55 = vld [vmem:[#allocation5 + $0xbb8] sm:$0xff] }
  0xfd   :  { %1007 = vmatmul.f32.vlgmr.msrb.gmra.mxu3 %v3605_v8  ;;  %1046 = vmatpush.msrb.mxu2 %v208_v31  ;;  %v276_v8 = vld [vmem:[#allocation5 + $0x238] sm:$0xff] }
  0xfe   :  { %1091 = vmatpush.msra.mxu3 %v460_v30  ;;  %1062 = vmatpush.msrb.mxu0 %v288_v32  ;;  %v428_v56 = vld [vmem:[#allocation5 + $0x6f8] sm:$0xff]  ;;  %v599_v30 = vperm.slane %v3625_v21, 0 }
  0xff   :  { %1073 = vmatpush.msrb.mxu1 %v388_v33  ;;  %1111 = vmatpush.msra.mxu2 %v524_v35  ;;  %v496_v57 = vld [vmem:[#allocation5 + $0x918] sm:$0xff]  ;;  %v628_v33 = vpop.f32.mrf.mxu0  ;;  %v1299_v35 = vld [vmem:[#allocation8 + $0x3e0] sm:$0xff] }
 0x100   :  { %1092 = vmatpush.msra.mxu3 %v456_v34  ;;  %1063 = vmatpush.msrb.mxu0 %v284_v4  ;;  %v576_v58 = vld [vmem:[#allocation5 + $0xb98] sm:$0xff]  ;;  %v1235_v34 = vld [vmem:[#allocation8 + $0x1e0] sm:$0xff] }
 0x101   :  { %1074 = vmatpush.msrb.mxu1 %v384_v36  ;;  %1112 = vmatpush.msra.mxu2 %v520_v38  ;;  %v356_v59 = vld [vmem:[#allocation5 + $0x4b8] sm:$0xff] }
 0x102   :  { %1093 = vmatpush.msra.mxu3 %v452_v37  ;;  %1064 = vmatpush.msrb.mxu0 %v280_v39  ;;  %v424_v11 = vld [vmem:[#allocation5 + $0x6d8] sm:$0xff]  ;;  %v629_v37 = vadd.f32 %v628_v33, %v599_v30  ;;  %v3171_v39 = vld [vmem:[#allocation2 + $0x18] sm:$0xff] }
 0x103   :  { %1075 = vmatpush.msrb.mxu1 %v380_v40  ;;  %1113 = vmatpush.msra.mxu2 %v516_v22  ;;  %v492_v60 = vld [vmem:[#allocation5 + $0x8f8] sm:$0xff]  ;;  %v648_v40 = vpop.f32.mrf.mxu1  ;;  %v1295_v22 = vld [vmem:[#allocation8 + $0x3c0] sm:$0xff] }
 0x104   :  { %1094 = vmatpush.msra.mxu3 %v448_v41  ;;  %1065 = vmatpush.msrb.mxu0 %v276_v8  ;;  %v572_v61 = vld [vmem:[#allocation5 + $0xb78] sm:$0xff]  ;;  %v1231_v41 = vld [vmem:[#allocation8 + $0x1c0] sm:$0xff] }
 0x105   :  { %1076 = vmatpush.msrb.mxu1 %v376_v42  ;;  %3118 = vmatmul.msk.f32.vlgmr.msra.gmra.mxu0 %vm607_vm0, %v3599_v63  ;;  %v360_v63 = vld [vmem:[#allocation5 + $0x4d8] sm:$0xff]  ;;  %v3172_v42 = vld [vmem:[#allocation2 + $0x8] sm:$0xff]  ;;  %v1183_v30 = vld [vmem:[#allocation8 + $0x40] sm:$0xff] }
 0x106   :  { %1095 = vmatpush.msra.mxu3 %v444_v43  ;;  %1114 = vmatpush.msra.mxu2 %v512_v44  ;;  %v352_v62 = vld [vmem:[#allocation5 + $0x498] sm:$0xff]  ;;  %v3173_v43 = vld [vmem:[#allocation2 + $0x20] sm:$0xff] }
 0x107   :  { %1066 = vmatpush.msrb.mxu0 %v272_v45  ;;  %1077 = vmatpush.msrb.mxu1 %v372_v46  ;;  %v420_v0 = vld [vmem:[#allocation5 + $0x6b8] sm:$0xff]  ;;  %v1227_v44 = vld [vmem:[#allocation8 + $0x1a0] sm:$0xff]  ;;  %v649_v46 = vadd.f32 %v648_v40, %v629_v37 }
 0x108   :  { %1096 = vmatpush.msra.mxu3 %v440_v47  ;;  %1115 = vmatpush.msra.mxu2 %v508_v48  ;;  %v488_v1 = vld [vmem:[#allocation5 + $0x8d8] sm:$0xff]  ;;  %v1291_v45 = vld [vmem:[#allocation8 + $0x3a0] sm:$0xff]  ;;  %v668_v48 = vpop.f32.mrf.mxu2 }
 0x109   :  { %1131 = vmatpush.msra.mxu0 %v588_v49  ;;  %1078 = vmatpush.msrb.mxu1 %v368_v16  ;;  %v568_v2 = vld [vmem:[#allocation5 + $0xb58] sm:$0xff]  ;;  %v1223_v49 = vld [vmem:[#allocation8 + $0x180] sm:$0xff] }
 0x10a   :  { %1097 = vmatpush.msra.mxu3 %v436_v50  ;;  %1116 = vmatpush.msra.mxu2 %v504_v17  ;;  %v348_v3 = vld [vmem:[#allocation5 + $0x478] sm:$0xff]  ;;  %v1287_v16 = vld [vmem:[#allocation8 + $0x380] sm:$0xff] }
 0x10b   :  { %1132 = vmatpush.msra.mxu0 %v584_v51  ;;  %1079 = vmatpush.msrb.mxu1 %v364_v52  ;;  %v416_v5 = vld [vmem:[#allocation5 + $0x698] sm:$0xff]  ;;  %v1219_v17 = vld [vmem:[#allocation8 + $0x160] sm:$0xff]  ;;  %v669_v52 = vadd.f32 %v668_v48, %v649_v46  ;;  %v1296_v48 = vld [vmem:[#allocation8 + $0x3c8] sm:$0xff] }
 0x10c   :  { %1098 = vmatpush.msra.mxu3 %v432_v53  ;;  %1117 = vmatpush.msra.mxu2 %v500_v54  ;;  %v484_v6 = vld [vmem:[#allocation5 + $0x8b8] sm:$0xff]  ;;  %v1283_v51 = vld [vmem:[#allocation8 + $0x360] sm:$0xff]  ;;  %v688_v53 = vpop.f32.mrf.mxu3 }
 0x10d   :  { %1133 = vmatpush.msra.mxu0 %v580_v55  ;;  %1080 = vmatpush.msrb.mxu1 %v360_v63  ;;  %v564_v7 = vld [vmem:[#allocation5 + $0xb38] sm:$0xff]  ;;  %v1215_v55 = vld [vmem:[#allocation8 + $0x140] sm:$0xff] }
 0x10e   :  { %1099 = vmatpush.msra.mxu3 %v428_v56  ;;  %1118 = vmatpush.msra.mxu2 %v496_v57  ;;  %v344_v9 = vld [vmem:[#allocation5 + $0x458] sm:$0xff]  ;;  %v1279_v56 = vld [vmem:[#allocation8 + $0x340] sm:$0xff] }
 0x10f   :  { %1134 = vmatpush.msra.mxu0 %v576_v58  ;;  %1081 = vmatpush.msrb.mxu1 %v356_v59  ;;  %v412_v10 = vld [vmem:[#allocation5 + $0x678] sm:$0xff]  ;;  %v1211_v58 = vld [vmem:[#allocation8 + $0x120] sm:$0xff]  ;;  %v689_v59 = vadd.f32 %v688_v53, %v669_v52 }
 0x110   :  { %1100 = vmatpush.msra.mxu3 %v424_v11  ;;  %1119 = vmatpush.msra.mxu2 %v492_v60  ;;  %v480_v12 = vld [vmem:[#allocation5 + $0x898] sm:$0xff]  ;;  %v708_v57 = vpop.f32.mrf.mxu0  ;;  %v3175_v11 = vld [vmem:[#allocation2 + $0x28] sm:$0xff]  ;;  %v1275_v60 = vld [vmem:[#allocation8 + $0x320] sm:$0xff] }
 0x111   :  { %1135 = vmatpush.msra.mxu0 %v572_v61  ;;  %1082 = vmatpush.msrb.mxu1 %v352_v62  ;;  %v560_v13 = vld [vmem:[#allocation5 + $0xb18] sm:$0xff]  ;;  %v1207_v61 = vld [vmem:[#allocation8 + $0x100] sm:$0xff]  ;;  %v709_v62 = vadd.f32 %v708_v57, %v689_v59  ;;  %v1284_v57 = vld [vmem:[#allocation8 + $0x368] sm:$0xff] }
 0x112   :  { %1101 = vmatpush.msra.mxu3 %v420_v0  ;;  %1120 = vmatpush.msra.mxu2 %v488_v1  ;;  %v340_v14 = vld [vmem:[#allocation5 + $0x438] sm:$0xff]  ;;  %v1271_v1 = vld [vmem:[#allocation8 + $0x300] sm:$0xff]  ;;  %v1216_v59 = vld [vmem:[#allocation8 + $0x148] sm:$0xff] }
 0x113   :  { %1136 = vmatpush.msra.mxu0 %v568_v2  ;;  %1083 = vmatpush.msrb.mxu1 %v348_v3  ;;  %v408_v15 = vld [vmem:[#allocation5 + $0x658] sm:$0xff]  ;;  %v748_v0 = vpop.f32.mrf.mxu2  ;;  %v728_v2 = vpop.f32.mrf.mxu1  ;;  %v1203_v3 = vld [vmem:[#allocation8 + $0xe0] sm:$0xff] }
 0x114   :  { %1102 = vmatpush.msra.mxu3 %v416_v5  ;;  %1121 = vmatpush.msra.mxu2 %v484_v6  ;;  %v476_v18 = vld [vmem:[#allocation5 + $0x878] sm:$0xff]  ;;  %v600_v5 = vperm.slane %v3625_v21, 1  ;;  %v1267_v6 = vld [vmem:[#allocation8 + $0x2e0] sm:$0xff] }
 0x115   :  { %1137 = vmatpush.msra.mxu0 %v564_v7  ;;  %1084 = vmatpush.msrb.mxu1 %v344_v9  ;;  %v556_v19 = vld [vmem:[#allocation5 + $0xaf8] sm:$0xff]  ;;  %v1199_v9 = vld [vmem:[#allocation8 + $0xc0] sm:$0xff] }
 0x116   :  { %1103 = vmatpush.msra.mxu3 %v412_v10  ;;  %1122 = vmatpush.msra.mxu2 %v480_v12  ;;  %v336_v20 = vld [vmem:[#allocation5 + $0x418] sm:$0xff]  ;;  %v729_v10 = vadd.f32 %v728_v2, %v709_v62  ;;  %v1263_v12 = vld [vmem:[#allocation8 + $0x2c0] sm:$0xff]  ;;  %v1276_v62 = vld [vmem:[#allocation8 + $0x328] sm:$0xff] }
 0x117   :  { %1138 = vmatpush.msra.mxu0 %v560_v13  ;;  %1047 = vmatmul.f32.vlgmr.msrb.gmra.mxu2 %v3169_v23  ;;  %v404_v24 = vld [vmem:[#allocation5 + $0x638] sm:$0xff]  ;;  %v1195_v13 = vld [vmem:[#allocation8 + $0xa0] sm:$0xff]  ;;  %v1208_v2 = vld [vmem:[#allocation8 + $0x108] sm:$0xff] }
 0x118   :  { %1085 = vmatpush.msrb.mxu1 %v340_v14  ;;  %v472_v25 = vld [vmem:[#allocation5 + $0x858] sm:$0xff]  ;;  %1104 = vmatpush.msra.mxu3 %v408_v15  ;;  %v1259_v15 = vld [vmem:[#allocation8 + $0x2a0] sm:$0xff] }
 0x119   :  { %1123 = vmatpush.msra.mxu2 %v476_v18  ;;  %v552_v26 = vld [vmem:[#allocation5 + $0xad8] sm:$0xff]  ;;  %1139 = vmatpush.msra.mxu0 %v556_v19  ;;  %v1363_v18 = vld [vmem:[#allocation8 + $0x5e0] sm:$0xff] }
 0x11a   :  { %v596_v27 = vld [vmem:[#allocation5 + $0xc38] sm:$0xff]  ;;  %1086 = vmatpush.msrb.mxu1 %v336_v20  ;;  %1105 = vmatpush.msra.mxu3 %v404_v24  ;;  %v1191_v19 = vld [vmem:[#allocation8 + $0x80] sm:$0xff]  ;;  %v749_v20 = vadd.f32 %v748_v0, %v729_v10  ;;  %v1200_v10 = vld [vmem:[#allocation8 + $0xc8] sm:$0xff] }
 0x11b   :  { %v400_v28 = vld [vmem:[#allocation5 + $0x618] sm:$0xff]  ;;  %1124 = vmatpush.msra.mxu2 %v472_v25  ;;  %1140 = vmatpush.msra.mxu0 %v552_v26  ;;  %v1255_v23 = vld [vmem:[#allocation8 + $0x280] sm:$0xff] }
 0x11c   :  { %v468_v29 = vld [vmem:[#allocation5 + $0x838] sm:$0xff]  ;;  %1165 = vmatpush.msra.mxu1 %v596_v27  ;;  %1106 = vmatpush.msra.mxu3 %v400_v28  ;;  %v1359_v25 = vld [vmem:[#allocation8 + $0x5c0] sm:$0xff]  ;;  %3137 = vtanh.f32 %v749_v20  ;;  %v1256_v20 = vld [vmem:[#allocation8 + $0x288] sm:$0xff] }
 0x11d   :  { %v548_v31 = vld [vmem:[#allocation5 + $0xab8] sm:$0xff]  ;;  %1125 = vmatpush.msra.mxu2 %v468_v29  ;;  %1107 = vmatmul.f32.vlgmr.msra.gmra.mxu3 %v3171_v39  ;;  %v1187_v26 = vld [vmem:[#allocation8 + $0x60] sm:$0xff] }
 0x11e   :  { %v592_v32 = vld [vmem:[#allocation5 + $0xc18] sm:$0xff]  ;;  %1141 = vmatpush.msra.mxu0 %v548_v31  ;;  %1441 = vmatpush.msrb.mxu3 %v1235_v34  ;;  %v1251_v28 = vld [vmem:[#allocation8 + $0x260] sm:$0xff] }
 0x11f   :  { %1166 = vmatpush.msra.mxu1 %v592_v32  ;;  %v464_v4 = vld [vmem:[#allocation5 + $0x818] sm:$0xff]  ;;  %1067 = vmatmul.f32.vlgmr.msrb.gmra.mxu0 %v3172_v42  ;;  %v1355_v29 = vld [vmem:[#allocation8 + $0x5a0] sm:$0xff]  ;;  %v1300_v42 = vld [vmem:[#allocation8 + $0x3e8] sm:$0xff] }
 0x120   :  { %v544_v36 = vld [vmem:[#allocation5 + $0xa98] sm:$0xff]  ;;  %1126 = vmatpush.msra.mxu2 %v464_v4  ;;  %1442 = vmatpush.msrb.mxu3 %v1231_v41  ;;  %v1247_v31 = vld [vmem:[#allocation8 + $0x240] sm:$0xff] }
 0x121   :  { %v3170_v38 = vld [vmem:[#allocation2 + $0x10] sm:$0xff]  ;;  %1142 = vmatpush.msra.mxu0 %v544_v36  ;;  %1127 = vmatmul.f32.vlgmr.msra.gmra.mxu2 %v3173_v43  ;;  %v1351_v34 = vld [vmem:[#allocation8 + $0x580] sm:$0xff] }
 0x122   :  { %1087 = vmatmul.f32.vlgmr.msrb.gmra.mxu1 %v3170_v38  ;;  %v540_v8 = vld [vmem:[#allocation5 + $0xa78] sm:$0xff]  ;;  %1443 = vmatpush.msrb.mxu3 %v1227_v44  ;;  %v1243_v36 = vld [vmem:[#allocation8 + $0x220] sm:$0xff]  ;;  %v3630_v43 = vpop.eup %3137 }
 0x123   :  { %1461 = vmatpush.msrb.mxu1 %v1299_v35  ;;  %v536_v47 = vld [vmem:[#allocation5 + $0xa58] sm:$0xff]  ;;  %1143 = vmatpush.msra.mxu0 %v540_v8  ;;  %v1179_v35 = vld [vmem:[#allocation8 + $0x20] sm:$0xff]  ;;  %v1236_v8 = vld [vmem:[#allocation8 + $0x1e8] sm:$0xff] }
 0x124   :  { %v532_v50 = vld [vmem:[#allocation5 + $0xa38] sm:$0xff]  ;;  %1444 = vmatpush.msrb.mxu3 %v1223_v49  ;;  %1481 = vmatpush.msrb.mxu2 %v1363_v18  ;;  %v1347_v37 = vld [vmem:[#allocation8 + $0x560] sm:$0xff]  ;;  %v1364_v18 = vld [vmem:[#allocation8 + $0x5e8] sm:$0xff] }
 0x125   :  { %1462 = vmatpush.msrb.mxu1 %v1295_v22  ;;  %1144 = vmatpush.msra.mxu0 %v536_v47  ;;  %v528_v54 = vld [vmem:[#allocation5 + $0xa18] sm:$0xff]  ;;  %v1175_v38 = vld [vmem:[#allocation8] sm:$0xff]  ;;  %v1232_v47 = vld [vmem:[#allocation8 + $0x1c8] sm:$0xff] }
 0x126   :  { %v3174_v63 = vld [vmem:[#allocation2 + $0x30] sm:$0xff]  ;;  %1445 = vmatpush.msrb.mxu3 %v1219_v17  ;;  %1482 = vmatpush.msrb.mxu2 %v1359_v25  ;;  %v1239_v40 = vld [vmem:[#allocation8 + $0x200] sm:$0xff]  ;;  %v1228_v17 = vld [vmem:[#allocation8 + $0x1a8] sm:$0xff] }
 0x127   :  { %1463 = vmatpush.msrb.mxu1 %v1291_v45  ;;  %1145 = vmatpush.msra.mxu0 %v532_v50  ;;  %v1343_v22 = vld [vmem:[#allocation8 + $0x540] sm:$0xff]  ;;  %v1252_v25 = vld [vmem:[#allocation8 + $0x268] sm:$0xff] }
 0x128   :  { %1446 = vmatpush.msrb.mxu3 %v1215_v55  ;;  %1483 = vmatpush.msrb.mxu2 %v1355_v29  ;;  %v1339_v46 = vld [vmem:[#allocation8 + $0x520] sm:$0xff]  ;;  %v1288_v55 = vld [vmem:[#allocation8 + $0x388] sm:$0xff] }
 0x129   :  { %1464 = vmatpush.msrb.mxu1 %v1287_v16  ;;  %1146 = vmatpush.msra.mxu0 %v528_v54  ;;  %v1335_v50 = vld [vmem:[#allocation8 + $0x500] sm:$0xff]  ;;  %v1224_v54 = vld [vmem:[#allocation8 + $0x188] sm:$0xff] }
 0x12a   :  { %3119 = vmatmul.msk.f32.vlgmr.msra.gmra.mxu1 %vm607_vm0, %v3174_v63  ;;  %1147 = vmatmul.f32.vlgmr.msra.gmra.mxu0 %v3175_v11  ;;  %v1331_v53 = vld [vmem:[#allocation8 + $0x4e0] sm:$0xff]  ;;  %v1280_v11 = vld [vmem:[#allocation8 + $0x348] sm:$0xff] }
 0x12b   :  { %1465 = vmatpush.msrb.mxu1 %v1283_v51  ;;  %1447 = vmatpush.msrb.mxu3 %v1211_v58  ;;  %v1292_v51 = vld [vmem:[#allocation8 + $0x3a8] sm:$0xff]  ;;  %v1327_v63 = vld [vmem:[#allocation8 + $0x4c0] sm:$0xff] }
 0x12c   :  { %v768_v7 = vpop.f32.mrf.mxu3  ;;  %1484 = vmatpush.msrb.mxu2 %v1351_v34  ;;  %v1323_v58 = vld [vmem:[#allocation8 + $0x4a0] sm:$0xff]  ;;  %v1248_v29 = vld [vmem:[#allocation8 + $0x248] sm:$0xff] }
 0x12d   :  { %1466 = vmatpush.msrb.mxu1 %v1279_v56  ;;  %1448 = vmatpush.msrb.mxu3 %v1207_v61  ;;  %v769_v14 = vadd.f32 %v768_v7, %v600_v5  ;;  %v1220_v56 = vld [vmem:[#allocation8 + $0x168] sm:$0xff]  ;;  %v1311_v5 = vld [vmem:[#allocation8 + $0x440] sm:$0xff] }
 0x12e   :  { %1485 = vmatpush.msrb.mxu2 %v1347_v37  ;;  %v1212_v61 = vld [vmem:[#allocation8 + $0x128] sm:$0xff]  ;;  %v1419_v34 = vld [vmem:[#allocation8 + $0x7a0] sm:$0xff] }
 0x12f   :  { %1467 = vmatpush.msrb.mxu1 %v1275_v60  ;;  %1449 = vmatpush.msrb.mxu3 %v1203_v3  ;;  %v1319_v60 = vld [vmem:[#allocation8 + $0x480] sm:$0xff]  ;;  %v1272_v3 = vld [vmem:[#allocation8 + $0x308] sm:$0xff] }
 0x130   :  { %1486 = vmatpush.msrb.mxu2 %v1343_v22  ;;  %v1268_v7 = vld [vmem:[#allocation8 + $0x2e8] sm:$0xff]  ;;  %v1415_v37 = vld [vmem:[#allocation8 + $0x780] sm:$0xff]  ;;  %v1233_v22 = vld [vmem:[#allocation8 + $0x1d0] sm:$0xff] }
 0x131   :  { %1468 = vmatpush.msrb.mxu1 %v1271_v1  ;;  %1450 = vmatpush.msrb.mxu3 %v1199_v9  ;;  %v1315_v1 = vld [vmem:[#allocation8 + $0x460] sm:$0xff] }
 0x132   :  { %1487 = vmatpush.msrb.mxu2 %v1339_v46  ;;  %v1307_v9 = vld [vmem:[#allocation8 + $0x420] sm:$0xff]  ;;  %v1293_v46 = vld [vmem:[#allocation8 + $0x3b0] sm:$0xff] }
 0x133   :  { %1469 = vmatpush.msrb.mxu1 %v1267_v6  ;;  %1451 = vmatpush.msrb.mxu3 %v1195_v13  ;;  %v788_v24 = vpop.f32.mrf.mxu2  ;;  %v1204_v6 = vld [vmem:[#allocation8 + $0xe8] sm:$0xff]  ;;  %v1303_v13 = vld [vmem:[#allocation8 + $0x400] sm:$0xff] }
 0x134   :  { %v789_v27 = vadd.f32 %v788_v24, %v769_v14  ;;  %1488 = vmatpush.msrb.mxu2 %v1335_v50  ;;  %v1196_v14 = vld [vmem:[#allocation8 + $0xa8] sm:$0xff] }
 0x135   :  { %1470 = vmatpush.msrb.mxu1 %v1263_v12  ;;  %1452 = vmatpush.msrb.mxu3 %v1191_v19  ;;  %v828_v39 = vpop.f32.mrf.mxu1  ;;  %v1264_v12 = vld [vmem:[#allocation8 + $0x2c8] sm:$0xff] }
 0x136   :  { %1489 = vmatpush.msrb.mxu2 %v1331_v53  ;;  %v1192_v19 = vld [vmem:[#allocation8 + $0x88] sm:$0xff] }
 0x137   :  { %1471 = vmatpush.msrb.mxu1 %v1259_v15  ;;  %1453 = vmatpush.msrb.mxu3 %v1187_v26  ;;  %v808_v32 = vpop.f32.mrf.mxu0  ;;  %v848_v33 = vpop.f32.mrf.mxu3  ;;  %v1260_v15 = vld [vmem:[#allocation8 + $0x2a8] sm:$0xff]  ;;  %v1427_v26 = vld [vmem:[#allocation8 + $0x7e0] sm:$0xff] }
 0x138   :  { %v809_v4 = vadd.f32 %v808_v32, %v789_v27  ;;  %1490 = vmatpush.msrb.mxu2 %v1327_v63  ;;  %v1188_v24 = vld [vmem:[#allocation8 + $0x68] sm:$0xff]  ;;  %1501 = vmatpush.msrb.mxu0 %v1427_v26  ;;  %v1281_v63 = vld [vmem:[#allocation8 + $0x350] sm:$0xff] }
 0x139   :  { %1472 = vmatpush.msrb.mxu1 %v1255_v23  ;;  %1454 = vmatpush.msrb.mxu3 %v1183_v30  ;;  %v1360_v23 = vld [vmem:[#allocation8 + $0x5c8] sm:$0xff]  ;;  %v1423_v30 = vld [vmem:[#allocation8 + $0x7c0] sm:$0xff]  ;;  %v1193_v26 = vld [vmem:[#allocation8 + $0x90] sm:$0xff] }
 0x13a   :  { %v829_v41 = vadd.f32 %v828_v39, %v809_v4  ;;  %1491 = vmatpush.msrb.mxu2 %v1323_v58  ;;  %v1356_v27 = vld [vmem:[#allocation8 + $0x5a8] sm:$0xff]  ;;  %1502 = vmatpush.msrb.mxu0 %v1423_v30  ;;  %v1301_v39 = vld [vmem:[#allocation8 + $0x3f0] sm:$0xff] }
 0x13b   :  { %1473 = vmatpush.msrb.mxu1 %v1251_v28  ;;  %1455 = vmatpush.msrb.mxu3 %v1179_v35  ;;  %v1184_v28 = vld [vmem:[#allocation8 + $0x48] sm:$0xff]  ;;  %v1213_v58 = vld [vmem:[#allocation8 + $0x130] sm:$0xff] }
 0x13c   :  { %v849_v44 = vadd.f32 %v848_v33, %v829_v41  ;;  %1492 = vmatpush.msrb.mxu2 %v1319_v60  ;;  %v1180_v32 = vld [vmem:[#allocation8 + $0x28] sm:$0xff]  ;;  %1503 = vmatpush.msrb.mxu0 %v1419_v34  ;;  %v1411_v41 = vld [vmem:[#allocation8 + $0x760] sm:$0xff]  ;;  %v1185_v34 = vld [vmem:[#allocation8 + $0x50] sm:$0xff] }
 0x13d   :  { %1474 = vmatpush.msrb.mxu1 %v1247_v31  ;;  %1456 = vmatpush.msrb.mxu3 %v1175_v38  ;;  %v1352_v31 = vld [vmem:[#allocation8 + $0x588] sm:$0xff]  ;;  %v1237_v38 = vld [vmem:[#allocation8 + $0x1f0] sm:$0xff]  ;;  %v1387_v60 = vld [vmem:[#allocation8 + $0x6a0] sm:$0xff] }
 0x13e   :  { %v868_v45 = vpop.f32.mrf.mxu2  ;;  %1457 = vmatmul.f32.vlgmr.msrb.gmra.mxu3 %v3630_v43  ;;  %1493 = vmatpush.msrb.mxu2 %v1315_v1  ;;  %v1244_v33 = vld [vmem:[#allocation8 + $0x228] sm:$0xff]  ;;  %v601_v1 = vperm.slane %v3625_v21, 2 }
 0x13f   :  { %1475 = vmatpush.msrb.mxu1 %v1243_v36  ;;  %1521 = vmatpush.msra.mxu3 %v1236_v8  ;;  %v869_v49 = vadd.f32 %v868_v45, %v849_v44  ;;  %v1348_v35 = vld [vmem:[#allocation8 + $0x568] sm:$0xff]  ;;  %v1297_v8 = vld [vmem:[#allocation8 + $0x3d0] sm:$0xff]  ;;  %v1407_v44 = vld [vmem:[#allocation8 + $0x740] sm:$0xff] }
 0x140   :  { %v888_v16 = vpop.f32.mrf.mxu3  ;;  %1494 = vmatpush.msrb.mxu2 %v1311_v5  ;;  %v1176_v4 = vld [vmem:[#allocation8 + $0x8] sm:$0xff]  ;;  %1504 = vmatpush.msrb.mxu0 %v1415_v37  ;;  %v1229_v45 = vld [vmem:[#allocation8 + $0x1b0] sm:$0xff] }
 0x141   :  { %1476 = vmatpush.msrb.mxu1 %v1239_v40  ;;  %1522 = vmatpush.msra.mxu3 %v1232_v47  ;;  %v889_v52 = vadd.f32 %v888_v16, %v869_v49  ;;  %v1240_v36 = vld [vmem:[#allocation8 + $0x208] sm:$0xff]  ;;  %v1225_v49 = vld [vmem:[#allocation8 + $0x190] sm:$0xff] }
 0x142   :  { %1495 = vmatpush.msrb.mxu2 %v1307_v9  ;;  %v1344_v40 = vld [vmem:[#allocation8 + $0x548] sm:$0xff]  ;;  %1505 = vmatpush.msrb.mxu0 %v1411_v41  ;;  %v1289_v16 = vld [vmem:[#allocation8 + $0x390] sm:$0xff] }
 0x143   :  { %1541 = vmatpush.msra.mxu1 %v1300_v42  ;;  %1523 = vmatpush.msra.mxu3 %v1228_v17  ;;  %3139 = vtanh.f32 %v889_v52  ;;  %v1340_v42 = vld [vmem:[#allocation8 + $0x528] sm:$0xff]  ;;  %v1399_v17 = vld [vmem:[#allocation8 + $0x700] sm:$0xff]  ;;  %v1285_v52 = vld [vmem:[#allocation8 + $0x370] sm:$0xff] }
 0x144   :  { %1496 = vmatpush.msrb.mxu2 %v1303_v13  ;;  %v1336_v47 = vld [vmem:[#allocation8 + $0x508] sm:$0xff]  ;;  %1506 = vmatpush.msrb.mxu0 %v1407_v44  ;;  %v1265_v13 = vld [vmem:[#allocation8 + $0x2d0] sm:$0xff]  ;;  %v1238_v44 = vld [vmem:[#allocation8 + $0x1f8] sm:$0xff] }
 0x145   :  { %1542 = vmatpush.msra.mxu1 %v1296_v48  ;;  %1524 = vmatpush.msra.mxu3 %v1224_v54  ;;  %v1403_v48 = vld [vmem:[#allocation8 + $0x720] sm:$0xff]  ;;  %v1332_v50 = vld [vmem:[#allocation8 + $0x4e8] sm:$0xff] }
 0x146   :  { %1561 = vmatpush.msra.mxu2 %v1364_v18  ;;  %1507 = vmatpush.msrb.mxu0 %v1403_v48  ;;  %v1328_v53 = vld [vmem:[#allocation8 + $0x4c8] sm:$0xff]  ;;  %v1395_v54 = vld [vmem:[#allocation8 + $0x6e0] sm:$0xff]  ;;  %v1234_v48 = vld [vmem:[#allocation8 + $0x1d8] sm:$0xff] }
 0x147   :  { %1543 = vmatpush.msra.mxu1 %v1292_v51  ;;  %1525 = vmatpush.msra.mxu3 %v1220_v56  ;;  %v1221_v51 = vld [vmem:[#allocation8 + $0x170] sm:$0xff]  ;;  %v1324_v56 = vld [vmem:[#allocation8 + $0x4a8] sm:$0xff]  ;;  %v1375_v18 = vld [vmem:[#allocation8 + $0x640] sm:$0xff] }
 0x148   :  { %1562 = vmatpush.msra.mxu2 %v1360_v23  ;;  %1508 = vmatpush.msrb.mxu0 %v1399_v17  ;;  %v1312_v9 = vld [vmem:[#allocation8 + $0x448] sm:$0xff]  ;;  %v1261_v23 = vld [vmem:[#allocation8 + $0x2b0] sm:$0xff] }
 0x149   :  { %1544 = vmatpush.msra.mxu1 %v1288_v55  ;;  %v3633_v0 = vpop.eup %3139  ;;  %1526 = vmatpush.msra.mxu3 %v1216_v59  ;;  %v1217_v55 = vld [vmem:[#allocation8 + $0x150] sm:$0xff]  ;;  %v1412_v17 = vld [vmem:[#allocation8 + $0x768] sm:$0xff] }
 0x14a   :  { %1477 = vmatmul.f32.vlgmr.msrb.gmra.mxu1 %v3633_v0  ;;  %1563 = vmatpush.msra.mxu2 %v1356_v27  ;;  %v1277_v59 = vld [vmem:[#allocation8 + $0x330] sm:$0xff] }
 0x14b   :  { %1545 = vmatpush.msra.mxu1 %v1284_v57  ;;  %1527 = vmatpush.msra.mxu3 %v1212_v61  ;;  %v1391_v57 = vld [vmem:[#allocation8 + $0x6c0] sm:$0xff]  ;;  %v1209_v61 = vld [vmem:[#allocation8 + $0x110] sm:$0xff] }
 0x14c   :  { %1564 = vmatpush.msra.mxu2 %v1352_v31  ;;  %1509 = vmatpush.msrb.mxu0 %v1395_v54  ;;  %v1257_v27 = vld [vmem:[#allocation8 + $0x290] sm:$0xff]  ;;  %v1408_v54 = vld [vmem:[#allocation8 + $0x748] sm:$0xff] }
 0x14d   :  { %1546 = vmatpush.msra.mxu1 %v1280_v11  ;;  %1528 = vmatpush.msra.mxu3 %v1208_v2  ;;  %v1320_v11 = vld [vmem:[#allocation8 + $0x488] sm:$0xff]  ;;  %v1189_v31 = vld [vmem:[#allocation8 + $0x70] sm:$0xff] }
 0x14e   :  { %1565 = vmatpush.msra.mxu2 %v1348_v35  ;;  %1510 = vmatpush.msrb.mxu0 %v1391_v57  ;;  %v1316_v2 = vld [vmem:[#allocation8 + $0x468] sm:$0xff]  ;;  %v1249_v35 = vld [vmem:[#allocation8 + $0x250] sm:$0xff] }
 0x14f   :  { %1547 = vmatpush.msra.mxu1 %v1276_v62  ;;  %1529 = vmatpush.msra.mxu3 %v1204_v6  ;;  %v1273_v62 = vld [vmem:[#allocation8 + $0x310] sm:$0xff]  ;;  %v1404_v57 = vld [vmem:[#allocation8 + $0x728] sm:$0xff] }
 0x150   :  { %1566 = vmatpush.msra.mxu2 %v1344_v40  ;;  %v1205_v6 = vld [vmem:[#allocation8 + $0xf0] sm:$0xff]  ;;  %1511 = vmatpush.msrb.mxu0 %v1387_v60  ;;  %v1420_v40 = vld [vmem:[#allocation8 + $0x7a8] sm:$0xff]  ;;  %v1218_v60 = vld [vmem:[#allocation8 + $0x158] sm:$0xff] }
 0x151   :  { %1548 = vmatpush.msra.mxu1 %v1272_v3  ;;  %1530 = vmatpush.msra.mxu3 %v1200_v10  ;;  %v1383_v3 = vld [vmem:[#allocation8 + $0x680] sm:$0xff] }
 0x152   :  { %1567 = vmatpush.msra.mxu2 %v1340_v42  ;;  %v1379_v10 = vld [vmem:[#allocation8 + $0x660] sm:$0xff]  ;;  %1512 = vmatpush.msrb.mxu0 %v1383_v3  ;;  %v1392_v3 = vld [vmem:[#allocation8 + $0x6c8] sm:$0xff] }
 0x153   :  { %1549 = vmatpush.msra.mxu1 %v1268_v7  ;;  %1531 = vmatpush.msra.mxu3 %v1196_v14  ;;  %v1269_v7 = vld [vmem:[#allocation8 + $0x2f0] sm:$0xff] }
 0x154   :  { %1568 = vmatpush.msra.mxu2 %v1336_v47  ;;  %1513 = vmatpush.msrb.mxu0 %v1379_v10  ;;  %v1416_v47 = vld [vmem:[#allocation8 + $0x788] sm:$0xff] }
 0x155   :  { %1550 = vmatpush.msra.mxu1 %v1264_v12  ;;  %1532 = vmatpush.msra.mxu3 %v1192_v19  ;;  %v1201_v12 = vld [vmem:[#allocation8 + $0xd0] sm:$0xff]  ;;  %v1388_v10 = vld [vmem:[#allocation8 + $0x6a8] sm:$0xff] }
 0x156   :  { %1569 = vmatpush.msra.mxu2 %v1332_v50  ;;  %1514 = vmatpush.msrb.mxu0 %v1375_v18  ;;  %v1202_v18 = vld [vmem:[#allocation8 + $0xd8] sm:$0xff] }
 0x157   :  { %1551 = vmatpush.msra.mxu1 %v1260_v15  ;;  %1533 = vmatpush.msra.mxu3 %v1188_v24  ;;  %v1308_v15 = vld [vmem:[#allocation8 + $0x428] sm:$0xff] }
 0x158   :  { %1570 = vmatpush.msra.mxu2 %v1328_v53  ;;  %v1304_v24 = vld [vmem:[#allocation8 + $0x408] sm:$0xff] }
 0x159   :  { %1552 = vmatpush.msra.mxu1 %v1256_v20  ;;  %1534 = vmatpush.msra.mxu3 %v1184_v28  ;;  %v1197_v20 = vld [vmem:[#allocation8 + $0xb0] sm:$0xff] }
 0x15a   :  { %1571 = vmatpush.msra.mxu2 %v1324_v56 }
 0x15b   :  { %1553 = vmatpush.msra.mxu1 %v1252_v25  ;;  %1535 = vmatpush.msra.mxu3 %v1180_v32  ;;  %v1371_v25 = vld [vmem:[#allocation8 + $0x620] sm:$0xff]  ;;  %v1253_v32 = vld [vmem:[#allocation8 + $0x270] sm:$0xff] }
 0x15c   :  { %1572 = vmatpush.msra.mxu2 %v1320_v11  ;;  %v928_v19 = vpop.f32.mrf.mxu3  ;;  %1515 = vmatpush.msrb.mxu0 %v1371_v25  ;;  %v1400_v11 = vld [vmem:[#allocation8 + $0x708] sm:$0xff]  ;;  %v1262_v25 = vld [vmem:[#allocation8 + $0x2b8] sm:$0xff] }
 0x15d   :  { %1554 = vmatpush.msra.mxu1 %v1248_v29  ;;  %1536 = vmatpush.msra.mxu3 %v1176_v4  ;;  %v908_v5 = vpop.f32.mrf.mxu1  ;;  %v1367_v29 = vld [vmem:[#allocation8 + $0x600] sm:$0xff] }
 0x15e   :  { %1537 = vmatmul.f32.vlgmr.msra.gmra.mxu3 %v3630_v43  ;;  %1573 = vmatpush.msra.mxu2 %v1316_v2  ;;  %v909_v14 = vadd.f32 %v908_v5, %v601_v1  ;;  %v1214_v1 = vld [vmem:[#allocation8 + $0x138] sm:$0xff] }
 0x15f   :  { %1555 = vmatpush.msra.mxu1 %v1244_v33  ;;  %1601 = vmatpush.msrb.mxu3 %v1237_v38  ;;  %v948_v30 = vpop.f32.mrf.mxu0  ;;  %v1428_v33 = vld [vmem:[#allocation8 + $0x7e8] sm:$0xff]  ;;  %v1181_v38 = vld [vmem:[#allocation8 + $0x30] sm:$0xff]  ;;  %v1278_v2 = vld [vmem:[#allocation8 + $0x338] sm:$0xff] }
 0x160   :  { %1574 = vmatpush.msra.mxu2 %v1312_v9  ;;  %v929_v28 = vadd.f32 %v928_v19, %v909_v14  ;;  %1516 = vmatpush.msrb.mxu0 %v1367_v29  ;;  %v1365_v9 = vld [vmem:[#allocation8 + $0x5f0] sm:$0xff]  ;;  %v1266_v19 = vld [vmem:[#allocation8 + $0x2d8] sm:$0xff] }
 0x161   :  { %1556 = vmatpush.msra.mxu1 %v1240_v36  ;;  %1602 = vmatpush.msrb.mxu3 %v1233_v22  ;;  %v1424_v36 = vld [vmem:[#allocation8 + $0x7c8] sm:$0xff]  ;;  %v1177_v22 = vld [vmem:[#allocation8 + $0x10] sm:$0xff]  ;;  %v1258_v29 = vld [vmem:[#allocation8 + $0x298] sm:$0xff] }
 0x162   :  { %1557 = vmatmul.f32.vlgmr.msra.gmra.mxu1 %v3633_v0  ;;  %1575 = vmatpush.msra.mxu2 %v1308_v15  ;;  %v949_v4 = vadd.f32 %v948_v30, %v929_v28  ;;  %v968_v37 = vpop.f32.mrf.mxu2  ;;  %v1361_v14 = vld [vmem:[#allocation8 + $0x5d0] sm:$0xff]  ;;  %v1384_v15 = vld [vmem:[#allocation8 + $0x688] sm:$0xff]  ;;  %v1194_v28 = vld [vmem:[#allocation8 + $0x98] sm:$0xff] }
 0x163   :  { %1621 = vmatpush.msrb.mxu1 %v1301_v39  ;;  %1603 = vmatpush.msrb.mxu3 %v1229_v45  ;;  %v1245_v39 = vld [vmem:[#allocation8 + $0x230] sm:$0xff]  ;;  %v1302_v45 = vld [vmem:[#allocation8 + $0x3f8] sm:$0xff]  ;;  %v1372_v30 = vld [vmem:[#allocation8 + $0x628] sm:$0xff] }
 0x164   :  { %1576 = vmatpush.msra.mxu2 %v1304_v24  ;;  %1581 = vmatpush.msra.mxu0 %v1428_v33  ;;  %v969_v42 = vadd.f32 %v968_v37, %v949_v4  ;;  %v1198_v24 = vld [vmem:[#allocation8 + $0xb8] sm:$0xff]  ;;  %v1349_v33 = vld [vmem:[#allocation8 + $0x570] sm:$0xff] }
 0x165   :  { %1622 = vmatpush.msrb.mxu1 %v1297_v8  ;;  %1604 = vmatpush.msrb.mxu3 %v1225_v49  ;;  %v1241_v8 = vld [vmem:[#allocation8 + $0x210] sm:$0xff]  ;;  %v1298_v49 = vld [vmem:[#allocation8 + $0x3d8] sm:$0xff] }
 0x166   :  { %1582 = vmatpush.msra.mxu0 %v1424_v36  ;;  %v1250_v4 = vld [vmem:[#allocation8 + $0x258] sm:$0xff]  ;;  %v602_v36 = vperm.slane %v3625_v21, 3  ;;  %v1345_v37 = vld [vmem:[#allocation8 + $0x550] sm:$0xff] }
 0x167   :  { %1623 = vmatpush.msrb.mxu1 %v1293_v46  ;;  %1605 = vmatpush.msrb.mxu3 %v1221_v51  ;;  %v1230_v51 = vld [vmem:[#allocation8 + $0x1b8] sm:$0xff]  ;;  %v1337_v21 = vld [vmem:[#allocation8 + $0x510] sm:$0xff] }
 0x168   :  { %1583 = vmatpush.msra.mxu0 %v1420_v40  ;;  %v1341_v40 = vld [vmem:[#allocation8 + $0x530] sm:$0xff] }
 0x169   :  { %1624 = vmatpush.msrb.mxu1 %v1289_v16  ;;  %1606 = vmatpush.msrb.mxu3 %v1217_v55  ;;  %v1226_v55 = vld [vmem:[#allocation8 + $0x198] sm:$0xff] }
 0x16a   :  { %1584 = vmatpush.msra.mxu0 %v1416_v47  ;;  %v1333_v47 = vld [vmem:[#allocation8 + $0x4f0] sm:$0xff] }
 0x16b   :  { %1625 = vmatpush.msrb.mxu1 %v1285_v52  ;;  %1607 = vmatpush.msrb.mxu3 %v1213_v58  ;;  %v1294_v52 = vld [vmem:[#allocation8 + $0x3b8] sm:$0xff] }
 0x16c   :  { %1585 = vmatpush.msra.mxu0 %v1412_v17  ;;  %v1222_v58 = vld [vmem:[#allocation8 + $0x178] sm:$0xff]  ;;  %v1325_v17 = vld [vmem:[#allocation8 + $0x4b0] sm:$0xff] }
 0x16d   :  { %1626 = vmatpush.msrb.mxu1 %v1281_v63  ;;  %1608 = vmatpush.msrb.mxu3 %v1209_v61  ;;  %v1290_v63 = vld [vmem:[#allocation8 + $0x398] sm:$0xff] }
 0x16e   :  { %1586 = vmatpush.msra.mxu0 %v1408_v54  ;;  %v1282_v61 = vld [vmem:[#allocation8 + $0x358] sm:$0xff] }
 0x16f   :  { %1627 = vmatpush.msrb.mxu1 %v1277_v59  ;;  %1609 = vmatpush.msrb.mxu3 %v1205_v6  ;;  %v1286_v59 = vld [vmem:[#allocation8 + $0x378] sm:$0xff] }
 0x170   :  { %1587 = vmatpush.msra.mxu0 %v1404_v57  ;;  %v1210_v6 = vld [vmem:[#allocation8 + $0x118] sm:$0xff]  ;;  %v1309_v57 = vld [vmem:[#allocation8 + $0x430] sm:$0xff] }
 0x171   :  { %1628 = vmatpush.msrb.mxu1 %v1273_v62  ;;  %1610 = vmatpush.msrb.mxu3 %v1201_v12  ;;  %v1396_v62 = vld [vmem:[#allocation8 + $0x6e8] sm:$0xff]  ;;  %v1206_v12 = vld [vmem:[#allocation8 + $0xf8] sm:$0xff] }
 0x172   :  { %1588 = vmatpush.msra.mxu0 %v1400_v11  ;;  %v1362_v11 = vld [vmem:[#allocation8 + $0x5d8] sm:$0xff] }
 0x173   :  { %1629 = vmatpush.msrb.mxu1 %v1269_v7  ;;  %1611 = vmatpush.msrb.mxu3 %v1197_v20  ;;  %v1274_v7 = vld [vmem:[#allocation8 + $0x318] sm:$0xff]  ;;  %v1357_v20 = vld [vmem:[#allocation8 + $0x5b0] sm:$0xff] }
 0x174   :  { %1589 = vmatpush.msra.mxu0 %v1396_v62  ;;  %v1358_v62 = vld [vmem:[#allocation8 + $0x5b8] sm:$0xff] }
 0x175   :  { %1630 = vmatpush.msrb.mxu1 %v1265_v13  ;;  %1612 = vmatpush.msrb.mxu3 %v1193_v26  ;;  %v1270_v13 = vld [vmem:[#allocation8 + $0x2f8] sm:$0xff]  ;;  %v1353_v26 = vld [vmem:[#allocation8 + $0x590] sm:$0xff] }
 0x176   :  { %v988_v41 = vpop.f32.mrf.mxu1  ;;  %1590 = vmatpush.msra.mxu0 %v1392_v3  ;;  %v1421_v3 = vld [vmem:[#allocation8 + $0x7b0] sm:$0xff] }
 0x177   :  { %1631 = vmatpush.msrb.mxu1 %v1261_v23  ;;  %1613 = vmatpush.msrb.mxu3 %v1189_v31  ;;  %v989_v46 = vadd.f32 %v988_v41, %v969_v42  ;;  %v1380_v23 = vld [vmem:[#allocation8 + $0x668] sm:$0xff]  ;;  %v1190_v31 = vld [vmem:[#allocation8 + $0x78] sm:$0xff] }
 0x178   :  { %1591 = vmatpush.msra.mxu0 %v1388_v10  ;;  %v1413_v10 = vld [vmem:[#allocation8 + $0x770] sm:$0xff] }
 0x179   :  { %1632 = vmatpush.msrb.mxu1 %v1257_v27  ;;  %1614 = vmatpush.msrb.mxu3 %v1185_v34  ;;  %v1376_v27 = vld [vmem:[#allocation8 + $0x648] sm:$0xff] }
 0x17a   :  { %1592 = vmatpush.msra.mxu0 %v1384_v15  ;;  %v1368_v34 = vld [vmem:[#allocation8 + $0x608] sm:$0xff]  ;;  %v1405_v15 = vld [vmem:[#allocation8 + $0x730] sm:$0xff] }
 0x17b   :  { %1633 = vmatpush.msrb.mxu1 %v1253_v32  ;;  %1615 = vmatpush.msrb.mxu3 %v1181_v38  ;;  %v1254_v32 = vld [vmem:[#allocation8 + $0x278] sm:$0xff] }
 0x17c   :  { %1593 = vmatpush.msra.mxu0 %v1380_v23  ;;  %v1182_v38 = vld [vmem:[#allocation8 + $0x38] sm:$0xff]  ;;  %v1397_v23 = vld [vmem:[#allocation8 + $0x6f0] sm:$0xff] }
 0x17d   :  { %1634 = vmatpush.msrb.mxu1 %v1249_v35  ;;  %1616 = vmatpush.msrb.mxu3 %v1177_v22  ;;  %v1186_v35 = vld [vmem:[#allocation8 + $0x58] sm:$0xff] }
 0x17e   :  { %1617 = vmatmul.f32.vlgmr.msrb.gmra.mxu3 %v3630_v43  ;;  %1594 = vmatpush.msra.mxu0 %v1376_v27  ;;  %v1178_v22 = vld [vmem:[#allocation8 + $0x18] sm:$0xff]  ;;  %v1389_v27 = vld [vmem:[#allocation8 + $0x6b0] sm:$0xff] }
 0x17f   :  { %1635 = vmatpush.msrb.mxu1 %v1245_v39  ;;  %1681 = vmatpush.msra.mxu3 %v1238_v44  ;;  %v1246_v39 = vld [vmem:[#allocation8 + $0x238] sm:$0xff] }
 0x180   :  { %v1008_v16 = vpop.f32.mrf.mxu3  ;;  %1595 = vmatpush.msra.mxu0 %v1372_v30  ;;  %v1314_v30 = vld [vmem:[#allocation8 + $0x458] sm:$0xff] }
 0x181   :  { %1636 = vmatpush.msrb.mxu1 %v1241_v8  ;;  %v1009_v50 = vadd.f32 %v1008_v16, %v989_v46  ;;  %1682 = vmatpush.msra.mxu3 %v1234_v48  ;;  %v1242_v8 = vld [vmem:[#allocation8 + $0x218] sm:$0xff] }
 0x182   :  { %1637 = vmatmul.f32.vlgmr.msrb.gmra.mxu1 %v3633_v0  ;;  %v1028_v53 = vpop.f32.mrf.mxu0  ;;  %1596 = vmatpush.msra.mxu0 %v1368_v34  ;;  %v1306_v34 = vld [vmem:[#allocation8 + $0x418] sm:$0xff] }
 0x183   :  { %1701 = vmatpush.msra.mxu1 %v1302_v45  ;;  %v1029_v56 = vadd.f32 %v1028_v53, %v1009_v50  ;;  %1683 = vmatpush.msra.mxu3 %v1230_v51  ;;  %v1321_v53 = vld [vmem:[#allocation8 + $0x490] sm:$0xff] }
 0x185   :  { %1702 = vmatpush.msra.mxu1 %v1298_v49  ;;  %3141 = vtanh.f32 %v1029_v56  ;;  %1684 = vmatpush.msra.mxu3 %v1226_v55  ;;  %v1329_v49 = vld [vmem:[#allocation8 + $0x4d0] sm:$0xff] }
 0x186   :  { %v1317_v55 = vld [vmem:[#allocation8 + $0x470] sm:$0xff] }
 0x187   :  { %1703 = vmatpush.msra.mxu1 %v1294_v52  ;;  %1685 = vmatpush.msra.mxu3 %v1222_v58  ;;  %v1305_v58 = vld [vmem:[#allocation8 + $0x410] sm:$0xff] }
 0x189   :  { %1704 = vmatpush.msra.mxu1 %v1290_v63  ;;  %1686 = vmatpush.msra.mxu3 %v1218_v60  ;;  %v1429_v60 = vld [vmem:[#allocation8 + $0x7f0] sm:$0xff] }
 0x18b   :  { %1705 = vmatpush.msra.mxu1 %v1286_v59  ;;  %v3641_v5 = vpop.eup %3141  ;;  %1687 = vmatpush.msra.mxu3 %v1214_v1  ;;  %v1366_v59 = vld [vmem:[#allocation8 + $0x5f8] sm:$0xff]  ;;  %v1425_v1 = vld [vmem:[#allocation8 + $0x7d0] sm:$0xff] }
 0x18c   :  { %1497 = vmatmul.f32.vlgmr.msrb.gmra.mxu2 %v3641_v5 }
 0x18d   :  { %1706 = vmatpush.msra.mxu1 %v1282_v61  ;;  %1688 = vmatpush.msra.mxu3 %v1210_v6  ;;  %v1350_v6 = vld [vmem:[#allocation8 + $0x578] sm:$0xff] }
 0x18e   :  { %1641 = vmatpush.msrb.mxu2 %v1365_v9  ;;  %v1346_v9 = vld [vmem:[#allocation8 + $0x558] sm:$0xff] }
 0x18f   :  { %1707 = vmatpush.msra.mxu1 %v1278_v2  ;;  %1689 = vmatpush.msra.mxu3 %v1206_v12  ;;  %v1354_v2 = vld [vmem:[#allocation8 + $0x598] sm:$0xff] }
 0x190   :  { %1642 = vmatpush.msrb.mxu2 %v1361_v14  ;;  %v1342_v12 = vld [vmem:[#allocation8 + $0x538] sm:$0xff] }
 0x191   :  { %1708 = vmatpush.msra.mxu1 %v1274_v7  ;;  %1690 = vmatpush.msra.mxu3 %v1202_v18  ;;  %v1417_v7 = vld [vmem:[#allocation8 + $0x790] sm:$0xff]  ;;  %v1338_v14 = vld [vmem:[#allocation8 + $0x518] sm:$0xff] }
 0x192   :  { %1643 = vmatpush.msrb.mxu2 %v1357_v20  ;;  %v1334_v18 = vld [vmem:[#allocation8 + $0x4f8] sm:$0xff] }
 0x193   :  { %1709 = vmatpush.msra.mxu1 %v1270_v13  ;;  %1691 = vmatpush.msra.mxu3 %v1198_v24  ;;  %v1409_v13 = vld [vmem:[#allocation8 + $0x750] sm:$0xff]  ;;  %v1330_v20 = vld [vmem:[#allocation8 + $0x4d8] sm:$0xff] }
 0x194   :  { %1644 = vmatpush.msrb.mxu2 %v1353_v26  ;;  %v1326_v24 = vld [vmem:[#allocation8 + $0x4b8] sm:$0xff] }
 0x195   :  { %1710 = vmatpush.msra.mxu1 %v1266_v19  ;;  %1692 = vmatpush.msra.mxu3 %v1194_v28  ;;  %v1401_v19 = vld [vmem:[#allocation8 + $0x710] sm:$0xff]  ;;  %v1322_v26 = vld [vmem:[#allocation8 + $0x498] sm:$0xff] }
 0x196   :  { %1577 = vmatmul.f32.vlgmr.msra.gmra.mxu2 %v3641_v5  ;;  %v1318_v28 = vld [vmem:[#allocation8 + $0x478] sm:$0xff] }
 0x197   :  { %1711 = vmatpush.msra.mxu1 %v1262_v25  ;;  %1693 = vmatpush.msra.mxu3 %v1190_v31  ;;  %v1393_v25 = vld [vmem:[#allocation8 + $0x6d0] sm:$0xff] }
 0x198   :  { %1645 = vmatpush.msrb.mxu2 %v1349_v33  ;;  %v1381_v31 = vld [vmem:[#allocation8 + $0x670] sm:$0xff] }
 0x199   :  { %1712 = vmatpush.msra.mxu1 %v1258_v29  ;;  %1694 = vmatpush.msra.mxu3 %v1186_v35  ;;  %v1385_v29 = vld [vmem:[#allocation8 + $0x690] sm:$0xff] }
 0x19a   :  { %v1048_v41 = vpop.f32.mrf.mxu2  ;;  %1646 = vmatpush.msrb.mxu2 %v1345_v37  ;;  %v1377_v33 = vld [vmem:[#allocation8 + $0x650] sm:$0xff]  ;;  %v1426_v37 = vld [vmem:[#allocation8 + $0x7d8] sm:$0xff] }
 0x19b   :  { %1713 = vmatpush.msra.mxu1 %v1254_v32  ;;  %v1049_v42 = vadd.f32 %v1048_v41, %v602_v36  ;;  %1695 = vmatpush.msra.mxu3 %v1182_v38  ;;  %v1310_v32 = vld [vmem:[#allocation8 + $0x438] sm:$0xff]  ;;  %v1373_v35 = vld [vmem:[#allocation8 + $0x630] sm:$0xff] }
 0x19c   :  { %1647 = vmatpush.msrb.mxu2 %v1341_v40  ;;  %v1068_v45 = vpop.f32.mrf.mxu0  ;;  %v1430_v36 = vld [vmem:[#allocation8 + $0x7f8] sm:$0xff] }
 0x19d   :  { %1714 = vmatpush.msra.mxu1 %v1250_v4  ;;  %1696 = vmatpush.msra.mxu3 %v1178_v22  ;;  %v1069_v46 = vadd.f32 %v1068_v45, %v1049_v42  ;;  %v1369_v4 = vld [vmem:[#allocation8 + $0x610] sm:$0xff]  ;;  %v1422_v38 = vld [vmem:[#allocation8 + $0x7b8] sm:$0xff]  ;;  %v1825_v22 = vld [vmem:[#allocation11 + $0x1e0] sm:$0xff] }
 0x19e   :  { %1697 = vmatmul.f32.vlgmr.msra.gmra.mxu3 %v3630_v43  ;;  %1648 = vmatpush.msrb.mxu2 %v1337_v21  ;;  %v1414_v40 = vld [vmem:[#allocation8 + $0x778] sm:$0xff] }
 0x19f   :  { %1715 = vmatpush.msra.mxu1 %v1246_v39  ;;  %v1088_v44 = vpop.f32.mrf.mxu1  ;;  %v1418_v39 = vld [vmem:[#allocation8 + $0x798] sm:$0xff]  ;;  %2031 = vmatpush.msrb.mxu3 %v1825_v22  ;;  %v1874_v22 = vld [vmem:[#allocation11 + $0x368] sm:$0xff] }
 0x1a0   :  { %v1089_v48 = vadd.f32 %v1088_v44, %v1069_v46  ;;  %v1108_v16 = vpop.f32.mrf.mxu3  ;;  %1649 = vmatpush.msrb.mxu2 %v1333_v47  ;;  %v1410_v41 = vld [vmem:[#allocation8 + $0x758] sm:$0xff]  ;;  %v1817_v44 = vld [vmem:[#allocation11 + $0x1a0] sm:$0xff] }
 0x1a1   :  { %1716 = vmatpush.msra.mxu1 %v1242_v8  ;;  %v1821_v8 = vld [vmem:[#allocation11 + $0x1c0] sm:$0xff]  ;;  %v1406_v42 = vld [vmem:[#allocation8 + $0x738] sm:$0xff] }
 0x1a2   :  { %1717 = vmatmul.f32.vlgmr.msra.gmra.mxu1 %v3633_v0  ;;  %v1109_v50 = vadd.f32 %v1108_v16, %v1089_v48  ;;  %1650 = vmatpush.msrb.mxu2 %v1329_v49  ;;  %v1313_v0 = vld [vmem:[#allocation8 + $0x450] sm:$0xff]  ;;  %v1398_v21 = vld [vmem:[#allocation8 + $0x6f8] sm:$0xff]  ;;  %v1813_v46 = vld [vmem:[#allocation11 + $0x180] sm:$0xff] }
 0x1a3   :  { %2032 = vmatpush.msrb.mxu3 %v1821_v8  ;;  %v1394_v45 = vld [vmem:[#allocation8 + $0x6d8] sm:$0xff]  ;;  %v1889_v47 = vld [vmem:[#allocation11 + $0x3e0] sm:$0xff] }
 0x1a4   :  { %v1128_v51 = vpop.f32.mrf.mxu2  ;;  %1651 = vmatpush.msrb.mxu2 %v1325_v17  ;;  %v1809_v48 = vld [vmem:[#allocation11 + $0x160] sm:$0xff]  ;;  %2051 = vmatpush.msrb.mxu1 %v1889_v47  ;;  %v1390_v16 = vld [vmem:[#allocation8 + $0x6b8] sm:$0xff]  ;;  %v1782_v47 = vld [vmem:[#allocation11 + $0x88] sm:$0xff] }
 0x1a5   :  { %v1129_v52 = vadd.f32 %v1128_v51, %v1109_v50  ;;  %2033 = vmatpush.msrb.mxu3 %v1817_v44  ;;  %v1885_v49 = vld [vmem:[#allocation11 + $0x3c0] sm:$0xff]  ;;  %v1386_v51 = vld [vmem:[#allocation8 + $0x698] sm:$0xff]  ;;  %v1786_v44 = vld [vmem:[#allocation11 + $0xa8] sm:$0xff] }
 0x1a6   :  { %1652 = vmatpush.msrb.mxu2 %v1321_v53  ;;  %v1881_v50 = vld [vmem:[#allocation11 + $0x3a0] sm:$0xff]  ;;  %2052 = vmatpush.msrb.mxu1 %v1885_v49 }
 0x1a7   :  { %v1148_v54 = vpop.f32.mrf.mxu0  ;;  %v1168_v63 = vpop.f32.mrf.mxu1  ;;  %2034 = vmatpush.msrb.mxu3 %v1813_v46  ;;  %v1805_v17 = vld [vmem:[#allocation11 + $0x140] sm:$0xff] }
 0x1a8   :  { %v1149_v43 = vadd.f32 %v1148_v54, %v1129_v52  ;;  %1653 = vmatpush.msrb.mxu2 %v1317_v55  ;;  %v1877_v52 = vld [vmem:[#allocation11 + $0x380] sm:$0xff]  ;;  %2053 = vmatpush.msrb.mxu1 %v1881_v50  ;;  %v1382_v54 = vld [vmem:[#allocation8 + $0x678] sm:$0xff]  ;;  %v1858_v50 = vld [vmem:[#allocation11 + $0x2e8] sm:$0xff] }
 0x1a9   :  { %2035 = vmatpush.msrb.mxu3 %v1809_v48  ;;  %v1801_v53 = vld [vmem:[#allocation11 + $0x120] sm:$0xff]  ;;  %v1862_v48 = vld [vmem:[#allocation11 + $0x308] sm:$0xff] }
 0x1aa   :  { %v1169_v56 = vadd.f32 %v1168_v63, %v1149_v43  ;;  %1654 = vmatpush.msrb.mxu2 %v1313_v0  ;;  %v1873_v55 = vld [vmem:[#allocation11 + $0x360] sm:$0xff]  ;;  %2054 = vmatpush.msrb.mxu1 %v1877_v52  ;;  %v1378_v43 = vld [vmem:[#allocation8 + $0x658] sm:$0xff]  ;;  %v1854_v52 = vld [vmem:[#allocation11 + $0x2c8] sm:$0xff] }
 0x1ab   :  { %2036 = vmatpush.msrb.mxu3 %v1805_v17  ;;  %v1797_v63 = vld [vmem:[#allocation11 + $0x100] sm:$0xff] }
 0x1ac   :  { %3143 = vtanh.f32 %v1169_v56  ;;  %1655 = vmatpush.msrb.mxu2 %v1309_v57  ;;  %v1869_v0 = vld [vmem:[#allocation11 + $0x340] sm:$0xff]  ;;  %2055 = vmatpush.msrb.mxu1 %v1873_v55  ;;  %v1374_v57 = vld [vmem:[#allocation8 + $0x638] sm:$0xff]  ;;  %v1850_v55 = vld [vmem:[#allocation11 + $0x2a8] sm:$0xff] }
 0x1ad   :  { %2037 = vmatpush.msrb.mxu3 %v1801_v53  ;;  %v1793_v56 = vld [vmem:[#allocation11 + $0xe0] sm:$0xff] }
 0x1ae   :  { %1656 = vmatpush.msrb.mxu2 %v1305_v58  ;;  %v1865_v58 = vld [vmem:[#allocation11 + $0x320] sm:$0xff]  ;;  %2056 = vmatpush.msrb.mxu1 %v1869_v0  ;;  %v1846_v0 = vld [vmem:[#allocation11 + $0x288] sm:$0xff] }
 0x1af   :  { %1657 = vmatmul.f32.vlgmr.msrb.gmra.mxu2 %v3641_v5  ;;  %2038 = vmatpush.msrb.mxu3 %v1797_v63  ;;  %v1917_v8 = vld [vmem:[#allocation11 + $0x4c0] sm:$0xff] }
 0x1b0   :  { %1721 = vmatpush.msra.mxu2 %v1366_v59  ;;  %v1789_v59 = vld [vmem:[#allocation11 + $0xc0] sm:$0xff]  ;;  %2057 = vmatpush.msrb.mxu1 %v1865_v58  ;;  %v1842_v58 = vld [vmem:[#allocation11 + $0x268] sm:$0xff] }
 0x1b1   :  { %2039 = vmatpush.msrb.mxu3 %v1793_v56  ;;  %v1909_v46 = vld [vmem:[#allocation11 + $0x480] sm:$0xff] }
 0x1b2   :  { %v3649_v61 = vpop.eup %3143  ;;  %1722 = vmatpush.msra.mxu2 %v1362_v11  ;;  %v1370_v11 = vld [vmem:[#allocation8 + $0x618] sm:$0xff]  ;;  %v1905_v49 = vld [vmem:[#allocation11 + $0x460] sm:$0xff] }
 0x1b3   :  { %1517 = vmatmul.f32.vlgmr.msrb.gmra.mxu0 %v3649_v61  ;;  %2040 = vmatpush.msrb.mxu3 %v1789_v59  ;;  %v1901_v17 = vld [vmem:[#allocation11 + $0x440] sm:$0xff] }
 0x1b4   :  { %1661 = vmatpush.msrb.mxu0 %v1429_v60  ;;  %1723 = vmatpush.msra.mxu2 %v1358_v62  ;;  %v1861_v60 = vld [vmem:[#allocation11 + $0x300] sm:$0xff] }
 0x1b5   :  { %v1785_v62 = vld [vmem:[#allocation11 + $0xa0] sm:$0xff]  ;;  %2058 = vmatpush.msrb.mxu1 %v1861_v60  ;;  %v1838_v60 = vld [vmem:[#allocation11 + $0x248] sm:$0xff] }
 0x1b6   :  { %1662 = vmatpush.msrb.mxu0 %v1425_v1  ;;  %1724 = vmatpush.msra.mxu2 %v1354_v2  ;;  %v1857_v1 = vld [vmem:[#allocation11 + $0x2e0] sm:$0xff] }
 0x1b7   :  { %v1781_v2 = vld [vmem:[#allocation11 + $0x80] sm:$0xff]  ;;  %2041 = vmatpush.msrb.mxu3 %v1785_v62  ;;  %2059 = vmatpush.msrb.mxu1 %v1857_v1  ;;  %v1946_v1 = vld [vmem:[#allocation11 + $0x5a8] sm:$0xff] }
 0x1b8   :  { %1663 = vmatpush.msrb.mxu0 %v1421_v3  ;;  %1725 = vmatpush.msra.mxu2 %v1350_v6  ;;  %v1853_v3 = vld [vmem:[#allocation11 + $0x2c0] sm:$0xff] }
 0x1b9   :  { %v1777_v6 = vld [vmem:[#allocation11 + $0x60] sm:$0xff]  ;;  %2042 = vmatpush.msrb.mxu3 %v1781_v2  ;;  %2060 = vmatpush.msrb.mxu1 %v1853_v3  ;;  %v1834_v2 = vld [vmem:[#allocation11 + $0x228] sm:$0xff] }
 0x1ba   :  { %1664 = vmatpush.msrb.mxu0 %v1417_v7  ;;  %1726 = vmatpush.msra.mxu2 %v1346_v9  ;;  %v1849_v7 = vld [vmem:[#allocation11 + $0x2a0] sm:$0xff] }
 0x1bb   :  { %1597 = vmatmul.f32.vlgmr.msra.gmra.mxu0 %v3649_v61  ;;  %v1773_v9 = vld [vmem:[#allocation11 + $0x40] sm:$0xff]  ;;  %2043 = vmatpush.msrb.mxu3 %v1777_v6  ;;  %v1942_v6 = vld [vmem:[#allocation11 + $0x588] sm:$0xff] }
 0x1bc   :  { %1665 = vmatpush.msrb.mxu0 %v1413_v10  ;;  %1727 = vmatpush.msra.mxu2 %v1342_v12  ;;  %v1769_v10 = vld [vmem:[#allocation11 + $0x20] sm:$0xff] }
 0x1bd   :  { %2061 = vmatpush.msrb.mxu1 %v1849_v7  ;;  %2044 = vmatpush.msrb.mxu3 %v1773_v9  ;;  %v1765_v12 = vld [vmem:[#allocation11] sm:$0xff]  ;;  %v1830_v7 = vld [vmem:[#allocation11 + $0x208] sm:$0xff] }
 0x1be   :  { %1666 = vmatpush.msrb.mxu0 %v1409_v13  ;;  %1728 = vmatpush.msra.mxu2 %v1338_v14  ;;  %v1845_v13 = vld [vmem:[#allocation11 + $0x280] sm:$0xff] }
 0x1bf   :  { %2045 = vmatpush.msrb.mxu3 %v1769_v10  ;;  %v1953_v14 = vld [vmem:[#allocation11 + $0x5e0] sm:$0xff]  ;;  %2062 = vmatpush.msrb.mxu1 %v1845_v13  ;;  %v1938_v10 = vld [vmem:[#allocation11 + $0x568] sm:$0xff] }
 0x1c0   :  { %1667 = vmatpush.msrb.mxu0 %v1405_v15  ;;  %1729 = vmatpush.msra.mxu2 %v1334_v18  ;;  %v1826_v15 = vld [vmem:[#allocation11 + $0x1e8] sm:$0xff]  ;;  %v1949_v18 = vld [vmem:[#allocation11 + $0x5c0] sm:$0xff] }
 0x1c1   :  { %2046 = vmatpush.msrb.mxu3 %v1765_v12  ;;  %v1897_v53 = vld [vmem:[#allocation11 + $0x420] sm:$0xff]  ;;  %v3656_v12 = vld [vmem:[#allocation10] sm:$0xf] }
 0x1c2   :  { %1668 = vmatpush.msrb.mxu0 %v1401_v19  ;;  %1730 = vmatpush.msra.mxu2 %v1330_v20  ;;  %v1822_v19 = vld [vmem:[#allocation11 + $0x1c8] sm:$0xff]  ;;  %v1837_v20 = vld [vmem:[#allocation11 + $0x240] sm:$0xff] }
 0x1c3   :  { %2111 = vmatpush.msra.mxu3 %v1826_v15  ;;  %v1893_v63 = vld [vmem:[#allocation11 + $0x400] sm:$0xff]  ;;  %v1458_v15 = vpop.f32.mrf.mxu3 }
 0x1c4   :  { %1669 = vmatpush.msrb.mxu0 %v1397_v23  ;;  %1731 = vmatpush.msra.mxu2 %v1326_v24  ;;  %v1945_v23 = vld [vmem:[#allocation11 + $0x5a0] sm:$0xff]  ;;  %v1818_v24 = vld [vmem:[#allocation11 + $0x1a8] sm:$0xff] }
 0x1c5   :  { %2112 = vmatpush.msra.mxu3 %v1822_v19  ;;  %v2017_v56 = vld [vmem:[#allocation11 + $0x7e0] sm:$0xff]  ;;  %v1930_v19 = vld [vmem:[#allocation11 + $0x528] sm:$0xff] }
 0x1c6   :  { %1670 = vmatpush.msrb.mxu0 %v1393_v25  ;;  %1732 = vmatpush.msra.mxu2 %v1322_v26  ;;  %v1833_v25 = vld [vmem:[#allocation11 + $0x220] sm:$0xff] }
 0x1c7   :  { %2113 = vmatpush.msra.mxu3 %v1818_v24  ;;  %v1941_v26 = vld [vmem:[#allocation11 + $0x580] sm:$0xff]  ;;  %v1478_v24 = vpop.f32.mrf.mxu1 }
 0x1c8   :  { %1671 = vmatpush.msrb.mxu0 %v1389_v27  ;;  %1733 = vmatpush.msra.mxu2 %v1318_v28  ;;  %v1814_v27 = vld [vmem:[#allocation11 + $0x188] sm:$0xff]  ;;  %v1829_v28 = vld [vmem:[#allocation11 + $0x200] sm:$0xff] }
 0x1c9   :  { %2114 = vmatpush.msra.mxu3 %v1814_v27  ;;  %v2013_v59 = vld [vmem:[#allocation11 + $0x7c0] sm:$0xff] }
 0x1ca   :  { %1672 = vmatpush.msrb.mxu0 %v1385_v29  ;;  %1734 = vmatpush.msra.mxu2 %v1314_v30  ;;  %v1937_v29 = vld [vmem:[#allocation11 + $0x560] sm:$0xff]  ;;  %v1810_v30 = vld [vmem:[#allocation11 + $0x168] sm:$0xff] }
 0x1cb   :  { %2115 = vmatpush.msra.mxu3 %v1810_v30  ;;  %v2009_v62 = vld [vmem:[#allocation11 + $0x7a0] sm:$0xff] }
 0x1cc   :  { %1673 = vmatpush.msrb.mxu0 %v1381_v31  ;;  %1735 = vmatpush.msra.mxu2 %v1310_v32  ;;  %v1890_v31 = vld [vmem:[#allocation11 + $0x3e8] sm:$0xff]  ;;  %v1933_v32 = vld [vmem:[#allocation11 + $0x540] sm:$0xff] }
 0x1cd   :  { %v2005_v3 = vld [vmem:[#allocation11 + $0x780] sm:$0xff] }
 0x1ce   :  { %1674 = vmatpush.msrb.mxu0 %v1377_v33  ;;  %1736 = vmatpush.msra.mxu2 %v1306_v34  ;;  %v1806_v33 = vld [vmem:[#allocation11 + $0x148] sm:$0xff]  ;;  %v2001_v9 = vld [vmem:[#allocation11 + $0x760] sm:$0xff] }
 0x1cf   :  { %1737 = vmatmul.f32.vlgmr.msra.gmra.mxu2 %v3641_v5  ;;  %v1402_v5 = vld [vmem:[#allocation8 + $0x718] sm:$0xff]  ;;  %v1886_v34 = vld [vmem:[#allocation11 + $0x3c8] sm:$0xff]  ;;  %2116 = vmatpush.msra.mxu3 %v1806_v33  ;;  %v1997_v13 = vld [vmem:[#allocation11 + $0x740] sm:$0xff] }
 0x1d0   :  { %1675 = vmatpush.msrb.mxu0 %v1373_v35  ;;  %2071 = vmatpush.msrb.mxu2 %v1953_v14  ;;  %v1929_v35 = vld [vmem:[#allocation11 + $0x520] sm:$0xff]  ;;  %v1934_v14 = vld [vmem:[#allocation11 + $0x548] sm:$0xff] }
 0x1d2   :  { %1676 = vmatpush.msrb.mxu0 %v1369_v4  ;;  %2072 = vmatpush.msrb.mxu2 %v1949_v18  ;;  %v1802_v4 = vld [vmem:[#allocation11 + $0x128] sm:$0xff]  ;;  %v1433_v18 = vperm.slane %v3656_v12, 0 }
 0x1d3   :  { %1677 = vmatmul.f32.vlgmr.msrb.gmra.mxu0 %v3649_v61  ;;  %2117 = vmatpush.msra.mxu3 %v1802_v4  ;;  %v1914_v4 = vld [vmem:[#allocation11 + $0x4a8] sm:$0xff] }
 0x1d4   :  { %1741 = vmatpush.msra.mxu0 %v1430_v36  ;;  %2073 = vmatpush.msrb.mxu2 %v1945_v23  ;;  %v1882_v36 = vld [vmem:[#allocation11 + $0x3a8] sm:$0xff]  ;;  %v1459_v27 = vadd.f32 %v1458_v15, %v1433_v18  ;;  %v1791_v18 = vld [vmem:[#allocation11 + $0xd0] sm:$0xff] }
 0x1d5   :  { %v1926_v23 = vld [vmem:[#allocation11 + $0x508] sm:$0xff] }
 0x1d6   :  { %1742 = vmatpush.msra.mxu0 %v1426_v37  ;;  %2074 = vmatpush.msrb.mxu2 %v1941_v26  ;;  %v1925_v37 = vld [vmem:[#allocation11 + $0x500] sm:$0xff]  ;;  %v1479_v30 = vadd.f32 %v1478_v24, %v1459_v27 }
 0x1d7   :  { %v1985_v26 = vld [vmem:[#allocation11 + $0x6e0] sm:$0xff] }
 0x1d8   :  { %1743 = vmatpush.msra.mxu0 %v1422_v38  ;;  %2075 = vmatpush.msrb.mxu2 %v1937_v29  ;;  %v1798_v38 = vld [vmem:[#allocation11 + $0x108] sm:$0xff]  ;;  %v1981_v29 = vld [vmem:[#allocation11 + $0x6c0] sm:$0xff] }
 0x1d9   :  { %2118 = vmatpush.msra.mxu3 %v1798_v38 }
 0x1da   :  { %1744 = vmatpush.msra.mxu0 %v1418_v39  ;;  %2076 = vmatpush.msrb.mxu2 %v1933_v32  ;;  %v1878_v39 = vld [vmem:[#allocation11 + $0x388] sm:$0xff] }
 0x1db   :  { %v1918_v32 = vld [vmem:[#allocation11 + $0x4c8] sm:$0xff] }
 0x1dc   :  { %1745 = vmatpush.msra.mxu0 %v1414_v40  ;;  %2077 = vmatpush.msrb.mxu2 %v1929_v35  ;;  %v1921_v40 = vld [vmem:[#allocation11 + $0x4e0] sm:$0xff] }
 0x1de   :  { %1746 = vmatpush.msra.mxu0 %v1410_v41  ;;  %v1794_v41 = vld [vmem:[#allocation11 + $0xe8] sm:$0xff]  ;;  %2078 = vmatpush.msrb.mxu2 %v1925_v37 }
 0x1df   :  { %2119 = vmatpush.msra.mxu3 %v1794_v41  ;;  %v1558_v41 = vpop.f32.mrf.mxu1 }
 0x1e0   :  { %1747 = vmatpush.msra.mxu0 %v1406_v42  ;;  %v1790_v42 = vld [vmem:[#allocation11 + $0xc8] sm:$0xff]  ;;  %2079 = vmatpush.msrb.mxu2 %v1921_v40 }
 0x1e1   :  { %2120 = vmatpush.msra.mxu3 %v1790_v42  ;;  %v1538_v33 = vpop.f32.mrf.mxu3  ;;  %v1910_v40 = vld [vmem:[#allocation11 + $0x488] sm:$0xff] }
 0x1e2   :  { %1748 = vmatpush.msra.mxu0 %v1402_v5  ;;  %v1870_v5 = vld [vmem:[#allocation11 + $0x348] sm:$0xff]  ;;  %2080 = vmatpush.msrb.mxu2 %v1917_v8  ;;  %v1969_v8 = vld [vmem:[#allocation11 + $0x660] sm:$0xff] }
 0x1e3   :  { %2121 = vmatpush.msra.mxu3 %v1786_v44  ;;  %v1906_v42 = vld [vmem:[#allocation11 + $0x468] sm:$0xff] }
 0x1e4   :  { %1749 = vmatpush.msra.mxu0 %v1398_v21  ;;  %v1913_v21 = vld [vmem:[#allocation11 + $0x4a0] sm:$0xff]  ;;  %v1902_v44 = vld [vmem:[#allocation11 + $0x448] sm:$0xff] }
 0x1e5   :  { %2081 = vmatpush.msrb.mxu2 %v1913_v21  ;;  %2122 = vmatpush.msra.mxu3 %v1782_v47  ;;  %v1965_v21 = vld [vmem:[#allocation11 + $0x640] sm:$0xff]  ;;  %v1898_v47 = vld [vmem:[#allocation11 + $0x428] sm:$0xff] }
 0x1e6   :  { %1750 = vmatpush.msra.mxu0 %v1394_v45  ;;  %v1866_v45 = vld [vmem:[#allocation11 + $0x328] sm:$0xff] }
 0x1e7   :  { %2082 = vmatpush.msrb.mxu2 %v1909_v46 }
 0x1e8   :  { %1751 = vmatpush.msra.mxu0 %v1390_v16  ;;  %v1778_v16 = vld [vmem:[#allocation11 + $0x68] sm:$0xff] }
 0x1e9   :  { %2083 = vmatpush.msrb.mxu2 %v1905_v49  ;;  %2123 = vmatpush.msra.mxu3 %v1778_v16  ;;  %v1827_v49 = vld [vmem:[#allocation11 + $0x1f0] sm:$0xff]  ;;  %v1957_v16 = vld [vmem:[#allocation11 + $0x600] sm:$0xff] }
 0x1ea   :  { %1752 = vmatpush.msra.mxu0 %v1386_v51  ;;  %v1774_v51 = vld [vmem:[#allocation11 + $0x48] sm:$0xff] }
 0x1eb   :  { %2084 = vmatpush.msrb.mxu2 %v1901_v17  ;;  %2124 = vmatpush.msra.mxu3 %v1774_v51  ;;  %v1894_v51 = vld [vmem:[#allocation11 + $0x408] sm:$0xff] }
 0x1ec   :  { %1753 = vmatpush.msra.mxu0 %v1382_v54  ;;  %v1770_v54 = vld [vmem:[#allocation11 + $0x28] sm:$0xff] }
 0x1ed   :  { %2085 = vmatpush.msrb.mxu2 %v1897_v53  ;;  %2125 = vmatpush.msra.mxu3 %v1770_v54  ;;  %v2018_v53 = vld [vmem:[#allocation11 + $0x7e8] sm:$0xff]  ;;  %v1819_v54 = vld [vmem:[#allocation11 + $0x1b0] sm:$0xff] }
 0x1ee   :  { %1754 = vmatpush.msra.mxu0 %v1378_v43  ;;  %v1766_v43 = vld [vmem:[#allocation11 + $0x8] sm:$0xff] }
 0x1ef   :  { %2086 = vmatpush.msrb.mxu2 %v1893_v63  ;;  %2126 = vmatpush.msra.mxu3 %v1766_v43  ;;  %v1815_v63 = vld [vmem:[#allocation11 + $0x190] sm:$0xff]  ;;  %v2010_v43 = vld [vmem:[#allocation11 + $0x7a8] sm:$0xff] }
 0x1f0   :  { %1755 = vmatpush.msra.mxu0 %v1374_v57  ;;  %v1954_v57 = vld [vmem:[#allocation11 + $0x5e8] sm:$0xff] }
 0x1f1   :  { %2151 = vmatpush.msra.mxu2 %v1954_v57 }
 0x1f2   :  { %1756 = vmatpush.msra.mxu0 %v1370_v11  ;;  %v1950_v11 = vld [vmem:[#allocation11 + $0x5c8] sm:$0xff] }
 0x1f3   :  { %1757 = vmatmul.f32.vlgmr.msra.gmra.mxu0 %v3649_v61  ;;  %v1841_v61 = vld [vmem:[#allocation11 + $0x260] sm:$0xff]  ;;  %2152 = vmatpush.msra.mxu2 %v1950_v11  ;;  %v1887_v11 = vld [vmem:[#allocation11 + $0x3d0] sm:$0xff] }
 0x1f4   :  { %2063 = vmatpush.msrb.mxu1 %v1841_v61  ;;  %2091 = vmatpush.msrb.mxu0 %v2017_v56  ;;  %v1993_v61 = vld [vmem:[#allocation11 + $0x720] sm:$0xff]  ;;  %v1891_v56 = vld [vmem:[#allocation11 + $0x3f0] sm:$0xff] }
 0x1f5   :  { %2153 = vmatpush.msra.mxu2 %v1946_v1  ;;  %v1883_v1 = vld [vmem:[#allocation11 + $0x3b0] sm:$0xff] }
 0x1f6   :  { %2064 = vmatpush.msrb.mxu1 %v1837_v20  ;;  %2092 = vmatpush.msrb.mxu0 %v2013_v59  ;;  %v1989_v20 = vld [vmem:[#allocation11 + $0x700] sm:$0xff]  ;;  %v1807_v59 = vld [vmem:[#allocation11 + $0x150] sm:$0xff] }
 0x1f7   :  { %2154 = vmatpush.msra.mxu2 %v1942_v6 }
 0x1f8   :  { %2065 = vmatpush.msrb.mxu1 %v1833_v25  ;;  %2093 = vmatpush.msrb.mxu0 %v2009_v62  ;;  %v1803_v62 = vld [vmem:[#allocation11 + $0x130] sm:$0xff] }
 0x1f9   :  { %2155 = vmatpush.msra.mxu2 %v1938_v10  ;;  %v1994_v10 = vld [vmem:[#allocation11 + $0x728] sm:$0xff] }
 0x1fa   :  { %2066 = vmatpush.msrb.mxu1 %v1829_v28  ;;  %2094 = vmatpush.msrb.mxu0 %v2005_v3  ;;  %v1922_v28 = vld [vmem:[#allocation11 + $0x4e8] sm:$0xff] }
 0x1fb   :  { %2156 = vmatpush.msra.mxu2 %v1934_v14  ;;  %v1998_v3 = vld [vmem:[#allocation11 + $0x748] sm:$0xff]  ;;  %v1875_v14 = vld [vmem:[#allocation11 + $0x370] sm:$0xff] }
 0x1fc   :  { %2131 = vmatpush.msra.mxu1 %v1890_v31  ;;  %2095 = vmatpush.msrb.mxu0 %v2001_v9  ;;  %v1434_v31 = vperm.slane %v3656_v12, 1  ;;  %v1879_v9 = vld [vmem:[#allocation11 + $0x390] sm:$0xff] }
 0x1fd   :  { %2157 = vmatpush.msra.mxu2 %v1930_v19  ;;  %v1871_v19 = vld [vmem:[#allocation11 + $0x350] sm:$0xff] }
 0x1fe   :  { %2132 = vmatpush.msra.mxu1 %v1886_v34  ;;  %2096 = vmatpush.msrb.mxu0 %v1997_v13  ;;  %v1977_v34 = vld [vmem:[#allocation11 + $0x6a0] sm:$0xff]  ;;  %v1539_v37 = vadd.f32 %v1538_v33, %v1434_v31  ;;  %v1795_v13 = vld [vmem:[#allocation11 + $0xf0] sm:$0xff] }
 0x1ff   :  { %2158 = vmatpush.msra.mxu2 %v1926_v23  ;;  %v1638_v23 = vpop.f32.mrf.mxu1 }
 0x200   :  { %2133 = vmatpush.msra.mxu1 %v1882_v36  ;;  %2097 = vmatpush.msrb.mxu0 %v1993_v61  ;;  %v1990_v61 = vld [vmem:[#allocation11 + $0x708] sm:$0xff] }
 0x201   :  { %2159 = vmatpush.msra.mxu2 %v1922_v28  ;;  %v1618_v6 = vpop.f32.mrf.mxu3  ;;  %v1982_v28 = vld [vmem:[#allocation11 + $0x6c8] sm:$0xff] }
 0x202   :  { %2134 = vmatpush.msra.mxu1 %v1878_v39  ;;  %2098 = vmatpush.msrb.mxu0 %v1989_v20  ;;  %v1973_v39 = vld [vmem:[#allocation11 + $0x680] sm:$0xff]  ;;  %v1986_v20 = vld [vmem:[#allocation11 + $0x6e8] sm:$0xff] }
 0x203   :  { %2160 = vmatpush.msra.mxu2 %v1918_v32  ;;  %v1978_v32 = vld [vmem:[#allocation11 + $0x6a8] sm:$0xff] }
 0x204   :  { %2135 = vmatpush.msra.mxu1 %v1874_v22  ;;  %2099 = vmatpush.msrb.mxu0 %v1985_v26  ;;  %v1867_v26 = vld [vmem:[#allocation11 + $0x330] sm:$0xff] }
 0x205   :  { %2161 = vmatpush.msra.mxu2 %v1914_v4 }
 0x206   :  { %2136 = vmatpush.msra.mxu1 %v1870_v5  ;;  %2100 = vmatpush.msrb.mxu0 %v1981_v29  ;;  %v1559_v5 = vadd.f32 %v1558_v41, %v1539_v37  ;;  %v1783_v29 = vld [vmem:[#allocation11 + $0x90] sm:$0xff] }
 0x207   :  { %2162 = vmatpush.msra.mxu2 %v1910_v40  ;;  %v1775_v37 = vld [vmem:[#allocation11 + $0x50] sm:$0xff] }
 0x208   :  { %2137 = vmatpush.msra.mxu1 %v1866_v45  ;;  %2101 = vmatpush.msrb.mxu0 %v1977_v34  ;;  %v1961_v45 = vld [vmem:[#allocation11 + $0x620] sm:$0xff]  ;;  %v1779_v34 = vld [vmem:[#allocation11 + $0x70] sm:$0xff] }
 0x209   :  { %2163 = vmatpush.msra.mxu2 %v1906_v42  ;;  %v1771_v40 = vld [vmem:[#allocation11 + $0x30] sm:$0xff] }
 0x20a   :  { %2138 = vmatpush.msra.mxu1 %v1862_v48  ;;  %2102 = vmatpush.msrb.mxu0 %v1973_v39  ;;  %v1970_v39 = vld [vmem:[#allocation11 + $0x668] sm:$0xff]  ;;  %v1851_v41 = vld [vmem:[#allocation11 + $0x2b0] sm:$0xff] }
 0x20b   :  { %2164 = vmatpush.msra.mxu2 %v1902_v44  ;;  %v1847_v42 = vld [vmem:[#allocation11 + $0x290] sm:$0xff] }
 0x20c   :  { %2139 = vmatpush.msra.mxu1 %v1858_v50  ;;  %2103 = vmatpush.msrb.mxu0 %v1969_v8  ;;  %v1767_v8 = vld [vmem:[#allocation11 + $0x10] sm:$0xff] }
 0x20d   :  { %2165 = vmatpush.msra.mxu2 %v1898_v47  ;;  %v1951_v47 = vld [vmem:[#allocation11 + $0x5d0] sm:$0xff] }
 0x20e   :  { %2140 = vmatpush.msra.mxu1 %v1854_v52  ;;  %2104 = vmatpush.msrb.mxu0 %v1965_v21  ;;  %v1823_v52 = vld [vmem:[#allocation11 + $0x1d0] sm:$0xff]  ;;  %v1828_v21 = vld [vmem:[#allocation11 + $0x1f8] sm:$0xff] }
 0x20f   :  { %v1498_v25 = vpop.f32.mrf.mxu2  ;;  %2166 = vmatpush.msra.mxu2 %v1894_v51  ;;  %v1820_v51 = vld [vmem:[#allocation11 + $0x1b8] sm:$0xff] }
 0x210   :  { %2141 = vmatpush.msra.mxu1 %v1850_v55  ;;  %v1499_v35 = vadd.f32 %v1498_v25, %v1479_v30  ;;  %2105 = vmatpush.msrb.mxu0 %v1961_v45  ;;  %v2014_v55 = vld [vmem:[#allocation11 + $0x7c8] sm:$0xff]  ;;  %v1787_v25 = vld [vmem:[#allocation11 + $0xb0] sm:$0xff] }
 0x211   :  { %v1863_v30 = vld [vmem:[#allocation11 + $0x310] sm:$0xff] }
 0x212   :  { %2142 = vmatpush.msra.mxu1 %v1846_v0  ;;  %2106 = vmatpush.msrb.mxu0 %v1957_v16  ;;  %v1811_v0 = vld [vmem:[#allocation11 + $0x170] sm:$0xff]  ;;  %v1958_v16 = vld [vmem:[#allocation11 + $0x608] sm:$0xff] }
 0x213   :  { %v1843_v45 = vld [vmem:[#allocation11 + $0x270] sm:$0xff] }
 0x214   :  { %2143 = vmatpush.msra.mxu1 %v1842_v58  ;;  %2171 = vmatpush.msra.mxu0 %v2018_v53  ;;  %v2006_v58 = vld [vmem:[#allocation11 + $0x788] sm:$0xff]  ;;  %v1943_v53 = vld [vmem:[#allocation11 + $0x590] sm:$0xff] }
 0x216   :  { %2144 = vmatpush.msra.mxu1 %v1838_v60  ;;  %2172 = vmatpush.msra.mxu0 %v2014_v55  ;;  %v2002_v60 = vld [vmem:[#allocation11 + $0x768] sm:$0xff]  ;;  %v1831_v55 = vld [vmem:[#allocation11 + $0x210] sm:$0xff] }
 0x218   :  { %2145 = vmatpush.msra.mxu1 %v1834_v2  ;;  %2173 = vmatpush.msra.mxu0 %v2010_v43  ;;  %v1435_v2 = vperm.slane %v3656_v12, 2  ;;  %v1812_v43 = vld [vmem:[#allocation11 + $0x178] sm:$0xff] }
 0x219   :  { %v1578_v22 = vpop.f32.mrf.mxu2 }
 0x21a   :  { %2146 = vmatpush.msra.mxu1 %v1830_v7  ;;  %v1579_v46 = vadd.f32 %v1578_v22, %v1559_v5  ;;  %2174 = vmatpush.msra.mxu0 %v2006_v58  ;;  %v1799_v7 = vld [vmem:[#allocation11 + $0x110] sm:$0xff]  ;;  %v1619_v15 = vadd.f32 %v1618_v6, %v1435_v2  ;;  %v1966_v22 = vld [vmem:[#allocation11 + $0x648] sm:$0xff]  ;;  %v1808_v58 = vld [vmem:[#allocation11 + $0x158] sm:$0xff] }
 0x21b   :  { %v1955_v5 = vld [vmem:[#allocation11 + $0x5f0] sm:$0xff]  ;;  %v1800_v6 = vld [vmem:[#allocation11 + $0x118] sm:$0xff] }
 0x21c   :  { %2175 = vmatpush.msra.mxu0 %v2002_v60  ;;  %v1639_v27 = vadd.f32 %v1638_v23, %v1619_v15  ;;  %v1436_v60 = vperm.slane %v3656_v12, 3  ;;  %v1919_v12 = vld [vmem:[#allocation11 + $0x4d0] sm:$0xff]  ;;  %v1792_v15 = vld [vmem:[#allocation11 + $0xd8] sm:$0xff] }
 0x21e   :  { %2176 = vmatpush.msra.mxu0 %v1998_v3  ;;  %v1927_v3 = vld [vmem:[#allocation11 + $0x510] sm:$0xff] }
 0x220   :  { %2177 = vmatpush.msra.mxu0 %v1994_v10 }
 0x221   :  { %v1698_v2 = vpop.f32.mrf.mxu3 }
 0x222   :  { %2178 = vmatpush.msra.mxu0 %v1990_v61  ;;  %v1699_v10 = vadd.f32 %v1698_v2, %v1436_v60  ;;  %v1872_v61 = vld [vmem:[#allocation11 + $0x358] sm:$0xff] }
 0x223   :  { %v1920_v60 = vld [vmem:[#allocation11 + $0x4d8] sm:$0xff] }
 0x224   :  { %2179 = vmatpush.msra.mxu0 %v1986_v20  ;;  %v1915_v20 = vld [vmem:[#allocation11 + $0x4b0] sm:$0xff]  ;;  %v1912_v2 = vld [vmem:[#allocation11 + $0x498] sm:$0xff] }
 0x226   :  { %2180 = vmatpush.msra.mxu0 %v1982_v28  ;;  %v1784_v28 = vld [vmem:[#allocation11 + $0x98] sm:$0xff] }
 0x228   :  { %2181 = vmatpush.msra.mxu0 %v1978_v32 }
 0x230   :  { %v1518_v36 = vpop.f32.mrf.mxu0 }
 0x231   :  { %v1519_v38 = vadd.f32 %v1518_v36, %v1499_v35  ;;  %v1859_v35 = vld [vmem:[#allocation11 + $0x2f0] sm:$0xff]  ;;  %v1974_v36 = vld [vmem:[#allocation11 + $0x688] sm:$0xff] }
 0x232   :  { %v1658_v24 = vpop.f32.mrf.mxu2  ;;  %2182 = vmatpush.msra.mxu0 %v1974_v36  ;;  %v1856_v36 = vld [vmem:[#allocation11 + $0x2d8] sm:$0xff] }
 0x233   :  { %3145 = vtanh.f32 %v1519_v38  ;;  %v1659_v31 = vadd.f32 %v1658_v24, %v1639_v27  ;;  %v1855_v38 = vld [vmem:[#allocation11 + $0x2d0] sm:$0xff]  ;;  %v1788_v24 = vld [vmem:[#allocation11 + $0xb8] sm:$0xff] }
 0x234   :  { %2183 = vmatpush.msra.mxu0 %v1970_v39  ;;  %v1852_v39 = vld [vmem:[#allocation11 + $0x2b8] sm:$0xff] }
 0x236   :  { %2184 = vmatpush.msra.mxu0 %v1966_v22  ;;  %v1848_v22 = vld [vmem:[#allocation11 + $0x298] sm:$0xff] }
 0x238   :  { %v1598_v48 = vpop.f32.mrf.mxu0 }
 0x239   :  { %v3660_v50 = vpop.eup %3145  ;;  %v1599_v17 = vadd.f32 %v1598_v48, %v1579_v46  ;;  %v1962_v46 = vld [vmem:[#allocation11 + $0x628] sm:$0xff]  ;;  %v1824_v48 = vld [vmem:[#allocation11 + $0x1d8] sm:$0xff] }
 0x23a   :  { %2047 = vmatmul.f32.vlgmr.msrb.gmra.mxu3 %v3660_v50  ;;  %2185 = vmatpush.msra.mxu0 %v1962_v46  ;;  %v1952_v46 = vld [vmem:[#allocation11 + $0x5d8] sm:$0xff] }
 0x23b   :  { %3147 = vtanh.f32 %v1599_v17  ;;  %2191 = vmatpush.msrb.mxu3 %v1827_v49  ;;  %v1839_v49 = vld [vmem:[#allocation11 + $0x250] sm:$0xff] }
 0x23c   :  { %v1947_v17 = vld [vmem:[#allocation11 + $0x5b0] sm:$0xff]  ;;  %2186 = vmatpush.msra.mxu0 %v1958_v16  ;;  %v1836_v16 = vld [vmem:[#allocation11 + $0x238] sm:$0xff] }
 0x23d   :  { %2192 = vmatpush.msrb.mxu3 %v1823_v52  ;;  %v1835_v52 = vld [vmem:[#allocation11 + $0x230] sm:$0xff] }
 0x23f   :  { %2193 = vmatpush.msrb.mxu3 %v1819_v54  ;;  %v1816_v54 = vld [vmem:[#allocation11 + $0x198] sm:$0xff] }
 0x241   :  { %v3663_v57 = vpop.eup %3147  ;;  %2194 = vmatpush.msrb.mxu3 %v1815_v63  ;;  %v1939_v63 = vld [vmem:[#allocation11 + $0x570] sm:$0xff] }
 0x242   :  { %2067 = vmatmul.f32.vlgmr.msrb.gmra.mxu1 %v3663_v57  ;;  %2127 = vmatmul.f32.vlgmr.msra.gmra.mxu3 %v3660_v50 }
 0x243   :  { %2195 = vmatpush.msrb.mxu3 %v1811_v0  ;;  %2211 = vmatpush.msrb.mxu1 %v1891_v56  ;;  %v1892_v0 = vld [vmem:[#allocation11 + $0x3f8] sm:$0xff]  ;;  %v1935_v56 = vld [vmem:[#allocation11 + $0x550] sm:$0xff] }
 0x245   :  { %2196 = vmatpush.msrb.mxu3 %v1807_v59  ;;  %2212 = vmatpush.msrb.mxu1 %v1887_v11  ;;  %v1888_v59 = vld [vmem:[#allocation11 + $0x3d8] sm:$0xff]  ;;  %v1931_v11 = vld [vmem:[#allocation11 + $0x530] sm:$0xff] }
 0x247   :  { %2197 = vmatpush.msrb.mxu3 %v1803_v62  ;;  %2213 = vmatpush.msrb.mxu1 %v1883_v1  ;;  %v1804_v62 = vld [vmem:[#allocation11 + $0x138] sm:$0xff] }
 0x248   :  { %v1884_v1 = vld [vmem:[#allocation11 + $0x3b8] sm:$0xff] }
 0x249   :  { %2198 = vmatpush.msrb.mxu3 %v1799_v7  ;;  %2214 = vmatpush.msrb.mxu1 %v1879_v9  ;;  %v1880_v7 = vld [vmem:[#allocation11 + $0x398] sm:$0xff]  ;;  %v1923_v9 = vld [vmem:[#allocation11 + $0x4f0] sm:$0xff] }
 0x24a   :  { %2147 = vmatmul.f32.vlgmr.msra.gmra.mxu1 %v3663_v57 }
 0x24b   :  { %2199 = vmatpush.msrb.mxu3 %v1795_v13  ;;  %2215 = vmatpush.msrb.mxu1 %v1875_v14  ;;  %v1796_v13 = vld [vmem:[#allocation11 + $0xf8] sm:$0xff] }
 0x24c   :  { %v1876_v14 = vld [vmem:[#allocation11 + $0x378] sm:$0xff] }
 0x24d   :  { %2200 = vmatpush.msrb.mxu3 %v1791_v18  ;;  %2216 = vmatpush.msrb.mxu1 %v1871_v19  ;;  %v1718_v18 = vpop.f32.mrf.mxu1 }
 0x24e   :  { %v1719_v23 = vadd.f32 %v1718_v18, %v1699_v10  ;;  %v1963_v10 = vld [vmem:[#allocation11 + $0x630] sm:$0xff]  ;;  %v2012_v18 = vld [vmem:[#allocation11 + $0x7b8] sm:$0xff] }
 0x24f   :  { %2201 = vmatpush.msrb.mxu3 %v1787_v25  ;;  %2217 = vmatpush.msrb.mxu1 %v1867_v26  ;;  %v1868_v25 = vld [vmem:[#allocation11 + $0x338] sm:$0xff]  ;;  %v1911_v26 = vld [vmem:[#allocation11 + $0x490] sm:$0xff] }
 0x250   :  { %v1678_v33 = vpop.f32.mrf.mxu0 }
 0x251   :  { %v1679_v4 = vadd.f32 %v1678_v33, %v1659_v31  ;;  %2202 = vmatpush.msrb.mxu3 %v1783_v29  ;;  %2218 = vmatpush.msrb.mxu1 %v1863_v30  ;;  %v1864_v29 = vld [vmem:[#allocation11 + $0x318] sm:$0xff]  ;;  %v1907_v31 = vld [vmem:[#allocation11 + $0x470] sm:$0xff] }
 0x252   :  { %v1738_v19 = vpop.f32.mrf.mxu2  ;;  %v1780_v33 = vld [vmem:[#allocation11 + $0x78] sm:$0xff] }
 0x253   :  { %3149 = vtanh.f32 %v1679_v4  ;;  %2203 = vmatpush.msrb.mxu3 %v1779_v34  ;;  %2219 = vmatpush.msrb.mxu1 %v1859_v35  ;;  %v1739_v27 = vadd.f32 %v1738_v19, %v1719_v23  ;;  %v1860_v34 = vld [vmem:[#allocation11 + $0x2f8] sm:$0xff]  ;;  %v1903_v35 = vld [vmem:[#allocation11 + $0x450] sm:$0xff]  ;;  %v2411_v23 = vld [vmem:[#allocation14 + $0x1c0] sm:$0xff] }
 0x254   :  { %v1776_v4 = vld [vmem:[#allocation11 + $0x58] sm:$0xff] }
 0x255   :  { %2204 = vmatpush.msrb.mxu3 %v1775_v37  ;;  %2220 = vmatpush.msrb.mxu1 %v1855_v38  ;;  %v1899_v37 = vld [vmem:[#allocation11 + $0x430] sm:$0xff]  ;;  %v1772_v38 = vld [vmem:[#allocation11 + $0x38] sm:$0xff] }
 0x256   :  { %v2008_v19 = vld [vmem:[#allocation11 + $0x798] sm:$0xff] }
 0x257   :  { %2205 = vmatpush.msrb.mxu3 %v1771_v40  ;;  %2221 = vmatpush.msrb.mxu1 %v1851_v41  ;;  %v1895_v40 = vld [vmem:[#allocation11 + $0x410] sm:$0xff]  ;;  %v1768_v41 = vld [vmem:[#allocation11 + $0x18] sm:$0xff] }
 0x259   :  { %v3669_v44 = vpop.eup %3149  ;;  %2206 = vmatpush.msrb.mxu3 %v1767_v8  ;;  %2222 = vmatpush.msrb.mxu1 %v1847_v42  ;;  %v2019_v42 = vld [vmem:[#allocation11 + $0x7f0] sm:$0xff] }
 0x25a   :  { %2087 = vmatmul.f32.vlgmr.msrb.gmra.mxu2 %v3669_v44  ;;  %2207 = vmatmul.f32.vlgmr.msrb.gmra.mxu3 %v3660_v50 }
 0x25b   :  { %2231 = vmatpush.msrb.mxu2 %v1955_v5  ;;  %2271 = vmatpush.msra.mxu3 %v1828_v21  ;;  %v1956_v5 = vld [vmem:[#allocation11 + $0x5f8] sm:$0xff] }
 0x25c   :  { %2223 = vmatpush.msrb.mxu1 %v1843_v45  ;;  %v1844_v21 = vld [vmem:[#allocation11 + $0x278] sm:$0xff]  ;;  %v2015_v45 = vld [vmem:[#allocation11 + $0x7d0] sm:$0xff] }
 0x25d   :  { %2232 = vmatpush.msrb.mxu2 %v1951_v47  ;;  %2272 = vmatpush.msra.mxu3 %v1824_v48  ;;  %v1840_v47 = vld [vmem:[#allocation11 + $0x258] sm:$0xff]  ;;  %v2011_v48 = vld [vmem:[#allocation11 + $0x7b0] sm:$0xff] }
 0x25e   :  { %2224 = vmatpush.msrb.mxu1 %v1839_v49  ;;  %v1948_v49 = vld [vmem:[#allocation11 + $0x5b8] sm:$0xff] }
 0x25f   :  { %2233 = vmatpush.msrb.mxu2 %v1947_v17  ;;  %2273 = vmatpush.msra.mxu3 %v1820_v51  ;;  %v2007_v17 = vld [vmem:[#allocation11 + $0x790] sm:$0xff]  ;;  %v1944_v51 = vld [vmem:[#allocation11 + $0x598] sm:$0xff] }
 0x260   :  { %2225 = vmatpush.msrb.mxu1 %v1835_v52  ;;  %v1832_v52 = vld [vmem:[#allocation11 + $0x218] sm:$0xff] }
 0x261   :  { %2234 = vmatpush.msrb.mxu2 %v1943_v53  ;;  %2274 = vmatpush.msra.mxu3 %v1816_v54  ;;  %v2003_v53 = vld [vmem:[#allocation11 + $0x770] sm:$0xff]  ;;  %v1940_v54 = vld [vmem:[#allocation11 + $0x578] sm:$0xff] }
 0x262   :  { %2226 = vmatpush.msrb.mxu1 %v1831_v55  ;;  %2167 = vmatmul.f32.vlgmr.msra.gmra.mxu2 %v3669_v44  ;;  %v1936_v55 = vld [vmem:[#allocation11 + $0x558] sm:$0xff] }
 0x263   :  { %2227 = vmatmul.f32.vlgmr.msrb.gmra.mxu1 %v3663_v57  ;;  %2235 = vmatpush.msrb.mxu2 %v1939_v63  ;;  %v1995_v63 = vld [vmem:[#allocation11 + $0x730] sm:$0xff] }
 0x264   :  { %2275 = vmatpush.msra.mxu3 %v1812_v43  ;;  %2291 = vmatpush.msra.mxu1 %v1892_v0  ;;  %v1932_v43 = vld [vmem:[#allocation11 + $0x538] sm:$0xff]  ;;  %v1991_v0 = vld [vmem:[#allocation11 + $0x710] sm:$0xff] }
 0x265   :  { %2236 = vmatpush.msrb.mxu2 %v1935_v56  ;;  %v1928_v56 = vld [vmem:[#allocation11 + $0x518] sm:$0xff] }
 0x266   :  { %2276 = vmatpush.msra.mxu3 %v1808_v58  ;;  %2292 = vmatpush.msra.mxu1 %v1888_v59  ;;  %v1987_v58 = vld [vmem:[#allocation11 + $0x6f0] sm:$0xff]  ;;  %v1924_v59 = vld [vmem:[#allocation11 + $0x4f8] sm:$0xff] }
 0x267   :  { %2237 = vmatpush.msrb.mxu2 %v1931_v11  ;;  %v1983_v11 = vld [vmem:[#allocation11 + $0x6d0] sm:$0xff] }
 0x268   :  { %2277 = vmatpush.msra.mxu3 %v1804_v62  ;;  %2293 = vmatpush.msra.mxu1 %v1884_v1  ;;  %v1916_v62 = vld [vmem:[#allocation11 + $0x4b8] sm:$0xff]  ;;  %v1975_v1 = vld [vmem:[#allocation11 + $0x690] sm:$0xff] }
 0x269   :  { %2238 = vmatpush.msrb.mxu2 %v1927_v3  ;;  %v1971_v3 = vld [vmem:[#allocation11 + $0x670] sm:$0xff] }
 0x26a   :  { %2278 = vmatpush.msra.mxu3 %v1800_v6  ;;  %2294 = vmatpush.msra.mxu1 %v1880_v7  ;;  %v1908_v6 = vld [vmem:[#allocation11 + $0x478] sm:$0xff]  ;;  %v1967_v7 = vld [vmem:[#allocation11 + $0x650] sm:$0xff] }
 0x26b   :  { %2239 = vmatpush.msrb.mxu2 %v1923_v9  ;;  %v1904_v9 = vld [vmem:[#allocation11 + $0x458] sm:$0xff] }
 0x26c   :  { %2279 = vmatpush.msra.mxu3 %v1796_v13  ;;  %2295 = vmatpush.msra.mxu1 %v1876_v14  ;;  %v1900_v13 = vld [vmem:[#allocation11 + $0x438] sm:$0xff]  ;;  %v1959_v14 = vld [vmem:[#allocation11 + $0x610] sm:$0xff] }
 0x26d   :  { %2240 = vmatpush.msrb.mxu2 %v1919_v12  ;;  %v1896_v12 = vld [vmem:[#allocation11 + $0x418] sm:$0xff] }
 0x26e   :  { %2280 = vmatpush.msra.mxu3 %v1792_v15  ;;  %2296 = vmatpush.msra.mxu1 %v1872_v61  ;;  %v2020_v15 = vld [vmem:[#allocation11 + $0x7f8] sm:$0xff] }
 0x26f   :  { %2241 = vmatpush.msrb.mxu2 %v1915_v20  ;;  %v2016_v61 = vld [vmem:[#allocation11 + $0x7d8] sm:$0xff]  ;;  %v2415_v20 = vld [vmem:[#allocation14 + $0x1e0] sm:$0xff] }
 0x270   :  { %2281 = vmatpush.msra.mxu3 %v1788_v24  ;;  %2297 = vmatpush.msra.mxu1 %v1868_v25  ;;  %v1758_v30 = vpop.f32.mrf.mxu0  ;;  %v2004_v24 = vld [vmem:[#allocation11 + $0x778] sm:$0xff] }
 0x271   :  { %v1759_v32 = vadd.f32 %v1758_v30, %v1739_v27  ;;  %2242 = vmatpush.msrb.mxu2 %v1911_v26  ;;  %v2000_v25 = vld [vmem:[#allocation11 + $0x758] sm:$0xff]  ;;  %v2407_v27 = vld [vmem:[#allocation14 + $0x1a0] sm:$0xff] }
 0x272   :  { %2282 = vmatpush.msra.mxu3 %v1784_v28  ;;  %2298 = vmatpush.msra.mxu1 %v1864_v29  ;;  %v1996_v26 = vld [vmem:[#allocation11 + $0x738] sm:$0xff]  ;;  %v2399_v29 = vld [vmem:[#allocation14 + $0x160] sm:$0xff] }
 0x273   :  { %3151 = vtanh.f32 %v1759_v32  ;;  %2243 = vmatpush.msrb.mxu2 %v1907_v31  ;;  %v1992_v28 = vld [vmem:[#allocation11 + $0x718] sm:$0xff]  ;;  %v2479_v30 = vld [vmem:[#allocation14 + $0x3e0] sm:$0xff] }
 0x274   :  { %2283 = vmatpush.msra.mxu3 %v1780_v33  ;;  %2299 = vmatpush.msra.mxu1 %v1860_v34  ;;  %v2475_v31 = vld [vmem:[#allocation14 + $0x3c0] sm:$0xff]  ;;  %v1988_v32 = vld [vmem:[#allocation11 + $0x6f8] sm:$0xff] }
 0x275   :  { %2244 = vmatpush.msrb.mxu2 %v1903_v35  ;;  %v2395_v33 = vld [vmem:[#allocation14 + $0x140] sm:$0xff]  ;;  %v1984_v35 = vld [vmem:[#allocation11 + $0x6d8] sm:$0xff] }
 0x276   :  { %2284 = vmatpush.msra.mxu3 %v1776_v4  ;;  %2300 = vmatpush.msra.mxu1 %v1856_v36  ;;  %v2471_v34 = vld [vmem:[#allocation14 + $0x3a0] sm:$0xff] }
 0x277   :  { %2245 = vmatpush.msrb.mxu2 %v1899_v37  ;;  %v2391_v4 = vld [vmem:[#allocation14 + $0x120] sm:$0xff]  ;;  %v1980_v37 = vld [vmem:[#allocation11 + $0x6b8] sm:$0xff] }
 0x278   :  { %2285 = vmatpush.msra.mxu3 %v1772_v38  ;;  %2301 = vmatpush.msra.mxu1 %v1852_v39  ;;  %v2467_v36 = vld [vmem:[#allocation14 + $0x380] sm:$0xff] }
 0x279   :  { %v3676_v8 = vpop.eup %3151  ;;  %2246 = vmatpush.msrb.mxu2 %v1895_v40  ;;  %v2387_v38 = vld [vmem:[#allocation14 + $0x100] sm:$0xff]  ;;  %v1976_v40 = vld [vmem:[#allocation11 + $0x698] sm:$0xff] }
 0x27a   :  { %2286 = vmatpush.msra.mxu3 %v1768_v41  ;;  %2302 = vmatpush.msra.mxu1 %v1848_v22  ;;  %v2463_v39 = vld [vmem:[#allocation14 + $0x360] sm:$0xff] }
 0x27b   :  { %2107 = vmatmul.f32.vlgmr.msrb.gmra.mxu0 %v3676_v8  ;;  %2247 = vmatmul.f32.vlgmr.msrb.gmra.mxu2 %v3669_v44  ;;  %v2383_v41 = vld [vmem:[#allocation14 + $0xe0] sm:$0xff] }
 0x27c   :  { %2251 = vmatpush.msrb.mxu0 %v2019_v42  ;;  %2287 = vmatmul.f32.vlgmr.msra.gmra.mxu3 %v3660_v50  ;;  %v1999_v50 = vld [vmem:[#allocation11 + $0x750] sm:$0xff]  ;;  %v2459_v22 = vld [vmem:[#allocation14 + $0x340] sm:$0xff]  ;;  %v1972_v42 = vld [vmem:[#allocation11 + $0x678] sm:$0xff] }
 0x27d   :  { %2311 = vmatpush.msra.mxu2 %v1956_v5  ;;  %2303 = vmatpush.msra.mxu1 %v1844_v21  ;;  %v2379_v5 = vld [vmem:[#allocation14 + $0xc0] sm:$0xff] }
 0x27e   :  { %2252 = vmatpush.msrb.mxu0 %v2015_v45  ;;  %2621 = vmatpush.msrb.mxu3 %v2415_v20  ;;  %v2455_v21 = vld [vmem:[#allocation14 + $0x320] sm:$0xff]  ;;  %v1968_v45 = vld [vmem:[#allocation11 + $0x658] sm:$0xff] }
 0x27f   :  { %2312 = vmatpush.msra.mxu2 %v1952_v46  ;;  %2304 = vmatpush.msra.mxu1 %v1840_v47  ;;  %v2375_v46 = vld [vmem:[#allocation14 + $0xa0] sm:$0xff] }
 0x280   :  { %2253 = vmatpush.msrb.mxu0 %v2011_v48  ;;  %2622 = vmatpush.msrb.mxu3 %v2411_v23  ;;  %v2451_v47 = vld [vmem:[#allocation14 + $0x300] sm:$0xff]  ;;  %v1964_v48 = vld [vmem:[#allocation11 + $0x638] sm:$0xff]  ;;  %v2384_v23 = vld [vmem:[#allocation14 + $0xe8] sm:$0xff] }
 0x281   :  { %2313 = vmatpush.msra.mxu2 %v1948_v49  ;;  %2305 = vmatpush.msra.mxu1 %v1836_v16  ;;  %v2371_v49 = vld [vmem:[#allocation14 + $0x80] sm:$0xff] }
 0x282   :  { %2254 = vmatpush.msrb.mxu0 %v2007_v17  ;;  %2623 = vmatpush.msrb.mxu3 %v2407_v27  ;;  %v2447_v16 = vld [vmem:[#allocation14 + $0x2e0] sm:$0xff]  ;;  %v1960_v17 = vld [vmem:[#allocation11 + $0x618] sm:$0xff]  ;;  %v2460_v27 = vld [vmem:[#allocation14 + $0x348] sm:$0xff] }
 0x283   :  { %2314 = vmatpush.msra.mxu2 %v1944_v51  ;;  %2306 = vmatpush.msra.mxu1 %v1832_v52  ;;  %v2367_v51 = vld [vmem:[#allocation14 + $0x60] sm:$0xff] }
 0x284   :  { %2187 = vmatmul.f32.vlgmr.msra.gmra.mxu0 %v3676_v8  ;;  %2307 = vmatmul.f32.vlgmr.msra.gmra.mxu1 %v3663_v57  ;;  %v1979_v57 = vld [vmem:[#allocation11 + $0x6b0] sm:$0xff]  ;;  %v2443_v52 = vld [vmem:[#allocation14 + $0x2c0] sm:$0xff] }
 0x285   :  { %2255 = vmatpush.msrb.mxu0 %v2003_v53  ;;  %2315 = vmatpush.msra.mxu2 %v1940_v54  ;;  %v2363_v53 = vld [vmem:[#allocation14 + $0x40] sm:$0xff] }
 0x286   :  { %2641 = vmatpush.msrb.mxu1 %v2479_v30  ;;  %v2359_v54 = vld [vmem:[#allocation14 + $0x20] sm:$0xff] }
 0x287   :  { %2256 = vmatpush.msrb.mxu0 %v1999_v50  ;;  %2316 = vmatpush.msra.mxu2 %v1936_v55  ;;  %v2439_v50 = vld [vmem:[#allocation14 + $0x2a0] sm:$0xff] }
 0x288   :  { %2642 = vmatpush.msrb.mxu1 %v2475_v31  ;;  %v2355_v55 = vld [vmem:[#allocation14] sm:$0xff]  ;;  %v2372_v31 = vld [vmem:[#allocation14 + $0x88] sm:$0xff] }
 0x289   :  { %2257 = vmatpush.msrb.mxu0 %v1995_v63  ;;  %2317 = vmatpush.msra.mxu2 %v1932_v43  ;;  %v2435_v63 = vld [vmem:[#allocation14 + $0x280] sm:$0xff] }
 0x28a   :  { %2643 = vmatpush.msrb.mxu1 %v2471_v34  ;;  %v2543_v43 = vld [vmem:[#allocation14 + $0x5e0] sm:$0xff]  ;;  %v2368_v34 = vld [vmem:[#allocation14 + $0x68] sm:$0xff] }
 0x28b   :  { %2258 = vmatpush.msrb.mxu0 %v1991_v0  ;;  %2318 = vmatpush.msra.mxu2 %v1928_v56  ;;  %v2416_v0 = vld [vmem:[#allocation14 + $0x1e8] sm:$0xff]  ;;  %v2431_v56 = vld [vmem:[#allocation14 + $0x260] sm:$0xff] }
 0x28c   :  { %2644 = vmatpush.msrb.mxu1 %v2467_v36  ;;  %v2511_v20 = vld [vmem:[#allocation14 + $0x4e0] sm:$0xff]  ;;  %v2364_v36 = vld [vmem:[#allocation14 + $0x48] sm:$0xff] }
 0x28d   :  { %2259 = vmatpush.msrb.mxu0 %v1987_v58  ;;  %2319 = vmatpush.msra.mxu2 %v1924_v59  ;;  %v2539_v58 = vld [vmem:[#allocation14 + $0x5c0] sm:$0xff]  ;;  %v2412_v59 = vld [vmem:[#allocation14 + $0x1c8] sm:$0xff] }
 0x28e   :  { %2645 = vmatpush.msrb.mxu1 %v2463_v39  ;;  %v2499_v30 = vld [vmem:[#allocation14 + $0x480] sm:$0xff]  ;;  %v2360_v39 = vld [vmem:[#allocation14 + $0x28] sm:$0xff] }
 0x28f   :  { %2260 = vmatpush.msrb.mxu0 %v1983_v11  ;;  %2320 = vmatpush.msra.mxu2 %v1920_v60  ;;  %v2427_v11 = vld [vmem:[#allocation14 + $0x240] sm:$0xff]  ;;  %v2408_v60 = vld [vmem:[#allocation14 + $0x1a8] sm:$0xff] }
 0x290   :  { %2646 = vmatpush.msrb.mxu1 %v2459_v22  ;;  %v2356_v22 = vld [vmem:[#allocation14 + $0x8] sm:$0xff] }
 0x291   :  { %2261 = vmatpush.msrb.mxu0 %v1979_v57  ;;  %2321 = vmatpush.msra.mxu2 %v1916_v62  ;;  %v2423_v57 = vld [vmem:[#allocation14 + $0x220] sm:$0xff] }
 0x292   :  { %2647 = vmatpush.msrb.mxu1 %v2455_v21  ;;  %v2531_v62 = vld [vmem:[#allocation14 + $0x580] sm:$0xff]  ;;  %v2544_v21 = vld [vmem:[#allocation14 + $0x5e8] sm:$0xff] }
 0x293   :  { %2262 = vmatpush.msrb.mxu0 %v1975_v1  ;;  %2322 = vmatpush.msra.mxu2 %v1912_v2  ;;  %v2404_v1 = vld [vmem:[#allocation14 + $0x188] sm:$0xff]  ;;  %v2419_v2 = vld [vmem:[#allocation14 + $0x200] sm:$0xff] }
 0x294   :  { %2648 = vmatpush.msrb.mxu1 %v2451_v47  ;;  %v2540_v47 = vld [vmem:[#allocation14 + $0x5c8] sm:$0xff] }
 0x295   :  { %2263 = vmatpush.msrb.mxu0 %v1971_v3  ;;  %2323 = vmatpush.msra.mxu2 %v1908_v6  ;;  %v2527_v3 = vld [vmem:[#allocation14 + $0x560] sm:$0xff]  ;;  %v2400_v6 = vld [vmem:[#allocation14 + $0x168] sm:$0xff] }
 0x296   :  { %2649 = vmatpush.msrb.mxu1 %v2447_v16  ;;  %v2536_v16 = vld [vmem:[#allocation14 + $0x5a8] sm:$0xff] }
 0x297   :  { %2264 = vmatpush.msrb.mxu0 %v1967_v7  ;;  %2324 = vmatpush.msra.mxu2 %v1904_v9  ;;  %v2480_v7 = vld [vmem:[#allocation14 + $0x3e8] sm:$0xff]  ;;  %v2523_v9 = vld [vmem:[#allocation14 + $0x540] sm:$0xff] }
 0x298   :  { %2650 = vmatpush.msrb.mxu1 %v2443_v52  ;;  %v2532_v52 = vld [vmem:[#allocation14 + $0x588] sm:$0xff] }
 0x299   :  { %2265 = vmatpush.msrb.mxu0 %v1963_v10  ;;  %2325 = vmatpush.msra.mxu2 %v1900_v13  ;;  %v2396_v10 = vld [vmem:[#allocation14 + $0x148] sm:$0xff] }
 0x29a   :  { %2651 = vmatpush.msrb.mxu1 %v2439_v50  ;;  %v2476_v13 = vld [vmem:[#allocation14 + $0x3c8] sm:$0xff]  ;;  %v2591_v50 = vld [vmem:[#allocation14 + $0x760] sm:$0xff] }
 0x29b   :  { %2266 = vmatpush.msrb.mxu0 %v1959_v14  ;;  %2326 = vmatpush.msra.mxu2 %v1896_v12  ;;  %v2519_v14 = vld [vmem:[#allocation14 + $0x520] sm:$0xff]  ;;  %v2392_v12 = vld [vmem:[#allocation14 + $0x128] sm:$0xff] }
 0x29c   :  { %2267 = vmatmul.f32.vlgmr.msrb.gmra.mxu0 %v3676_v8  ;;  %2327 = vmatmul.f32.vlgmr.msra.gmra.mxu2 %v3669_v44  ;;  %v2403_v44 = vld [vmem:[#allocation14 + $0x180] sm:$0xff] }
 0x29d   :  { %2331 = vmatpush.msra.mxu0 %v2020_v15  ;;  %2624 = vmatpush.msrb.mxu3 %v2403_v44  ;;  %v2472_v15 = vld [vmem:[#allocation14 + $0x3a8] sm:$0xff] }
 0x29e   :  { %2652 = vmatpush.msrb.mxu1 %v2435_v63  ;;  %2661 = vmatpush.msrb.mxu2 %v2543_v43  ;;  %v2376_v44 = vld [vmem:[#allocation14 + $0xa8] sm:$0xff]  ;;  %v2587_v63 = vld [vmem:[#allocation14 + $0x740] sm:$0xff] }
 0x29f   :  { %2332 = vmatpush.msra.mxu0 %v2016_v61  ;;  %2625 = vmatpush.msrb.mxu3 %v2399_v29  ;;  %v2515_v61 = vld [vmem:[#allocation14 + $0x500] sm:$0xff]  ;;  %v2456_v29 = vld [vmem:[#allocation14 + $0x328] sm:$0xff] }
 0x2a0   :  { %2653 = vmatpush.msrb.mxu1 %v2431_v56  ;;  %2662 = vmatpush.msrb.mxu2 %v2539_v58  ;;  %v2524_v56 = vld [vmem:[#allocation14 + $0x548] sm:$0xff]  ;;  %v2583_v58 = vld [vmem:[#allocation14 + $0x720] sm:$0xff] }
 0x2a1   :  { %2333 = vmatpush.msra.mxu0 %v2012_v18  ;;  %2626 = vmatpush.msrb.mxu3 %v2395_v33  ;;  %v2388_v18 = vld [vmem:[#allocation14 + $0x108] sm:$0xff]  ;;  %v2495_v33 = vld [vmem:[#allocation14 + $0x460] sm:$0xff] }
 0x2a2   :  { %2654 = vmatpush.msrb.mxu1 %v2427_v11  ;;  %v2579_v11 = vld [vmem:[#allocation14 + $0x700] sm:$0xff] }
 0x2a3   :  { %2334 = vmatpush.msra.mxu0 %v2008_v19  ;;  %2627 = vmatpush.msrb.mxu3 %v2391_v4  ;;  %v2468_v19 = vld [vmem:[#allocation14 + $0x388] sm:$0xff]  ;;  %v2491_v4 = vld [vmem:[#allocation14 + $0x440] sm:$0xff] }
 0x2a4   :  { %2655 = vmatpush.msrb.mxu1 %v2423_v57  ;;  %v2516_v57 = vld [vmem:[#allocation14 + $0x508] sm:$0xff] }
 0x2a5   :  { %2335 = vmatpush.msra.mxu0 %v2004_v24  ;;  %2628 = vmatpush.msrb.mxu3 %v2387_v38  ;;  %v2464_v24 = vld [vmem:[#allocation14 + $0x368] sm:$0xff]  ;;  %v2487_v38 = vld [vmem:[#allocation14 + $0x420] sm:$0xff] }
 0x2a6   :  { %2656 = vmatpush.msrb.mxu1 %v2419_v2  ;;  %v2512_v2 = vld [vmem:[#allocation14 + $0x4e8] sm:$0xff] }
 0x2a7   :  { %2336 = vmatpush.msra.mxu0 %v2000_v25  ;;  %2629 = vmatpush.msrb.mxu3 %v2383_v41  ;;  %v2507_v25 = vld [vmem:[#allocation14 + $0x4c0] sm:$0xff] }
 0x2a8   :  { %2721 = vmatpush.msra.mxu1 %v2480_v7  ;;  %v2483_v41 = vld [vmem:[#allocation14 + $0x400] sm:$0xff]  ;;  %v2508_v7 = vld [vmem:[#allocation14 + $0x4c8] sm:$0xff] }
 0x2a9   :  { %2337 = vmatpush.msra.mxu0 %v1996_v26  ;;  %2630 = vmatpush.msrb.mxu3 %v2379_v5  ;;  %v2380_v26 = vld [vmem:[#allocation14 + $0xc8] sm:$0xff]  ;;  %v2607_v5 = vld [vmem:[#allocation14 + $0x7e0] sm:$0xff] }
 0x2aa   :  { %2722 = vmatpush.msra.mxu1 %v2476_v13 }
 0x2ab   :  { %2338 = vmatpush.msra.mxu0 %v1992_v28  ;;  %2631 = vmatpush.msrb.mxu3 %v2375_v46  ;;  %v2503_v28 = vld [vmem:[#allocation14 + $0x4a0] sm:$0xff] }
 0x2ac   :  { %2723 = vmatpush.msra.mxu1 %v2472_v15  ;;  %v2603_v46 = vld [vmem:[#allocation14 + $0x7c0] sm:$0xff] }
 0x2ad   :  { %2339 = vmatpush.msra.mxu0 %v1988_v32  ;;  %2632 = vmatpush.msrb.mxu3 %v2371_v49  ;;  %v2452_v32 = vld [vmem:[#allocation14 + $0x308] sm:$0xff]  ;;  %v2599_v49 = vld [vmem:[#allocation14 + $0x7a0] sm:$0xff] }
 0x2ae   :  { %2724 = vmatpush.msra.mxu1 %v2468_v19  ;;  %v2563_v19 = vld [vmem:[#allocation14 + $0x680] sm:$0xff] }
 0x2af   :  { %2340 = vmatpush.msra.mxu0 %v1984_v35  ;;  %2633 = vmatpush.msrb.mxu3 %v2367_v51  ;;  %v2448_v35 = vld [vmem:[#allocation14 + $0x2e8] sm:$0xff]  ;;  %v2595_v51 = vld [vmem:[#allocation14 + $0x780] sm:$0xff] }
 0x2b0   :  { %2725 = vmatpush.msra.mxu1 %v2464_v24  ;;  %v2559_v24 = vld [vmem:[#allocation14 + $0x660] sm:$0xff] }
 0x2b1   :  { %2341 = vmatpush.msra.mxu0 %v1980_v37  ;;  %2634 = vmatpush.msrb.mxu3 %v2363_v53  ;;  %v2444_v37 = vld [vmem:[#allocation14 + $0x2c8] sm:$0xff]  ;;  %v3686_v53 = vld [vmem:[#allocation13] sm:$0xf] }
 0x2b2   :  { %2726 = vmatpush.msra.mxu1 %v2460_v27  ;;  %v2023_v43 = vperm.slane %v3686_v53, 0  ;;  %v2555_v27 = vld [vmem:[#allocation14 + $0x640] sm:$0xff] }
 0x2b3   :  { %2342 = vmatpush.msra.mxu0 %v1976_v40  ;;  %2635 = vmatpush.msrb.mxu3 %v2359_v54  ;;  %v2440_v40 = vld [vmem:[#allocation14 + $0x2a8] sm:$0xff] }
 0x2b4   :  { %2727 = vmatpush.msra.mxu1 %v2456_v29  ;;  %v2420_v54 = vld [vmem:[#allocation14 + $0x208] sm:$0xff] }
 0x2b5   :  { %2343 = vmatpush.msra.mxu0 %v1972_v42  ;;  %2636 = vmatpush.msrb.mxu3 %v2355_v55  ;;  %v2436_v42 = vld [vmem:[#allocation14 + $0x288] sm:$0xff] }
 0x2b6   :  { %2728 = vmatpush.msra.mxu1 %v2452_v32  ;;  %v2528_v55 = vld [vmem:[#allocation14 + $0x568] sm:$0xff] }
 0x2b7   :  { %2344 = vmatpush.msra.mxu0 %v1968_v45  ;;  %2701 = vmatpush.msra.mxu3 %v2416_v0  ;;  %v2432_v45 = vld [vmem:[#allocation14 + $0x268] sm:$0xff] }
 0x2b8   :  { %2729 = vmatpush.msra.mxu1 %v2448_v35  ;;  %v2488_v32 = vld [vmem:[#allocation14 + $0x428] sm:$0xff]  ;;  %v2547_v35 = vld [vmem:[#allocation14 + $0x600] sm:$0xff] }
 0x2b9   :  { %2345 = vmatpush.msra.mxu0 %v1964_v48  ;;  %2702 = vmatpush.msra.mxu3 %v2412_v59  ;;  %v2428_v48 = vld [vmem:[#allocation14 + $0x248] sm:$0xff] }
 0x2ba   :  { %2730 = vmatpush.msra.mxu1 %v2444_v37  ;;  %v2520_v59 = vld [vmem:[#allocation14 + $0x528] sm:$0xff]  ;;  %v2413_v37 = vld [vmem:[#allocation14 + $0x1d0] sm:$0xff] }
 0x2bb   :  { %2346 = vmatpush.msra.mxu0 %v1960_v17  ;;  %2703 = vmatpush.msra.mxu3 %v2408_v60  ;;  %v2424_v17 = vld [vmem:[#allocation14 + $0x228] sm:$0xff] }
 0x2bc   :  { %2347 = vmatmul.f32.vlgmr.msra.gmra.mxu0 %v3676_v8  ;;  %v2535_v8 = vld [vmem:[#allocation14 + $0x5a0] sm:$0xff]  ;;  %2731 = vmatpush.msra.mxu1 %v2440_v40  ;;  %v2604_v40 = vld [vmem:[#allocation14 + $0x7c8] sm:$0xff] }
 0x2bd   :  { %2663 = vmatpush.msrb.mxu2 %v2535_v8  ;;  %2704 = vmatpush.msra.mxu3 %v2404_v1  ;;  %v2048_v0 = vpop.f32.mrf.mxu3 }
 0x2be   :  { %2732 = vmatpush.msra.mxu1 %v2436_v42  ;;  %2681 = vmatpush.msrb.mxu0 %v2607_v5  ;;  %v2049_v8 = vadd.f32 %v2048_v0, %v2023_v43  ;;  %v2401_v42 = vld [vmem:[#allocation14 + $0x170] sm:$0xff]  ;;  %v2596_v5 = vld [vmem:[#allocation14 + $0x788] sm:$0xff] }
 0x2bf   :  { %2664 = vmatpush.msrb.mxu2 %v2531_v62  ;;  %2705 = vmatpush.msra.mxu3 %v2400_v6  ;;  %v2068_v60 = vpop.f32.mrf.mxu1  ;;  %v2575_v62 = vld [vmem:[#allocation14 + $0x6e0] sm:$0xff]  ;;  %v2465_v43 = vld [vmem:[#allocation14 + $0x370] sm:$0xff]  ;;  %v2580_v0 = vld [vmem:[#allocation14 + $0x708] sm:$0xff] }
 0x2c0   :  { %2733 = vmatpush.msra.mxu1 %v2432_v45  ;;  %2682 = vmatpush.msrb.mxu0 %v2603_v46  ;;  %v2069_v6 = vadd.f32 %v2068_v60, %v2049_v8  ;;  %v2397_v46 = vld [vmem:[#allocation14 + $0x150] sm:$0xff]  ;;  %v2576_v8 = vld [vmem:[#allocation14 + $0x6e8] sm:$0xff] }
 0x2c1   :  { %2665 = vmatpush.msrb.mxu2 %v2527_v3  ;;  %2706 = vmatpush.msra.mxu3 %v2396_v10  ;;  %v2571_v3 = vld [vmem:[#allocation14 + $0x6c0] sm:$0xff]  ;;  %v2377_v60 = vld [vmem:[#allocation14 + $0xb0] sm:$0xff] }
 0x2c2   :  { %2734 = vmatpush.msra.mxu1 %v2428_v48  ;;  %2683 = vmatpush.msrb.mxu0 %v2599_v49  ;;  %v2567_v10 = vld [vmem:[#allocation14 + $0x6a0] sm:$0xff]  ;;  %v2592_v48 = vld [vmem:[#allocation14 + $0x768] sm:$0xff]  ;;  %v2393_v49 = vld [vmem:[#allocation14 + $0x130] sm:$0xff] }
 0x2c3   :  { %2666 = vmatpush.msrb.mxu2 %v2523_v9  ;;  %2707 = vmatpush.msra.mxu3 %v2392_v12  ;;  %v2024_v9 = vperm.slane %v3686_v53, 1  ;;  %v2504_v12 = vld [vmem:[#allocation14 + $0x4a8] sm:$0xff] }
 0x2c4   :  { %2735 = vmatpush.msra.mxu1 %v2424_v17  ;;  %2684 = vmatpush.msrb.mxu0 %v2595_v51  ;;  %v2588_v17 = vld [vmem:[#allocation14 + $0x748] sm:$0xff]  ;;  %v2025_v51 = vperm.slane %v3686_v53, 2 }
 0x2c5   :  { %2667 = vmatpush.msrb.mxu2 %v2519_v14  ;;  %2708 = vmatpush.msra.mxu3 %v2388_v18  ;;  %v2128_v13 = vpop.f32.mrf.mxu3 }
 0x2c6   :  { %2736 = vmatpush.msra.mxu1 %v2420_v54  ;;  %2685 = vmatpush.msrb.mxu0 %v2591_v50  ;;  %v2129_v18 = vadd.f32 %v2128_v13, %v2024_v9  ;;  %v2469_v50 = vld [vmem:[#allocation14 + $0x390] sm:$0xff] }
 0x2c7   :  { %2668 = vmatpush.msrb.mxu2 %v2515_v61  ;;  %2709 = vmatpush.msra.mxu3 %v2384_v23  ;;  %v2148_v23 = vpop.f32.mrf.mxu1 }
 0x2c8   :  { %2686 = vmatpush.msrb.mxu0 %v2587_v63  ;;  %v2385_v63 = vld [vmem:[#allocation14 + $0xf0] sm:$0xff] }
 0x2c9   :  { %2669 = vmatpush.msrb.mxu2 %v2511_v20  ;;  %2710 = vmatpush.msra.mxu3 %v2380_v26  ;;  %v2500_v20 = vld [vmem:[#allocation14 + $0x488] sm:$0xff] }
 0x2ca   :  { %2687 = vmatpush.msrb.mxu0 %v2583_v58  ;;  %v2381_v58 = vld [vmem:[#allocation14 + $0xd0] sm:$0xff] }
 0x2cb   :  { %2670 = vmatpush.msrb.mxu2 %v2507_v25  ;;  %2711 = vmatpush.msra.mxu3 %v2376_v44  ;;  %v2496_v25 = vld [vmem:[#allocation14 + $0x468] sm:$0xff]  ;;  %v2149_v44 = vadd.f32 %v2148_v23, %v2129_v18  ;;  %v2445_v18 = vld [vmem:[#allocation14 + $0x2d0] sm:$0xff] }
 0x2cc   :  { %2688 = vmatpush.msrb.mxu0 %v2579_v11  ;;  %v2461_v11 = vld [vmem:[#allocation14 + $0x350] sm:$0xff] }
 0x2cd   :  { %2671 = vmatpush.msrb.mxu2 %v2503_v28  ;;  %2712 = vmatpush.msra.mxu3 %v2372_v31  ;;  %v2492_v28 = vld [vmem:[#allocation14 + $0x448] sm:$0xff]  ;;  %v2551_v31 = vld [vmem:[#allocation14 + $0x620] sm:$0xff]  ;;  %v2441_v23 = vld [vmem:[#allocation14 + $0x2b0] sm:$0xff] }
 0x2ce   :  { %2689 = vmatpush.msrb.mxu0 %v2575_v62  ;;  %v2457_v62 = vld [vmem:[#allocation14 + $0x330] sm:$0xff] }
 0x2cf   :  { %2672 = vmatpush.msrb.mxu2 %v2499_v30  ;;  %2713 = vmatpush.msra.mxu3 %v2368_v34  ;;  %v2417_v30 = vld [vmem:[#allocation14 + $0x1f0] sm:$0xff] }
 0x2d0   :  { %2690 = vmatpush.msrb.mxu0 %v2571_v3  ;;  %v2373_v3 = vld [vmem:[#allocation14 + $0x90] sm:$0xff] }
 0x2d1   :  { %2673 = vmatpush.msrb.mxu2 %v2495_v33  ;;  %2714 = vmatpush.msra.mxu3 %v2364_v36 }
 0x2d2   :  { %2691 = vmatpush.msrb.mxu0 %v2567_v10  ;;  %v2369_v10 = vld [vmem:[#allocation14 + $0x70] sm:$0xff] }
 0x2d3   :  { %2674 = vmatpush.msrb.mxu2 %v2491_v4  ;;  %2715 = vmatpush.msra.mxu3 %v2360_v39  ;;  %v2484_v4 = vld [vmem:[#allocation14 + $0x408] sm:$0xff]  ;;  %v2409_v39 = vld [vmem:[#allocation14 + $0x1b0] sm:$0xff] }
 0x2d4   :  { %2692 = vmatpush.msrb.mxu0 %v2563_v19  ;;  %v2361_v19 = vld [vmem:[#allocation14 + $0x30] sm:$0xff] }
 0x2d5   :  { %2675 = vmatpush.msrb.mxu2 %v2487_v38  ;;  %2716 = vmatpush.msra.mxu3 %v2356_v22  ;;  %v2608_v38 = vld [vmem:[#allocation14 + $0x7e8] sm:$0xff] }
 0x2d6   :  { %2693 = vmatpush.msrb.mxu0 %v2559_v24  ;;  %v2600_v22 = vld [vmem:[#allocation14 + $0x7a8] sm:$0xff] }
 0x2d7   :  { %2676 = vmatpush.msrb.mxu2 %v2483_v41  ;;  %v2405_v41 = vld [vmem:[#allocation14 + $0x190] sm:$0xff]  ;;  %v2556_v24 = vld [vmem:[#allocation14 + $0x648] sm:$0xff] }
 0x2d8   :  { %2694 = vmatpush.msrb.mxu0 %v2555_v27  ;;  %v2552_v27 = vld [vmem:[#allocation14 + $0x628] sm:$0xff] }
 0x2d9   :  { %2741 = vmatpush.msra.mxu2 %v2544_v21  ;;  %v2481_v21 = vld [vmem:[#allocation14 + $0x3f0] sm:$0xff] }
 0x2da   :  { %2695 = vmatpush.msrb.mxu0 %v2551_v31  ;;  %v2414_v31 = vld [vmem:[#allocation14 + $0x1d8] sm:$0xff] }
 0x2db   :  { %2742 = vmatpush.msra.mxu2 %v2540_v47  ;;  %v2477_v47 = vld [vmem:[#allocation14 + $0x3d0] sm:$0xff] }
 0x2dc   :  { %2696 = vmatpush.msrb.mxu0 %v2547_v35  ;;  %v2429_v35 = vld [vmem:[#allocation14 + $0x250] sm:$0xff] }
 0x2dd   :  { %2743 = vmatpush.msra.mxu2 %v2536_v16  ;;  %v2088_v1 = vpop.f32.mrf.mxu2  ;;  %v2473_v16 = vld [vmem:[#allocation14 + $0x3b0] sm:$0xff]  ;;  %v2208_v54 = vpop.f32.mrf.mxu3 }
 0x2de   :  { %v2089_v14 = vadd.f32 %v2088_v1, %v2069_v6  ;;  %2761 = vmatpush.msra.mxu0 %v2608_v38  ;;  %v2572_v1 = vld [vmem:[#allocation14 + $0x6c8] sm:$0xff]  ;;  %v2453_v6 = vld [vmem:[#allocation14 + $0x310] sm:$0xff]  ;;  %v2406_v38 = vld [vmem:[#allocation14 + $0x198] sm:$0xff] }
 0x2df   :  { %2744 = vmatpush.msra.mxu2 %v2532_v52  ;;  %v2389_v52 = vld [vmem:[#allocation14 + $0x110] sm:$0xff] }
 0x2e0   :  { %2762 = vmatpush.msra.mxu0 %v2604_v40  ;;  %v2421_v40 = vld [vmem:[#allocation14 + $0x210] sm:$0xff] }
 0x2e1   :  { %2745 = vmatpush.msra.mxu2 %v2528_v55  ;;  %v2584_v55 = vld [vmem:[#allocation14 + $0x728] sm:$0xff] }
 0x2e2   :  { %2763 = vmatpush.msra.mxu0 %v2600_v22  ;;  %v2402_v22 = vld [vmem:[#allocation14 + $0x178] sm:$0xff] }
 0x2e3   :  { %2746 = vmatpush.msra.mxu2 %v2524_v56  ;;  %v2209_v56 = vadd.f32 %v2208_v54, %v2025_v51  ;;  %v2517_v51 = vld [vmem:[#allocation14 + $0x510] sm:$0xff]  ;;  %v2470_v54 = vld [vmem:[#allocation14 + $0x398] sm:$0xff] }
 0x2e4   :  { %2764 = vmatpush.msra.mxu0 %v2596_v5  ;;  %v2525_v5 = vld [vmem:[#allocation14 + $0x550] sm:$0xff] }
 0x2e5   :  { %2747 = vmatpush.msra.mxu2 %v2520_v59  ;;  %v2168_v26 = vpop.f32.mrf.mxu2  ;;  %v2228_v59 = vpop.f32.mrf.mxu1 }
 0x2e6   :  { %v2169_v29 = vadd.f32 %v2168_v26, %v2149_v44  ;;  %2765 = vmatpush.msra.mxu0 %v2592_v48  ;;  %v2437_v26 = vld [vmem:[#allocation14 + $0x290] sm:$0xff]  ;;  %v2394_v48 = vld [vmem:[#allocation14 + $0x138] sm:$0xff] }
 0x2e7   :  { %2748 = vmatpush.msra.mxu2 %v2516_v57  ;;  %v2545_v44 = vld [vmem:[#allocation14 + $0x5f0] sm:$0xff] }
 0x2e8   :  { %2766 = vmatpush.msra.mxu0 %v2588_v17 }
 0x2e9   :  { %2749 = vmatpush.msra.mxu2 %v2512_v2  ;;  %v2229_v2 = vadd.f32 %v2228_v59, %v2209_v56  ;;  %v2382_v56 = vld [vmem:[#allocation14 + $0xd8] sm:$0xff] }
 0x2ea   :  { %2767 = vmatpush.msra.mxu0 %v2584_v55  ;;  %v2386_v55 = vld [vmem:[#allocation14 + $0xf8] sm:$0xff] }
 0x2eb   :  { %2750 = vmatpush.msra.mxu2 %v2508_v7  ;;  %v2568_v7 = vld [vmem:[#allocation14 + $0x6a8] sm:$0xff] }
 0x2ec   :  { %2768 = vmatpush.msra.mxu0 %v2580_v0 }
 0x2ed   :  { %2751 = vmatpush.msra.mxu2 %v2504_v12 }
 0x2ee   :  { %2769 = vmatpush.msra.mxu0 %v2576_v8  ;;  %v2378_v8 = vld [vmem:[#allocation14 + $0xb8] sm:$0xff] }
 0x2ef   :  { %2752 = vmatpush.msra.mxu2 %v2500_v20  ;;  %v2560_v20 = vld [vmem:[#allocation14 + $0x668] sm:$0xff] }
 0x2f0   :  { %2770 = vmatpush.msra.mxu0 %v2572_v1  ;;  %v2374_v1 = vld [vmem:[#allocation14 + $0x98] sm:$0xff] }
 0x2f1   :  { %2753 = vmatpush.msra.mxu2 %v2496_v25  ;;  %v2357_v25 = vld [vmem:[#allocation14 + $0x10] sm:$0xff] }
 0x2f2   :  { %2771 = vmatpush.msra.mxu0 %v2568_v7  ;;  %v2497_v7 = vld [vmem:[#allocation14 + $0x470] sm:$0xff] }
 0x2f3   :  { %2754 = vmatpush.msra.mxu2 %v2492_v28  ;;  %v2418_v28 = vld [vmem:[#allocation14 + $0x1f8] sm:$0xff] }
 0x2f5   :  { %2755 = vmatpush.msra.mxu2 %v2488_v32  ;;  %v2548_v32 = vld [vmem:[#allocation14 + $0x608] sm:$0xff] }
 0x2f7   :  { %2756 = vmatpush.msra.mxu2 %v2484_v4  ;;  %v2410_v4 = vld [vmem:[#allocation14 + $0x1b8] sm:$0xff] }
 0x2f8   :  { %v2108_v15 = vpop.f32.mrf.mxu0 }
 0x2f9   :  { %v2109_v61 = vadd.f32 %v2108_v15, %v2089_v14  ;;  %v2449_v14 = vld [vmem:[#allocation14 + $0x2f0] sm:$0xff] }
 0x2fa   :  { %v2365_v15 = vld [vmem:[#allocation14 + $0x50] sm:$0xff] }
 0x2fb   :  { %3153 = vtanh.f32 %v2109_v61  ;;  %v2564_v61 = vld [vmem:[#allocation14 + $0x688] sm:$0xff] }
 0x2fc   :  { %2772 = vmatpush.msra.mxu0 %v2564_v61  ;;  %v2489_v61 = vld [vmem:[#allocation14 + $0x430] sm:$0xff] }
 0x2fe   :  { %v2248_v57 = vpop.f32.mrf.mxu2  ;;  %2773 = vmatpush.msra.mxu0 %v2560_v20  ;;  %v2485_v20 = vld [vmem:[#allocation14 + $0x410] sm:$0xff] }
 0x2ff   :  { %v2249_v9 = vadd.f32 %v2248_v57, %v2229_v2  ;;  %v2288_v17 = vpop.f32.mrf.mxu3  ;;  %v2458_v57 = vld [vmem:[#allocation14 + $0x338] sm:$0xff] }
 0x300   :  { %2774 = vmatpush.msra.mxu0 %v2556_v24  ;;  %v2438_v24 = vld [vmem:[#allocation14 + $0x298] sm:$0xff] }
 0x301   :  { %v3690_v33 = vpop.eup %3153  ;;  %v2188_v34 = vpop.f32.mrf.mxu0 }
 0x302   :  { %v2189_v36 = vadd.f32 %v2188_v34, %v2169_v29  ;;  %2637 = vmatmul.f32.vlgmr.msrb.gmra.mxu3 %v3690_v33  ;;  %v2433_v29 = vld [vmem:[#allocation14 + $0x270] sm:$0xff]  ;;  %2775 = vmatpush.msra.mxu0 %v2552_v27  ;;  %v2308_v0 = vpop.f32.mrf.mxu1  ;;  %v2546_v27 = vld [vmem:[#allocation14 + $0x5f8] sm:$0xff] }
 0x303   :  { %2781 = vmatpush.msrb.mxu3 %v2417_v30  ;;  %v2541_v34 = vld [vmem:[#allocation14 + $0x5d0] sm:$0xff] }
 0x304   :  { %3155 = vtanh.f32 %v2189_v36  ;;  %v2537_v36 = vld [vmem:[#allocation14 + $0x5b0] sm:$0xff]  ;;  %2776 = vmatpush.msra.mxu0 %v2548_v32 }
 0x305   :  { %2782 = vmatpush.msrb.mxu3 %v2413_v37  ;;  %v2425_v37 = vld [vmem:[#allocation14 + $0x230] sm:$0xff] }
 0x306   :  { %v2601_v32 = vld [vmem:[#allocation14 + $0x7b0] sm:$0xff] }
 0x307   :  { %2783 = vmatpush.msrb.mxu3 %v2409_v39  ;;  %v2533_v39 = vld [vmem:[#allocation14 + $0x590] sm:$0xff] }
 0x309   :  { %2784 = vmatpush.msrb.mxu3 %v2405_v41  ;;  %v2529_v41 = vld [vmem:[#allocation14 + $0x570] sm:$0xff] }
 0x30a   :  { %v3693_v45 = vpop.eup %3155  ;;  %2717 = vmatmul.f32.vlgmr.msra.gmra.mxu3 %v3690_v33 }
 0x30b   :  { %2657 = vmatmul.f32.vlgmr.msrb.gmra.mxu1 %v3693_v45  ;;  %2785 = vmatpush.msrb.mxu3 %v2401_v42  ;;  %v2482_v42 = vld [vmem:[#allocation14 + $0x3f8] sm:$0xff] }
 0x30c   :  { %2801 = vmatpush.msrb.mxu1 %v2481_v21  ;;  %v2398_v21 = vld [vmem:[#allocation14 + $0x158] sm:$0xff] }
 0x30d   :  { %2786 = vmatpush.msrb.mxu3 %v2397_v46  ;;  %v2478_v46 = vld [vmem:[#allocation14 + $0x3d8] sm:$0xff] }
 0x30e   :  { %2802 = vmatpush.msrb.mxu1 %v2477_v47  ;;  %v2521_v47 = vld [vmem:[#allocation14 + $0x530] sm:$0xff] }
 0x30f   :  { %2787 = vmatpush.msrb.mxu3 %v2393_v49  ;;  %v2026_v49 = vperm.slane %v3686_v53, 3  ;;  %v2509_v53 = vld [vmem:[#allocation14 + $0x4d0] sm:$0xff] }
 0x310   :  { %2803 = vmatpush.msrb.mxu1 %v2473_v16  ;;  %v2474_v16 = vld [vmem:[#allocation14 + $0x3b8] sm:$0xff] }
 0x311   :  { %2788 = vmatpush.msrb.mxu3 %v2389_v52  ;;  %v2390_v52 = vld [vmem:[#allocation14 + $0x118] sm:$0xff] }
 0x312   :  { %2804 = vmatpush.msrb.mxu1 %v2469_v50  ;;  %v2513_v50 = vld [vmem:[#allocation14 + $0x4f0] sm:$0xff] }
 0x313   :  { %2737 = vmatmul.f32.vlgmr.msra.gmra.mxu1 %v3693_v45  ;;  %2789 = vmatpush.msrb.mxu3 %v2385_v63  ;;  %v2289_v63 = vadd.f32 %v2288_v17, %v2026_v49  ;;  %v2569_v49 = vld [vmem:[#allocation14 + $0x6b0] sm:$0xff]  ;;  %v2502_v17 = vld [vmem:[#allocation14 + $0x498] sm:$0xff] }
 0x314   :  { %2805 = vmatpush.msrb.mxu1 %v2465_v43  ;;  %v2466_v43 = vld [vmem:[#allocation14 + $0x378] sm:$0xff] }
 0x315   :  { %2790 = vmatpush.msrb.mxu3 %v2381_v58  ;;  %v2462_v58 = vld [vmem:[#allocation14 + $0x358] sm:$0xff] }
 0x316   :  { %2806 = vmatpush.msrb.mxu1 %v2461_v11  ;;  %v2505_v11 = vld [vmem:[#allocation14 + $0x4b0] sm:$0xff] }
 0x317   :  { %2791 = vmatpush.msrb.mxu3 %v2377_v60  ;;  %v2309_v60 = vadd.f32 %v2308_v0, %v2289_v63  ;;  %v2490_v63 = vld [vmem:[#allocation14 + $0x438] sm:$0xff] }
 0x318   :  { %2807 = vmatpush.msrb.mxu1 %v2457_v62  ;;  %v2501_v62 = vld [vmem:[#allocation14 + $0x490] sm:$0xff]  ;;  %v2486_v0 = vld [vmem:[#allocation14 + $0x418] sm:$0xff] }
 0x319   :  { %v2268_v13 = vpop.f32.mrf.mxu0  ;;  %2792 = vmatpush.msrb.mxu3 %v2373_v3  ;;  %v2454_v3 = vld [vmem:[#allocation14 + $0x318] sm:$0xff] }
 0x31a   :  { %v2269_v12 = vadd.f32 %v2268_v13, %v2249_v9  ;;  %2808 = vmatpush.msrb.mxu1 %v2453_v6  ;;  %v2370_v9 = vld [vmem:[#allocation14 + $0x78] sm:$0xff] }
 0x31b   :  { %2793 = vmatpush.msrb.mxu3 %v2369_v10  ;;  %v2450_v13 = vld [vmem:[#allocation14 + $0x2f8] sm:$0xff] }
 0x31c   :  { %3157 = vtanh.f32 %v2269_v12  ;;  %2809 = vmatpush.msrb.mxu1 %v2449_v14  ;;  %v2493_v14 = vld [vmem:[#allocation14 + $0x450] sm:$0xff]  ;;  %v2366_v12 = vld [vmem:[#allocation14 + $0x58] sm:$0xff] }
 0x31d   :  { %2794 = vmatpush.msrb.mxu3 %v2365_v15  ;;  %v2446_v15 = vld [vmem:[#allocation14 + $0x2d8] sm:$0xff] }
 0x31e   :  { %2810 = vmatpush.msrb.mxu1 %v2445_v18  ;;  %v2362_v18 = vld [vmem:[#allocation14 + $0x38] sm:$0xff] }
 0x31f   :  { %2795 = vmatpush.msrb.mxu3 %v2361_v19  ;;  %v2328_v59 = vpop.f32.mrf.mxu2  ;;  %v2442_v19 = vld [vmem:[#allocation14 + $0x2b8] sm:$0xff] }
 0x320   :  { %2811 = vmatpush.msrb.mxu1 %v2441_v23  ;;  %v2329_v2 = vadd.f32 %v2328_v59, %v2309_v60  ;;  %v2358_v23 = vld [vmem:[#allocation14 + $0x18] sm:$0xff] }
 0x321   :  { %2796 = vmatpush.msrb.mxu3 %v2357_v25  ;;  %v2609_v25 = vld [vmem:[#allocation14 + $0x7f0] sm:$0xff]  ;;  %v2598_v59 = vld [vmem:[#allocation14 + $0x798] sm:$0xff] }
 0x322   :  { %v3699_v30 = vpop.eup %3157  ;;  %2812 = vmatpush.msrb.mxu1 %v2437_v26  ;;  %2797 = vmatmul.f32.vlgmr.msrb.gmra.mxu3 %v3690_v33  ;;  %v2586_v60 = vld [vmem:[#allocation14 + $0x738] sm:$0xff] }
 0x323   :  { %2677 = vmatmul.f32.vlgmr.msrb.gmra.mxu2 %v3699_v30  ;;  %2861 = vmatpush.msra.mxu3 %v2418_v28  ;;  %v2434_v28 = vld [vmem:[#allocation14 + $0x278] sm:$0xff] }
 0x324   :  { %2821 = vmatpush.msrb.mxu2 %v2545_v44  ;;  %2813 = vmatpush.msrb.mxu1 %v2433_v29  ;;  %v2605_v44 = vld [vmem:[#allocation14 + $0x7d0] sm:$0xff]  ;;  %v2542_v29 = vld [vmem:[#allocation14 + $0x5d8] sm:$0xff] }
 0x325   :  { %2862 = vmatpush.msra.mxu3 %v2414_v31  ;;  %v2430_v31 = vld [vmem:[#allocation14 + $0x258] sm:$0xff] }
 0x326   :  { %2822 = vmatpush.msrb.mxu2 %v2541_v34  ;;  %2814 = vmatpush.msrb.mxu1 %v2429_v35  ;;  %v2538_v34 = vld [vmem:[#allocation14 + $0x5b8] sm:$0xff] }
 0x327   :  { %2863 = vmatpush.msra.mxu3 %v2410_v4  ;;  %v2426_v35 = vld [vmem:[#allocation14 + $0x238] sm:$0xff]  ;;  %v2597_v4 = vld [vmem:[#allocation14 + $0x790] sm:$0xff] }
 0x328   :  { %2823 = vmatpush.msrb.mxu2 %v2537_v36  ;;  %2815 = vmatpush.msrb.mxu1 %v2425_v37  ;;  %v2534_v36 = vld [vmem:[#allocation14 + $0x598] sm:$0xff] }
 0x329   :  { %2864 = vmatpush.msra.mxu3 %v2406_v38  ;;  %v2422_v37 = vld [vmem:[#allocation14 + $0x218] sm:$0xff]  ;;  %v2593_v38 = vld [vmem:[#allocation14 + $0x770] sm:$0xff] }
 0x32a   :  { %2824 = vmatpush.msrb.mxu2 %v2533_v39  ;;  %2816 = vmatpush.msrb.mxu1 %v2421_v40  ;;  %v2530_v39 = vld [vmem:[#allocation14 + $0x578] sm:$0xff] }
 0x32b   :  { %2757 = vmatmul.f32.vlgmr.msra.gmra.mxu2 %v3699_v30  ;;  %2817 = vmatmul.f32.vlgmr.msrb.gmra.mxu1 %v3693_v45  ;;  %v2526_v40 = vld [vmem:[#allocation14 + $0x558] sm:$0xff] }
 0x32c   :  { %2825 = vmatpush.msrb.mxu2 %v2529_v41  ;;  %2865 = vmatpush.msra.mxu3 %v2402_v22  ;;  %v2585_v41 = vld [vmem:[#allocation14 + $0x730] sm:$0xff]  ;;  %v2522_v22 = vld [vmem:[#allocation14 + $0x538] sm:$0xff] }
 0x32d   :  { %2881 = vmatpush.msra.mxu1 %v2482_v42  ;;  %v2581_v42 = vld [vmem:[#allocation14 + $0x710] sm:$0xff] }
 0x32e   :  { %2826 = vmatpush.msrb.mxu2 %v2525_v5  ;;  %2866 = vmatpush.msra.mxu3 %v2398_v21  ;;  %v2518_v5 = vld [vmem:[#allocation14 + $0x518] sm:$0xff]  ;;  %v2577_v21 = vld [vmem:[#allocation14 + $0x6f0] sm:$0xff] }
 0x32f   :  { %2882 = vmatpush.msra.mxu1 %v2478_v46  ;;  %v2514_v46 = vld [vmem:[#allocation14 + $0x4f8] sm:$0xff] }
 0x330   :  { %2827 = vmatpush.msrb.mxu2 %v2521_v47  ;;  %2867 = vmatpush.msra.mxu3 %v2394_v48  ;;  %v2573_v47 = vld [vmem:[#allocation14 + $0x6d0] sm:$0xff]  ;;  %v2510_v48 = vld [vmem:[#allocation14 + $0x4d8] sm:$0xff] }
 0x331   :  { %2883 = vmatpush.msra.mxu1 %v2474_v16  ;;  %v2565_v16 = vld [vmem:[#allocation14 + $0x690] sm:$0xff] }
 0x332   :  { %2828 = vmatpush.msrb.mxu2 %v2517_v51  ;;  %2868 = vmatpush.msra.mxu3 %v2390_v52  ;;  %v2561_v51 = vld [vmem:[#allocation14 + $0x670] sm:$0xff]  ;;  %v2498_v52 = vld [vmem:[#allocation14 + $0x478] sm:$0xff] }
 0x333   :  { %2884 = vmatpush.msra.mxu1 %v2470_v54  ;;  %v2557_v54 = vld [vmem:[#allocation14 + $0x650] sm:$0xff] }
 0x334   :  { %2829 = vmatpush.msrb.mxu2 %v2513_v50  ;;  %2869 = vmatpush.msra.mxu3 %v2386_v55  ;;  %v2494_v50 = vld [vmem:[#allocation14 + $0x458] sm:$0xff]  ;;  %v2553_v55 = vld [vmem:[#allocation14 + $0x630] sm:$0xff] }
 0x335   :  { %2885 = vmatpush.msra.mxu1 %v2466_v43  ;;  %v2549_v43 = vld [vmem:[#allocation14 + $0x610] sm:$0xff] }
 0x336   :  { %2830 = vmatpush.msrb.mxu2 %v2509_v53  ;;  %2870 = vmatpush.msra.mxu3 %v2382_v56  ;;  %v2610_v53 = vld [vmem:[#allocation14 + $0x7f8] sm:$0xff] }
 0x337   :  { %2886 = vmatpush.msra.mxu1 %v2462_v58  ;;  %v2606_v56 = vld [vmem:[#allocation14 + $0x7d8] sm:$0xff] }
 0x338   :  { %2831 = vmatpush.msrb.mxu2 %v2505_v11  ;;  %2871 = vmatpush.msra.mxu3 %v2378_v8  ;;  %v2602_v58 = vld [vmem:[#allocation14 + $0x7b8] sm:$0xff] }
 0x339   :  { %2887 = vmatpush.msra.mxu1 %v2458_v57  ;;  %v2348_v6 = vpop.f32.mrf.mxu0  ;;  %v2594_v11 = vld [vmem:[#allocation14 + $0x778] sm:$0xff] }
 0x33a   :  { %v2349_v10 = vadd.f32 %v2348_v6, %v2329_v2  ;;  %2832 = vmatpush.msrb.mxu2 %v2501_v62  ;;  %2872 = vmatpush.msra.mxu3 %v2374_v1  ;;  %v2590_v8 = vld [vmem:[#allocation14 + $0x758] sm:$0xff] }
 0x33b   :  { %2888 = vmatpush.msra.mxu1 %v2454_v3  ;;  %v2582_v57 = vld [vmem:[#allocation14 + $0x718] sm:$0xff] }
 0x33c   :  { %3159 = vtanh.f32 %v2349_v10  ;;  %2833 = vmatpush.msrb.mxu2 %v2497_v7  ;;  %2873 = vmatpush.msra.mxu3 %v2370_v9  ;;  %v2578_v62 = vld [vmem:[#allocation14 + $0x6f8] sm:$0xff] }
 0x33d   :  { %2889 = vmatpush.msra.mxu1 %v2450_v13  ;;  %v2574_v1 = vld [vmem:[#allocation14 + $0x6d8] sm:$0xff] }
 0x33e   :  { %2834 = vmatpush.msrb.mxu2 %v2493_v14  ;;  %2874 = vmatpush.msra.mxu3 %v2366_v12  ;;  %v2570_v2 = vld [vmem:[#allocation14 + $0x6b8] sm:$0xff]  ;;  %v2958_v14 = vld [vmem:[#allocation17 + $0x68] sm:$0xff]  ;;  %v2957_v12 = vld [vmem:[#allocation17 + $0x60] sm:$0xff] }
 0x33f   :  { %2890 = vmatpush.msra.mxu1 %v2446_v15  ;;  %v2562_v3 = vld [vmem:[#allocation14 + $0x678] sm:$0xff] }
 0x340   :  { %2835 = vmatpush.msrb.mxu2 %v2489_v61  ;;  %2875 = vmatpush.msra.mxu3 %v2362_v18  ;;  %v2558_v6 = vld [vmem:[#allocation14 + $0x658] sm:$0xff] }
 0x341   :  { %2891 = vmatpush.msra.mxu1 %v2442_v19  ;;  %v2554_v7 = vld [vmem:[#allocation14 + $0x638] sm:$0xff]  ;;  %v2974_v19 = vld [vmem:[#allocation17 + $0xe8] sm:$0xff] }
 0x342   :  { %v3706_v26 = vpop.eup %3159  ;;  %2836 = vmatpush.msrb.mxu2 %v2485_v20  ;;  %2876 = vmatpush.msra.mxu3 %v2358_v23  ;;  %v2550_v9 = vld [vmem:[#allocation14 + $0x618] sm:$0xff]  ;;  %v2973_v23 = vld [vmem:[#allocation17 + $0xe0] sm:$0xff] }
 0x343   :  { %2892 = vmatpush.msra.mxu1 %v2438_v24  ;;  %2697 = vmatmul.f32.vlgmr.msrb.gmra.mxu0 %v3706_v26  ;;  %v2960_v10 = vld [vmem:[#allocation17 + $0x78] sm:$0xff]  ;;  %v2959_v13 = vld [vmem:[#allocation17 + $0x70] sm:$0xff]  ;;  %v2954_v24 = vld [vmem:[#allocation17 + $0x48] sm:$0xff] }
 0x344   :  { %2837 = vmatmul.f32.vlgmr.msrb.gmra.mxu2 %v3699_v30  ;;  %2841 = vmatpush.msrb.mxu0 %v2609_v25  ;;  %v2976_v15 = vld [vmem:[#allocation17 + $0xf8] sm:$0xff]  ;;  %v2975_v61 = vld [vmem:[#allocation17 + $0xf0] sm:$0xff] }
 0x345   :  { %2877 = vmatmul.f32.vlgmr.msra.gmra.mxu3 %v3690_v33  ;;  %2901 = vmatpush.msra.mxu2 %v2546_v27  ;;  %v2589_v33 = vld [vmem:[#allocation14 + $0x750] sm:$0xff]  ;;  %v2956_v18 = vld [vmem:[#allocation17 + $0x58] sm:$0xff] }
 0x346   :  { %2893 = vmatpush.msra.mxu1 %v2434_v28  ;;  %2842 = vmatpush.msrb.mxu0 %v2605_v44  ;;  %v2955_v20 = vld [vmem:[#allocation17 + $0x50] sm:$0xff]  ;;  %v2972_v25 = vld [vmem:[#allocation17 + $0xd8] sm:$0xff]  ;;  %v2970_v44 = vld [vmem:[#allocation17 + $0xc8] sm:$0xff] }
 0x347   :  { %2902 = vmatpush.msra.mxu2 %v2542_v29  ;;  %3013 = vmatpush.msrb.mxu3 %v2960_v10  ;;  %v2971_v27 = vld [vmem:[#allocation17 + $0xd0] sm:$0xff]  ;;  %v2952_v28 = vld [vmem:[#allocation17 + $0x38] sm:$0xff] }
 0x348   :  { %2894 = vmatpush.msra.mxu1 %v2430_v31  ;;  %2843 = vmatpush.msrb.mxu0 %v2601_v32  ;;  %v2951_v29 = vld [vmem:[#allocation17 + $0x30] sm:$0xff]  ;;  %v2950_v31 = vld [vmem:[#allocation17 + $0x28] sm:$0xff]  ;;  %v2949_v32 = vld [vmem:[#allocation17 + $0x20] sm:$0xff] }
 0x349   :  { %2903 = vmatpush.msra.mxu2 %v2538_v34  ;;  %3014 = vmatpush.msrb.mxu3 %v2959_v13  ;;  %v2969_v34 = vld [vmem:[#allocation17 + $0xc0] sm:$0xff] }
 0x34a   :  { %2895 = vmatpush.msra.mxu1 %v2426_v35  ;;  %2844 = vmatpush.msrb.mxu0 %v2597_v4  ;;  %v2948_v35 = vld [vmem:[#allocation17 + $0x18] sm:$0xff]  ;;  %v2977_v13 = vld [vmem:[#allocation17 + $0x100] sm:$0xff] }
 0x34b   :  { %2904 = vmatpush.msra.mxu2 %v2534_v36  ;;  %2777 = vmatmul.f32.vlgmr.msra.gmra.mxu0 %v3706_v26  ;;  %v2968_v4 = vld [vmem:[#allocation17 + $0xb8] sm:$0xff]  ;;  %v2947_v36 = vld [vmem:[#allocation17 + $0x10] sm:$0xff] }
 0x34c   :  { %2896 = vmatpush.msra.mxu1 %v2422_v37  ;;  %2845 = vmatpush.msrb.mxu0 %v2593_v38  ;;  %v2967_v37 = vld [vmem:[#allocation17 + $0xb0] sm:$0xff]  ;;  %v2946_v38 = vld [vmem:[#allocation17 + $0x8] sm:$0xff] }
 0x34d   :  { %2897 = vmatmul.f32.vlgmr.msra.gmra.mxu1 %v3693_v45  ;;  %2905 = vmatpush.msra.mxu2 %v2530_v39  ;;  %v2506_v45 = vld [vmem:[#allocation14 + $0x4b8] sm:$0xff]  ;;  %v2966_v39 = vld [vmem:[#allocation17 + $0xa8] sm:$0xff] }
 0x34e   :  { %2846 = vmatpush.msrb.mxu0 %v2589_v33  ;;  %3015 = vmatpush.msrb.mxu3 %v2958_v14  ;;  %v2945_v33 = vld [vmem:[#allocation17] sm:$0xff] }
 0x34f   :  { %2906 = vmatpush.msra.mxu2 %v2526_v40  ;;  %3033 = vmatpush.msrb.mxu1 %v2976_v15  ;;  %v2965_v40 = vld [vmem:[#allocation17 + $0xa0] sm:$0xff]  ;;  %v3008_v15 = vld [vmem:[#allocation17 + $0x1f8] sm:$0xff] }
 0x350   :  { %2847 = vmatpush.msrb.mxu0 %v2585_v41  ;;  %3016 = vmatpush.msrb.mxu3 %v2957_v12  ;;  %v2992_v41 = vld [vmem:[#allocation17 + $0x178] sm:$0xff] }
 0x351   :  { %2907 = vmatpush.msra.mxu2 %v2522_v22  ;;  %3034 = vmatpush.msrb.mxu1 %v2975_v61  ;;  %v2964_v22 = vld [vmem:[#allocation17 + $0x98] sm:$0xff]  ;;  %v3007_v61 = vld [vmem:[#allocation17 + $0x1f0] sm:$0xff] }
 0x352   :  { %2848 = vmatpush.msrb.mxu0 %v2581_v42  ;;  %3017 = vmatpush.msrb.mxu3 %v2956_v18  ;;  %v2991_v42 = vld [vmem:[#allocation17 + $0x170] sm:$0xff]  ;;  %v3006_v18 = vld [vmem:[#allocation17 + $0x1e8] sm:$0xff] }
 0x353   :  { %2908 = vmatpush.msra.mxu2 %v2518_v5  ;;  %3035 = vmatpush.msrb.mxu1 %v2974_v19  ;;  %v2963_v5 = vld [vmem:[#allocation17 + $0x90] sm:$0xff]  ;;  %v3005_v19 = vld [vmem:[#allocation17 + $0x1e0] sm:$0xff] }
 0x354   :  { %2849 = vmatpush.msrb.mxu0 %v2577_v21  ;;  %3018 = vmatpush.msrb.mxu3 %v2955_v20  ;;  %v2990_v21 = vld [vmem:[#allocation17 + $0x168] sm:$0xff]  ;;  %v3004_v20 = vld [vmem:[#allocation17 + $0x1d8] sm:$0xff] }
 0x355   :  { %2909 = vmatpush.msra.mxu2 %v2514_v46  ;;  %3036 = vmatpush.msrb.mxu1 %v2973_v23  ;;  %v2962_v46 = vld [vmem:[#allocation17 + $0x88] sm:$0xff] }
 0x356   :  { %2850 = vmatpush.msrb.mxu0 %v2573_v47  ;;  %3019 = vmatpush.msrb.mxu3 %v2954_v24  ;;  %v2989_v47 = vld [vmem:[#allocation17 + $0x160] sm:$0xff]  ;;  %v3003_v24 = vld [vmem:[#allocation17 + $0x1d0] sm:$0xff] }
 0x357   :  { %2910 = vmatpush.msra.mxu2 %v2510_v48  ;;  %3037 = vmatpush.msrb.mxu1 %v2972_v25  ;;  %v2961_v48 = vld [vmem:[#allocation17 + $0x80] sm:$0xff]  ;;  %v3002_v25 = vld [vmem:[#allocation17 + $0x1c8] sm:$0xff] }
 0x358   :  { %2851 = vmatpush.msrb.mxu0 %v2569_v49  ;;  %v3716_v49 = vld [vmem:[#allocation16] sm:$0xf] }
 0x359   :  { %2911 = vmatpush.msra.mxu2 %v2506_v45  ;;  %3038 = vmatpush.msrb.mxu1 %v2971_v27  ;;  %v2988_v45 = vld [vmem:[#allocation17 + $0x158] sm:$0xff] }
 0x35a   :  { %2852 = vmatpush.msrb.mxu0 %v2565_v16  ;;  %v2987_v16 = vld [vmem:[#allocation17 + $0x150] sm:$0xff] }
 0x35b   :  { %2912 = vmatpush.msra.mxu2 %v2502_v17  ;;  %3039 = vmatpush.msrb.mxu1 %v2970_v44  ;;  %v3000_v44 = vld [vmem:[#allocation17 + $0x1b8] sm:$0xff] }
 0x35c   :  { %2853 = vmatpush.msrb.mxu0 %v2561_v51  ;;  %v2613_v51 = vperm.slane %v3716_v49, 0 }
 0x35d   :  { %2913 = vmatpush.msra.mxu2 %v2498_v52  ;;  %3040 = vmatpush.msrb.mxu1 %v2969_v34  ;;  %v2986_v52 = vld [vmem:[#allocation17 + $0x148] sm:$0xff] }
 0x35e   :  { %2854 = vmatpush.msrb.mxu0 %v2557_v54  ;;  %v2985_v54 = vld [vmem:[#allocation17 + $0x140] sm:$0xff] }
 0x35f   :  { %2914 = vmatpush.msra.mxu2 %v2494_v50  ;;  %3041 = vmatpush.msrb.mxu1 %v2968_v4 }
 0x360   :  { %2855 = vmatpush.msrb.mxu0 %v2553_v55 }
 0x361   :  { %2915 = vmatpush.msra.mxu2 %v2490_v63  ;;  %3042 = vmatpush.msrb.mxu1 %v2967_v37  ;;  %v2984_v63 = vld [vmem:[#allocation17 + $0x138] sm:$0xff] }
 0x362   :  { %2856 = vmatpush.msrb.mxu0 %v2549_v43 }
 0x363   :  { %2916 = vmatpush.msra.mxu2 %v2486_v0  ;;  %2857 = vmatmul.f32.vlgmr.msrb.gmra.mxu0 %v3706_v26  ;;  %v2983_v0 = vld [vmem:[#allocation17 + $0x130] sm:$0xff] }
 0x364   :  { %2917 = vmatmul.f32.vlgmr.msra.gmra.mxu2 %v3699_v30  ;;  %2921 = vmatpush.msra.mxu0 %v2610_v53  ;;  %v2566_v30 = vld [vmem:[#allocation14 + $0x698] sm:$0xff] }
 0x365   :  { %3043 = vmatpush.msrb.mxu1 %v2966_v39  ;;  %3053 = vmatpush.msrb.mxu2 %v2992_v41  ;;  %v2994_v41 = vld [vmem:[#allocation17 + $0x188] sm:$0xff] }
 0x366   :  { %2922 = vmatpush.msra.mxu0 %v2606_v56  ;;  %v2614_v56 = vperm.slane %v3716_v49, 1 }
 0x367   :  { %3044 = vmatpush.msrb.mxu1 %v2965_v40  ;;  %3054 = vmatpush.msrb.mxu2 %v2991_v42  ;;  %v2995_v40 = vld [vmem:[#allocation17 + $0x190] sm:$0xff] }
 0x368   :  { %2923 = vmatpush.msra.mxu0 %v2602_v58  ;;  %v2982_v58 = vld [vmem:[#allocation17 + $0x128] sm:$0xff] }
 0x369   :  { %3045 = vmatpush.msrb.mxu1 %v2964_v22  ;;  %3055 = vmatpush.msrb.mxu2 %v2990_v21  ;;  %v2993_v22 = vld [vmem:[#allocation17 + $0x180] sm:$0xff] }
 0x36a   :  { %2924 = vmatpush.msra.mxu0 %v2598_v59 }
 0x36b   :  { %3046 = vmatpush.msrb.mxu1 %v2963_v5  ;;  %3056 = vmatpush.msrb.mxu2 %v2989_v47  ;;  %v2616_v5 = vperm.slane %v3716_v49, 3 }
 0x36c   :  { %2925 = vmatpush.msra.mxu0 %v2594_v11 }
 0x36d   :  { %3047 = vmatpush.msrb.mxu1 %v2962_v46  ;;  %3057 = vmatpush.msrb.mxu2 %v2988_v45 }
 0x36e   :  { %2926 = vmatpush.msra.mxu0 %v2590_v8 }
 0x36f   :  { %3048 = vmatpush.msrb.mxu1 %v2961_v48  ;;  %3058 = vmatpush.msrb.mxu2 %v2987_v16 }
 0x370   :  { %2927 = vmatpush.msra.mxu0 %v2586_v60 }
 0x371   :  { %3059 = vmatpush.msrb.mxu2 %v2986_v52 }
 0x372   :  { %2928 = vmatpush.msra.mxu0 %v2582_v57 }
 0x373   :  { %3060 = vmatpush.msrb.mxu2 %v2985_v54  ;;  %v3136_v54 = vld [vmem:[#allocation19] ss:$0 sm:$0xff] }
 0x374   :  { %2929 = vmatpush.msra.mxu0 %v2578_v62  ;;  %v2981_v62 = vld [vmem:[#allocation17 + $0x120] sm:$0xff] }
 0x375   :  { %3061 = vmatpush.msrb.mxu2 %v2984_v63 }
 0x376   :  { %2930 = vmatpush.msra.mxu0 %v2574_v1 }
 0x377   :  { %3062 = vmatpush.msrb.mxu2 %v2983_v0 }
 0x378   :  { %2931 = vmatpush.msra.mxu0 %v2570_v2  ;;  %v2980_v2 = vld [vmem:[#allocation17 + $0x118] sm:$0xff] }
 0x379   :  { %3063 = vmatpush.msrb.mxu2 %v2982_v58 }
 0x37a   :  { %2932 = vmatpush.msra.mxu0 %v2566_v30  ;;  %v2979_v30 = vld [vmem:[#allocation17 + $0x110] sm:$0xff] }
 0x37b   :  { %3064 = vmatpush.msrb.mxu2 %v2981_v62 }
 0x37c   :  { %2933 = vmatpush.msra.mxu0 %v2562_v3 }
 0x37d   :  { %3065 = vmatpush.msrb.mxu2 %v2980_v2 }
 0x37e   :  { %2934 = vmatpush.msra.mxu0 %v2558_v6 }
 0x37f   :  { %3066 = vmatpush.msrb.mxu2 %v2979_v30 }
 0x380   :  { %2935 = vmatpush.msra.mxu0 %v2554_v7 }
 0x382   :  { %2936 = vmatpush.msra.mxu0 %v2550_v9  ;;  %v2978_v9 = vld [vmem:[#allocation17 + $0x108] sm:$0xff] }
 0x383   :  { %2937 = vmatmul.f32.vlgmr.msra.gmra.mxu0 %v3706_v26  ;;  %v2953_v26 = vld [vmem:[#allocation17 + $0x40] sm:$0xff]  ;;  %3067 = vmatpush.msrb.mxu2 %v2978_v9 }
 0x384   :  { %3020 = vmatpush.msrb.mxu3 %v2953_v26  ;;  %3073 = vmatpush.msrb.mxu0 %v3008_v15  ;;  %v2615_v26 = vperm.slane %v3716_v49, 2 }
 0x385   :  { %v2638_v17 = vpop.f32.mrf.mxu3  ;;  %3068 = vmatpush.msrb.mxu2 %v2977_v13 }
 0x386   :  { %3021 = vmatpush.msrb.mxu3 %v2952_v28  ;;  %v2639_v55 = vadd.f32 %v2638_v17, %v2613_v51  ;;  %3074 = vmatpush.msrb.mxu0 %v3007_v61  ;;  %v3001_v28 = vld [vmem:[#allocation17 + $0x1c0] sm:$0xff] }
 0x388   :  { %3022 = vmatpush.msrb.mxu3 %v2951_v29  ;;  %v2658_v50 = vpop.f32.mrf.mxu1  ;;  %3075 = vmatpush.msrb.mxu0 %v3006_v18 }
 0x389   :  { %v2659_v53 = vadd.f32 %v2658_v50, %v2639_v55 }
 0x38a   :  { %3023 = vmatpush.msrb.mxu3 %v2950_v31  ;;  %3076 = vmatpush.msrb.mxu0 %v3005_v19 }
 0x38c   :  { %3024 = vmatpush.msrb.mxu3 %v2949_v32  ;;  %3077 = vmatpush.msrb.mxu0 %v3004_v20  ;;  %v2999_v32 = vld [vmem:[#allocation17 + $0x1b0] sm:$0xff] }
 0x38d   :  { %v2718_v59 = vpop.f32.mrf.mxu3 }
 0x38e   :  { %3025 = vmatpush.msrb.mxu3 %v2948_v35  ;;  %v2719_v60 = vadd.f32 %v2718_v59, %v2614_v56  ;;  %3078 = vmatpush.msrb.mxu0 %v3003_v24  ;;  %v2998_v35 = vld [vmem:[#allocation17 + $0x1a8] sm:$0xff] }
 0x390   :  { %3026 = vmatpush.msrb.mxu3 %v2947_v36  ;;  %v2738_v1 = vpop.f32.mrf.mxu1  ;;  %3079 = vmatpush.msrb.mxu0 %v3002_v25 }
 0x391   :  { %v2739_v6 = vadd.f32 %v2738_v1, %v2719_v60 }
 0x392   :  { %3027 = vmatpush.msrb.mxu3 %v2946_v38  ;;  %3080 = vmatpush.msrb.mxu0 %v3001_v28  ;;  %v2997_v38 = vld [vmem:[#allocation17 + $0x1a0] sm:$0xff] }
 0x394   :  { %3028 = vmatpush.msrb.mxu3 %v2945_v33  ;;  %3081 = vmatpush.msrb.mxu0 %v3000_v44  ;;  %v2996_v33 = vld [vmem:[#allocation17 + $0x198] sm:$0xff] }
 0x396   :  { %3082 = vmatpush.msrb.mxu0 %v2999_v32 }
 0x398   :  { %3083 = vmatpush.msrb.mxu0 %v2998_v35 }
 0x39a   :  { %3084 = vmatpush.msrb.mxu0 %v2997_v38 }
 0x39c   :  { %3085 = vmatpush.msrb.mxu0 %v2996_v33 }
 0x39e   :  { %3086 = vmatpush.msrb.mxu0 %v2995_v40 }
 0x3a0   :  { %3087 = vmatpush.msrb.mxu0 %v2994_v41 }
 0x3a2   :  { %3088 = vmatpush.msrb.mxu0 %v2993_v22 }
 0x3a5   :  { %v2798_v27 = vpop.f32.mrf.mxu3 }
 0x3a6   :  { %v2678_v43 = vpop.f32.mrf.mxu2  ;;  %v2799_v29 = vadd.f32 %v2798_v27, %v2615_v26 }
 0x3a7   :  { %v2679_v11 = vadd.f32 %v2678_v43, %v2659_v53 }
 0x3a8   :  { %v2818_v31 = vpop.f32.mrf.mxu1 }
 0x3a9   :  { %v2819_v4 = vadd.f32 %v2818_v31, %v2799_v29 }
 0x3ae   :  { %v2758_v3 = vpop.f32.mrf.mxu2 }
 0x3af   :  { %v2759_v7 = vadd.f32 %v2758_v3, %v2739_v6 }
 0x3c0   :  { %v2698_v8 = vpop.f32.mrf.mxu0 }
 0x3c1   :  { %v2699_v57 = vadd.f32 %v2698_v8, %v2679_v11 }
 0x3c3   :  { %3161 = vtanh.f32 %v2699_v57 }
 0x3c7   :  { %v2838_v34 = vpop.f32.mrf.mxu2 }
 0x3c8   :  { %v2778_v10 = vpop.f32.mrf.mxu0  ;;  %v2839_v36 = vadd.f32 %v2838_v34, %v2819_v4  ;;  %v2878_v21 = vpop.f32.mrf.mxu3 }
 0x3c9   :  { %v3162_v14 = vpop.eup %3161  ;;  %v2779_v12 = vadd.f32 %v2778_v10, %v2759_v7  ;;  %v2879_v46 = vadd.f32 %v2878_v21, %v2616_v5 }
 0x3ca   :  { %3029 = vmatmul.f32.vlgmr.msrb.gmra.mxu3 %v3162_v14  ;;  %v2898_v47 = vpop.f32.mrf.mxu1 }
 0x3cb   :  { %3163 = vtanh.f32 %v2779_v12  ;;  %v2899_v45 = vadd.f32 %v2898_v47, %v2879_v46 }
 0x3d1   :  { %v3164_v23 = vpop.eup %3163 }
 0x3d2   :  { %3049 = vmatmul.f32.vlgmr.msrb.gmra.mxu1 %v3164_v23 }
 0x3e0   :  { %v2858_v37 = vpop.f32.mrf.mxu0 }
 0x3e1   :  { %v2859_v39 = vadd.f32 %v2858_v37, %v2839_v36 }
 0x3e3   :  { %3165 = vtanh.f32 %v2859_v39 }
 0x3e7   :  { %v2918_v48 = vpop.f32.mrf.mxu2 }
 0x3e8   :  { %v2919_v16 = vadd.f32 %v2918_v48, %v2899_v45 }
 0x3e9   :  { %v3166_v42 = vpop.eup %3165 }
 0x3ea   :  { %3069 = vmatmul.f32.vlgmr.msrb.gmra.mxu2 %v3166_v42 }
 0x400   :  { %v2938_v17 = vpop.f32.mrf.mxu0 }
 0x401   :  { %v2939_v51 = vadd.f32 %v2938_v17, %v2919_v16 }
 0x403   :  { %3167 = vtanh.f32 %v2939_v51 }
 0x409   :  { %v3168_v52 = vpop.eup %3167 }
 0x40a   :  { %3089 = vmatmul.f32.vlgmr.msrb.gmra.mxu0 %v3168_v52 }
 0x44d   :  { %v3030_v50 = vpop.f32.mrf.mxu3 }
 0x44e   :  { %v3031_v55 = vadd.f32 %v3136_v54, %v3030_v50 }
 0x44f   :  { %v3050_v63 = vpop.f32.mrf.mxu1 }
 0x450   :  { %v3051_v0 = vadd.f32 %v3050_v63, %v3031_v55 }
 0x46d   :  { %v3070_v43 = vpop.f32.mrf.mxu2 }
 0x46e   :  { %v3071_v49 = vadd.f32 %v3070_v43, %v3051_v0 }
 0x487   :  { %v3090_v53 = vpop.f32.mrf.mxu0 }
 0x488   :  { %v3091_v56 = vadd.f32 %v3090_v53, %v3071_v49 }
 0x48a   :  { %3093 = vst [vmem:[#allocation20] sm:$0xff] %v3091_v56 }
 0x48b   :  { %3104 = dma.vmem_to_hbm [thread:$0]  %s3100_s10, 128, %s3102_s29, [#allocation4]  }
 0x48c   :  { %3476 = dma.done.wait [#allocation4], 128  }
 0x48d   :  { %3477 = vsyncadd [#allocation4], 4294967168 }
 0x48e   :  { %3109 = vsyncpa [#allocation3], 1 }
 0x48f   :  { %3110 = vsyncpa [#allocation6], 1 }
 0x490   :  { %3111 = vsyncpa [#allocation9], 1 }
 0x491   :  { %3112 = vsyncpa [#allocation12], 1 }
 0x492   :  { %3113 = vsyncpa [#allocation15], 1 }
 0x493   :  { %3114 = vsyncpa [#allocation18], 1 }
 0x494   :  { %3115 = vsyncpa [#allocation4], 1 }

</bundles_post_ra>
